<compile_context>
chip_gen: v6e
topology: v6e:2x2x1
jax: 0.10.0
libtpu: 0.0.40
codegen_flags: <defaults>
</compile_context>

<pallas_src>
import numpy as np
import jax
import jax.numpy as jnp
from jax import lax
from jax.experimental import pallas as pl
from jax.experimental.pallas import tpu as pltpu

H = 120    # GRU hidden size (fixed by the module definition)
Hp = 128   # lane-padded hidden size


def predictor_kernel(x_ref,            # (Tc*B, C)      input rows of this chunk
                     wih0_ref,         # (C, 3*Hp)      layer-0 input weights
                     b0gi_ref,         # (1, 3*Hp)      [bir+bhr, biz+bhz, bin]
                     b0hn_ref,         # (1, Hp)        bhn (layer 0)
                     w1_ref,           # (2*Hp, 7*Hp)   fused L1 + next-step L0-recurrent
                     b1_ref,           # (1, 4*Hp)      fused layer-1 biases
                     wout_ref,         # (Hp, Cp)       output Linear weight^T (lane-padded)
                     bout_ref,         # (1, Cp)        output Linear bias (lane-padded)
                     o_ref,            # (Tc*B, Cp)     output rows of this chunk
                     h0_ref, h1_ref,   # (B, Hp)        hidden-state carry (scratch)
                     gh0_ref,          # (B, 3*Hp)      carried h0 @ Whh0 for next step
                     gi0_ref,          # (Tc*B, 3*Hp)   hoisted layer-0 input gates
                     h1s_ref):         # (Tc*B, Hp)     per-step h1 slab (loop path only)
    TB = x_ref.shape[0]
    B = h0_ref.shape[0]
    Tc = TB // B

    # -- init carries at the first time-chunk --------------------------------
    @pl.when(pl.program_id(0) == 0)
    def _init():
        h0_ref[...] = jnp.zeros_like(h0_ref)
        h1_ref[...] = jnp.zeros_like(h1_ref)
        gh0_ref[...] = jnp.zeros_like(gh0_ref)   # == h0_init @ Whh0 since h0_init = 0

    # -- hoisted layer-0 input projection: ONE matmul for the whole chunk ----
    gi0_ref[...] = (jnp.dot(x_ref[...], wih0_ref[...],
                            preferred_element_type=jnp.float32)
                    + b0gi_ref[...])

    w1 = w1_ref[...]
    # bias broadcasts hoisted out of the time loop (JAX does not CSE them)
    b0hn = jnp.broadcast_to(b0hn_ref[...], (B, Hp))
    b1 = jnp.broadcast_to(b1_ref[...], (B, 4 * Hp))

    def step(t, carry):
        h0, h1, gh0 = carry
        # ---- layer 0: purely elementwise (gh0 came from previous matmul) ----
        gi0 = gi0_ref[pl.ds(t * B, B), :]                       # (B, 3*Hp)
        r0 = jax.nn.sigmoid(gi0[:, 0:Hp] + gh0[:, 0:Hp])
        z0 = jax.nn.sigmoid(gi0[:, Hp:2 * Hp] + gh0[:, Hp:2 * Hp])
        n0 = jnp.tanh(gi0[:, 2 * Hp:3 * Hp] + r0 * (gh0[:, 2 * Hp:3 * Hp] + b0hn))
        h0 = (1.0 - z0) * n0 + z0 * h0

        # ---- single fused matmul: layer-1 gates + next step's gh0 -----------
        hin = jnp.concatenate([h0, h1], axis=1)                 # (B, 2*Hp)
        g = jnp.dot(hin, w1, preferred_element_type=jnp.float32)  # (B, 7*Hp)
        g1 = g[:, 0:4 * Hp] + b1
        gh0_next = g[:, 4 * Hp:7 * Hp]

        r1 = jax.nn.sigmoid(g1[:, 0:Hp])
        z1 = jax.nn.sigmoid(g1[:, Hp:2 * Hp])
        n1 = jnp.tanh(g1[:, 2 * Hp:3 * Hp] + r1 * g1[:, 3 * Hp:4 * Hp])
        h1 = (1.0 - z1) * n1 + z1 * h1
        return (h0, h1, gh0_next)

    carry0 = (h0_ref[...], h1_ref[...], gh0_ref[...])

    if Tc <= 16:
        # full static unroll: literal slice offsets, h1(t) kept in vregs
        carry = carry0
        h1_steps = []
        for t in range(Tc):
            carry = step(t, carry)
            h1_steps.append(carry[1])
        h0_fin, h1_fin, gh0_fin = carry
        h1s = jnp.concatenate(h1_steps, axis=0)                 # (Tc*B, Hp)
    else:
        def body(t, carry):
            new = step(t, carry)
            h1s_ref[pl.ds(t * B, B), :] = new[1]
            return new
        unroll = 8 if Tc % 8 == 0 else (4 if Tc % 4 == 0 else 1)
        h0_fin, h1_fin, gh0_fin = lax.fori_loop(0, Tc, body, carry0, unroll=unroll)
        h1s = h1s_ref[...]

    h0_ref[...] = h0_fin
    h1_ref[...] = h1_fin
    gh0_ref[...] = gh0_fin

    # -- deferred output Linear + Sigmoid: ONE matmul, ONE lane-dense store ---
    y = (jnp.dot(h1s, wout_ref[...], preferred_element_type=jnp.float32)
         + bout_ref[...])
    o_ref[...] = jax.nn.sigmoid(y).astype(o_ref.dtype)


def predictor_forward(x, params):
    """x: (B, S, C) batch-first float32 -> (B, S, C)."""
    B, S, C = x.shape
    Cp = params["wout"].shape[1]
    # row-flattened time-major: row t*B + b  <->  (timestep t, batch b)
    x_rows = jnp.transpose(x, (1, 0, 2)).reshape(S * B, C)

    # time-chunking (keeps resident VMEM modest for long sequences / v7x)
    Tc = S
    if S * B > 4096:
        for cand in (1024, 512, 256, 128, 64, 32, 16, 8, 4, 2, 1):
            if S % cand == 0 and (cand * B) % 8 == 0 and cand * B <= 4096:
                Tc = cand
                break
    n_chunks = S // Tc

    def full(a):
        nd = a.ndim
        return pl.BlockSpec(a.shape, lambda i, _n=nd: (0,) * _n)

    grid_spec = pltpu.PrefetchScalarGridSpec(
        num_scalar_prefetch=0,
        grid=(n_chunks,),
        in_specs=[pl.BlockSpec((Tc * B, C), lambda i: (i, 0)),
                  full(params["wih0"]), full(params["b0gi"]), full(params["b0hn"]),
                  full(params["w1"]), full(params["b1"]),
                  full(params["wout"]), full(params["bout"])],
        out_specs=pl.BlockSpec((Tc * B, Cp), lambda i: (i, 0)),
        scratch_shapes=[pltpu.VMEM((B, Hp), jnp.float32),           # h0 carry
                        pltpu.VMEM((B, Hp), jnp.float32),           # h1 carry
                        pltpu.VMEM((B, 3 * Hp), jnp.float32),       # gh0 carry
                        pltpu.VMEM((Tc * B, 3 * Hp), jnp.float32),  # gi0 chunk
                        pltpu.VMEM((Tc * B, Hp), jnp.float32)],     # h1 slab
    )

    out_rows = pl.pallas_call(
        predictor_kernel,
        out_shape=jax.ShapeDtypeStruct((S * B, Cp), jnp.float32),
        grid_spec=grid_spec,
        compiler_params=pltpu.CompilerParams(
            dimension_semantics=("arbitrary",)),   # sequential time recurrence
    )(x_rows,
      params["wih0"], params["b0gi"], params["b0hn"],
      params["w1"], params["b1"], params["wout"], params["bout"])

    out = out_rows[:, :C].reshape(S, B, C)
    return jnp.transpose(out, (1, 0, 2))


# ----------------------------- parameter handling ---------------------------

def init_raw_params(key, n_channels):
    """Raw PyTorch-layout weights (deterministic synthetic init).

    GRU: uniform(-1/sqrt(H), 1/sqrt(H)) (PyTorch default; the module's
    init_weights() does not touch nn.GRU).  Output Linear: xavier_uniform_,
    zero bias (xavier only touches the weight; zero bias chosen for the
    synthetic kernel).
    """
    ks = jax.random.split(key, 9)
    k = 1.0 / np.sqrt(H)

    def u(kk, shape):
        return jax.random.uniform(kk, shape, jnp.float32, -k, k)

    wih0 = u(ks[0], (3 * H, n_channels)); whh0 = u(ks[1], (3 * H, H))
    bih0 = u(ks[2], (3 * H,));            bhh0 = u(ks[3], (3 * H,))
    wih1 = u(ks[4], (3 * H, H));          whh1 = u(ks[5], (3 * H, H))
    bih1 = u(ks[6], (3 * H,));            bhh1 = u(ks[7], (3 * H,))
    limit = np.sqrt(6.0 / (H + n_channels))
    wout = jax.random.uniform(ks[8], (n_channels, H), jnp.float32, -limit, limit)
    bout = jnp.zeros((n_channels,), jnp.float32)
    return dict(wih0=wih0, whh0=whh0, bih0=bih0, bhh0=bhh0,
                wih1=wih1, whh1=whh1, bih1=bih1, bhh1=bhh1,
                wout=wout, bout=bout)


def pack_params(raw, n_channels):
    """Transpose, lane-pad each gate to 128, fuse layer-1 + layer-0-recurrent
    weights, and lane-pad the output Linear.

    All padded rows/columns/biases are zero so padded hidden lanes stay
    exactly 0 through the GRU update.
    """
    C = n_channels
    Cp = max(128, ((C + 127) // 128) * 128)

    def pad_gate_cols(w_t):     # (K, 3H) -> (K, 3*Hp), each gate padded to Hp
        return jnp.concatenate(
            [jnp.pad(w_t[:, g * H:(g + 1) * H], ((0, 0), (0, Hp - H)))
             for g in range(3)], axis=1)

    def pad_gate_bias(b):       # (3H,) -> [ (Hp,), (Hp,), (Hp,) ]
        return [jnp.pad(b[g * H:(g + 1) * H], (0, Hp - H)) for g in range(3)]

    def pad_rows(w):            # (H, X) -> (Hp, X)
        return jnp.pad(w, ((0, Hp - H), (0, 0)))

    # ---- layer 0 ----
    wih0_p = pad_gate_cols(raw["wih0"].T)                 # (C, 3Hp)
    whh0_p = pad_rows(pad_gate_cols(raw["whh0"].T))       # (Hp, 3Hp)
    bi0 = pad_gate_bias(raw["bih0"]); bh0 = pad_gate_bias(raw["bhh0"])
    b0gi = jnp.concatenate([bi0[0] + bh0[0], bi0[1] + bh0[1], bi0[2]])[None, :]
    b0hn = bh0[2][None, :]

    # ---- layer 1 fused with NEXT step's layer-0 recurrent projection -------
    # cols: [r_sum (Hp), z_sum (Hp), gi_n (Hp), gh_n (Hp), gh0_next (3Hp)]
    # rows: [h0 (Hp); h1 (Hp)]
    wih1_p = pad_rows(pad_gate_cols(raw["wih1"].T))       # (Hp, 3Hp)
    whh1_p = pad_rows(pad_gate_cols(raw["whh1"].T))       # (Hp, 3Hp)
    zblk = jnp.zeros((Hp, Hp), jnp.float32)
    z3 = jnp.zeros((Hp, 3 * Hp), jnp.float32)
    top = jnp.concatenate([wih1_p, zblk, whh0_p], axis=1)                      # (Hp, 7Hp)
    bot = jnp.concatenate([whh1_p[:, :2 * Hp], zblk, whh1_p[:, 2 * Hp:], z3],
                          axis=1)                                              # (Hp, 7Hp)
    w1 = jnp.concatenate([top, bot], axis=0)                                   # (2Hp, 7Hp)
    bi1 = pad_gate_bias(raw["bih1"]); bh1 = pad_gate_bias(raw["bhh1"])
    b1 = jnp.concatenate([bi1[0] + bh1[0], bi1[1] + bh1[1], bi1[2], bh1[2]])[None, :]

    # ---- output Linear (lane-padded columns for an unmasked output store) --
    wout_p = jnp.pad(raw["wout"].T, ((0, Hp - H), (0, Cp - C)))   # (Hp, Cp)
    bout_p = jnp.pad(raw["bout"], (0, Cp - C))[None, :]           # (1, Cp)

    return dict(wih0=wih0_p, b0gi=b0gi, b0hn=b0hn,
                w1=w1, b1=b1, wout=wout_p, bout=bout_p)


# ------------------------------- reference ----------------------------------

def reference_forward(x, raw):
    """Pure-JAX reference with raw (unpadded) PyTorch-layout weights."""
    B, S, C = x.shape

    def cell(inp, h, wih, whh, bih, bhh):
        gi = inp @ wih.T + bih
        gh = h @ whh.T + bhh
        r = jax.nn.sigmoid(gi[:, 0:H] + gh[:, 0:H])
        z = jax.nn.sigmoid(gi[:, H:2 * H] + gh[:, H:2 * H])
        n = jnp.tanh(gi[:, 2 * H:3 * H] + r * gh[:, 2 * H:3 * H])
        return (1.0 - z) * n + z * h

    h0 = jnp.zeros((B, H), jnp.float32)
    h1 = jnp.zeros((B, H), jnp.float32)
    ys = []
    for t in range(S):
        h0 = cell(x[:, t, :], h0, raw["wih0"], raw["whh0"], raw["bih0"], raw["bhh0"])
        h1 = cell(h0, h1, raw["wih1"], raw["whh1"], raw["bih1"], raw["bhh1"])
        ys.append(jax.nn.sigmoid(h1 @ raw["wout"].T + raw["bout"]))
    return jnp.stack(ys, axis=1)


if __name__ == "__main__":
    key = jax.random.PRNGKey(0)
    kx, kw = jax.random.split(key)

    B, S, C = 2, 8, 4   # batch, sequence length, N_channels
    x = jax.random.normal(kx, (B, S, C), jnp.float32)
    raw = init_raw_params(kw, C)
    packed = pack_params(raw, C)

    out = jax.block_until_ready(predictor_forward(x, packed))
    ref = jax.block_until_ready(reference_forward(x, raw))

    assert out.shape == (B, S, C)
    np.testing.assert_allclose(np.asarray(out), np.asarray(ref),
                               rtol=1e-4, atol=5e-5)
    print("KERNEL_OK")
</pallas_src>

<mosaic_0001>
module attributes {stable_mosaic.version = 11 : i64} {
  func.func @predictor_kernel(%arg0: i32, %arg1: memref<16x4xf32, #tpu.memory_space<vmem>>, %arg2: memref<4x384xf32, #tpu.memory_space<vmem>>, %arg3: memref<1x384xf32, #tpu.memory_space<vmem>>, %arg4: memref<1x128xf32, #tpu.memory_space<vmem>>, %arg5: memref<256x896xf32, #tpu.memory_space<vmem>>, %arg6: memref<1x512xf32, #tpu.memory_space<vmem>>, %arg7: memref<128x128xf32, #tpu.memory_space<vmem>>, %arg8: memref<1x128xf32, #tpu.memory_space<vmem>>, %arg9: memref<16x128xf32, #tpu.memory_space<vmem>>, %arg10: memref<2x128xf32, #tpu.memory_space<vmem>>, %arg11: memref<2x128xf32, #tpu.memory_space<vmem>>, %arg12: memref<2x384xf32, #tpu.memory_space<vmem>>, %arg13: memref<16x384xf32, #tpu.memory_space<vmem>>, %arg14: memref<16x128xf32, #tpu.memory_space<vmem>>) attributes {dimension_semantics = [#tpu.dimension_semantics<arbitrary>], iteration_bounds = array<i64: 1>, scalar_prefetch = 0 : i64, scratch_operands = 5 : i64, tpu.core_type = #tpu.core_type<tc>, window_params = [{transform_indices = @transform_0, window_bounds = array<i64: 16, 4>}, {pipeline_mode = #tpu.pipeline_mode<synchronous>, transform_indices = @transform_1, window_bounds = array<i64: 4, 384>}, {pipeline_mode = #tpu.pipeline_mode<synchronous>, transform_indices = @transform_2, window_bounds = array<i64: 1, 384>}, {pipeline_mode = #tpu.pipeline_mode<synchronous>, transform_indices = @transform_3, window_bounds = array<i64: 1, 128>}, {pipeline_mode = #tpu.pipeline_mode<synchronous>, transform_indices = @transform_4, window_bounds = array<i64: 256, 896>}, {pipeline_mode = #tpu.pipeline_mode<synchronous>, transform_indices = @transform_5, window_bounds = array<i64: 1, 512>}, {pipeline_mode = #tpu.pipeline_mode<synchronous>, transform_indices = @transform_6, window_bounds = array<i64: 128, 128>}, {pipeline_mode = #tpu.pipeline_mode<synchronous>, transform_indices = @transform_7, window_bounds = array<i64: 1, 128>}, {transform_indices = @transform_8, window_bounds = array<i64: 16, 128>}]} {
    %c0_i32 = arith.constant 0 : i32
    %0 = arith.cmpi eq, %arg0, %c0_i32 : i32
    %1 = arith.extui %0 : i1 to i32
    %c0_i32_0 = arith.constant 0 : i32
    %2 = arith.cmpi ne, %1, %c0_i32_0 : i32
    scf.if %2 {
      %cst_99 = arith.constant 0.000000e+00 : f32
      %475 = vector.broadcast %cst_99 : f32 to vector<2x128xf32>
      %c0_100 = arith.constant 0 : index
      %c0_101 = arith.constant 0 : index
      %476 = vector.load %arg10[%c0_100, %c0_101] : memref<2x128xf32, #tpu.memory_space<vmem>>, vector<2x128xf32>
      tpu.vector_store %arg10[%c0_100, %c0_101], %475 {strides = array<i32>} : memref<2x128xf32, #tpu.memory_space<vmem>>, vector<2x128xf32>,
      %cst_102 = arith.constant 0.000000e+00 : f32
      %477 = vector.broadcast %cst_102 : f32 to vector<2x128xf32>
      %c0_103 = arith.constant 0 : index
      %c0_104 = arith.constant 0 : index
      %478 = vector.load %arg11[%c0_103, %c0_104] : memref<2x128xf32, #tpu.memory_space<vmem>>, vector<2x128xf32>
      tpu.vector_store %arg11[%c0_103, %c0_104], %477 {strides = array<i32>} : memref<2x128xf32, #tpu.memory_space<vmem>>, vector<2x128xf32>,
      %cst_105 = arith.constant 0.000000e+00 : f32
      %479 = vector.broadcast %cst_105 : f32 to vector<2x384xf32>
      %c0_106 = arith.constant 0 : index
      %c0_107 = arith.constant 0 : index
      %480 = vector.load %arg12[%c0_106, %c0_107] : memref<2x384xf32, #tpu.memory_space<vmem>>, vector<2x384xf32>
      tpu.vector_store %arg12[%c0_106, %c0_107], %479 {strides = array<i32>} : memref<2x384xf32, #tpu.memory_space<vmem>>, vector<2x384xf32>,
    } else {
    }
    %c0 = arith.constant 0 : index
    %c0_1 = arith.constant 0 : index
    %3 = vector.load %arg1[%c0, %c0_1] : memref<16x4xf32, #tpu.memory_space<vmem>>, vector<16x4xf32>
    %c0_2 = arith.constant 0 : index
    %c0_3 = arith.constant 0 : index
    %4 = vector.load %arg2[%c0_2, %c0_3] : memref<4x384xf32, #tpu.memory_space<vmem>>, vector<4x384xf32>
    %cst = arith.constant dense<0.000000e+00> : vector<16x384xf32>
    %5 = tpu.matmul %3, %4, %cst {dimension_numbers = #tpu.dot_dimension_numbers<[1], [0], [0], [1], [0, 0, 1, 1], [], []>} : vector<16x4xf32>, vector<4x384xf32>, vector<16x384xf32> -> vector<16x384xf32>
    %c0_4 = arith.constant 0 : index
    %c0_5 = arith.constant 0 : index
    %6 = vector.load %arg3[%c0_4, %c0_5] : memref<1x384xf32, #tpu.memory_space<vmem>>, vector<1x384xf32>
    %7 = vector.broadcast %6 : vector<1x384xf32> to vector<16x384xf32>
    %8 = arith.addf %5, %7 : vector<16x384xf32>
    %c0_6 = arith.constant 0 : index
    %c0_7 = arith.constant 0 : index
    %9 = vector.load %arg13[%c0_6, %c0_7] : memref<16x384xf32, #tpu.memory_space<vmem>>, vector<16x384xf32>
    tpu.vector_store %arg13[%c0_6, %c0_7], %8 {strides = array<i32>} : memref<16x384xf32, #tpu.memory_space<vmem>>, vector<16x384xf32>,
    %c0_8 = arith.constant 0 : index
    %c0_9 = arith.constant 0 : index
    %10 = vector.load %arg5[%c0_8, %c0_9] : memref<256x896xf32, #tpu.memory_space<vmem>>, vector<256x896xf32>
    %c0_10 = arith.constant 0 : index
    %c0_11 = arith.constant 0 : index
    %11 = vector.load %arg4[%c0_10, %c0_11] : memref<1x128xf32, #tpu.memory_space<vmem>>, vector<1x128xf32>
    %12 = vector.shape_cast %11 : vector<1x128xf32> to vector<1x128xf32>
    %13 = vector.broadcast %12 : vector<1x128xf32> to vector<2x128xf32>
    %c0_12 = arith.constant 0 : index
    %c0_13 = arith.constant 0 : index
    %14 = vector.load %arg6[%c0_12, %c0_13] : memref<1x512xf32, #tpu.memory_space<vmem>>, vector<1x512xf32>
    %15 = vector.shape_cast %14 : vector<1x512xf32> to vector<1x512xf32>
    %16 = vector.broadcast %15 : vector<1x512xf32> to vector<2x512xf32>
    %c0_14 = arith.constant 0 : index
    %c0_15 = arith.constant 0 : index
    %17 = vector.load %arg10[%c0_14, %c0_15] : memref<2x128xf32, #tpu.memory_space<vmem>>, vector<2x128xf32>
    %c0_16 = arith.constant 0 : index
    %c0_17 = arith.constant 0 : index
    %18 = vector.load %arg11[%c0_16, %c0_17] : memref<2x128xf32, #tpu.memory_space<vmem>>, vector<2x128xf32>
    %c0_18 = arith.constant 0 : index
    %c0_19 = arith.constant 0 : index
    %19 = vector.load %arg12[%c0_18, %c0_19] : memref<2x384xf32, #tpu.memory_space<vmem>>, vector<2x384xf32>
    %c0_20 = arith.constant 0 : index
    %c0_21 = arith.constant 0 : index
    %20 = vector.load %arg13[%c0_20, %c0_21] : memref<16x384xf32, #tpu.memory_space<vmem>>, vector<2x384xf32>
    %21 = vector.extract_strided_slice %20 {offsets = [0, 0], sizes = [2, 128], strides = [1, 1]} : vector<2x384xf32> to vector<2x128xf32>
    %22 = vector.extract_strided_slice %19 {offsets = [0, 0], sizes = [2, 128], strides = [1, 1]} : vector<2x384xf32> to vector<2x128xf32>
    %23 = arith.addf %21, %22 : vector<2x128xf32>
    %24 = arith.negf %23 : vector<2x128xf32>
    %25 = math.exp %24 : vector<2x128xf32>
    %cst_22 = arith.constant 1.000000e+00 : f32
    %26 = vector.broadcast %cst_22 : f32 to vector<2x128xf32>
    %27 = arith.addf %26, %25 : vector<2x128xf32>
    %28 = arith.divf %26, %27 : vector<2x128xf32>
    %29 = vector.extract_strided_slice %20 {offsets = [0, 128], sizes = [2, 128], strides = [1, 1]} : vector<2x384xf32> to vector<2x128xf32>
    %30 = vector.extract_strided_slice %19 {offsets = [0, 128], sizes = [2, 128], strides = [1, 1]} : vector<2x384xf32> to vector<2x128xf32>
    %31 = arith.addf %29, %30 : vector<2x128xf32>
    %32 = arith.negf %31 : vector<2x128xf32>
    %33 = math.exp %32 : vector<2x128xf32>
    %cst_23 = arith.constant 1.000000e+00 : f32
    %34 = vector.broadcast %cst_23 : f32 to vector<2x128xf32>
    %35 = arith.addf %34, %33 : vector<2x128xf32>
    %36 = arith.divf %34, %35 : vector<2x128xf32>
    %37 = vector.extract_strided_slice %20 {offsets = [0, 256], sizes = [2, 128], strides = [1, 1]} : vector<2x384xf32> to vector<2x128xf32>
    %38 = vector.extract_strided_slice %19 {offsets = [0, 256], sizes = [2, 128], strides = [1, 1]} : vector<2x384xf32> to vector<2x128xf32>
    %39 = arith.addf %38, %13 : vector<2x128xf32>
    %40 = arith.mulf %28, %39 : vector<2x128xf32>
    %41 = arith.addf %37, %40 : vector<2x128xf32>
    %42 = math.tanh %41 : vector<2x128xf32>
    %cst_24 = arith.constant 1.000000e+00 : f32
    %43 = vector.broadcast %cst_24 : f32 to vector<2x128xf32>
    %44 = arith.subf %43, %36 : vector<2x128xf32>
    %45 = arith.mulf %44, %42 : vector<2x128xf32>
    %46 = arith.mulf %36, %17 : vector<2x128xf32>
    %47 = arith.addf %45, %46 : vector<2x128xf32>
    %48 = tpu.concatenate %47, %18 in 1 : vector<2x128xf32>, vector<2x128xf32> -> vector<2x256xf32>
    %cst_25 = arith.constant dense<0.000000e+00> : vector<2x896xf32>
    %49 = tpu.matmul %48, %10, %cst_25 {dimension_numbers = #tpu.dot_dimension_numbers<[1], [0], [0], [1], [0, 0, 1, 1], [], []>} : vector<2x256xf32>, vector<256x896xf32>, vector<2x896xf32> -> vector<2x896xf32>
    %50 = vector.extract_strided_slice %49 {offsets = [0, 0], sizes = [2, 512], strides = [1, 1]} : vector<2x896xf32> to vector<2x512xf32>
    %51 = arith.addf %50, %16 : vector<2x512xf32>
    %52 = vector.extract_strided_slice %49 {offsets = [0, 512], sizes = [2, 384], strides = [1, 1]} : vector<2x896xf32> to vector<2x384xf32>
    %53 = vector.extract_strided_slice %51 {offsets = [0, 0], sizes = [2, 128], strides = [1, 1]} : vector<2x512xf32> to vector<2x128xf32>
    %54 = arith.negf %53 : vector<2x128xf32>
    %55 = math.exp %54 : vector<2x128xf32>
    %cst_26 = arith.constant 1.000000e+00 : f32
    %56 = vector.broadcast %cst_26 : f32 to vector<2x128xf32>
    %57 = arith.addf %56, %55 : vector<2x128xf32>
    %58 = arith.divf %56, %57 : vector<2x128xf32>
    %59 = vector.extract_strided_slice %51 {offsets = [0, 128], sizes = [2, 128], strides = [1, 1]} : vector<2x512xf32> to vector<2x128xf32>
    %60 = arith.negf %59 : vector<2x128xf32>
    %61 = math.exp %60 : vector<2x128xf32>
    %cst_27 = arith.constant 1.000000e+00 : f32
    %62 = vector.broadcast %cst_27 : f32 to vector<2x128xf32>
    %63 = arith.addf %62, %61 : vector<2x128xf32>
    %64 = arith.divf %62, %63 : vector<2x128xf32>
    %65 = vector.extract_strided_slice %51 {offsets = [0, 256], sizes = [2, 128], strides = [1, 1]} : vector<2x512xf32> to vector<2x128xf32>
    %66 = vector.extract_strided_slice %51 {offsets = [0, 384], sizes = [2, 128], strides = [1, 1]} : vector<2x512xf32> to vector<2x128xf32>
    %67 = arith.mulf %58, %66 : vector<2x128xf32>
    %68 = arith.addf %65, %67 : vector<2x128xf32>
    %69 = math.tanh %68 : vector<2x128xf32>
    %cst_28 = arith.constant 1.000000e+00 : f32
    %70 = vector.broadcast %cst_28 : f32 to vector<2x128xf32>
    %71 = arith.subf %70, %64 : vector<2x128xf32>
    %72 = arith.mulf %71, %69 : vector<2x128xf32>
    %73 = arith.mulf %64, %18 : vector<2x128xf32>
    %74 = arith.addf %72, %73 : vector<2x128xf32>
    %c2 = arith.constant 2 : index
    %c0_29 = arith.constant 0 : index
    %75 = vector.load %arg13[%c2, %c0_29] : memref<16x384xf32, #tpu.memory_space<vmem>>, vector<2x384xf32>
    %76 = vector.extract_strided_slice %75 {offsets = [0, 0], sizes = [2, 128], strides = [1, 1]} : vector<2x384xf32> to vector<2x128xf32>
    %77 = vector.extract_strided_slice %52 {offsets = [0, 0], sizes = [2, 128], strides = [1, 1]} : vector<2x384xf32> to vector<2x128xf32>
    %78 = arith.addf %76, %77 : vector<2x128xf32>
    %79 = arith.negf %78 : vector<2x128xf32>
    %80 = math.exp %79 : vector<2x128xf32>
    %cst_30 = arith.constant 1.000000e+00 : f32
    %81 = vector.broadcast %cst_30 : f32 to vector<2x128xf32>
    %82 = arith.addf %81, %80 : vector<2x128xf32>
    %83 = arith.divf %81, %82 : vector<2x128xf32>
    %84 = vector.extract_strided_slice %75 {offsets = [0, 128], sizes = [2, 128], strides = [1, 1]} : vector<2x384xf32> to vector<2x128xf32>
    %85 = vector.extract_strided_slice %52 {offsets = [0, 128], sizes = [2, 128], strides = [1, 1]} : vector<2x384xf32> to vector<2x128xf32>
    %86 = arith.addf %84, %85 : vector<2x128xf32>
    %87 = arith.negf %86 : vector<2x128xf32>
    %88 = math.exp %87 : vector<2x128xf32>
    %cst_31 = arith.constant 1.000000e+00 : f32
    %89 = vector.broadcast %cst_31 : f32 to vector<2x128xf32>
    %90 = arith.addf %89, %88 : vector<2x128xf32>
    %91 = arith.divf %89, %90 : vector<2x128xf32>
    %92 = vector.extract_strided_slice %75 {offsets = [0, 256], sizes = [2, 128], strides = [1, 1]} : vector<2x384xf32> to vector<2x128xf32>
    %93 = vector.extract_strided_slice %52 {offsets = [0, 256], sizes = [2, 128], strides = [1, 1]} : vector<2x384xf32> to vector<2x128xf32>
    %94 = arith.addf %93, %13 : vector<2x128xf32>
    %95 = arith.mulf %83, %94 : vector<2x128xf32>
    %96 = arith.addf %92, %95 : vector<2x128xf32>
    %97 = math.tanh %96 : vector<2x128xf32>
    %cst_32 = arith.constant 1.000000e+00 : f32
    %98 = vector.broadcast %cst_32 : f32 to vector<2x128xf32>
    %99 = arith.subf %98, %91 : vector<2x128xf32>
    %100 = arith.mulf %99, %97 : vector<2x128xf32>
    %101 = arith.mulf %91, %47 : vector<2x128xf32>
    %102 = arith.addf %100, %101 : vector<2x128xf32>
    %103 = tpu.concatenate %102, %74 in 1 : vector<2x128xf32>, vector<2x128xf32> -> vector<2x256xf32>
    %cst_33 = arith.constant dense<0.000000e+00> : vector<2x896xf32>
    %104 = tpu.matmul %103, %10, %cst_33 {dimension_numbers = #tpu.dot_dimension_numbers<[1], [0], [0], [1], [0, 0, 1, 1], [], []>} : vector<2x256xf32>, vector<256x896xf32>, vector<2x896xf32> -> vector<2x896xf32>
    %105 = vector.extract_strided_slice %104 {offsets = [0, 0], sizes = [2, 512], strides = [1, 1]} : vector<2x896xf32> to vector<2x512xf32>
    %106 = arith.addf %105, %16 : vector<2x512xf32>
    %107 = vector.extract_strided_slice %104 {offsets = [0, 512], sizes = [2, 384], strides = [1, 1]} : vector<2x896xf32> to vector<2x384xf32>
    %108 = vector.extract_strided_slice %106 {offsets = [0, 0], sizes = [2, 128], strides = [1, 1]} : vector<2x512xf32> to vector<2x128xf32>
    %109 = arith.negf %108 : vector<2x128xf32>
    %110 = math.exp %109 : vector<2x128xf32>
    %cst_34 = arith.constant 1.000000e+00 : f32
    %111 = vector.broadcast %cst_34 : f32 to vector<2x128xf32>
    %112 = arith.addf %111, %110 : vector<2x128xf32>
    %113 = arith.divf %111, %112 : vector<2x128xf32>
    %114 = vector.extract_strided_slice %106 {offsets = [0, 128], sizes = [2, 128], strides = [1, 1]} : vector<2x512xf32> to vector<2x128xf32>
    %115 = arith.negf %114 : vector<2x128xf32>
    %116 = math.exp %115 : vector<2x128xf32>
    %cst_35 = arith.constant 1.000000e+00 : f32
    %117 = vector.broadcast %cst_35 : f32 to vector<2x128xf32>
    %118 = arith.addf %117, %116 : vector<2x128xf32>
    %119 = arith.divf %117, %118 : vector<2x128xf32>
    %120 = vector.extract_strided_slice %106 {offsets = [0, 256], sizes = [2, 128], strides = [1, 1]} : vector<2x512xf32> to vector<2x128xf32>
    %121 = vector.extract_strided_slice %106 {offsets = [0, 384], sizes = [2, 128], strides = [1, 1]} : vector<2x512xf32> to vector<2x128xf32>
    %122 = arith.mulf %113, %121 : vector<2x128xf32>
    %123 = arith.addf %120, %122 : vector<2x128xf32>
    %124 = math.tanh %123 : vector<2x128xf32>
    %cst_36 = arith.constant 1.000000e+00 : f32
    %125 = vector.broadcast %cst_36 : f32 to vector<2x128xf32>
    %126 = arith.subf %125, %119 : vector<2x128xf32>
    %127 = arith.mulf %126, %124 : vector<2x128xf32>
    %128 = arith.mulf %119, %74 : vector<2x128xf32>
    %129 = arith.addf %127, %128 : vector<2x128xf32>
    %c4 = arith.constant 4 : index
    %c0_37 = arith.constant 0 : index
    %130 = vector.load %arg13[%c4, %c0_37] : memref<16x384xf32, #tpu.memory_space<vmem>>, vector<2x384xf32>
    %131 = vector.extract_strided_slice %130 {offsets = [0, 0], sizes = [2, 128], strides = [1, 1]} : vector<2x384xf32> to vector<2x128xf32>
    %132 = vector.extract_strided_slice %107 {offsets = [0, 0], sizes = [2, 128], strides = [1, 1]} : vector<2x384xf32> to vector<2x128xf32>
    %133 = arith.addf %131, %132 : vector<2x128xf32>
    %134 = arith.negf %133 : vector<2x128xf32>
    %135 = math.exp %134 : vector<2x128xf32>
    %cst_38 = arith.constant 1.000000e+00 : f32
    %136 = vector.broadcast %cst_38 : f32 to vector<2x128xf32>
    %137 = arith.addf %136, %135 : vector<2x128xf32>
    %138 = arith.divf %136, %137 : vector<2x128xf32>
    %139 = vector.extract_strided_slice %130 {offsets = [0, 128], sizes = [2, 128], strides = [1, 1]} : vector<2x384xf32> to vector<2x128xf32>
    %140 = vector.extract_strided_slice %107 {offsets = [0, 128], sizes = [2, 128], strides = [1, 1]} : vector<2x384xf32> to vector<2x128xf32>
    %141 = arith.addf %139, %140 : vector<2x128xf32>
    %142 = arith.negf %141 : vector<2x128xf32>
    %143 = math.exp %142 : vector<2x128xf32>
    %cst_39 = arith.constant 1.000000e+00 : f32
    %144 = vector.broadcast %cst_39 : f32 to vector<2x128xf32>
    %145 = arith.addf %144, %143 : vector<2x128xf32>
    %146 = arith.divf %144, %145 : vector<2x128xf32>
    %147 = vector.extract_strided_slice %130 {offsets = [0, 256], sizes = [2, 128], strides = [1, 1]} : vector<2x384xf32> to vector<2x128xf32>
    %148 = vector.extract_strided_slice %107 {offsets = [0, 256], sizes = [2, 128], strides = [1, 1]} : vector<2x384xf32> to vector<2x128xf32>
    %149 = arith.addf %148, %13 : vector<2x128xf32>
    %150 = arith.mulf %138, %149 : vector<2x128xf32>
    %151 = arith.addf %147, %150 : vector<2x128xf32>
    %152 = math.tanh %151 : vector<2x128xf32>
    %cst_40 = arith.constant 1.000000e+00 : f32
    %153 = vector.broadcast %cst_40 : f32 to vector<2x128xf32>
    %154 = arith.subf %153, %146 : vector<2x128xf32>
    %155 = arith.mulf %154, %152 : vector<2x128xf32>
    %156 = arith.mulf %146, %102 : vector<2x128xf32>
    %157 = arith.addf %155, %156 : vector<2x128xf32>
    %158 = tpu.concatenate %157, %129 in 1 : vector<2x128xf32>, vector<2x128xf32> -> vector<2x256xf32>
    %cst_41 = arith.constant dense<0.000000e+00> : vector<2x896xf32>
    %159 = tpu.matmul %158, %10, %cst_41 {dimension_numbers = #tpu.dot_dimension_numbers<[1], [0], [0], [1], [0, 0, 1, 1], [], []>} : vector<2x256xf32>, vector<256x896xf32>, vector<2x896xf32> -> vector<2x896xf32>
    %160 = vector.extract_strided_slice %159 {offsets = [0, 0], sizes = [2, 512], strides = [1, 1]} : vector<2x896xf32> to vector<2x512xf32>
    %161 = arith.addf %160, %16 : vector<2x512xf32>
    %162 = vector.extract_strided_slice %159 {offsets = [0, 512], sizes = [2, 384], strides = [1, 1]} : vector<2x896xf32> to vector<2x384xf32>
    %163 = vector.extract_strided_slice %161 {offsets = [0, 0], sizes = [2, 128], strides = [1, 1]} : vector<2x512xf32> to vector<2x128xf32>
    %164 = arith.negf %163 : vector<2x128xf32>
    %165 = math.exp %164 : vector<2x128xf32>
    %cst_42 = arith.constant 1.000000e+00 : f32
    %166 = vector.broadcast %cst_42 : f32 to vector<2x128xf32>
    %167 = arith.addf %166, %165 : vector<2x128xf32>
    %168 = arith.divf %166, %167 : vector<2x128xf32>
    %169 = vector.extract_strided_slice %161 {offsets = [0, 128], sizes = [2, 128], strides = [1, 1]} : vector<2x512xf32> to vector<2x128xf32>
    %170 = arith.negf %169 : vector<2x128xf32>
    %171 = math.exp %170 : vector<2x128xf32>
    %cst_43 = arith.constant 1.000000e+00 : f32
    %172 = vector.broadcast %cst_43 : f32 to vector<2x128xf32>
    %173 = arith.addf %172, %171 : vector<2x128xf32>
    %174 = arith.divf %172, %173 : vector<2x128xf32>
    %175 = vector.extract_strided_slice %161 {offsets = [0, 256], sizes = [2, 128], strides = [1, 1]} : vector<2x512xf32> to vector<2x128xf32>
    %176 = vector.extract_strided_slice %161 {offsets = [0, 384], sizes = [2, 128], strides = [1, 1]} : vector<2x512xf32> to vector<2x128xf32>
    %177 = arith.mulf %168, %176 : vector<2x128xf32>
    %178 = arith.addf %175, %177 : vector<2x128xf32>
    %179 = math.tanh %178 : vector<2x128xf32>
    %cst_44 = arith.constant 1.000000e+00 : f32
    %180 = vector.broadcast %cst_44 : f32 to vector<2x128xf32>
    %181 = arith.subf %180, %174 : vector<2x128xf32>
    %182 = arith.mulf %181, %179 : vector<2x128xf32>
    %183 = arith.mulf %174, %129 : vector<2x128xf32>
    %184 = arith.addf %182, %183 : vector<2x128xf32>
    %c6 = arith.constant 6 : index
    %c0_45 = arith.constant 0 : index
    %185 = vector.load %arg13[%c6, %c0_45] : memref<16x384xf32, #tpu.memory_space<vmem>>, vector<2x384xf32>
    %186 = vector.extract_strided_slice %185 {offsets = [0, 0], sizes = [2, 128], strides = [1, 1]} : vector<2x384xf32> to vector<2x128xf32>
    %187 = vector.extract_strided_slice %162 {offsets = [0, 0], sizes = [2, 128], strides = [1, 1]} : vector<2x384xf32> to vector<2x128xf32>
    %188 = arith.addf %186, %187 : vector<2x128xf32>
    %189 = arith.negf %188 : vector<2x128xf32>
    %190 = math.exp %189 : vector<2x128xf32>
    %cst_46 = arith.constant 1.000000e+00 : f32
    %191 = vector.broadcast %cst_46 : f32 to vector<2x128xf32>
    %192 = arith.addf %191, %190 : vector<2x128xf32>
    %193 = arith.divf %191, %192 : vector<2x128xf32>
    %194 = vector.extract_strided_slice %185 {offsets = [0, 128], sizes = [2, 128], strides = [1, 1]} : vector<2x384xf32> to vector<2x128xf32>
    %195 = vector.extract_strided_slice %162 {offsets = [0, 128], sizes = [2, 128], strides = [1, 1]} : vector<2x384xf32> to vector<2x128xf32>
    %196 = arith.addf %194, %195 : vector<2x128xf32>
    %197 = arith.negf %196 : vector<2x128xf32>
    %198 = math.exp %197 : vector<2x128xf32>
    %cst_47 = arith.constant 1.000000e+00 : f32
    %199 = vector.broadcast %cst_47 : f32 to vector<2x128xf32>
    %200 = arith.addf %199, %198 : vector<2x128xf32>
    %201 = arith.divf %199, %200 : vector<2x128xf32>
    %202 = vector.extract_strided_slice %185 {offsets = [0, 256], sizes = [2, 128], strides = [1, 1]} : vector<2x384xf32> to vector<2x128xf32>
    %203 = vector.extract_strided_slice %162 {offsets = [0, 256], sizes = [2, 128], strides = [1, 1]} : vector<2x384xf32> to vector<2x128xf32>
    %204 = arith.addf %203, %13 : vector<2x128xf32>
    %205 = arith.mulf %193, %204 : vector<2x128xf32>
    %206 = arith.addf %202, %205 : vector<2x128xf32>
    %207 = math.tanh %206 : vector<2x128xf32>
    %cst_48 = arith.constant 1.000000e+00 : f32
    %208 = vector.broadcast %cst_48 : f32 to vector<2x128xf32>
    %209 = arith.subf %208, %201 : vector<2x128xf32>
    %210 = arith.mulf %209, %207 : vector<2x128xf32>
    %211 = arith.mulf %201, %157 : vector<2x128xf32>
    %212 = arith.addf %210, %211 : vector<2x128xf32>
    %213 = tpu.concatenate %212, %184 in 1 : vector<2x128xf32>, vector<2x128xf32> -> vector<2x256xf32>
    %cst_49 = arith.constant dense<0.000000e+00> : vector<2x896xf32>
    %214 = tpu.matmul %213, %10, %cst_49 {dimension_numbers = #tpu.dot_dimension_numbers<[1], [0], [0], [1], [0, 0, 1, 1], [], []>} : vector<2x256xf32>, vector<256x896xf32>, vector<2x896xf32> -> vector<2x896xf32>
    %215 = vector.extract_strided_slice %214 {offsets = [0, 0], sizes = [2, 512], strides = [1, 1]} : vector<2x896xf32> to vector<2x512xf32>
    %216 = arith.addf %215, %16 : vector<2x512xf32>
    %217 = vector.extract_strided_slice %214 {offsets = [0, 512], sizes = [2, 384], strides = [1, 1]} : vector<2x896xf32> to vector<2x384xf32>
    %218 = vector.extract_strided_slice %216 {offsets = [0, 0], sizes = [2, 128], strides = [1, 1]} : vector<2x512xf32> to vector<2x128xf32>
    %219 = arith.negf %218 : vector<2x128xf32>
    %220 = math.exp %219 : vector<2x128xf32>
    %cst_50 = arith.constant 1.000000e+00 : f32
    %221 = vector.broadcast %cst_50 : f32 to vector<2x128xf32>
    %222 = arith.addf %221, %220 : vector<2x128xf32>
    %223 = arith.divf %221, %222 : vector<2x128xf32>
    %224 = vector.extract_strided_slice %216 {offsets = [0, 128], sizes = [2, 128], strides = [1, 1]} : vector<2x512xf32> to vector<2x128xf32>
    %225 = arith.negf %224 : vector<2x128xf32>
    %226 = math.exp %225 : vector<2x128xf32>
    %cst_51 = arith.constant 1.000000e+00 : f32
    %227 = vector.broadcast %cst_51 : f32 to vector<2x128xf32>
    %228 = arith.addf %227, %226 : vector<2x128xf32>
    %229 = arith.divf %227, %228 : vector<2x128xf32>
    %230 = vector.extract_strided_slice %216 {offsets = [0, 256], sizes = [2, 128], strides = [1, 1]} : vector<2x512xf32> to vector<2x128xf32>
    %231 = vector.extract_strided_slice %216 {offsets = [0, 384], sizes = [2, 128], strides = [1, 1]} : vector<2x512xf32> to vector<2x128xf32>
    %232 = arith.mulf %223, %231 : vector<2x128xf32>
    %233 = arith.addf %230, %232 : vector<2x128xf32>
    %234 = math.tanh %233 : vector<2x128xf32>
    %cst_52 = arith.constant 1.000000e+00 : f32
    %235 = vector.broadcast %cst_52 : f32 to vector<2x128xf32>
    %236 = arith.subf %235, %229 : vector<2x128xf32>
    %237 = arith.mulf %236, %234 : vector<2x128xf32>
    %238 = arith.mulf %229, %184 : vector<2x128xf32>
    %239 = arith.addf %237, %238 : vector<2x128xf32>
    %c8 = arith.constant 8 : index
    %c0_53 = arith.constant 0 : index
    %240 = vector.load %arg13[%c8, %c0_53] : memref<16x384xf32, #tpu.memory_space<vmem>>, vector<2x384xf32>
    %241 = vector.extract_strided_slice %240 {offsets = [0, 0], sizes = [2, 128], strides = [1, 1]} : vector<2x384xf32> to vector<2x128xf32>
    %242 = vector.extract_strided_slice %217 {offsets = [0, 0], sizes = [2, 128], strides = [1, 1]} : vector<2x384xf32> to vector<2x128xf32>
    %243 = arith.addf %241, %242 : vector<2x128xf32>
    %244 = arith.negf %243 : vector<2x128xf32>
    %245 = math.exp %244 : vector<2x128xf32>
    %cst_54 = arith.constant 1.000000e+00 : f32
    %246 = vector.broadcast %cst_54 : f32 to vector<2x128xf32>
    %247 = arith.addf %246, %245 : vector<2x128xf32>
    %248 = arith.divf %246, %247 : vector<2x128xf32>
    %249 = vector.extract_strided_slice %240 {offsets = [0, 128], sizes = [2, 128], strides = [1, 1]} : vector<2x384xf32> to vector<2x128xf32>
    %250 = vector.extract_strided_slice %217 {offsets = [0, 128], sizes = [2, 128], strides = [1, 1]} : vector<2x384xf32> to vector<2x128xf32>
    %251 = arith.addf %249, %250 : vector<2x128xf32>
    %252 = arith.negf %251 : vector<2x128xf32>
    %253 = math.exp %252 : vector<2x128xf32>
    %cst_55 = arith.constant 1.000000e+00 : f32
    %254 = vector.broadcast %cst_55 : f32 to vector<2x128xf32>
    %255 = arith.addf %254, %253 : vector<2x128xf32>
    %256 = arith.divf %254, %255 : vector<2x128xf32>
    %257 = vector.extract_strided_slice %240 {offsets = [0, 256], sizes = [2, 128], strides = [1, 1]} : vector<2x384xf32> to vector<2x128xf32>
    %258 = vector.extract_strided_slice %217 {offsets = [0, 256], sizes = [2, 128], strides = [1, 1]} : vector<2x384xf32> to vector<2x128xf32>
    %259 = arith.addf %258, %13 : vector<2x128xf32>
    %260 = arith.mulf %248, %259 : vector<2x128xf32>
    %261 = arith.addf %257, %260 : vector<2x128xf32>
    %262 = math.tanh %261 : vector<2x128xf32>
    %cst_56 = arith.constant 1.000000e+00 : f32
    %263 = vector.broadcast %cst_56 : f32 to vector<2x128xf32>
    %264 = arith.subf %263, %256 : vector<2x128xf32>
    %265 = arith.mulf %264, %262 : vector<2x128xf32>
    %266 = arith.mulf %256, %212 : vector<2x128xf32>
    %267 = arith.addf %265, %266 : vector<2x128xf32>
    %268 = tpu.concatenate %267, %239 in 1 : vector<2x128xf32>, vector<2x128xf32> -> vector<2x256xf32>
    %cst_57 = arith.constant dense<0.000000e+00> : vector<2x896xf32>
    %269 = tpu.matmul %268, %10, %cst_57 {dimension_numbers = #tpu.dot_dimension_numbers<[1], [0], [0], [1], [0, 0, 1, 1], [], []>} : vector<2x256xf32>, vector<256x896xf32>, vector<2x896xf32> -> vector<2x896xf32>
    %270 = vector.extract_strided_slice %269 {offsets = [0, 0], sizes = [2, 512], strides = [1, 1]} : vector<2x896xf32> to vector<2x512xf32>
    %271 = arith.addf %270, %16 : vector<2x512xf32>
    %272 = vector.extract_strided_slice %269 {offsets = [0, 512], sizes = [2, 384], strides = [1, 1]} : vector<2x896xf32> to vector<2x384xf32>
    %273 = vector.extract_strided_slice %271 {offsets = [0, 0], sizes = [2, 128], strides = [1, 1]} : vector<2x512xf32> to vector<2x128xf32>
    %274 = arith.negf %273 : vector<2x128xf32>
    %275 = math.exp %274 : vector<2x128xf32>
    %cst_58 = arith.constant 1.000000e+00 : f32
    %276 = vector.broadcast %cst_58 : f32 to vector<2x128xf32>
    %277 = arith.addf %276, %275 : vector<2x128xf32>
    %278 = arith.divf %276, %277 : vector<2x128xf32>
    %279 = vector.extract_strided_slice %271 {offsets = [0, 128], sizes = [2, 128], strides = [1, 1]} : vector<2x512xf32> to vector<2x128xf32>
    %280 = arith.negf %279 : vector<2x128xf32>
    %281 = math.exp %280 : vector<2x128xf32>
    %cst_59 = arith.constant 1.000000e+00 : f32
    %282 = vector.broadcast %cst_59 : f32 to vector<2x128xf32>
    %283 = arith.addf %282, %281 : vector<2x128xf32>
    %284 = arith.divf %282, %283 : vector<2x128xf32>
    %285 = vector.extract_strided_slice %271 {offsets = [0, 256], sizes = [2, 128], strides = [1, 1]} : vector<2x512xf32> to vector<2x128xf32>
    %286 = vector.extract_strided_slice %271 {offsets = [0, 384], sizes = [2, 128], strides = [1, 1]} : vector<2x512xf32> to vector<2x128xf32>
    %287 = arith.mulf %278, %286 : vector<2x128xf32>
    %288 = arith.addf %285, %287 : vector<2x128xf32>
    %289 = math.tanh %288 : vector<2x128xf32>
    %cst_60 = arith.constant 1.000000e+00 : f32
    %290 = vector.broadcast %cst_60 : f32 to vector<2x128xf32>
    %291 = arith.subf %290, %284 : vector<2x128xf32>
    %292 = arith.mulf %291, %289 : vector<2x128xf32>
    %293 = arith.mulf %284, %239 : vector<2x128xf32>
    %294 = arith.addf %292, %293 : vector<2x128xf32>
    %c10 = arith.constant 10 : index
    %c0_61 = arith.constant 0 : index
    %295 = vector.load %arg13[%c10, %c0_61] : memref<16x384xf32, #tpu.memory_space<vmem>>, vector<2x384xf32>
    %296 = vector.extract_strided_slice %295 {offsets = [0, 0], sizes = [2, 128], strides = [1, 1]} : vector<2x384xf32> to vector<2x128xf32>
    %297 = vector.extract_strided_slice %272 {offsets = [0, 0], sizes = [2, 128], strides = [1, 1]} : vector<2x384xf32> to vector<2x128xf32>
    %298 = arith.addf %296, %297 : vector<2x128xf32>
    %299 = arith.negf %298 : vector<2x128xf32>
    %300 = math.exp %299 : vector<2x128xf32>
    %cst_62 = arith.constant 1.000000e+00 : f32
    %301 = vector.broadcast %cst_62 : f32 to vector<2x128xf32>
    %302 = arith.addf %301, %300 : vector<2x128xf32>
    %303 = arith.divf %301, %302 : vector<2x128xf32>
    %304 = vector.extract_strided_slice %295 {offsets = [0, 128], sizes = [2, 128], strides = [1, 1]} : vector<2x384xf32> to vector<2x128xf32>
    %305 = vector.extract_strided_slice %272 {offsets = [0, 128], sizes = [2, 128], strides = [1, 1]} : vector<2x384xf32> to vector<2x128xf32>
    %306 = arith.addf %304, %305 : vector<2x128xf32>
    %307 = arith.negf %306 : vector<2x128xf32>
    %308 = math.exp %307 : vector<2x128xf32>
    %cst_63 = arith.constant 1.000000e+00 : f32
    %309 = vector.broadcast %cst_63 : f32 to vector<2x128xf32>
    %310 = arith.addf %309, %308 : vector<2x128xf32>
    %311 = arith.divf %309, %310 : vector<2x128xf32>
    %312 = vector.extract_strided_slice %295 {offsets = [0, 256], sizes = [2, 128], strides = [1, 1]} : vector<2x384xf32> to vector<2x128xf32>
    %313 = vector.extract_strided_slice %272 {offsets = [0, 256], sizes = [2, 128], strides = [1, 1]} : vector<2x384xf32> to vector<2x128xf32>
    %314 = arith.addf %313, %13 : vector<2x128xf32>
    %315 = arith.mulf %303, %314 : vector<2x128xf32>
    %316 = arith.addf %312, %315 : vector<2x128xf32>
    %317 = math.tanh %316 : vector<2x128xf32>
    %cst_64 = arith.constant 1.000000e+00 : f32
    %318 = vector.broadcast %cst_64 : f32 to vector<2x128xf32>
    %319 = arith.subf %318, %311 : vector<2x128xf32>
    %320 = arith.mulf %319, %317 : vector<2x128xf32>
    %321 = arith.mulf %311, %267 : vector<2x128xf32>
    %322 = arith.addf %320, %321 : vector<2x128xf32>
    %323 = tpu.concatenate %322, %294 in 1 : vector<2x128xf32>, vector<2x128xf32> -> vector<2x256xf32>
    %cst_65 = arith.constant dense<0.000000e+00> : vector<2x896xf32>
    %324 = tpu.matmul %323, %10, %cst_65 {dimension_numbers = #tpu.dot_dimension_numbers<[1], [0], [0], [1], [0, 0, 1, 1], [], []>} : vector<2x256xf32>, vector<256x896xf32>, vector<2x896xf32> -> vector<2x896xf32>
    %325 = vector.extract_strided_slice %324 {offsets = [0, 0], sizes = [2, 512], strides = [1, 1]} : vector<2x896xf32> to vector<2x512xf32>
    %326 = arith.addf %325, %16 : vector<2x512xf32>
    %327 = vector.extract_strided_slice %324 {offsets = [0, 512], sizes = [2, 384], strides = [1, 1]} : vector<2x896xf32> to vector<2x384xf32>
    %328 = vector.extract_strided_slice %326 {offsets = [0, 0], sizes = [2, 128], strides = [1, 1]} : vector<2x512xf32> to vector<2x128xf32>
    %329 = arith.negf %328 : vector<2x128xf32>
    %330 = math.exp %329 : vector<2x128xf32>
    %cst_66 = arith.constant 1.000000e+00 : f32
    %331 = vector.broadcast %cst_66 : f32 to vector<2x128xf32>
    %332 = arith.addf %331, %330 : vector<2x128xf32>
    %333 = arith.divf %331, %332 : vector<2x128xf32>
    %334 = vector.extract_strided_slice %326 {offsets = [0, 128], sizes = [2, 128], strides = [1, 1]} : vector<2x512xf32> to vector<2x128xf32>
    %335 = arith.negf %334 : vector<2x128xf32>
    %336 = math.exp %335 : vector<2x128xf32>
    %cst_67 = arith.constant 1.000000e+00 : f32
    %337 = vector.broadcast %cst_67 : f32 to vector<2x128xf32>
    %338 = arith.addf %337, %336 : vector<2x128xf32>
    %339 = arith.divf %337, %338 : vector<2x128xf32>
    %340 = vector.extract_strided_slice %326 {offsets = [0, 256], sizes = [2, 128], strides = [1, 1]} : vector<2x512xf32> to vector<2x128xf32>
    %341 = vector.extract_strided_slice %326 {offsets = [0, 384], sizes = [2, 128], strides = [1, 1]} : vector<2x512xf32> to vector<2x128xf32>
    %342 = arith.mulf %333, %341 : vector<2x128xf32>
    %343 = arith.addf %340, %342 : vector<2x128xf32>
    %344 = math.tanh %343 : vector<2x128xf32>
    %cst_68 = arith.constant 1.000000e+00 : f32
    %345 = vector.broadcast %cst_68 : f32 to vector<2x128xf32>
    %346 = arith.subf %345, %339 : vector<2x128xf32>
    %347 = arith.mulf %346, %344 : vector<2x128xf32>
    %348 = arith.mulf %339, %294 : vector<2x128xf32>
    %349 = arith.addf %347, %348 : vector<2x128xf32>
    %c12 = arith.constant 12 : index
    %c0_69 = arith.constant 0 : index
    %350 = vector.load %arg13[%c12, %c0_69] : memref<16x384xf32, #tpu.memory_space<vmem>>, vector<2x384xf32>
    %351 = vector.extract_strided_slice %350 {offsets = [0, 0], sizes = [2, 128], strides = [1, 1]} : vector<2x384xf32> to vector<2x128xf32>
    %352 = vector.extract_strided_slice %327 {offsets = [0, 0], sizes = [2, 128], strides = [1, 1]} : vector<2x384xf32> to vector<2x128xf32>
    %353 = arith.addf %351, %352 : vector<2x128xf32>
    %354 = arith.negf %353 : vector<2x128xf32>
    %355 = math.exp %354 : vector<2x128xf32>
    %cst_70 = arith.constant 1.000000e+00 : f32
    %356 = vector.broadcast %cst_70 : f32 to vector<2x128xf32>
    %357 = arith.addf %356, %355 : vector<2x128xf32>
    %358 = arith.divf %356, %357 : vector<2x128xf32>
    %359 = vector.extract_strided_slice %350 {offsets = [0, 128], sizes = [2, 128], strides = [1, 1]} : vector<2x384xf32> to vector<2x128xf32>
    %360 = vector.extract_strided_slice %327 {offsets = [0, 128], sizes = [2, 128], strides = [1, 1]} : vector<2x384xf32> to vector<2x128xf32>
    %361 = arith.addf %359, %360 : vector<2x128xf32>
    %362 = arith.negf %361 : vector<2x128xf32>
    %363 = math.exp %362 : vector<2x128xf32>
    %cst_71 = arith.constant 1.000000e+00 : f32
    %364 = vector.broadcast %cst_71 : f32 to vector<2x128xf32>
    %365 = arith.addf %364, %363 : vector<2x128xf32>
    %366 = arith.divf %364, %365 : vector<2x128xf32>
    %367 = vector.extract_strided_slice %350 {offsets = [0, 256], sizes = [2, 128], strides = [1, 1]} : vector<2x384xf32> to vector<2x128xf32>
    %368 = vector.extract_strided_slice %327 {offsets = [0, 256], sizes = [2, 128], strides = [1, 1]} : vector<2x384xf32> to vector<2x128xf32>
    %369 = arith.addf %368, %13 : vector<2x128xf32>
    %370 = arith.mulf %358, %369 : vector<2x128xf32>
    %371 = arith.addf %367, %370 : vector<2x128xf32>
    %372 = math.tanh %371 : vector<2x128xf32>
    %cst_72 = arith.constant 1.000000e+00 : f32
    %373 = vector.broadcast %cst_72 : f32 to vector<2x128xf32>
    %374 = arith.subf %373, %366 : vector<2x128xf32>
    %375 = arith.mulf %374, %372 : vector<2x128xf32>
    %376 = arith.mulf %366, %322 : vector<2x128xf32>
    %377 = arith.addf %375, %376 : vector<2x128xf32>
    %378 = tpu.concatenate %377, %349 in 1 : vector<2x128xf32>, vector<2x128xf32> -> vector<2x256xf32>
    %cst_73 = arith.constant dense<0.000000e+00> : vector<2x896xf32>
    %379 = tpu.matmul %378, %10, %cst_73 {dimension_numbers = #tpu.dot_dimension_numbers<[1], [0], [0], [1], [0, 0, 1, 1], [], []>} : vector<2x256xf32>, vector<256x896xf32>, vector<2x896xf32> -> vector<2x896xf32>
    %380 = vector.extract_strided_slice %379 {offsets = [0, 0], sizes = [2, 512], strides = [1, 1]} : vector<2x896xf32> to vector<2x512xf32>
    %381 = arith.addf %380, %16 : vector<2x512xf32>
    %382 = vector.extract_strided_slice %379 {offsets = [0, 512], sizes = [2, 384], strides = [1, 1]} : vector<2x896xf32> to vector<2x384xf32>
    %383 = vector.extract_strided_slice %381 {offsets = [0, 0], sizes = [2, 128], strides = [1, 1]} : vector<2x512xf32> to vector<2x128xf32>
    %384 = arith.negf %383 : vector<2x128xf32>
    %385 = math.exp %384 : vector<2x128xf32>
    %cst_74 = arith.constant 1.000000e+00 : f32
    %386 = vector.broadcast %cst_74 : f32 to vector<2x128xf32>
    %387 = arith.addf %386, %385 : vector<2x128xf32>
    %388 = arith.divf %386, %387 : vector<2x128xf32>
    %389 = vector.extract_strided_slice %381 {offsets = [0, 128], sizes = [2, 128], strides = [1, 1]} : vector<2x512xf32> to vector<2x128xf32>
    %390 = arith.negf %389 : vector<2x128xf32>
    %391 = math.exp %390 : vector<2x128xf32>
    %cst_75 = arith.constant 1.000000e+00 : f32
    %392 = vector.broadcast %cst_75 : f32 to vector<2x128xf32>
    %393 = arith.addf %392, %391 : vector<2x128xf32>
    %394 = arith.divf %392, %393 : vector<2x128xf32>
    %395 = vector.extract_strided_slice %381 {offsets = [0, 256], sizes = [2, 128], strides = [1, 1]} : vector<2x512xf32> to vector<2x128xf32>
    %396 = vector.extract_strided_slice %381 {offsets = [0, 384], sizes = [2, 128], strides = [1, 1]} : vector<2x512xf32> to vector<2x128xf32>
    %397 = arith.mulf %388, %396 : vector<2x128xf32>
    %398 = arith.addf %395, %397 : vector<2x128xf32>
    %399 = math.tanh %398 : vector<2x128xf32>
    %cst_76 = arith.constant 1.000000e+00 : f32
    %400 = vector.broadcast %cst_76 : f32 to vector<2x128xf32>
    %401 = arith.subf %400, %394 : vector<2x128xf32>
    %402 = arith.mulf %401, %399 : vector<2x128xf32>
    %403 = arith.mulf %394, %349 : vector<2x128xf32>
    %404 = arith.addf %402, %403 : vector<2x128xf32>
    %c14 = arith.constant 14 : index
    %c0_77 = arith.constant 0 : index
    %405 = vector.load %arg13[%c14, %c0_77] : memref<16x384xf32, #tpu.memory_space<vmem>>, vector<2x384xf32>
    %406 = vector.extract_strided_slice %405 {offsets = [0, 0], sizes = [2, 128], strides = [1, 1]} : vector<2x384xf32> to vector<2x128xf32>
    %407 = vector.extract_strided_slice %382 {offsets = [0, 0], sizes = [2, 128], strides = [1, 1]} : vector<2x384xf32> to vector<2x128xf32>
    %408 = arith.addf %406, %407 : vector<2x128xf32>
    %409 = arith.negf %408 : vector<2x128xf32>
    %410 = math.exp %409 : vector<2x128xf32>
    %cst_78 = arith.constant 1.000000e+00 : f32
    %411 = vector.broadcast %cst_78 : f32 to vector<2x128xf32>
    %412 = arith.addf %411, %410 : vector<2x128xf32>
    %413 = arith.divf %411, %412 : vector<2x128xf32>
    %414 = vector.extract_strided_slice %405 {offsets = [0, 128], sizes = [2, 128], strides = [1, 1]} : vector<2x384xf32> to vector<2x128xf32>
    %415 = vector.extract_strided_slice %382 {offsets = [0, 128], sizes = [2, 128], strides = [1, 1]} : vector<2x384xf32> to vector<2x128xf32>
    %416 = arith.addf %414, %415 : vector<2x128xf32>
    %417 = arith.negf %416 : vector<2x128xf32>
    %418 = math.exp %417 : vector<2x128xf32>
    %cst_79 = arith.constant 1.000000e+00 : f32
    %419 = vector.broadcast %cst_79 : f32 to vector<2x128xf32>
    %420 = arith.addf %419, %418 : vector<2x128xf32>
    %421 = arith.divf %419, %420 : vector<2x128xf32>
    %422 = vector.extract_strided_slice %405 {offsets = [0, 256], sizes = [2, 128], strides = [1, 1]} : vector<2x384xf32> to vector<2x128xf32>
    %423 = vector.extract_strided_slice %382 {offsets = [0, 256], sizes = [2, 128], strides = [1, 1]} : vector<2x384xf32> to vector<2x128xf32>
    %424 = arith.addf %423, %13 : vector<2x128xf32>
    %425 = arith.mulf %413, %424 : vector<2x128xf32>
    %426 = arith.addf %422, %425 : vector<2x128xf32>
    %427 = math.tanh %426 : vector<2x128xf32>
    %cst_80 = arith.constant 1.000000e+00 : f32
    %428 = vector.broadcast %cst_80 : f32 to vector<2x128xf32>
    %429 = arith.subf %428, %421 : vector<2x128xf32>
    %430 = arith.mulf %429, %427 : vector<2x128xf32>
    %431 = arith.mulf %421, %377 : vector<2x128xf32>
    %432 = arith.addf %430, %431 : vector<2x128xf32>
    %433 = tpu.concatenate %432, %404 in 1 : vector<2x128xf32>, vector<2x128xf32> -> vector<2x256xf32>
    %cst_81 = arith.constant dense<0.000000e+00> : vector<2x896xf32>
    %434 = tpu.matmul %433, %10, %cst_81 {dimension_numbers = #tpu.dot_dimension_numbers<[1], [0], [0], [1], [0, 0, 1, 1], [], []>} : vector<2x256xf32>, vector<256x896xf32>, vector<2x896xf32> -> vector<2x896xf32>
    %435 = vector.extract_strided_slice %434 {offsets = [0, 0], sizes = [2, 512], strides = [1, 1]} : vector<2x896xf32> to vector<2x512xf32>
    %436 = arith.addf %435, %16 : vector<2x512xf32>
    %437 = vector.extract_strided_slice %434 {offsets = [0, 512], sizes = [2, 384], strides = [1, 1]} : vector<2x896xf32> to vector<2x384xf32>
    %438 = vector.extract_strided_slice %436 {offsets = [0, 0], sizes = [2, 128], strides = [1, 1]} : vector<2x512xf32> to vector<2x128xf32>
    %439 = arith.negf %438 : vector<2x128xf32>
    %440 = math.exp %439 : vector<2x128xf32>
    %cst_82 = arith.constant 1.000000e+00 : f32
    %441 = vector.broadcast %cst_82 : f32 to vector<2x128xf32>
    %442 = arith.addf %441, %440 : vector<2x128xf32>
    %443 = arith.divf %441, %442 : vector<2x128xf32>
    %444 = vector.extract_strided_slice %436 {offsets = [0, 128], sizes = [2, 128], strides = [1, 1]} : vector<2x512xf32> to vector<2x128xf32>
    %445 = arith.negf %444 : vector<2x128xf32>
    %446 = math.exp %445 : vector<2x128xf32>
    %cst_83 = arith.constant 1.000000e+00 : f32
    %447 = vector.broadcast %cst_83 : f32 to vector<2x128xf32>
    %448 = arith.addf %447, %446 : vector<2x128xf32>
    %449 = arith.divf %447, %448 : vector<2x128xf32>
    %450 = vector.extract_strided_slice %436 {offsets = [0, 256], sizes = [2, 128], strides = [1, 1]} : vector<2x512xf32> to vector<2x128xf32>
    %451 = vector.extract_strided_slice %436 {offsets = [0, 384], sizes = [2, 128], strides = [1, 1]} : vector<2x512xf32> to vector<2x128xf32>
    %452 = arith.mulf %443, %451 : vector<2x128xf32>
    %453 = arith.addf %450, %452 : vector<2x128xf32>
    %454 = math.tanh %453 : vector<2x128xf32>
    %cst_84 = arith.constant 1.000000e+00 : f32
    %455 = vector.broadcast %cst_84 : f32 to vector<2x128xf32>
    %456 = arith.subf %455, %449 : vector<2x128xf32>
    %457 = arith.mulf %456, %454 : vector<2x128xf32>
    %458 = arith.mulf %449, %404 : vector<2x128xf32>
    %459 = arith.addf %457, %458 : vector<2x128xf32>
    %460 = tpu.concatenate %74, %129, %184, %239, %294, %349, %404, %459 in 0 : vector<2x128xf32>, vector<2x128xf32>, vector<2x128xf32>, vector<2x128xf32>, vector<2x128xf32>, vector<2x128xf32>, vector<2x128xf32>, vector<2x128xf32> -> vector<16x128xf32>
    %c0_85 = arith.constant 0 : index
    %c0_86 = arith.constant 0 : index
    %461 = vector.load %arg10[%c0_85, %c0_86] : memref<2x128xf32, #tpu.memory_space<vmem>>, vector<2x128xf32>
    tpu.vector_store %arg10[%c0_85, %c0_86], %432 {strides = array<i32>} : memref<2x128xf32, #tpu.memory_space<vmem>>, vector<2x128xf32>,
    %c0_87 = arith.constant 0 : index
    %c0_88 = arith.constant 0 : index
    %462 = vector.load %arg11[%c0_87, %c0_88] : memref<2x128xf32, #tpu.memory_space<vmem>>, vector<2x128xf32>
    tpu.vector_store %arg11[%c0_87, %c0_88], %459 {strides = array<i32>} : memref<2x128xf32, #tpu.memory_space<vmem>>, vector<2x128xf32>,
    %c0_89 = arith.constant 0 : index
    %c0_90 = arith.constant 0 : index
    %463 = vector.load %arg12[%c0_89, %c0_90] : memref<2x384xf32, #tpu.memory_space<vmem>>, vector<2x384xf32>
    tpu.vector_store %arg12[%c0_89, %c0_90], %437 {strides = array<i32>} : memref<2x384xf32, #tpu.memory_space<vmem>>, vector<2x384xf32>,
    %c0_91 = arith.constant 0 : index
    %c0_92 = arith.constant 0 : index
    %464 = vector.load %arg7[%c0_91, %c0_92] : memref<128x128xf32, #tpu.memory_space<vmem>>, vector<128x128xf32>
    %cst_93 = arith.constant dense<0.000000e+00> : vector<16x128xf32>
    %465 = tpu.matmul %460, %464, %cst_93 {dimension_numbers = #tpu.dot_dimension_numbers<[1], [0], [0], [1], [0, 0, 1, 1], [], []>} : vector<16x128xf32>, vector<128x128xf32>, vector<16x128xf32> -> vector<16x128xf32>
    %c0_94 = arith.constant 0 : index
    %c0_95 = arith.constant 0 : index
    %466 = vector.load %arg8[%c0_94, %c0_95] : memref<1x128xf32, #tpu.memory_space<vmem>>, vector<1x128xf32>
    %467 = vector.broadcast %466 : vector<1x128xf32> to vector<16x128xf32>
    %468 = arith.addf %465, %467 : vector<16x128xf32>
    %469 = arith.negf %468 : vector<16x128xf32>
    %470 = math.exp %469 : vector<16x128xf32>
    %cst_96 = arith.constant 1.000000e+00 : f32
    %471 = vector.broadcast %cst_96 : f32 to vector<16x128xf32>
    %472 = arith.addf %471, %470 : vector<16x128xf32>
    %473 = arith.divf %471, %472 : vector<16x128xf32>
    %c0_97 = arith.constant 0 : index
    %c0_98 = arith.constant 0 : index
    %474 = vector.load %arg9[%c0_97, %c0_98] : memref<16x128xf32, #tpu.memory_space<vmem>>, vector<16x128xf32>
    tpu.vector_store %arg9[%c0_97, %c0_98], %473 {strides = array<i32>} : memref<16x128xf32, #tpu.memory_space<vmem>>, vector<16x128xf32>,
    return
  }
  func.func @transform_0(%arg0: i32) -> (i32, i32) {
    %c0_i32 = arith.constant 0 : i32
    %c0_i32_0 = arith.constant 0 : i32
    return %arg0, %c0_i32 : i32, i32
  }
  func.func @transform_1(%arg0: i32) -> (i32, i32) {
    %c0_i32 = arith.constant 0 : i32
    %c0_i32_0 = arith.constant 0 : i32
    %c0_i32_1 = arith.constant 0 : i32
    return %c0_i32, %c0_i32_0 : i32, i32
  }
  func.func @transform_2(%arg0: i32) -> (i32, i32) {
    %c0_i32 = arith.constant 0 : i32
    %c0_i32_0 = arith.constant 0 : i32
    %c0_i32_1 = arith.constant 0 : i32
    return %c0_i32, %c0_i32_0 : i32, i32
  }
  func.func @transform_3(%arg0: i32) -> (i32, i32) {
    %c0_i32 = arith.constant 0 : i32
    %c0_i32_0 = arith.constant 0 : i32
    %c0_i32_1 = arith.constant 0 : i32
    return %c0_i32, %c0_i32_0 : i32, i32
  }
  func.func @transform_4(%arg0: i32) -> (i32, i32) {
    %c0_i32 = arith.constant 0 : i32
    %c0_i32_0 = arith.constant 0 : i32
    %c0_i32_1 = arith.constant 0 : i32
    return %c0_i32, %c0_i32_0 : i32, i32
  }
  func.func @transform_5(%arg0: i32) -> (i32, i32) {
    %c0_i32 = arith.constant 0 : i32
    %c0_i32_0 = arith.constant 0 : i32
    %c0_i32_1 = arith.constant 0 : i32
    return %c0_i32, %c0_i32_0 : i32, i32
  }
  func.func @transform_6(%arg0: i32) -> (i32, i32) {
    %c0_i32 = arith.constant 0 : i32
    %c0_i32_0 = arith.constant 0 : i32
    %c0_i32_1 = arith.constant 0 : i32
    return %c0_i32, %c0_i32_0 : i32, i32
  }
  func.func @transform_7(%arg0: i32) -> (i32, i32) {
    %c0_i32 = arith.constant 0 : i32
    %c0_i32_0 = arith.constant 0 : i32
    %c0_i32_1 = arith.constant 0 : i32
    return %c0_i32, %c0_i32_0 : i32, i32
  }
  func.func @transform_8(%arg0: i32) -> (i32, i32) {
    %c0_i32 = arith.constant 0 : i32
    %c0_i32_0 = arith.constant 0 : i32
    return %arg0, %c0_i32 : i32, i32
  }
}

</mosaic_0001>

<bundles_post_ra>
// kernel: tpu_custom_call.1
= control target key start
LH: loop header
LB: loop body
LE: loop exit
PB: predicated region body
PF: predicated region fallthrough
CT: control target
= control target key end

     0   :  { %13 = vsyncpa [#allocation8], 0  ;;  %s8596_s0 = inlined_call_operand.vmem [shape: f32[16,4], index: 0, kind: input, shape index: {}]   ;;  %s8597_s1 = inlined_call_operand.vmem [shape: f32[4,384], index: 1, kind: input, shape index: {}]   ;;  %s8598_s2 = inlined_call_operand.vmem [shape: f32[1,384], index: 2, kind: input, shape index: {}]   ;;  %s8599_s3 = inlined_call_operand.vmem [shape: f32[1,128], index: 3, kind: input, shape index: {}]   ;;  %s8600_s4 = inlined_call_operand.hbm [shape: f32[256,896], index: 4, kind: input, shape index: {}]   ;;  %s8601_s5 = inlined_call_operand.vmem [shape: f32[1,512], index: 5, kind: input, shape index: {}]   ;;  %s8602_s6 = inlined_call_operand.hbm [shape: f32[128,128], index: 6, kind: input, shape index: {}]   ;;  %s8603_s7 = inlined_call_operand.vmem [shape: f32[1,128], index: 7, kind: input, shape index: {}]   ;;  %s8604_s8 = inlined_call_operand.hbm [shape: f32[16,128], index: 8, kind: output, shape index: {}]  }
   0x1   :  { %14 = vsyncpa [#allocation11], 0 }
   0x2   :  { %15 = vsyncpa [#allocation9], 0  ;;  %s4784_s27 = smov [#allocation7]  }
   0x3   :  { %s29_s28 = sshll.u32 %s4784_s27, 4  ;;  %s30_s28 = int_to_ptr.vmem [resolvable:$true] %s29_s28 }
   0x4   :  { %s4726_s29 = scalar_lea.vmem %s30_s28, 28672  ;;  %p4731_p1 = scmp.lt.s32.totalorder %s30_s28, %s30_s28 }
   0x5   :  { %p4727_p0 = scmp.ne.s32.totalorder %s30_s28, %s4726_s29  ;;  %p4732_p2 = scmp.lt.s32.totalorder %s4726_s29, %s4726_s29 }
   0x7   :  { %p4733_p3 = por %p4732_p2, %p4731_p1 }
   0x9   :  { %p4734_p4 = pnand %p4733_p3, %p4727_p0 }
   0xb   :  { %4737 = shalt.err (!%p4734_p4)
}
   0xc   :  { %s4785_s30 = smov 896   ;;  %s4786_s9 = smov 56  }
   0xd   :  { %35 = dma.hbm_to_vmem [thread:$0]  %s8600_s4, 28672, %s30_s28, [#allocation8], %s4785_s30, %s4785_s30, %s4786_s9  }
   0xe   :  { %s4787_s12 = smov [#allocation10]  }
   0xf   :  { %s43_s13 = sshll.u32 %s4787_s12, 4  ;;  %s44_s13 = int_to_ptr.vmem [resolvable:$true] %s43_s13 }
  0x10   :  { %s4746_s14 = scalar_lea.vmem %s44_s13, 2048  ;;  %p4751_p6 = scmp.lt.s32.totalorder %s44_s13, %s44_s13 }
  0x11   :  { %p4747_p5 = scmp.ne.s32.totalorder %s44_s13, %s4746_s14  ;;  %p4752_p7 = scmp.lt.s32.totalorder %s4746_s14, %s4746_s14 }
  0x13   :  { %p4753_p8 = por %p4752_p7, %p4751_p6 }
  0x15   :  { %p4754_p9 = pnand %p4753_p8, %p4747_p5 }
  0x17   :  { %4757 = shalt.err (!%p4754_p9)
}
  0x18   :  { %s4788_s15 = smov 128   ;;  %s4789_s16 = smov 8  }
  0x19   :  { %49 = dma.hbm_to_vmem [thread:$0]  %s8602_s6, 2048, %s44_s13, [#allocation11], %s4788_s15, %s4788_s15, %s4789_s16  }
  0x1a   :  { %4778 = dma.done.wait [#allocation8], 28672  }
  0x1b   :  { %4779 = vsyncadd [#allocation8], 4294938624 }
  0x1c   :  { %4780 = dma.done.wait [#allocation11], 2048  }
  0x1d   :  { %4781 = vsyncadd [#allocation11], 4294965248  ;;  %v4790_v0 = vmov 0.0   ;;  %v67_v1 = vld [vmem:[%s8597_s1] sm:$0xff]  ;;  %vm96_vm0 = vcmask 1043456   ;;  %vm89_vm1 = vcmask 31744  }
  0x1e   :  { %62 = vst [vmem:[#allocation2] sm:$0x3] %v4790_v0  ;;  %63 = vst [vmem:[#allocation3] sm:$0x3] %v4790_v0  ;;  %167 = vmatprep.mubr.f32.mxu1 %v4790_v0  ;;  %v88_v2 = vcombine.high %v67_v1, %v67_v1  ;;  %v65_v3 = vld [vmem:[%s8596_s0] sm:$0xff]  ;;  %v66_v5 = vld [vmem:[%s8596_s0 + $0x8] sm:$0xff] }
  0x1f   :  { %64 = vst [vmem:[#allocation4] sm:$0x3f] %v4790_v0  ;;  %v68_v4 = vld [vmem:[%s8597_s1 + $0x8] sm:$0xf]  ;;  %v369_v7 = vld [vmem:[#allocation7 + $0x360] sm:$0xff]  ;;  %v368_v9 = vld [vmem:[#allocation7 + $0x358] sm:$0xff] }
  0x20   :  { %3462 = vmatprep.subr.msk.mxu1 %vm96_vm0, %v88_v2  ;;  %v4863_v6 = vld [vmem:[#allocation7 + $0x350] sm:$0xff]  ;;  %v4866_v8 = vld [vmem:[#allocation7 + $0x348] sm:$0xff]  ;;  %v4869_v10 = vld [vmem:[#allocation7 + $0x318] sm:$0xff]  ;;  %vm3301_vm2 = vcmask 1041408   ;;  %vm3304_vm3 = vcmask 1045504   ;;  %s4792_s12 = smov [#allocation12]  }
  0x21   :  { %3463 = vmatpush1.msk.msra.mxu1 %vm96_vm0, %v67_v1  ;;  %554 = vmatprep.subr.mxu0 %v4863_v6  ;;  %v362_v11 = vld [vmem:[#allocation7 + $0x328] sm:$0xff]  ;;  %v4872_v12 = vld [vmem:[#allocation7 + $0x310] sm:$0xff]  ;;  %v361_v13 = vld [vmem:[#allocation7 + $0x320] sm:$0xff]  ;;  %s3449_s13 = sshll.u32 %s4792_s12, 4  ;;  %s3450_s13 = int_to_ptr.vmem [resolvable:$true] %s3449_s13 }
  0x22   :  { %3464 = vmatmul.mubr.msk.f32.vlgmr.msra.gmra.mxu1 %vm89_vm1, %v65_v3  ;;  %3806 = vmatprep.subr.msk.mxu1 %vm96_vm0, %v68_v4  ;;  %v4875_v14 = vld [vmem:[#allocation7 + $0x2e0] sm:$0xff]  ;;  %v355_v15 = vld [vmem:[#allocation7 + $0x2f0] sm:$0xff]  ;;  %v4878_v16 = vld [vmem:[#allocation7 + $0x2d8] sm:$0xff]  ;;  %p4763_p11 = scmp.lt.s32.totalorder %s3450_s13, %s3450_s13 }
  0x23   :  { %3807 = vmatpush3.msk.msra.mxu1 %vm96_vm0, %v68_v4  ;;  %173 = vmatprep.mubr.f32.mxu1 %v4790_v0  ;;  %v354_v17 = vld [vmem:[#allocation7 + $0x2e8] sm:$0xff]  ;;  %v348_v19 = vld [vmem:[#allocation7 + $0x2b8] sm:$0xff]  ;;  %v4884_v20 = vld [vmem:[#allocation7 + $0x2a0] sm:$0xff] }
  0x24   :  { %625 = vmatprep.subr.mxu1 %v369_v7  ;;  %555 = vmatpush1.msra.mxu0 %v4866_v8  ;;  %v4881_v18 = vld [vmem:[#allocation7 + $0x2a8] sm:$0xff]  ;;  %v347_v21 = vld [vmem:[#allocation7 + $0x2b0] sm:$0xff]  ;;  %v341_v23 = vld [vmem:[#allocation7 + $0x280] sm:$0xff] }
  0x25   :  { %556 = vmatprep.subr.mxu0 %v4869_v10  ;;  %v4887_v22 = vld [vmem:[#allocation7 + $0x270] sm:$0xff]  ;;  %v4890_v24 = vld [vmem:[#allocation7 + $0x268] sm:$0xff]  ;;  %v340_v25 = vld [vmem:[#allocation7 + $0x278] sm:$0xff] }
  0x26   :  { %3465 = vmatmul.mubr.msk.f32.gmra.mxu1 %vm89_vm1, %v66_v5  ;;  %557 = vmatpush1.msra.mxu0 %v4872_v12  ;;  %v4893_v26 = vld [vmem:[#allocation7 + $0x238] sm:$0xff]  ;;  %v334_v27 = vld [vmem:[#allocation7 + $0x248] sm:$0xff]  ;;  %v4896_v28 = vld [vmem:[#allocation7 + $0x230] sm:$0xff] }
  0x27   :  { %3808 = vmatprep.mubr.msk.f32.mxu1 %vm89_vm1, %v65_v3  ;;  %558 = vmatprep.subr.mxu0 %v4875_v14  ;;  %v333_v29 = vld [vmem:[#allocation7 + $0x240] sm:$0xff]  ;;  %v327_v31 = vld [vmem:[#allocation7 + $0x210] sm:$0xff]  ;;  %v4902_v32 = vld [vmem:[#allocation7 + $0x1f8] sm:$0xff] }
  0x28   :  { %559 = vmatpush1.msra.mxu0 %v4878_v16  ;;  %v4899_v30 = vld [vmem:[#allocation7 + $0x200] sm:$0xff]  ;;  %v326_v33 = vld [vmem:[#allocation7 + $0x208] sm:$0xff]  ;;  %v320_v35 = vld [vmem:[#allocation7 + $0x1d8] sm:$0xff] }
  0x29   :  { %560 = vmatprep.subr.mxu0 %v4881_v18  ;;  %v4905_v34 = vld [vmem:[#allocation7 + $0x1c8] sm:$0xff]  ;;  %v4908_v36 = vld [vmem:[#allocation7 + $0x1c0] sm:$0xff]  ;;  %v319_v37 = vld [vmem:[#allocation7 + $0x1d0] sm:$0xff] }
  0x2a   :  { %3809 = vmatmul.mubr.msk.f32.vlgmr.msra.gmra.mxu1 %vm89_vm1, %v66_v5  ;;  %561 = vmatpush1.msra.mxu0 %v4884_v20  ;;  %v4911_v38 = vld [vmem:[#allocation7 + $0x190] sm:$0xff]  ;;  %v313_v39 = vld [vmem:[#allocation7 + $0x1a0] sm:$0xff]  ;;  %v4914_v40 = vld [vmem:[#allocation7 + $0x188] sm:$0xff] }
  0x2b   :  { %626 = vmatpush1.msra.mxu1 %v368_v9  ;;  %562 = vmatprep.subr.mxu0 %v4887_v22  ;;  %v312_v41 = vld [vmem:[#allocation7 + $0x198] sm:$0xff]  ;;  %v306_v43 = vld [vmem:[#allocation7 + $0x168] sm:$0xff]  ;;  %v4920_v44 = vld [vmem:[#allocation7 + $0x150] sm:$0xff] }
  0x2c   :  { %627 = vmatprep.subr.mxu1 %v362_v11  ;;  %563 = vmatpush1.msra.mxu0 %v4890_v24  ;;  %v4917_v42 = vld [vmem:[#allocation7 + $0x158] sm:$0xff]  ;;  %v4922_v45 = vld [vmem:[#allocation7 + $0x160] sm:$0xff]  ;;  %v4927_v47 = vld [vmem:[#allocation7 + $0x130] sm:$0xff] }
  0x2d   :  { %628 = vmatpush1.msra.mxu1 %v361_v13  ;;  %564 = vmatprep.subr.mxu0 %v4893_v26  ;;  %9169 = vst [vmem:[#allocation16_spill] sm:$0xff] %v4922_v45  ;;  %v4925_v46 = vld [vmem:[#allocation7 + $0x120] sm:$0xff]  ;;  %9170 = vst [vmem:[#allocation17_spill] sm:$0xff] %v4927_v47  ;;  %v4931_v48 = vld [vmem:[#allocation7 + $0x118] sm:$0xff] }
  0x2e   :  { %629 = vmatprep.subr.mxu1 %v355_v15  ;;  %565 = vmatpush1.msra.mxu0 %v4896_v28  ;;  %v4933_v49 = vld [vmem:[#allocation7 + $0x128] sm:$0xff]  ;;  %v4939_v51 = vld [vmem:[#allocation7 + $0xf8] sm:$0xff]  ;;  %v4943_v52 = vld [vmem:[#allocation7 + $0xe0] sm:$0xff] }
  0x2f   :  { %630 = vmatpush1.msra.mxu1 %v354_v17  ;;  %566 = vmatprep.subr.mxu0 %v4899_v30  ;;  %9171 = vst [vmem:[#allocation18_spill] sm:$0xff] %v4933_v49  ;;  %v4937_v50 = vld [vmem:[#allocation7 + $0xe8] sm:$0xff]  ;;  %9172 = vst [vmem:[#allocation19_spill] sm:$0xff] %v4939_v51  ;;  %v4945_v53 = vld [vmem:[#allocation7 + $0xf0] sm:$0xff] }
  0x30   :  { %631 = vmatprep.subr.mxu1 %v348_v19  ;;  %567 = vmatpush1.msra.mxu0 %v4902_v32  ;;  %9173 = vst [vmem:[#allocation20_spill] sm:$0xff] %v4945_v53  ;;  %v4949_v54 = vld [vmem:[#allocation7 + $0xb0] sm:$0xff]  ;;  %v4951_v55 = vld [vmem:[#allocation7 + $0xc0] sm:$0xff]  ;;  %v4955_v56 = vld [vmem:[#allocation7 + $0xa8] sm:$0xff] }
  0x31   :  { %632 = vmatpush1.msra.mxu1 %v347_v21  ;;  %568 = vmatprep.subr.mxu0 %v4905_v34  ;;  %9174 = vst [vmem:[#allocation21_spill] sm:$0xff] %v4951_v55  ;;  %v4957_v57 = vld [vmem:[#allocation7 + $0xb8] sm:$0xff]  ;;  %v4963_v59 = vld [vmem:[#allocation7 + $0x88] sm:$0xff]  ;;  %v4967_v60 = vld [vmem:[#allocation7 + $0x70] sm:$0xff] }
  0x32   :  { %633 = vmatprep.subr.mxu1 %v341_v23  ;;  %569 = vmatpush1.msra.mxu0 %v4908_v36  ;;  %9175 = vst [vmem:[#allocation22_spill] sm:$0xff] %v4957_v57  ;;  %v4961_v58 = vld [vmem:[#allocation7 + $0x78] sm:$0xff]  ;;  %9176 = vst [vmem:[#allocation23_spill] sm:$0xff] %v4963_v59  ;;  %v4969_v61 = vld [vmem:[#allocation7 + $0x80] sm:$0xff] }
  0x33   :  { %634 = vmatpush1.msra.mxu1 %v340_v25  ;;  %570 = vmatprep.subr.mxu0 %v4911_v38  ;;  %9177 = vst [vmem:[#allocation24_spill] sm:$0xff] %v4969_v61  ;;  %v4973_v62 = vld [vmem:[#allocation7 + $0x40] sm:$0xff]  ;;  %v4975_v63 = vld [vmem:[#allocation7 + $0x50] sm:$0xff]  ;;  %v4979_v0 = vld [vmem:[#allocation7 + $0x38] sm:$0xff] }
  0x34   :  { %635 = vmatprep.subr.mxu1 %v334_v27  ;;  %571 = vmatpush1.msra.mxu0 %v4914_v40  ;;  %9178 = vst [vmem:[#allocation25_spill] sm:$0xff] %v4975_v63  ;;  %v4981_v1 = vld [vmem:[#allocation7 + $0x48] sm:$0xff]  ;;  %v4987_v3 = vld [vmem:[#allocation7 + $0x18] sm:$0xff]  ;;  %v4989_v4 = vld [vmem:[#allocation7] sm:$0xff] }
  0x35   :  { %636 = vmatpush1.msra.mxu1 %v333_v29  ;;  %572 = vmatprep.subr.mxu0 %v4917_v42  ;;  %9179 = vst [vmem:[#allocation26_spill] sm:$0xff] %v4981_v1  ;;  %v4985_v2 = vld [vmem:[#allocation7 + $0x8] sm:$0xff]  ;;  %9180 = vst [vmem:[#allocation27_spill] sm:$0xff] %v4987_v3  ;;  %v4993_v5 = vld [vmem:[#allocation7 + $0x10] sm:$0xff] }
  0x36   :  { %637 = vmatprep.subr.mxu1 %v327_v31  ;;  %573 = vmatpush1.msra.mxu0 %v4920_v44  ;;  %9181 = vst [vmem:[#allocation28_spill] sm:$0xff] %v4993_v5  ;;  %v4995_v7 = vld [vmem:[#allocation7 + $0x6d0] sm:$0xff]  ;;  %v4997_v9 = vld [vmem:[#allocation7 + $0x6e0] sm:$0xff]  ;;  %v5001_v11 = vld [vmem:[#allocation7 + $0x6c8] sm:$0xff] }
  0x37   :  { %638 = vmatpush1.msra.mxu1 %v326_v33  ;;  %574 = vmatprep.subr.mxu0 %v4925_v46  ;;  %9182 = vst [vmem:[#allocation29_spill] sm:$0xff] %v4997_v9  ;;  %v5003_v13 = vld [vmem:[#allocation7 + $0x6d8] sm:$0xff]  ;;  %v5009_v17 = vld [vmem:[#allocation7 + $0x6a8] sm:$0xff]  ;;  %v5011_v19 = vld [vmem:[#allocation7 + $0x690] sm:$0xff] }
  0x38   :  { %639 = vmatprep.subr.mxu1 %v320_v35  ;;  %575 = vmatpush1.msra.mxu0 %v4931_v48  ;;  %9183 = vst [vmem:[#allocation30_spill] sm:$0xff] %v5003_v13  ;;  %v5005_v15 = vld [vmem:[#allocation7 + $0x698] sm:$0xff]  ;;  %9184 = vst [vmem:[#allocation31_spill] sm:$0xff] %v5009_v17  ;;  %v5015_v21 = vld [vmem:[#allocation7 + $0x6a0] sm:$0xff] }
  0x39   :  { %640 = vmatpush1.msra.mxu1 %v319_v37  ;;  %576 = vmatprep.subr.mxu0 %v4937_v50  ;;  %9185 = vst [vmem:[#allocation32_spill] sm:$0xff] %v5015_v21  ;;  %v5017_v23 = vld [vmem:[#allocation7 + $0x660] sm:$0xff]  ;;  %v5021_v25 = vld [vmem:[#allocation7 + $0x670] sm:$0xff]  ;;  %v5023_v27 = vld [vmem:[#allocation7 + $0x658] sm:$0xff] }
  0x3a   :  { %641 = vmatprep.subr.mxu1 %v313_v39  ;;  %577 = vmatpush1.msra.mxu0 %v4943_v52  ;;  %9186 = vst [vmem:[#allocation33_spill] sm:$0xff] %v5021_v25  ;;  %v5027_v29 = vld [vmem:[#allocation7 + $0x668] sm:$0xff]  ;;  %v5033_v33 = vld [vmem:[#allocation7 + $0x638] sm:$0xff]  ;;  %v5035_v35 = vld [vmem:[#allocation7 + $0x620] sm:$0xff] }
  0x3b   :  { %642 = vmatpush1.msra.mxu1 %v312_v41  ;;  %578 = vmatprep.subr.mxu0 %v4949_v54  ;;  %9187 = vst [vmem:[#allocation34_spill] sm:$0xff] %v5027_v29  ;;  %v5029_v31 = vld [vmem:[#allocation7 + $0x628] sm:$0xff]  ;;  %9188 = vst [vmem:[#allocation35_spill] sm:$0xff] %v5033_v33  ;;  %v5039_v37 = vld [vmem:[#allocation7 + $0x630] sm:$0xff] }
  0x3c   :  { %643 = vmatprep.subr.mxu1 %v306_v43  ;;  %579 = vmatpush1.msra.mxu0 %v4955_v56  ;;  %9189 = vst [vmem:[#allocation36_spill] sm:$0xff] %v5039_v37  ;;  %v5041_v39 = vld [vmem:[#allocation7 + $0x5f0] sm:$0xff]  ;;  %v5045_v41 = vld [vmem:[#allocation7 + $0x600] sm:$0xff]  ;;  %v5047_v43 = vld [vmem:[#allocation7 + $0x5e8] sm:$0xff] }
  0x3d   :  { %644 = vmatpush1.msra.mxu1 %v4922_v45  ;;  %580 = vmatprep.subr.mxu0 %v4961_v58  ;;  %9190 = vst [vmem:[#allocation37_spill] sm:$0xff] %v5045_v41 }
  0x3e   :  { %645 = vmatprep.subr.mxu1 %v4927_v47  ;;  %581 = vmatpush1.msra.mxu0 %v4967_v60 }
  0x3f   :  { %646 = vmatpush1.msra.mxu1 %v4933_v49  ;;  %582 = vmatprep.subr.mxu0 %v4973_v62 }
  0x40   :  { %647 = vmatprep.subr.mxu1 %v4939_v51  ;;  %583 = vmatpush1.msra.mxu0 %v4979_v0  ;;  %v5129_v51 = vld [vmem:[#allocation7 + $0x478] sm:$0xff] }
  0x41   :  { %648 = vmatpush1.msra.mxu1 %v4945_v53  ;;  %584 = vmatprep.subr.mxu0 %v4985_v2  ;;  %v5123_v53 = vld [vmem:[#allocation7 + $0x4a8] sm:$0xff]  ;;  %9217 = vst [vmem:[#allocation64_spill] sm:$0xff] %v5129_v51 }
  0x42   :  { %649 = vmatprep.subr.mxu1 %v4951_v55  ;;  %585 = vmatpush1.msra.mxu0 %v4989_v4  ;;  %v5117_v55 = vld [vmem:[#allocation7 + $0x4b0] sm:$0xff]  ;;  %9215 = vst [vmem:[#allocation62_spill] sm:$0xff] %v5123_v53 }
  0x43   :  { %650 = vmatpush1.msra.mxu1 %v4957_v57  ;;  %586 = vmatprep.subr.mxu0 %v4995_v7  ;;  %v5111_v57 = vld [vmem:[#allocation7 + $0x4e0] sm:$0xff]  ;;  %9213 = vst [vmem:[#allocation60_spill] sm:$0xff] %v5117_v55 }
  0x44   :  { %651 = vmatprep.subr.mxu1 %v4963_v59  ;;  %587 = vmatpush2.msra.mxu0 %v5001_v11  ;;  %v5105_v59 = vld [vmem:[#allocation7 + $0x4e8] sm:$0xff]  ;;  %9211 = vst [vmem:[#allocation58_spill] sm:$0xff] %v5111_v57 }
  0x45   :  { %652 = vmatpush1.msra.mxu1 %v4969_v61  ;;  %588 = vmatprep.subr.mxu0 %v5005_v15  ;;  %v5099_v61 = vld [vmem:[#allocation7 + $0x518] sm:$0xff]  ;;  %9209 = vst [vmem:[#allocation56_spill] sm:$0xff] %v5105_v59 }
  0x46   :  { %653 = vmatprep.subr.mxu1 %v4975_v63  ;;  %589 = vmatpush2.msra.mxu0 %v5011_v19  ;;  %v5093_v63 = vld [vmem:[#allocation7 + $0x520] sm:$0xff]  ;;  %9207 = vst [vmem:[#allocation54_spill] sm:$0xff] %v5099_v61 }
  0x47   :  { %654 = vmatpush1.msra.mxu1 %v4981_v1  ;;  %590 = vmatprep.subr.mxu0 %v5017_v23  ;;  %v5087_v1 = vld [vmem:[#allocation7 + $0x550] sm:$0xff]  ;;  %9205 = vst [vmem:[#allocation52_spill] sm:$0xff] %v5093_v63 }
  0x48   :  { %655 = vmatprep.subr.mxu1 %v4987_v3  ;;  %591 = vmatpush2.msra.mxu0 %v5023_v27  ;;  %v5081_v3 = vld [vmem:[#allocation7 + $0x558] sm:$0xff]  ;;  %9203 = vst [vmem:[#allocation50_spill] sm:$0xff] %v5087_v1 }
  0x49   :  { %656 = vmatpush1.msra.mxu1 %v4993_v5  ;;  %592 = vmatprep.subr.mxu0 %v5029_v31  ;;  %v5075_v5 = vld [vmem:[#allocation7 + $0x588] sm:$0xff]  ;;  %9201 = vst [vmem:[#allocation48_spill] sm:$0xff] %v5081_v3 }
  0x4a   :  { %657 = vmatprep.subr.mxu1 %v4997_v9  ;;  %593 = vmatpush2.msra.mxu0 %v5035_v35  ;;  %v5069_v9 = vld [vmem:[#allocation7 + $0x590] sm:$0xff]  ;;  %9199 = vst [vmem:[#allocation46_spill] sm:$0xff] %v5075_v5 }
  0x4b   :  { %658 = vmatpush2.msra.mxu1 %v5003_v13  ;;  %594 = vmatprep.subr.mxu0 %v5041_v39  ;;  %v5063_v13 = vld [vmem:[#allocation7 + $0x5c0] sm:$0xff]  ;;  %9197 = vst [vmem:[#allocation44_spill] sm:$0xff] %v5069_v9 }
  0x4c   :  { %659 = vmatprep.subr.mxu1 %v5009_v17  ;;  %v5057_v17 = vld [vmem:[#allocation7 + $0x5c8] sm:$0xff]  ;;  %595 = vmatpush2.msra.mxu0 %v5047_v43  ;;  %9195 = vst [vmem:[#allocation42_spill] sm:$0xff] %v5063_v13 }
  0x4d   :  { %660 = vmatpush2.msra.mxu1 %v5015_v21  ;;  %v5051_v21 = vld [vmem:[#allocation7 + $0x5f8] sm:$0xff]  ;;  %9193 = vst [vmem:[#allocation40_spill] sm:$0xff] %v5057_v17 }
  0x4e   :  { %661 = vmatprep.subr.mxu1 %v5021_v25  ;;  %9191 = vst [vmem:[#allocation38_spill] sm:$0xff] %v5051_v21  ;;  %v5053_v25 = vld [vmem:[#allocation7 + $0x5b8] sm:$0xff] }
  0x4f   :  { %662 = vmatpush2.msra.mxu1 %v5027_v29  ;;  %9192 = vst [vmem:[#allocation39_spill] sm:$0xff] %v5053_v25  ;;  %v5059_v29 = vld [vmem:[#allocation7 + $0x5b0] sm:$0xff]  ;;  %596 = vmatprep.subr.mxu0 %v5053_v25 }
  0x50   :  { %663 = vmatprep.subr.mxu1 %v5033_v33  ;;  %9194 = vst [vmem:[#allocation41_spill] sm:$0xff] %v5059_v29  ;;  %v5065_v33 = vld [vmem:[#allocation7 + $0x580] sm:$0xff]  ;;  %597 = vmatpush2.msra.mxu0 %v5059_v29 }
  0x51   :  { %664 = vmatpush2.msra.mxu1 %v5039_v37  ;;  %9196 = vst [vmem:[#allocation43_spill] sm:$0xff] %v5065_v33  ;;  %v5071_v37 = vld [vmem:[#allocation7 + $0x578] sm:$0xff]  ;;  %598 = vmatprep.subr.mxu0 %v5065_v33 }
  0x52   :  { %665 = vmatprep.subr.mxu1 %v5045_v41  ;;  %9198 = vst [vmem:[#allocation45_spill] sm:$0xff] %v5071_v37  ;;  %v5077_v41 = vld [vmem:[#allocation7 + $0x548] sm:$0xff]  ;;  %599 = vmatpush2.msra.mxu0 %v5071_v37 }
  0x53   :  { %666 = vmatpush2.msra.mxu1 %v5051_v21  ;;  %9200 = vst [vmem:[#allocation47_spill] sm:$0xff] %v5077_v41  ;;  %v5083_v21 = vld [vmem:[#allocation7 + $0x540] sm:$0xff]  ;;  %600 = vmatprep.subr.mxu0 %v5077_v41 }
  0x54   :  { %667 = vmatprep.subr.mxu1 %v5057_v17  ;;  %9202 = vst [vmem:[#allocation49_spill] sm:$0xff] %v5083_v21  ;;  %v5089_v17 = vld [vmem:[#allocation7 + $0x510] sm:$0xff]  ;;  %601 = vmatpush2.msra.mxu0 %v5083_v21 }
  0x55   :  { %668 = vmatpush2.msra.mxu1 %v5063_v13  ;;  %9204 = vst [vmem:[#allocation51_spill] sm:$0xff] %v5089_v17  ;;  %v5095_v13 = vld [vmem:[#allocation7 + $0x508] sm:$0xff]  ;;  %602 = vmatprep.subr.mxu0 %v5089_v17 }
  0x56   :  { %669 = vmatprep.subr.mxu1 %v5069_v9  ;;  %9206 = vst [vmem:[#allocation53_spill] sm:$0xff] %v5095_v13  ;;  %v5101_v9 = vld [vmem:[#allocation7 + $0x4d8] sm:$0xff]  ;;  %603 = vmatpush2.msra.mxu0 %v5095_v13 }
  0x57   :  { %670 = vmatpush2.msra.mxu1 %v5075_v5  ;;  %9208 = vst [vmem:[#allocation55_spill] sm:$0xff] %v5101_v9  ;;  %v5107_v5 = vld [vmem:[#allocation7 + $0x4d0] sm:$0xff]  ;;  %604 = vmatprep.subr.mxu0 %v5101_v9 }
  0x58   :  { %671 = vmatprep.subr.mxu1 %v5081_v3  ;;  %9210 = vst [vmem:[#allocation57_spill] sm:$0xff] %v5107_v5  ;;  %v5113_v3 = vld [vmem:[#allocation7 + $0x4a0] sm:$0xff]  ;;  %605 = vmatpush2.msra.mxu0 %v5107_v5  ;;  %v5135_v9 = vld [vmem:[#allocation7 + $0x470] sm:$0xff] }
  0x59   :  { %672 = vmatpush2.msra.mxu1 %v5087_v1  ;;  %9212 = vst [vmem:[#allocation59_spill] sm:$0xff] %v5113_v3  ;;  %v5119_v1 = vld [vmem:[#allocation7 + $0x498] sm:$0xff]  ;;  %606 = vmatprep.subr.mxu0 %v5113_v3  ;;  %9219 = vst [vmem:[#allocation66_spill] sm:$0xff] %v5135_v9  ;;  %v5141_v5 = vld [vmem:[#allocation7 + $0x440] sm:$0xff] }
  0x5a   :  { %673 = vmatprep.subr.mxu1 %v5093_v63  ;;  %9214 = vst [vmem:[#allocation61_spill] sm:$0xff] %v5119_v1  ;;  %v5125_v63 = vld [vmem:[#allocation7 + $0x468] sm:$0xff]  ;;  %607 = vmatpush2.msra.mxu0 %v5119_v1  ;;  %9221 = vst [vmem:[#allocation68_spill] sm:$0xff] %v5141_v5  ;;  %v5147_v3 = vld [vmem:[#allocation7 + $0x438] sm:$0xff] }
  0x5b   :  { %674 = vmatpush2.msra.mxu1 %v5099_v61  ;;  %9216 = vst [vmem:[#allocation63_spill] sm:$0xff] %v5125_v63  ;;  %v5131_v61 = vld [vmem:[#allocation7 + $0x460] sm:$0xff]  ;;  %608 = vmatprep.subr.mxu0 %v5125_v63  ;;  %9223 = vst [vmem:[#allocation70_spill] sm:$0xff] %v5147_v3  ;;  %v5153_v1 = vld [vmem:[#allocation7 + $0x408] sm:$0xff] }
  0x5c   :  { %675 = vmatprep.subr.mxu1 %v5105_v59  ;;  %9218 = vst [vmem:[#allocation65_spill] sm:$0xff] %v5131_v61  ;;  %v5137_v59 = vld [vmem:[#allocation7 + $0x430] sm:$0xff]  ;;  %609 = vmatpush2.msra.mxu0 %v5131_v61  ;;  %9225 = vst [vmem:[#allocation72_spill] sm:$0xff] %v5153_v1  ;;  %v5159_v63 = vld [vmem:[#allocation7 + $0x400] sm:$0xff] }
  0x5d   :  { %676 = vmatpush2.msra.mxu1 %v5111_v57  ;;  %9220 = vst [vmem:[#allocation67_spill] sm:$0xff] %v5137_v59  ;;  %v5143_v57 = vld [vmem:[#allocation7 + $0x428] sm:$0xff]  ;;  %610 = vmatprep.subr.mxu0 %v5137_v59  ;;  %9227 = vst [vmem:[#allocation74_spill] sm:$0xff] %v5159_v63  ;;  %v5165_v61 = vld [vmem:[#allocation7 + $0x3d0] sm:$0xff] }
  0x5e   :  { %677 = vmatprep.subr.mxu1 %v5117_v55  ;;  %9222 = vst [vmem:[#allocation69_spill] sm:$0xff] %v5143_v57  ;;  %v5149_v55 = vld [vmem:[#allocation7 + $0x3f8] sm:$0xff]  ;;  %611 = vmatpush2.msra.mxu0 %v5143_v57  ;;  %9229 = vst [vmem:[#allocation76_spill] sm:$0xff] %v5165_v61  ;;  %v5171_v59 = vld [vmem:[#allocation7 + $0x3c8] sm:$0xff] }
  0x5f   :  { %678 = vmatpush2.msra.mxu1 %v5123_v53  ;;  %9224 = vst [vmem:[#allocation71_spill] sm:$0xff] %v5149_v55  ;;  %v5155_v53 = vld [vmem:[#allocation7 + $0x3f0] sm:$0xff]  ;;  %612 = vmatprep.subr.mxu0 %v5149_v55  ;;  %9231 = vst [vmem:[#allocation78_spill] sm:$0xff] %v5171_v59  ;;  %v5177_v57 = vld [vmem:[#allocation7 + $0x398] sm:$0xff] }
  0x60   :  { %679 = vmatprep.subr.mxu1 %v5129_v51  ;;  %9226 = vst [vmem:[#allocation73_spill] sm:$0xff] %v5155_v53  ;;  %v5161_v51 = vld [vmem:[#allocation7 + $0x3c0] sm:$0xff]  ;;  %613 = vmatpush2.msra.mxu0 %v5155_v53  ;;  %9233 = vst [vmem:[#allocation80_spill] sm:$0xff] %v5177_v57  ;;  %v5183_v55 = vld [vmem:[#allocation7 + $0x390] sm:$0xff] }
  0x61   :  { %680 = vmatpush2.msra.mxu1 %v5135_v9  ;;  %9228 = vst [vmem:[#allocation75_spill] sm:$0xff] %v5161_v51  ;;  %v5167_v9 = vld [vmem:[#allocation7 + $0x3b8] sm:$0xff]  ;;  %614 = vmatprep.subr.mxu0 %v5161_v51  ;;  %9235 = vst [vmem:[#allocation82_spill] sm:$0xff] %v5183_v55  ;;  %v5189_v53 = vld [vmem:[#allocation7 + $0x370] sm:$0xff] }
  0x62   :  { %681 = vmatprep.subr.mxu1 %v5141_v5  ;;  %9230 = vst [vmem:[#allocation77_spill] sm:$0xff] %v5167_v9  ;;  %v5173_v5 = vld [vmem:[#allocation7 + $0x388] sm:$0xff]  ;;  %615 = vmatpush2.msra.mxu0 %v5167_v9  ;;  %9236 = vst [vmem:[#allocation83_spill] sm:$0xff] %v5189_v53  ;;  %v4791_v9 = vmov 1983009808  }
  0x63   :  { %682 = vmatpush2.msra.mxu1 %v5147_v3  ;;  %9232 = vst [vmem:[#allocation79_spill] sm:$0xff] %v5173_v5  ;;  %v5179_v3 = vld [vmem:[#allocation7 + $0x380] sm:$0xff]  ;;  %616 = vmatprep.subr.mxu0 %v5173_v5  ;;  %v529_v51 = vunpack.c.l.s4 %v4791_v9 }
  0x64   :  { %683 = vmatprep.subr.mxu1 %v5153_v1  ;;  %9234 = vst [vmem:[#allocation81_spill] sm:$0xff] %v5179_v3  ;;  %v5185_v1 = vld [vmem:[#allocation3] sm:$0x3]  ;;  %617 = vmatpush2.msra.mxu0 %v5179_v3 }
  0x65   :  { %684 = vmatpush2.msra.mxu1 %v5159_v63  ;;  %v5193_v63 = vld [vmem:[#allocation7 + $0x6f8] sm:$0xff]  ;;  %618 = vmatprep.mubr.f32.mxu0 %v5185_v1 }
  0x66   :  { %685 = vmatprep.subr.mxu1 %v5165_v61  ;;  %9237 = vst [vmem:[#allocation84_spill] sm:$0xff] %v5193_v63  ;;  %689 = vmatprep.mubr.f32.mxu1 %v5185_v1 }
  0x67   :  { %686 = vmatpush2.msra.mxu1 %v5171_v59  ;;  %696 = vmatprep.subr.mxu0 %v5189_v53  ;;  %v71_v59 = vlaneseq }
  0x68   :  { %687 = vmatprep.subr.mxu1 %v5177_v57  ;;  %v69_v57 = vld [vmem:[%s8598_s2] sm:$0x7] }
  0x69   :  { %688 = vmatpush2.msra.mxu1 %v5183_v55  ;;  %v5200_v61 = vshrl.u32 %v71_v59, 7  ;;  %v530_v59 = vunpack.c.0.s8 %v529_v51 }
  0x6a   :  { %3508 = vmatprep.subr.mxu1 %v5193_v63 }
  0x6b   :  { %v8670_v5 = vsub.s32 0, %v5200_v61  ;;  %v8672_v3 = vsub.s32 1, %v5200_v61  ;;  %v8676_v49 = vsub.s32 2, %v5200_v61  ;;  %v5213_v45 = vsub.s32 %v530_v59, %v5200_v61 }
  0x6d   :  { %v74_v55 = vrot.slane %v69_v57, %v8670_v5  ;;  %v78_v53 = vrot.slane %v69_v57, %v8672_v3  ;;  %9238 = vst [vmem:[#allocation85_spill] sm:$0xff] %v5213_v45  ;;  %v82_v9 = vrot.slane %v69_v57, %v8676_v49  ;;  %v516_v5 = vld [vmem:[#allocation4] sm:$0x3f] }
  0x6e   :  { %v534_v51 = vrot.slane %v516_v5, %v5213_v45  ;;  %v5274_v45 = vld [vmem:[#allocation7 + $0x298] sm:$0xff] }
  0x6f   :  { %9249 = vst [vmem:[#allocation96_spill] sm:$0xff] %v5274_v45 }
  0xe2   :  { %v169_v63 = vpop.f32.mrf.mxu1 }
  0xe3   :  { %v170_v13 = vadd.f32 %v169_v63, %v74_v55 }
  0xe4   :  { %v171_v17 = vpop.f32.mrf.mxu1 }
  0xe5   :  { %255 = vst [vmem:[#allocation5 + $0x28] sm:$0xff] %v170_v13  ;;  %v172_v47 = vadd.f32 %v171_v17, %v78_v53 }
  0xe6   :  { %v175_v21 = vpop.f32.mrf.mxu1 }
  0xe7   :  { %256 = vst [vmem:[#allocation5 + $0x10] sm:$0xff] %v172_v47  ;;  %v176_v41 = vadd.f32 %v175_v21, %v74_v55  ;;  %v535_v47 = vcombine.high %v534_v51, %v534_v51 }
  0xe8   :  { %v177_v37 = vpop.f32.mrf.mxu1 }
  0xe9   :  { %258 = vst [vmem:[#allocation5] sm:$0xff] %v176_v41  ;;  %v178_v3 = vadd.f32 %v177_v37, %v78_v53  ;;  %v544_v37 = vrot.slane %v516_v5, 4 }
  0xea   :  { %v3810_v63 = vpop.f32.mrf.mxu1 }
  0xeb   :  { %259 = vst [vmem:[#allocation5 + $0x18] sm:$0xff] %v178_v3  ;;  %v252_v33 = vadd.f32 %v3810_v63, %v82_v9  ;;  %v5221_v3 = vld [vmem:[%s8599_s3] ss:$0 sm:$0xff] }
  0xec   :  { %v517_v13 = vld [vmem:[#allocation5 + $0x28] sm:$0x3]  ;;  %v246_v17 = vpop.f32.mrf.mxu1 }
  0xed   :  { %v520_v29 = vadd.f32 %v517_v13, %v516_v5  ;;  %260 = vst [vmem:[#allocation5 + $0x20] sm:$0xff] %v252_v33  ;;  %v247_v59 = vadd.f32 %v246_v17, %v82_v9  ;;  %v514_v17 = vld [vmem:[#allocation2] sm:$0x3] }
  0xee   :  { %v518_v55 = vld [vmem:[#allocation5 + $0x10] sm:$0x3] }
  0xef   :  { %v3470_v25 = vmul.f32 -1.442695, %v520_v29  ;;  %257 = vst [vmem:[#allocation5 + $0x8] sm:$0xff] %v247_v59  ;;  %v537_v57 = vadd.f32 %v535_v47, %v518_v55  ;;  %v546_v29 = vadd.f32 %v5221_v3, %v544_v37  ;;  %v5236_v37 = vld [vmem:[#allocation7 + $0x330] sm:$0xff] }
  0xf1   :  { %3856 = vpow2.f32 %v3470_v25  ;;  %v3471_v21 = vmul.f32 -1.442695, %v537_v57 }
  0xf3   :  { %3858 = vpow2.f32 %v3471_v21  ;;  %v5226_v21 = vld [vmem:[#allocation7 + $0x368] sm:$0xff] }
  0xf6   :  { %v519_v25 = vld [vmem:[#allocation5 + $0x8] sm:$0x3] }
  0xfe   :  { %v3857_v41 = vpop.eup %3856 }
  0xff   :  { %v524_v53 = vadd.f32 1.0, %v3857_v41  ;;  %v5228_v41 = vld [vmem:[#allocation7 + $0x378] sm:$0xff] }
 0x100   :  { %v3859_v49 = vpop.eup %3858 }
 0x101   :  { %3860 = vrcp.f32 %v524_v53  ;;  %v541_v33 = vadd.f32 1.0, %v3859_v49  ;;  %v5230_v49 = vld [vmem:[#allocation7 + $0x338] sm:$0xff]  ;;  %v5232_v53 = vld [vmem:[#allocation7 + $0x6c0] sm:$0xff] }
 0x103   :  { %3862 = vrcp.f32 %v541_v33  ;;  %v5238_v33 = vld [vmem:[#allocation7 + $0x340] sm:$0xff] }
 0x10e   :  { %v3861_v9 = vpop.eup %3860 }
 0x10f   :  { %v547_v63 = vmul.f32 %v3861_v9, %v546_v29  ;;  %v5242_v29 = vld [vmem:[#allocation7 + $0x300] sm:$0xff]  ;;  %v5244_v9 = vld [vmem:[#allocation7 + $0x688] sm:$0xff] }
 0x110   :  { %v3863_v13 = vpop.eup %3862  ;;  %9239 = vst [vmem:[#allocation86_spill] sm:$0xff] %v5244_v9 }
 0x111   :  { %v548_v51 = vadd.f32 %v547_v63, %v519_v25  ;;  %v550_v59 = vsub.f32 1.0, %v3863_v13  ;;  %v552_v55 = vmul.f32 %v3863_v13, %v514_v17  ;;  %v5248_v63 = vld [vmem:[#allocation7 + $0x2f8] sm:$0xff]  ;;  %v5250_v25 = vld [vmem:[#allocation7 + $0x308] sm:$0xff]  ;;  %v5256_v13 = vld [vmem:[#allocation7 + $0x650] sm:$0xff] }
 0x112   :  { %9240 = vst [vmem:[#allocation87_spill] sm:$0xff] %v5248_v63  ;;  %9241 = vst [vmem:[#allocation88_spill] sm:$0xff] %v5250_v25  ;;  %v5260_v17 = vld [vmem:[#allocation7 + $0x2c0] sm:$0xff] }
 0x113   :  { %3864 = vtanh.f32 %v548_v51  ;;  %v5254_v51 = vld [vmem:[#allocation7 + $0x2c8] sm:$0xff]  ;;  %9243 = vst [vmem:[#allocation90_spill] sm:$0xff] %v5256_v13  ;;  %9244 = vst [vmem:[#allocation91_spill] sm:$0xff] %v5260_v17 }
 0x114   :  { %9242 = vst [vmem:[#allocation89_spill] sm:$0xff] %v5254_v51 }
 0x120   :  { %v3865_v47 = vpop.eup %3864 }
 0x121   :  { %v551_v5 = vmul.f32 %v3865_v47, %v550_v59  ;;  %v5262_v59 = vld [vmem:[#allocation7 + $0x2d0] sm:$0xff] }
 0x122   :  { %9245 = vst [vmem:[#allocation92_spill] sm:$0xff] %v5262_v59  ;;  %v5266_v47 = vld [vmem:[#allocation7 + $0x290] sm:$0xff] }
 0x123   :  { %v5224_v57 = vadd.f32 %v552_v55, %v551_v5  ;;  %9246 = vst [vmem:[#allocation93_spill] sm:$0xff] %v5266_v47  ;;  %v5268_v5 = vld [vmem:[#allocation7 + $0x618] sm:$0xff]  ;;  %v5272_v55 = vld [vmem:[#allocation7 + $0x288] sm:$0xff] }
 0x124   :  { %9247 = vst [vmem:[#allocation94_spill] sm:$0xff] %v5268_v5  ;;  %9248 = vst [vmem:[#allocation95_spill] sm:$0xff] %v5272_v55 }
 0x125   :  { %619 = vmatmul.mubr.f32.vlgmr.msra.gmra.mxu0 %v5224_v57  ;;  %690 = vmatmul.mubr.f32.vlgmr.msra.gmra.mxu1 %v5224_v57 }
 0x126   :  { %697 = vmatpush1.msra.mxu0 %v5226_v21  ;;  %3509 = vmatpush3.msra.mxu1 %v5228_v41 }
 0x127   :  { %698 = vmatprep.subr.mxu0 %v5230_v49  ;;  %3510 = vmatprep.subr.mxu1 %v5232_v53 }
 0x128   :  { %699 = vmatpush1.msra.mxu0 %v5236_v37  ;;  %3511 = vmatpush3.msra.mxu1 %v5238_v33 }
 0x129   :  { %700 = vmatprep.subr.mxu0 %v5242_v29  ;;  %3512 = vmatprep.subr.mxu1 %v5244_v9  ;;  %v5278_v9 = vld [vmem:[#allocation7 + $0x258] sm:$0xff] }
 0x12a   :  { %701 = vmatpush1.msra.mxu0 %v5248_v63  ;;  %3513 = vmatpush3.msra.mxu1 %v5250_v25  ;;  %9250 = vst [vmem:[#allocation97_spill] sm:$0xff] %v5278_v9  ;;  %v5280_v63 = vld [vmem:[#allocation7 + $0x5e0] sm:$0xff]  ;;  %v5284_v25 = vld [vmem:[#allocation7 + $0x250] sm:$0xff] }
 0x12b   :  { %702 = vmatprep.subr.mxu0 %v5254_v51  ;;  %3514 = vmatprep.subr.mxu1 %v5256_v13  ;;  %9251 = vst [vmem:[#allocation98_spill] sm:$0xff] %v5280_v63  ;;  %9252 = vst [vmem:[#allocation99_spill] sm:$0xff] %v5284_v25  ;;  %v5286_v51 = vld [vmem:[#allocation7 + $0x260] sm:$0xff] }
 0x12c   :  { %703 = vmatpush1.msra.mxu0 %v5260_v17  ;;  %3515 = vmatpush3.msra.mxu1 %v5262_v59  ;;  %9253 = vst [vmem:[#allocation100_spill] sm:$0xff] %v5286_v51  ;;  %v5290_v13 = vld [vmem:[#allocation7 + $0x220] sm:$0xff]  ;;  %v5292_v17 = vld [vmem:[#allocation7 + $0x5a8] sm:$0xff]  ;;  %v5296_v59 = vld [vmem:[#allocation7 + $0x218] sm:$0xff] }
 0x12d   :  { %704 = vmatprep.subr.mxu0 %v5266_v47  ;;  %3516 = vmatprep.subr.mxu1 %v5268_v5  ;;  %9254 = vst [vmem:[#allocation101_spill] sm:$0xff] %v5290_v13  ;;  %9255 = vst [vmem:[#allocation102_spill] sm:$0xff] %v5292_v17  ;;  %v5298_v47 = vld [vmem:[#allocation7 + $0x228] sm:$0xff] }
 0x12e   :  { %705 = vmatpush1.msra.mxu0 %v5272_v55  ;;  %3517 = vmatpush3.msra.mxu1 %v5274_v45  ;;  %9256 = vst [vmem:[#allocation103_spill] sm:$0xff] %v5296_v59  ;;  %9257 = vst [vmem:[#allocation104_spill] sm:$0xff] %v5298_v47  ;;  %v5302_v5 = vld [vmem:[#allocation7 + $0x1e8] sm:$0xff]  ;;  %v5304_v55 = vld [vmem:[#allocation7 + $0x570] sm:$0xff] }
 0x12f   :  { %706 = vmatprep.subr.mxu0 %v5278_v9  ;;  %3518 = vmatprep.subr.mxu1 %v5280_v63  ;;  %9258 = vst [vmem:[#allocation105_spill] sm:$0xff] %v5302_v5  ;;  %9259 = vst [vmem:[#allocation106_spill] sm:$0xff] %v5304_v55  ;;  %v5308_v45 = vld [vmem:[#allocation7 + $0x1e0] sm:$0xff]  ;;  %v5310_v9 = vld [vmem:[#allocation7 + $0x1f0] sm:$0xff] }
 0x130   :  { %707 = vmatpush1.msra.mxu0 %v5284_v25  ;;  %3519 = vmatpush3.msra.mxu1 %v5286_v51  ;;  %9260 = vst [vmem:[#allocation107_spill] sm:$0xff] %v5308_v45  ;;  %9261 = vst [vmem:[#allocation108_spill] sm:$0xff] %v5310_v9  ;;  %v5314_v63 = vld [vmem:[#allocation7 + $0x1b0] sm:$0xff]  ;;  %v5316_v25 = vld [vmem:[#allocation7 + $0x538] sm:$0xff] }
 0x131   :  { %708 = vmatprep.subr.mxu0 %v5290_v13  ;;  %3520 = vmatprep.subr.mxu1 %v5292_v17  ;;  %9262 = vst [vmem:[#allocation109_spill] sm:$0xff] %v5314_v63  ;;  %9263 = vst [vmem:[#allocation110_spill] sm:$0xff] %v5316_v25  ;;  %v5320_v51 = vld [vmem:[#allocation7 + $0x1a8] sm:$0xff]  ;;  %v5322_v13 = vld [vmem:[#allocation7 + $0x1b8] sm:$0xff] }
 0x132   :  { %709 = vmatpush1.msra.mxu0 %v5296_v59  ;;  %3521 = vmatpush3.msra.mxu1 %v5298_v47  ;;  %9264 = vst [vmem:[#allocation111_spill] sm:$0xff] %v5320_v51  ;;  %9265 = vst [vmem:[#allocation112_spill] sm:$0xff] %v5322_v13  ;;  %v5326_v17 = vld [vmem:[#allocation7 + $0x178] sm:$0xff]  ;;  %v5328_v59 = vld [vmem:[#allocation7 + $0x500] sm:$0xff] }
 0x133   :  { %710 = vmatprep.subr.mxu0 %v5302_v5  ;;  %3522 = vmatprep.subr.mxu1 %v5304_v55  ;;  %9266 = vst [vmem:[#allocation113_spill] sm:$0xff] %v5326_v17  ;;  %9267 = vst [vmem:[#allocation114_spill] sm:$0xff] %v5328_v59  ;;  %v5332_v47 = vld [vmem:[#allocation7 + $0x170] sm:$0xff]  ;;  %v5334_v5 = vld [vmem:[#allocation7 + $0x180] sm:$0xff] }
 0x134   :  { %711 = vmatpush1.msra.mxu0 %v5308_v45  ;;  %3523 = vmatpush3.msra.mxu1 %v5310_v9  ;;  %9268 = vst [vmem:[#allocation115_spill] sm:$0xff] %v5332_v47  ;;  %9269 = vst [vmem:[#allocation116_spill] sm:$0xff] %v5334_v5  ;;  %v5338_v55 = vld [vmem:[#allocation7 + $0x140] sm:$0xff]  ;;  %v5340_v45 = vld [vmem:[#allocation7 + $0x4c8] sm:$0xff] }
 0x135   :  { %712 = vmatprep.subr.mxu0 %v5314_v63  ;;  %3524 = vmatprep.subr.mxu1 %v5316_v25  ;;  %9270 = vst [vmem:[#allocation117_spill] sm:$0xff] %v5338_v55  ;;  %9271 = vst [vmem:[#allocation118_spill] sm:$0xff] %v5340_v45  ;;  %v5344_v9 = vld [vmem:[#allocation7 + $0x138] sm:$0xff]  ;;  %v5346_v63 = vld [vmem:[#allocation7 + $0x148] sm:$0xff] }
 0x136   :  { %713 = vmatpush1.msra.mxu0 %v5320_v51  ;;  %3525 = vmatpush3.msra.mxu1 %v5322_v13  ;;  %9272 = vst [vmem:[#allocation119_spill] sm:$0xff] %v5344_v9  ;;  %9273 = vst [vmem:[#allocation120_spill] sm:$0xff] %v5346_v63  ;;  %v5350_v25 = vld [vmem:[#allocation7 + $0x108] sm:$0xff]  ;;  %v5352_v51 = vld [vmem:[#allocation7 + $0x490] sm:$0xff] }
 0x137   :  { %714 = vmatprep.subr.mxu0 %v5326_v17  ;;  %3526 = vmatprep.subr.mxu1 %v5328_v59  ;;  %9274 = vst [vmem:[#allocation121_spill] sm:$0xff] %v5350_v25  ;;  %9275 = vst [vmem:[#allocation122_spill] sm:$0xff] %v5352_v51  ;;  %v5356_v13 = vld [vmem:[#allocation7 + $0x100] sm:$0xff]  ;;  %v5358_v17 = vld [vmem:[#allocation7 + $0x110] sm:$0xff] }
 0x138   :  { %715 = vmatpush1.msra.mxu0 %v5332_v47  ;;  %3527 = vmatpush3.msra.mxu1 %v5334_v5  ;;  %9276 = vst [vmem:[#allocation123_spill] sm:$0xff] %v5356_v13  ;;  %9277 = vst [vmem:[#allocation124_spill] sm:$0xff] %v5358_v17  ;;  %v5362_v59 = vld [vmem:[#allocation7 + $0xd0] sm:$0xff]  ;;  %v5364_v47 = vld [vmem:[#allocation7 + $0x458] sm:$0xff] }
 0x139   :  { %716 = vmatprep.subr.mxu0 %v5338_v55  ;;  %3528 = vmatprep.subr.mxu1 %v5340_v45  ;;  %9278 = vst [vmem:[#allocation125_spill] sm:$0xff] %v5362_v59  ;;  %9279 = vst [vmem:[#allocation126_spill] sm:$0xff] %v5364_v47  ;;  %v5368_v5 = vld [vmem:[#allocation7 + $0xc8] sm:$0xff]  ;;  %v5370_v55 = vld [vmem:[#allocation7 + $0xd8] sm:$0xff] }
 0x13a   :  { %717 = vmatpush1.msra.mxu0 %v5344_v9  ;;  %3529 = vmatpush3.msra.mxu1 %v5346_v63  ;;  %9280 = vst [vmem:[#allocation127_spill] sm:$0xff] %v5368_v5  ;;  %9281 = vst [vmem:[#allocation128_spill] sm:$0xff] %v5370_v55  ;;  %v5374_v45 = vld [vmem:[#allocation7 + $0x98] sm:$0xff]  ;;  %v5376_v9 = vld [vmem:[#allocation7 + $0x420] sm:$0xff] }
 0x13b   :  { %718 = vmatprep.subr.mxu0 %v5350_v25  ;;  %3530 = vmatprep.subr.mxu1 %v5352_v51  ;;  %9282 = vst [vmem:[#allocation129_spill] sm:$0xff] %v5374_v45  ;;  %9283 = vst [vmem:[#allocation130_spill] sm:$0xff] %v5376_v9  ;;  %v5380_v63 = vld [vmem:[#allocation7 + $0x90] sm:$0xff]  ;;  %v5382_v25 = vld [vmem:[#allocation7 + $0xa0] sm:$0xff] }
 0x13c   :  { %719 = vmatpush1.msra.mxu0 %v5356_v13  ;;  %3531 = vmatpush3.msra.mxu1 %v5358_v17  ;;  %9284 = vst [vmem:[#allocation131_spill] sm:$0xff] %v5382_v25  ;;  %v5386_v51 = vld [vmem:[#allocation7 + $0x60] sm:$0xff]  ;;  %v5388_v13 = vld [vmem:[#allocation7 + $0x3e8] sm:$0xff]  ;;  %v5392_v17 = vld [vmem:[#allocation7 + $0x58] sm:$0xff] }
 0x13d   :  { %720 = vmatprep.subr.mxu0 %v5362_v59  ;;  %3532 = vmatprep.subr.mxu1 %v5364_v47  ;;  %9285 = vst [vmem:[#allocation132_spill] sm:$0xff] %v5388_v13  ;;  %9286 = vst [vmem:[#allocation133_spill] sm:$0xff] %v5392_v17  ;;  %v5394_v59 = vld [vmem:[#allocation7 + $0x68] sm:$0xff] }
 0x13e   :  { %721 = vmatpush1.msra.mxu0 %v5368_v5  ;;  %3533 = vmatpush3.msra.mxu1 %v5370_v55  ;;  %v5398_v47 = vld [vmem:[#allocation7 + $0x28] sm:$0xff]  ;;  %v5400_v5 = vld [vmem:[#allocation7 + $0x3b0] sm:$0xff]  ;;  %v5404_v55 = vld [vmem:[#allocation7 + $0x20] sm:$0xff] }
 0x13f   :  { %722 = vmatprep.subr.mxu0 %v5374_v45  ;;  %3534 = vmatprep.subr.mxu1 %v5376_v9  ;;  %9287 = vst [vmem:[#allocation134_spill] sm:$0xff] %v5398_v47  ;;  %9288 = vst [vmem:[#allocation135_spill] sm:$0xff] %v5400_v5  ;;  %v5406_v45 = vld [vmem:[#allocation7 + $0x30] sm:$0xff] }
 0x140   :  { %723 = vmatpush1.msra.mxu0 %v5380_v63  ;;  %3535 = vmatpush3.msra.mxu1 %v5382_v25  ;;  %9289 = vst [vmem:[#allocation136_spill] sm:$0xff] %v5406_v45  ;;  %v5410_v9 = vld [vmem:[#allocation7 + $0x6f0] sm:$0xff]  ;;  %v5414_v25 = vld [vmem:[#allocation7 + $0x6e8] sm:$0xff] }
 0x141   :  { %724 = vmatprep.subr.mxu0 %v5386_v51  ;;  %3536 = vmatprep.subr.mxu1 %v5388_v13  ;;  %9290 = vst [vmem:[#allocation137_spill] sm:$0xff] %v5410_v9  ;;  %9291 = vst [vmem:[#allocation138_spill] sm:$0xff] %v5414_v25  ;;  %v5418_v13 = vld [vmem:[#allocation7 + $0x6b8] sm:$0xff] }
 0x142   :  { %725 = vmatpush1.msra.mxu0 %v5392_v17  ;;  %3537 = vmatpush3.msra.mxu1 %v5394_v59  ;;  %9292 = vst [vmem:[#allocation139_spill] sm:$0xff] %v5418_v13  ;;  %v5422_v17 = vld [vmem:[#allocation7 + $0x6b0] sm:$0xff] }
 0x143   :  { %726 = vmatprep.subr.mxu0 %v5398_v47  ;;  %3538 = vmatprep.subr.mxu1 %v5400_v5  ;;  %v5426_v47 = vld [vmem:[#allocation7 + $0x680] sm:$0xff]  ;;  %v5429_v5 = vld [vmem:[#allocation7 + $0x678] sm:$0xff] }
 0x144   :  { %727 = vmatpush1.msra.mxu0 %v5404_v55  ;;  %3539 = vmatpush3.msra.mxu1 %v5406_v45  ;;  %v5433_v45 = vld [vmem:[#allocation7 + $0x648] sm:$0xff] }
 0x145   :  { %831 = vmatprep.mubr.f32.mxu1 %v5185_v1  ;;  %728 = vmatprep.subr.mxu0 %v5410_v9  ;;  %v5437_v9 = vld [vmem:[#allocation7 + $0x640] sm:$0xff] }
 0x146   :  { %832 = vmatmul.mubr.f32.vlgmr.msra.gmra.mxu1 %v5224_v57  ;;  %729 = vmatpush2.msra.mxu0 %v5414_v25  ;;  %v5441_v25 = vld [vmem:[#allocation7 + $0x610] sm:$0xff] }
 0x147   :  { %730 = vmatprep.subr.mxu0 %v5418_v13  ;;  %760 = vmatprep.mubr.f32.mxu0 %v5185_v1  ;;  %v5445_v13 = vld [vmem:[#allocation7 + $0x608] sm:$0xff] }
 0x148   :  { %731 = vmatpush2.msra.mxu0 %v5422_v17  ;;  %904 = vmatprep.subr.mxu1 %v4863_v6  ;;  %v5449_v6 = vld [vmem:[#allocation7 + $0x5d8] sm:$0xff] }
 0x149   :  { %732 = vmatprep.subr.mxu0 %v5426_v47  ;;  %905 = vmatpush1.msra.mxu1 %v4866_v8  ;;  %v5453_v8 = vld [vmem:[#allocation7 + $0x5d0] sm:$0xff] }
 0x14a   :  { %733 = vmatpush2.msra.mxu0 %v5429_v5  ;;  %906 = vmatprep.subr.mxu1 %v4869_v10  ;;  %v5457_v10 = vld [vmem:[#allocation7 + $0x5a0] sm:$0xff] }
 0x14b   :  { %734 = vmatprep.subr.mxu0 %v5433_v45  ;;  %907 = vmatpush1.msra.mxu1 %v4872_v12  ;;  %v5461_v12 = vld [vmem:[#allocation7 + $0x598] sm:$0xff] }
 0x14c   :  { %735 = vmatpush2.msra.mxu0 %v5437_v9  ;;  %908 = vmatprep.subr.mxu1 %v4875_v14  ;;  %v5465_v14 = vld [vmem:[#allocation7 + $0x568] sm:$0xff] }
 0x14d   :  { %736 = vmatprep.subr.mxu0 %v5441_v25  ;;  %909 = vmatpush1.msra.mxu1 %v4878_v16  ;;  %v5469_v16 = vld [vmem:[#allocation7 + $0x560] sm:$0xff] }
 0x14e   :  { %737 = vmatpush2.msra.mxu0 %v5445_v13  ;;  %910 = vmatprep.subr.mxu1 %v4881_v18  ;;  %v5473_v18 = vld [vmem:[#allocation7 + $0x530] sm:$0xff] }
 0x14f   :  { %738 = vmatprep.subr.mxu0 %v5449_v6  ;;  %911 = vmatpush1.msra.mxu1 %v4884_v20  ;;  %v5477_v20 = vld [vmem:[#allocation7 + $0x528] sm:$0xff] }
 0x150   :  { %739 = vmatpush2.msra.mxu0 %v5453_v8  ;;  %912 = vmatprep.subr.mxu1 %v4887_v22  ;;  %v5481_v22 = vld [vmem:[#allocation7 + $0x4f8] sm:$0xff] }
 0x151   :  { %740 = vmatprep.subr.mxu0 %v5457_v10  ;;  %913 = vmatpush1.msra.mxu1 %v4890_v24  ;;  %v5485_v24 = vld [vmem:[#allocation7 + $0x4f0] sm:$0xff] }
 0x152   :  { %741 = vmatpush2.msra.mxu0 %v5461_v12  ;;  %914 = vmatprep.subr.mxu1 %v4893_v26  ;;  %v5489_v26 = vld [vmem:[#allocation7 + $0x4c0] sm:$0xff] }
 0x153   :  { %742 = vmatprep.subr.mxu0 %v5465_v14  ;;  %915 = vmatpush1.msra.mxu1 %v4896_v28  ;;  %v5493_v28 = vld [vmem:[#allocation7 + $0x4b8] sm:$0xff] }
 0x154   :  { %743 = vmatpush2.msra.mxu0 %v5469_v16  ;;  %916 = vmatprep.subr.mxu1 %v4899_v30  ;;  %v5497_v30 = vld [vmem:[#allocation7 + $0x488] sm:$0xff] }
 0x155   :  { %744 = vmatprep.subr.mxu0 %v5473_v18  ;;  %917 = vmatpush1.msra.mxu1 %v4902_v32  ;;  %v5501_v32 = vld [vmem:[#allocation7 + $0x480] sm:$0xff] }
 0x156   :  { %745 = vmatpush2.msra.mxu0 %v5477_v20  ;;  %918 = vmatprep.subr.mxu1 %v4905_v34  ;;  %v5505_v34 = vld [vmem:[#allocation7 + $0x450] sm:$0xff] }
 0x157   :  { %746 = vmatprep.subr.mxu0 %v5481_v22  ;;  %919 = vmatpush1.msra.mxu1 %v4908_v36  ;;  %v5509_v36 = vld [vmem:[#allocation7 + $0x448] sm:$0xff] }
 0x158   :  { %747 = vmatpush2.msra.mxu0 %v5485_v24  ;;  %920 = vmatprep.subr.mxu1 %v4911_v38  ;;  %v5513_v38 = vld [vmem:[#allocation7 + $0x418] sm:$0xff] }
 0x159   :  { %748 = vmatprep.subr.mxu0 %v5489_v26  ;;  %921 = vmatpush1.msra.mxu1 %v4914_v40  ;;  %v5517_v40 = vld [vmem:[#allocation7 + $0x410] sm:$0xff] }
 0x15a   :  { %749 = vmatpush2.msra.mxu0 %v5493_v28  ;;  %922 = vmatprep.subr.mxu1 %v4917_v42  ;;  %v5521_v42 = vld [vmem:[#allocation7 + $0x3e0] sm:$0xff] }
 0x15b   :  { %750 = vmatprep.subr.mxu0 %v5497_v30  ;;  %923 = vmatpush1.msra.mxu1 %v4920_v44  ;;  %v5525_v44 = vld [vmem:[#allocation7 + $0x3d8] sm:$0xff] }
 0x15c   :  { %751 = vmatpush2.msra.mxu0 %v5501_v32  ;;  %924 = vmatprep.subr.mxu1 %v4925_v46  ;;  %v5529_v46 = vld [vmem:[#allocation7 + $0x3a8] sm:$0xff] }
 0x15d   :  { %752 = vmatprep.subr.mxu0 %v5505_v34  ;;  %925 = vmatpush1.msra.mxu1 %v4931_v48  ;;  %v5533_v48 = vld [vmem:[#allocation7 + $0x3a0] sm:$0xff] }
 0x15e   :  { %753 = vmatpush2.msra.mxu0 %v5509_v36  ;;  %926 = vmatprep.subr.mxu1 %v4937_v50  ;;  %v5543_v50 = vld [vmem:[#allocation7 + $0x360] sm:$0xff] }
 0x15f   :  { %754 = vmatprep.subr.mxu0 %v5513_v38  ;;  %927 = vmatpush1.msra.mxu1 %v4943_v52  ;;  %v5546_v52 = vld [vmem:[#allocation7 + $0x358] sm:$0xff] }
 0x160   :  { %755 = vmatpush2.msra.mxu0 %v5517_v40  ;;  %928 = vmatprep.subr.mxu1 %v4949_v54  ;;  %9293 = vst [vmem:[#allocation140_spill] sm:$0xff] %v5546_v52  ;;  %v5550_v54 = vld [vmem:[#allocation7 + $0x328] sm:$0xff] }
 0x161   :  { %756 = vmatprep.subr.mxu0 %v5521_v42  ;;  %929 = vmatpush1.msra.mxu1 %v4955_v56  ;;  %9294 = vst [vmem:[#allocation141_spill] sm:$0xff] %v5550_v54  ;;  %v5554_v56 = vld [vmem:[#allocation7 + $0x320] sm:$0xff] }
 0x162   :  { %757 = vmatpush2.msra.mxu0 %v5525_v44  ;;  %930 = vmatprep.subr.mxu1 %v4961_v58  ;;  %9295 = vst [vmem:[#allocation142_spill] sm:$0xff] %v5554_v56  ;;  %v5558_v58 = vld [vmem:[#allocation7 + $0x2f0] sm:$0xff] }
 0x163   :  { %758 = vmatprep.subr.mxu0 %v5529_v46  ;;  %931 = vmatpush1.msra.mxu1 %v4967_v60  ;;  %9296 = vst [vmem:[#allocation143_spill] sm:$0xff] %v5558_v58  ;;  %v5562_v60 = vld [vmem:[#allocation7 + $0x2e8] sm:$0xff] }
 0x164   :  { %759 = vmatpush2.msra.mxu0 %v5533_v48  ;;  %932 = vmatprep.subr.mxu1 %v4973_v62  ;;  %9297 = vst [vmem:[#allocation144_spill] sm:$0xff] %v5562_v60  ;;  %v5566_v62 = vld [vmem:[#allocation7 + $0x2b8] sm:$0xff] }
 0x165   :  { %761 = vmatmul.mubr.f32.vlgmr.msra.gmra.mxu0 %v5224_v57  ;;  %975 = vmatprep.subr.mxu0 %v5543_v50  ;;  %9298 = vst [vmem:[#allocation145_spill] sm:$0xff] %v5566_v62 }
 0x166   :  { %976 = vmatpush1.msra.mxu0 %v5546_v52  ;;  %933 = vmatpush1.msra.mxu1 %v4979_v0  ;;  %v5570_v0 = vld [vmem:[#allocation7 + $0x2b0] sm:$0xff] }
 0x167   :  { %977 = vmatprep.subr.mxu0 %v5550_v54  ;;  %934 = vmatprep.subr.mxu1 %v4985_v2  ;;  %9299 = vst [vmem:[#allocation146_spill] sm:$0xff] %v5570_v0  ;;  %v5574_v2 = vld [vmem:[#allocation7 + $0x280] sm:$0xff] }
 0x168   :  { %978 = vmatpush1.msra.mxu0 %v5554_v56  ;;  %935 = vmatpush1.msra.mxu1 %v4989_v4  ;;  %9300 = vst [vmem:[#allocation147_spill] sm:$0xff] %v5574_v2  ;;  %v5578_v4 = vld [vmem:[#allocation7 + $0x278] sm:$0xff] }
 0x169   :  { %979 = vmatprep.subr.mxu0 %v5558_v58  ;;  %936 = vmatprep.subr.mxu1 %v4995_v7  ;;  %9301 = vst [vmem:[#allocation148_spill] sm:$0xff] %v5578_v4  ;;  %v5582_v7 = vld [vmem:[#allocation7 + $0x248] sm:$0xff] }
 0x16a   :  { %980 = vmatpush1.msra.mxu0 %v5562_v60  ;;  %937 = vmatpush2.msra.mxu1 %v5001_v11  ;;  %9302 = vst [vmem:[#allocation149_spill] sm:$0xff] %v5582_v7  ;;  %v5586_v11 = vld [vmem:[#allocation7 + $0x240] sm:$0xff] }
 0x16b   :  { %981 = vmatprep.subr.mxu0 %v5566_v62  ;;  %938 = vmatprep.subr.mxu1 %v5005_v15  ;;  %9303 = vst [vmem:[#allocation150_spill] sm:$0xff] %v5586_v11  ;;  %v5590_v15 = vld [vmem:[#allocation7 + $0x210] sm:$0xff] }
 0x16c   :  { %982 = vmatpush1.msra.mxu0 %v5570_v0  ;;  %939 = vmatpush2.msra.mxu1 %v5011_v19  ;;  %9304 = vst [vmem:[#allocation151_spill] sm:$0xff] %v5590_v15  ;;  %v5594_v19 = vld [vmem:[#allocation7 + $0x208] sm:$0xff] }
 0x16d   :  { %983 = vmatprep.subr.mxu0 %v5574_v2  ;;  %940 = vmatprep.subr.mxu1 %v5017_v23  ;;  %9305 = vst [vmem:[#allocation152_spill] sm:$0xff] %v5594_v19  ;;  %v5598_v23 = vld [vmem:[#allocation7 + $0x1d8] sm:$0xff] }
 0x16e   :  { %984 = vmatpush1.msra.mxu0 %v5578_v4  ;;  %941 = vmatpush2.msra.mxu1 %v5023_v27  ;;  %9306 = vst [vmem:[#allocation153_spill] sm:$0xff] %v5598_v23  ;;  %v9307_v27 = vld [vmem:[#allocation39_spill] sm:$0xff]  ;;  %v9324_v4 = vld [vmem:[#allocation20_spill] sm:$0xff] }
 0x16f   :  { %985 = vmatprep.subr.mxu0 %v5582_v7  ;;  %942 = vmatprep.subr.mxu1 %v5029_v31  ;;  %v5602_v31 = vld [vmem:[#allocation7 + $0x1d0] sm:$0xff]  ;;  %v9321_v7 = vld [vmem:[#allocation53_spill] sm:$0xff] }
 0x170   :  { %986 = vmatpush1.msra.mxu0 %v5586_v11  ;;  %943 = vmatpush2.msra.mxu1 %v5035_v35  ;;  %9308 = vst [vmem:[#allocation39_spill] sm:$0xff] %v5602_v31  ;;  %v9309_v35 = vld [vmem:[#allocation41_spill] sm:$0xff] }
 0x171   :  { %987 = vmatprep.subr.mxu0 %v5590_v15  ;;  %944 = vmatprep.subr.mxu1 %v5041_v39  ;;  %v5606_v15 = vld [vmem:[#allocation7 + $0x1a0] sm:$0xff]  ;;  %v9311_v39 = vld [vmem:[#allocation43_spill] sm:$0xff]  ;;  %v9318_v11 = vld [vmem:[#allocation17_spill] sm:$0xff] }
 0x172   :  { %988 = vmatpush1.msra.mxu0 %v5594_v19  ;;  %945 = vmatpush2.msra.mxu1 %v5047_v43  ;;  %9310 = vst [vmem:[#allocation41_spill] sm:$0xff] %v5606_v15  ;;  %v5610_v19 = vld [vmem:[#allocation7 + $0x198] sm:$0xff] }
 0x173   :  { %989 = vmatprep.subr.mxu0 %v5598_v23  ;;  %946 = vmatprep.subr.mxu1 %v9307_v27  ;;  %9312 = vst [vmem:[#allocation43_spill] sm:$0xff] %v5610_v19  ;;  %v9313_v43 = vld [vmem:[#allocation45_spill] sm:$0xff]  ;;  %v5614_v23 = vld [vmem:[#allocation7 + $0x168] sm:$0xff] }
 0x174   :  { %990 = vmatpush1.msra.mxu0 %v5602_v31  ;;  %947 = vmatpush2.msra.mxu1 %v9309_v35  ;;  %9314 = vst [vmem:[#allocation45_spill] sm:$0xff] %v5614_v23  ;;  %v9315_v27 = vld [vmem:[#allocation47_spill] sm:$0xff]  ;;  %v9316_v31 = vld [vmem:[#allocation16_spill] sm:$0xff]  ;;  %v9317_v35 = vld [vmem:[#allocation49_spill] sm:$0xff] }
 0x175   :  { %991 = vmatprep.subr.mxu0 %v5606_v15  ;;  %948 = vmatprep.subr.mxu1 %v9311_v39  ;;  %v9319_v15 = vld [vmem:[#allocation51_spill] sm:$0xff]  ;;  %v9320_v39 = vld [vmem:[#allocation18_spill] sm:$0xff] }
 0x176   :  { %992 = vmatpush1.msra.mxu0 %v5610_v19  ;;  %949 = vmatpush2.msra.mxu1 %v9313_v43  ;;  %v9322_v19 = vld [vmem:[#allocation19_spill] sm:$0xff] }
 0x177   :  { %993 = vmatprep.subr.mxu0 %v5614_v23  ;;  %950 = vmatprep.subr.mxu1 %v9315_v27  ;;  %v9323_v43 = vld [vmem:[#allocation55_spill] sm:$0xff]  ;;  %v9325_v23 = vld [vmem:[#allocation57_spill] sm:$0xff] }
 0x178   :  { %994 = vmatpush1.msra.mxu0 %v9316_v31  ;;  %951 = vmatpush2.msra.mxu1 %v9317_v35  ;;  %v9326_v27 = vld [vmem:[#allocation21_spill] sm:$0xff]  ;;  %v9327_v31 = vld [vmem:[#allocation59_spill] sm:$0xff]  ;;  %v9328_v35 = vld [vmem:[#allocation22_spill] sm:$0xff] }
 0x179   :  { %995 = vmatprep.subr.mxu0 %v9318_v11  ;;  %952 = vmatprep.subr.mxu1 %v9319_v15  ;;  %v9329_v11 = vld [vmem:[#allocation61_spill] sm:$0xff]  ;;  %v9330_v15 = vld [vmem:[#allocation23_spill] sm:$0xff] }
 0x17a   :  { %996 = vmatpush1.msra.mxu0 %v9320_v39  ;;  %953 = vmatpush2.msra.mxu1 %v9321_v7  ;;  %v9331_v39 = vld [vmem:[#allocation63_spill] sm:$0xff]  ;;  %v9332_v7 = vld [vmem:[#allocation24_spill] sm:$0xff] }
 0x17b   :  { %997 = vmatprep.subr.mxu0 %v9322_v19  ;;  %954 = vmatprep.subr.mxu1 %v9323_v43  ;;  %v9333_v19 = vld [vmem:[#allocation65_spill] sm:$0xff] }
 0x17c   :  { %998 = vmatpush1.msra.mxu0 %v9324_v4  ;;  %955 = vmatpush2.msra.mxu1 %v9325_v23  ;;  %v9334_v43 = vld [vmem:[#allocation25_spill] sm:$0xff]  ;;  %v9335_v4 = vld [vmem:[#allocation67_spill] sm:$0xff]  ;;  %v9336_v23 = vld [vmem:[#allocation26_spill] sm:$0xff] }
 0x17d   :  { %999 = vmatprep.subr.mxu0 %v9326_v27  ;;  %956 = vmatprep.subr.mxu1 %v9327_v31  ;;  %v9337_v27 = vld [vmem:[#allocation69_spill] sm:$0xff]  ;;  %v9338_v31 = vld [vmem:[#allocation27_spill] sm:$0xff] }
 0x17e   :  { %1000 = vmatpush1.msra.mxu0 %v9328_v35  ;;  %957 = vmatpush2.msra.mxu1 %v9329_v11  ;;  %v9339_v35 = vld [vmem:[#allocation71_spill] sm:$0xff]  ;;  %v9340_v11 = vld [vmem:[#allocation28_spill] sm:$0xff] }
 0x17f   :  { %1001 = vmatprep.subr.mxu0 %v9330_v15  ;;  %958 = vmatprep.subr.mxu1 %v9331_v39  ;;  %v9341_v15 = vld [vmem:[#allocation73_spill] sm:$0xff] }
 0x180   :  { %1002 = vmatpush1.msra.mxu0 %v9332_v7  ;;  %959 = vmatpush2.msra.mxu1 %v9333_v19  ;;  %v9342_v39 = vld [vmem:[#allocation29_spill] sm:$0xff]  ;;  %v9343_v7 = vld [vmem:[#allocation75_spill] sm:$0xff]  ;;  %v9344_v19 = vld [vmem:[#allocation30_spill] sm:$0xff] }
 0x181   :  { %1003 = vmatprep.subr.mxu0 %v9334_v43  ;;  %960 = vmatprep.subr.mxu1 %v9335_v4  ;;  %v9345_v43 = vld [vmem:[#allocation77_spill] sm:$0xff]  ;;  %v9346_v4 = vld [vmem:[#allocation31_spill] sm:$0xff] }
 0x182   :  { %1004 = vmatpush1.msra.mxu0 %v9336_v23  ;;  %961 = vmatpush2.msra.mxu1 %v9337_v27  ;;  %v9347_v23 = vld [vmem:[#allocation79_spill] sm:$0xff]  ;;  %v9348_v27 = vld [vmem:[#allocation32_spill] sm:$0xff] }
 0x183   :  { %1005 = vmatprep.subr.mxu0 %v9338_v31  ;;  %962 = vmatprep.subr.mxu1 %v9339_v35  ;;  %v9349_v31 = vld [vmem:[#allocation81_spill] sm:$0xff] }
 0x184   :  { %1006 = vmatpush1.msra.mxu0 %v9340_v11  ;;  %963 = vmatpush2.msra.mxu1 %v9341_v15  ;;  %v9350_v35 = vld [vmem:[#allocation33_spill] sm:$0xff]  ;;  %v9351_v11 = vld [vmem:[#allocation83_spill] sm:$0xff]  ;;  %v9352_v15 = vld [vmem:[#allocation34_spill] sm:$0xff] }
 0x185   :  { %1007 = vmatprep.subr.mxu0 %v9342_v39  ;;  %964 = vmatprep.subr.mxu1 %v9343_v7  ;;  %v9353_v39 = vld [vmem:[#allocation35_spill] sm:$0xff]  ;;  %v9354_v7 = vld [vmem:[#allocation36_spill] sm:$0xff] }
 0x186   :  { %1008 = vmatpush2.msra.mxu0 %v9344_v19  ;;  %965 = vmatpush2.msra.mxu1 %v9345_v43  ;;  %v9355_v19 = vld [vmem:[#allocation37_spill] sm:$0xff]  ;;  %v9356_v43 = vld [vmem:[#allocation38_spill] sm:$0xff] }
 0x187   :  { %1009 = vmatprep.subr.mxu0 %v9346_v4  ;;  %966 = vmatprep.subr.mxu1 %v9347_v23  ;;  %v9357_v4 = vld [vmem:[#allocation40_spill] sm:$0xff]  ;;  %v9358_v23 = vld [vmem:[#allocation42_spill] sm:$0xff] }
 0x188   :  { %1010 = vmatpush2.msra.mxu0 %v9348_v27  ;;  %967 = vmatpush2.msra.mxu1 %v9349_v31  ;;  %v9359_v27 = vld [vmem:[#allocation44_spill] sm:$0xff]  ;;  %v9360_v31 = vld [vmem:[#allocation46_spill] sm:$0xff] }
 0x189   :  { %1011 = vmatprep.subr.mxu0 %v9350_v35  ;;  %1046 = vmatprep.subr.mxu1 %v9351_v11  ;;  %v9361_v35 = vld [vmem:[#allocation48_spill] sm:$0xff]  ;;  %v9362_v11 = vld [vmem:[#allocation50_spill] sm:$0xff] }
 0x18a   :  { %1012 = vmatpush2.msra.mxu0 %v9352_v15  ;;  %v9363_v15 = vld [vmem:[#allocation52_spill] sm:$0xff] }
 0x18b   :  { %1013 = vmatprep.subr.mxu0 %v9353_v39  ;;  %v9364_v39 = vld [vmem:[#allocation54_spill] sm:$0xff] }
 0x18c   :  { %1014 = vmatpush2.msra.mxu0 %v9354_v7  ;;  %v9365_v7 = vld [vmem:[#allocation56_spill] sm:$0xff] }
 0x18d   :  { %1015 = vmatprep.subr.mxu0 %v9355_v19  ;;  %v9366_v19 = vld [vmem:[#allocation58_spill] sm:$0xff] }
 0x18e   :  { %1016 = vmatpush2.msra.mxu0 %v9356_v43  ;;  %v9367_v43 = vld [vmem:[#allocation60_spill] sm:$0xff] }
 0x18f   :  { %1017 = vmatprep.subr.mxu0 %v9357_v4  ;;  %v9368_v4 = vld [vmem:[#allocation62_spill] sm:$0xff] }
 0x190   :  { %1018 = vmatpush2.msra.mxu0 %v9358_v23  ;;  %v9369_v23 = vld [vmem:[#allocation64_spill] sm:$0xff] }
 0x191   :  { %1019 = vmatprep.subr.mxu0 %v9359_v27  ;;  %v9370_v27 = vld [vmem:[#allocation66_spill] sm:$0xff] }
 0x192   :  { %1020 = vmatpush2.msra.mxu0 %v9360_v31  ;;  %v9371_v31 = vld [vmem:[#allocation68_spill] sm:$0xff] }
 0x193   :  { %1021 = vmatprep.subr.mxu0 %v9361_v35  ;;  %v9372_v35 = vld [vmem:[#allocation70_spill] sm:$0xff] }
 0x194   :  { %1022 = vmatpush2.msra.mxu0 %v9362_v11  ;;  %v9373_v11 = vld [vmem:[#allocation72_spill] sm:$0xff] }
 0x195   :  { %1023 = vmatprep.subr.mxu0 %v9363_v15  ;;  %v9374_v15 = vld [vmem:[#allocation74_spill] sm:$0xff] }
 0x196   :  { %1024 = vmatpush2.msra.mxu0 %v9364_v39  ;;  %v9375_v39 = vld [vmem:[#allocation76_spill] sm:$0xff] }
 0x197   :  { %1025 = vmatprep.subr.mxu0 %v9365_v7  ;;  %v9376_v7 = vld [vmem:[#allocation78_spill] sm:$0xff] }
 0x198   :  { %1026 = vmatpush2.msra.mxu0 %v9366_v19  ;;  %v9377_v19 = vld [vmem:[#allocation80_spill] sm:$0xff] }
 0x199   :  { %1027 = vmatprep.subr.mxu0 %v9367_v43  ;;  %v9378_v43 = vld [vmem:[#allocation82_spill] sm:$0xff] }
 0x19a   :  { %1028 = vmatpush2.msra.mxu0 %v9368_v4  ;;  %v9379_v4 = vld [vmem:[#allocation84_spill] sm:$0xff] }
 0x19b   :  { %1029 = vmatprep.subr.mxu0 %v9369_v23  ;;  %v492_v23 = vld [vmem:[%s8601_s5] sm:$0xf] }
 0x19c   :  { %1030 = vmatpush2.msra.mxu0 %v9370_v27  ;;  %v9380_v27 = vsub.s32 0, %v5200_v61 }
 0x19d   :  { %1031 = vmatprep.subr.mxu0 %v9371_v31 }
 0x19e   :  { %1032 = vmatpush2.msra.mxu0 %v9372_v35  ;;  %v5687_v31 = vrot.slane %v492_v23, %v9380_v27  ;;  %v508_v27 = vsub.s32 3, %v5200_v61 }
 0x19f   :  { %1033 = vmatprep.subr.mxu0 %v9373_v11 }
 0x1a0   :  { %1034 = vmatpush2.msra.mxu0 %v9374_v15  ;;  %9381 = vst [vmem:[#allocation47_spill] sm:$0xff] %v5687_v31  ;;  %v9382_v15 = vsub.s32 1, %v5200_v61  ;;  %v5696_v58 = vrot.slane %v492_v23, %v508_v27 }
 0x1a1   :  { %1035 = vmatprep.subr.mxu0 %v9375_v39 }
 0x1a2   :  { %1036 = vmatpush2.msra.mxu0 %v9376_v7  ;;  %v5692_v39 = vrot.slane %v492_v23, %v9382_v15  ;;  %9384 = vst [vmem:[#allocation49_spill] sm:$0xff] %v5696_v58  ;;  %v9385_v15 = vsub.s32 2, %v5200_v61 }
 0x1a3   :  { %1037 = vmatprep.subr.mxu0 %v9377_v19 }
 0x1a4   :  { %1038 = vmatpush2.msra.mxu0 %v9378_v43  ;;  %9383 = vst [vmem:[#allocation16_spill] sm:$0xff] %v5692_v39 }
 0x1a5   :  { %3543 = vmatprep.subr.mxu0 %v9379_v4 }
 0x1e5   :  { %v620_v35 = vpop.f32.mrf.mxu0  ;;  %v691_v62 = vpop.f32.mrf.mxu1 }
 0x1e6   :  { %v837_v11 = vadd.f32 %v620_v35, %v5687_v31  ;;  %v5700_v31 = vrot.slane %v492_v23, %v9385_v15 }
 0x1e7   :  { %v622_v19 = vpop.f32.mrf.mxu0  ;;  %v693_v35 = vpop.f32.mrf.mxu1 }
 0x1e8   :  { %v3472_v7 = vmul.f32 -1.442695, %v837_v11  ;;  %v838_v43 = vadd.f32 %v622_v19, %v5692_v39  ;;  %9386 = vst [vmem:[#allocation17_spill] sm:$0xff] %v5700_v31 }
 0x1ea   :  { %3866 = vpow2.f32 %v3472_v7  ;;  %v3473_v4 = vmul.f32 -1.442695, %v838_v43  ;;  %v840_v7 = vadd.f32 %v693_v35, %v5696_v58  ;;  %v839_v43 = vadd.f32 %v691_v62, %v5700_v31  ;;  %v860_v62 = vld [vmem:[#allocation5 + $0x28] sm:$0xc] }
 0x1ec   :  { %3868 = vpow2.f32 %v3473_v4 }
 0x1f7   :  { %v3867_v2 = vpop.eup %3866 }
 0x1f8   :  { %v844_v0 = vadd.f32 1.0, %v3867_v2 }
 0x1f9   :  { %v3869_v60 = vpop.eup %3868 }
 0x1fa   :  { %3870 = vrcp.f32 %v844_v0  ;;  %v850_v11 = vadd.f32 1.0, %v3869_v60 }
 0x1fc   :  { %3872 = vrcp.f32 %v850_v11 }
 0x207   :  { %v3871_v19 = vpop.eup %3870 }
 0x208   :  { %v853_v2 = vmul.f32 %v3871_v19, %v840_v7 }
 0x209   :  { %v3873_v4 = vpop.eup %3872 }
 0x20a   :  { %v854_v0 = vadd.f32 %v853_v2, %v839_v43  ;;  %v856_v39 = vsub.f32 1.0, %v3873_v4  ;;  %v858_v54 = vmul.f32 %v3873_v4, %v5185_v1  ;;  %v861_v43 = vld [vmem:[#allocation5 + $0x10] sm:$0xc] }
 0x20c   :  { %3874 = vtanh.f32 %v854_v0 }
 0x219   :  { %v3875_v56 = vpop.eup %3874 }
 0x21a   :  { %v857_v27 = vmul.f32 %v3875_v56, %v856_v39 }
 0x21c   :  { %v5705_v52 = vadd.f32 %v858_v54, %v857_v27  ;;  %v3540_v54 = vpop.f32.mrf.mxu1 }
 0x21e   :  { %9387 = vst [vmem:[#allocation51_spill] sm:$0xff] %v5705_v52  ;;  %v898_v61 = vrot.slane %v5705_v52, 6  ;;  %v3541_v0 = vpop.f32.mrf.mxu1 }
 0x21f   :  { %v3542_v4 = vadd.f32 %v3541_v0, %v3540_v54  ;;  %v9401_v0 = vld [vmem:[#allocation99_spill] sm:$0xff] }
 0x220   :  { %v901_v60 = vrot.slane %v898_v61, 2 }
 0x221   :  { %v883_v61 = vadd.f32 %v3542_v4, %v5221_v3  ;;  %v9388_v3 = vld [vmem:[#allocation86_spill] sm:$0xff]  ;;  %v9402_v4 = vld [vmem:[#allocation100_spill] sm:$0xff] }
 0x222   :  { %968 = vmatprep.mubr.f32.mxu1 %v901_v60  ;;  %1039 = vmatprep.mubr.f32.mxu0 %v901_v60 }
 0x223   :  { %v885_v52 = vrot.slane %v883_v61, 6  ;;  %v9404_v61 = vld [vmem:[#allocation102_spill] sm:$0xff] }
 0x225   :  { %v762_v23 = vpop.f32.mrf.mxu0 }
 0x226   :  { %v864_v35 = vrot.slane %v762_v23, 6 }
 0x227   :  { %v764_v15 = vpop.f32.mrf.mxu0 }
 0x228   :  { %v866_v11 = vadd.f32 %v864_v35, %v860_v62  ;;  %v874_v19 = vrot.slane %v764_v15, 6  ;;  %v862_v62 = vld [vmem:[#allocation5 + $0x8] sm:$0xc] }
 0x22a   :  { %v3474_v7 = vmul.f32 -1.442695, %v866_v11  ;;  %v876_v2 = vadd.f32 %v874_v19, %v861_v43  ;;  %v893_v19 = vrot.slane %v5224_v57, 6  ;;  %v9389_v57 = vld [vmem:[#allocation87_spill] sm:$0xff] }
 0x22c   :  { %3876 = vpow2.f32 %v3474_v7  ;;  %v3475_v56 = vmul.f32 -1.442695, %v876_v2 }
 0x22e   :  { %3878 = vpow2.f32 %v3475_v56 }
 0x239   :  { %v3877_v1 = vpop.eup %3876 }
 0x23a   :  { %v870_v39 = vadd.f32 1.0, %v3877_v1 }
 0x23b   :  { %v3879_v27 = vpop.eup %3878 }
 0x23c   :  { %3880 = vrcp.f32 %v870_v39  ;;  %v880_v23 = vadd.f32 1.0, %v3879_v27  ;;  %v9400_v39 = vld [vmem:[#allocation98_spill] sm:$0xff]  ;;  %v9403_v27 = vld [vmem:[#allocation101_spill] sm:$0xff] }
 0x23e   :  { %3882 = vrcp.f32 %v880_v23  ;;  %v9405_v23 = vld [vmem:[#allocation103_spill] sm:$0xff] }
 0x249   :  { %v3881_v31 = vpop.eup %3880 }
 0x24a   :  { %v887_v35 = vmul.f32 %v3881_v31, %v885_v52  ;;  %v9390_v52 = vld [vmem:[#allocation88_spill] sm:$0xff]  ;;  %v9395_v31 = vld [vmem:[#allocation93_spill] sm:$0xff] }
 0x24b   :  { %v3883_v11 = vpop.eup %3882 }
 0x24c   :  { %v888_v15 = vadd.f32 %v887_v35, %v862_v62  ;;  %v890_v7 = vsub.f32 1.0, %v3883_v11  ;;  %v895_v56 = vmul.f32 %v3883_v11, %v893_v19  ;;  %v9406_v35 = vld [vmem:[#allocation104_spill] sm:$0xff]  ;;  %v9407_v62 = vld [vmem:[#allocation105_spill] sm:$0xff]  ;;  %v9409_v11 = vld [vmem:[#allocation107_spill] sm:$0xff] }
 0x24d   :  { %v9411_v19 = vld [vmem:[#allocation109_spill] sm:$0xff] }
 0x24e   :  { %3884 = vtanh.f32 %v888_v15  ;;  %v9408_v15 = vld [vmem:[#allocation106_spill] sm:$0xff] }
 0x25b   :  { %v3885_v43 = vpop.eup %3884 }
 0x25c   :  { %v891_v2 = vmul.f32 %v3885_v43, %v890_v7  ;;  %v9410_v7 = vld [vmem:[#allocation108_spill] sm:$0xff]  ;;  %v9412_v43 = vld [vmem:[#allocation110_spill] sm:$0xff] }
 0x25e   :  { %v5710_v1 = vadd.f32 %v895_v56, %v891_v2  ;;  %v9413_v2 = vld [vmem:[#allocation111_spill] sm:$0xff]  ;;  %v9414_v56 = vld [vmem:[#allocation112_spill] sm:$0xff] }
 0x260   :  { %v5713_v54 = vrot.slane %v5710_v1, 2 }
 0x262   :  { %969 = vmatmul.mubr.f32.vlgmr.msra.gmra.mxu1 %v5713_v54  ;;  %1040 = vmatmul.mubr.f32.vlgmr.msra.gmra.mxu0 %v5713_v54 }
 0x263   :  { %1047 = vmatpush1.msra.mxu1 %v5226_v21  ;;  %3544 = vmatpush3.msra.mxu0 %v5228_v41  ;;  %v9391_v21 = vld [vmem:[#allocation89_spill] sm:$0xff]  ;;  %v9392_v41 = vld [vmem:[#allocation90_spill] sm:$0xff] }
 0x264   :  { %1048 = vmatprep.subr.mxu1 %v5230_v49  ;;  %1110 = vmatprep.mubr.f32.mxu1 %v901_v60  ;;  %v9393_v49 = vld [vmem:[#allocation91_spill] sm:$0xff] }
 0x265   :  { %3545 = vmatprep.subr.mxu0 %v5232_v53  ;;  %1181 = vmatprep.mubr.f32.mxu0 %v901_v60  ;;  %v9394_v53 = vld [vmem:[#allocation92_spill] sm:$0xff]  ;;  %v9399_v60 = vld [vmem:[#allocation97_spill] sm:$0xff] }
 0x266   :  { %1049 = vmatpush1.msra.mxu1 %v5236_v37  ;;  %3546 = vmatpush3.msra.mxu0 %v5238_v33  ;;  %v9396_v37 = vld [vmem:[#allocation94_spill] sm:$0xff]  ;;  %v9397_v33 = vld [vmem:[#allocation95_spill] sm:$0xff] }
 0x267   :  { %1050 = vmatprep.subr.mxu1 %v5242_v29  ;;  %3547 = vmatprep.subr.mxu0 %v9388_v3  ;;  %v9398_v29 = vld [vmem:[#allocation96_spill] sm:$0xff]  ;;  %v9415_v3 = vld [vmem:[#allocation113_spill] sm:$0xff] }
 0x268   :  { %1051 = vmatpush1.msra.mxu1 %v9389_v57  ;;  %3548 = vmatpush3.msra.mxu0 %v9390_v52  ;;  %v9416_v57 = vld [vmem:[#allocation114_spill] sm:$0xff]  ;;  %v9417_v52 = vld [vmem:[#allocation115_spill] sm:$0xff] }
 0x269   :  { %1052 = vmatprep.subr.mxu1 %v9391_v21  ;;  %3549 = vmatprep.subr.mxu0 %v9392_v41  ;;  %v9418_v21 = vld [vmem:[#allocation116_spill] sm:$0xff]  ;;  %v9419_v41 = vld [vmem:[#allocation117_spill] sm:$0xff] }
 0x26a   :  { %1053 = vmatpush1.msra.mxu1 %v9393_v49  ;;  %3550 = vmatpush3.msra.mxu0 %v9394_v53  ;;  %v9420_v49 = vld [vmem:[#allocation118_spill] sm:$0xff]  ;;  %v9421_v53 = vld [vmem:[#allocation119_spill] sm:$0xff] }
 0x26b   :  { %1054 = vmatprep.subr.mxu1 %v9395_v31  ;;  %3551 = vmatprep.subr.mxu0 %v9396_v37  ;;  %v9422_v31 = vld [vmem:[#allocation120_spill] sm:$0xff]  ;;  %v9423_v37 = vld [vmem:[#allocation121_spill] sm:$0xff] }
 0x26c   :  { %1055 = vmatpush1.msra.mxu1 %v9397_v33  ;;  %3552 = vmatpush3.msra.mxu0 %v9398_v29  ;;  %v9424_v33 = vld [vmem:[#allocation122_spill] sm:$0xff]  ;;  %v9425_v29 = vld [vmem:[#allocation123_spill] sm:$0xff] }
 0x26d   :  { %1056 = vmatprep.subr.mxu1 %v9399_v60  ;;  %3553 = vmatprep.subr.mxu0 %v9400_v39  ;;  %v9426_v60 = vld [vmem:[#allocation124_spill] sm:$0xff]  ;;  %v9427_v39 = vld [vmem:[#allocation125_spill] sm:$0xff] }
 0x26e   :  { %1057 = vmatpush1.msra.mxu1 %v9401_v0  ;;  %3554 = vmatpush3.msra.mxu0 %v9402_v4  ;;  %v9428_v0 = vld [vmem:[#allocation126_spill] sm:$0xff]  ;;  %v9429_v4 = vld [vmem:[#allocation127_spill] sm:$0xff] }
 0x26f   :  { %1058 = vmatprep.subr.mxu1 %v9403_v27  ;;  %3555 = vmatprep.subr.mxu0 %v9404_v61  ;;  %v9430_v27 = vld [vmem:[#allocation128_spill] sm:$0xff]  ;;  %v9431_v61 = vld [vmem:[#allocation129_spill] sm:$0xff] }
 0x270   :  { %1059 = vmatpush1.msra.mxu1 %v9405_v23  ;;  %3556 = vmatpush3.msra.mxu0 %v9406_v35  ;;  %v9432_v23 = vld [vmem:[#allocation130_spill] sm:$0xff]  ;;  %v9433_v35 = vld [vmem:[#allocation131_spill] sm:$0xff] }
 0x271   :  { %1060 = vmatprep.subr.mxu1 %v9407_v62  ;;  %3557 = vmatprep.subr.mxu0 %v9408_v15  ;;  %v9434_v62 = vld [vmem:[#allocation132_spill] sm:$0xff]  ;;  %v9435_v15 = vld [vmem:[#allocation133_spill] sm:$0xff] }
 0x272   :  { %1061 = vmatpush1.msra.mxu1 %v9409_v11  ;;  %3558 = vmatpush3.msra.mxu0 %v9410_v7  ;;  %v9436_v11 = vld [vmem:[#allocation134_spill] sm:$0xff]  ;;  %v9437_v7 = vld [vmem:[#allocation135_spill] sm:$0xff] }
 0x273   :  { %1062 = vmatprep.subr.mxu1 %v9411_v19  ;;  %3559 = vmatprep.subr.mxu0 %v9412_v43  ;;  %v9438_v19 = vld [vmem:[#allocation136_spill] sm:$0xff]  ;;  %v9439_v43 = vld [vmem:[#allocation137_spill] sm:$0xff] }
 0x274   :  { %1063 = vmatpush1.msra.mxu1 %v9413_v2  ;;  %3560 = vmatpush3.msra.mxu0 %v9414_v56  ;;  %v9441_v2 = vld [vmem:[#allocation139_spill] sm:$0xff]  ;;  %v5794_v56 = vld [vmem:[#allocation7 + $0x310] sm:$0xff] }
 0x275   :  { %1064 = vmatprep.subr.mxu1 %v9415_v3  ;;  %3561 = vmatprep.subr.mxu0 %v9416_v57  ;;  %v5798_v3 = vld [vmem:[#allocation7 + $0x2e0] sm:$0xff]  ;;  %v5802_v57 = vld [vmem:[#allocation7 + $0x2d8] sm:$0xff] }
 0x276   :  { %1065 = vmatpush1.msra.mxu1 %v9417_v52  ;;  %3562 = vmatpush3.msra.mxu0 %v9418_v21  ;;  %v5912_v52 = vld [vmem:[#allocation7 + $0x6d0] sm:$0xff]  ;;  %v5916_v21 = vld [vmem:[#allocation7 + $0x6c8] sm:$0xff] }
 0x277   :  { %1066 = vmatprep.subr.mxu1 %v9419_v41  ;;  %3563 = vmatprep.subr.mxu0 %v9420_v49  ;;  %v9446_v41 = vld [vmem:[#allocation144_spill] sm:$0xff] }
 0x278   :  { %1067 = vmatpush1.msra.mxu1 %v9421_v53  ;;  %3564 = vmatpush3.msra.mxu0 %v9422_v31  ;;  %v5924_v49 = vld [vmem:[#allocation7 + $0x690] sm:$0xff]  ;;  %v9447_v53 = vld [vmem:[#allocation145_spill] sm:$0xff]  ;;  %v5928_v31 = vld [vmem:[#allocation7 + $0x660] sm:$0xff] }
 0x279   :  { %1068 = vmatprep.subr.mxu1 %v9423_v37  ;;  %3565 = vmatprep.subr.mxu0 %v9424_v33  ;;  %v9448_v37 = vld [vmem:[#allocation146_spill] sm:$0xff]  ;;  %v5932_v33 = vld [vmem:[#allocation7 + $0x658] sm:$0xff] }
 0x27a   :  { %1069 = vmatpush1.msra.mxu1 %v9425_v29  ;;  %3566 = vmatpush3.msra.mxu0 %v9426_v60  ;;  %v9449_v29 = vld [vmem:[#allocation147_spill] sm:$0xff] }
 0x27b   :  { %1070 = vmatprep.subr.mxu1 %v9427_v39  ;;  %3567 = vmatprep.subr.mxu0 %v9428_v0  ;;  %v5936_v60 = vld [vmem:[#allocation7 + $0x628] sm:$0xff]  ;;  %v9450_v39 = vld [vmem:[#allocation148_spill] sm:$0xff]  ;;  %v5940_v0 = vld [vmem:[#allocation7 + $0x620] sm:$0xff] }
 0x27c   :  { %1071 = vmatpush1.msra.mxu1 %v9429_v4  ;;  %3568 = vmatpush3.msra.mxu0 %v9430_v27  ;;  %v9451_v4 = vld [vmem:[#allocation149_spill] sm:$0xff]  ;;  %v5944_v27 = vld [vmem:[#allocation7 + $0x5f0] sm:$0xff] }
 0x27d   :  { %1072 = vmatprep.subr.mxu1 %v9431_v61  ;;  %3569 = vmatprep.subr.mxu0 %v9432_v23  ;;  %v9452_v61 = vld [vmem:[#allocation150_spill] sm:$0xff]  ;;  %v5948_v23 = vld [vmem:[#allocation7 + $0x5e8] sm:$0xff] }
 0x27e   :  { %1073 = vmatpush1.msra.mxu1 %v5380_v63  ;;  %3570 = vmatpush3.msra.mxu0 %v9433_v35  ;;  %v9440_v63 = vld [vmem:[#allocation138_spill] sm:$0xff]  ;;  %v9453_v35 = vld [vmem:[#allocation151_spill] sm:$0xff] }
 0x27f   :  { %1074 = vmatprep.subr.mxu1 %v5386_v51  ;;  %3571 = vmatprep.subr.mxu0 %v9434_v62  ;;  %v5782_v51 = vld [vmem:[#allocation7 + $0x350] sm:$0xff]  ;;  %v5952_v62 = vld [vmem:[#allocation7 + $0x5b8] sm:$0xff] }
 0x280   :  { %1075 = vmatpush1.msra.mxu1 %v9435_v15  ;;  %3572 = vmatpush3.msra.mxu0 %v5394_v59  ;;  %v5786_v59 = vld [vmem:[#allocation7 + $0x348] sm:$0xff]  ;;  %v9454_v15 = vld [vmem:[#allocation152_spill] sm:$0xff] }
 0x281   :  { %1076 = vmatprep.subr.mxu1 %v9436_v11  ;;  %3573 = vmatprep.subr.mxu0 %v9437_v7  ;;  %v5956_v11 = vld [vmem:[#allocation7 + $0x5b0] sm:$0xff]  ;;  %v9455_v7 = vld [vmem:[#allocation153_spill] sm:$0xff] }
 0x282   :  { %1077 = vmatpush1.msra.mxu1 %v5404_v55  ;;  %3574 = vmatpush3.msra.mxu0 %v9438_v19  ;;  %v5790_v55 = vld [vmem:[#allocation7 + $0x318] sm:$0xff]  ;;  %v5960_v19 = vld [vmem:[#allocation7 + $0x580] sm:$0xff] }
 0x283   :  { %1078 = vmatprep.subr.mxu1 %v9439_v43  ;;  %1182 = vmatmul.mubr.f32.vlgmr.msra.gmra.mxu0 %v5713_v54  ;;  %9456 = vst [vmem:[#allocation18_spill] sm:$0xff] %v5960_v19  ;;  %v9457_v43 = vld [vmem:[#allocation39_spill] sm:$0xff] }
 0x284   :  { %1079 = vmatpush2.msra.mxu1 %v9440_v63  ;;  %1253 = vmatprep.subr.mxu0 %v5782_v51  ;;  %v5964_v63 = vld [vmem:[#allocation7 + $0x578] sm:$0xff] }
 0x285   :  { %1080 = vmatprep.subr.mxu1 %v9441_v2  ;;  %1254 = vmatpush1.msra.mxu0 %v5786_v59  ;;  %9458 = vst [vmem:[#allocation53_spill] sm:$0xff] %v5964_v63  ;;  %v9459_v2 = vld [vmem:[#allocation41_spill] sm:$0xff] }
 0x286   :  { %1081 = vmatpush2.msra.mxu1 %v5422_v17  ;;  %1255 = vmatprep.subr.mxu0 %v5790_v55  ;;  %v5806_v17 = vld [vmem:[#allocation7 + $0x2a8] sm:$0xff] }
 0x287   :  { %1082 = vmatprep.subr.mxu1 %v5426_v47  ;;  %1256 = vmatpush1.msra.mxu0 %v5794_v56  ;;  %v5810_v47 = vld [vmem:[#allocation7 + $0x2a0] sm:$0xff] }
 0x288   :  { %1083 = vmatpush2.msra.mxu1 %v5429_v5  ;;  %1257 = vmatprep.subr.mxu0 %v5798_v3  ;;  %v5814_v5 = vld [vmem:[#allocation7 + $0x270] sm:$0xff] }
 0x289   :  { %1084 = vmatprep.subr.mxu1 %v5433_v45  ;;  %1258 = vmatpush1.msra.mxu0 %v5802_v57  ;;  %v5818_v45 = vld [vmem:[#allocation7 + $0x268] sm:$0xff] }
 0x28a   :  { %1085 = vmatpush2.msra.mxu1 %v5437_v9  ;;  %1259 = vmatprep.subr.mxu0 %v5806_v17  ;;  %v5822_v9 = vld [vmem:[#allocation7 + $0x238] sm:$0xff] }
 0x28b   :  { %1086 = vmatprep.subr.mxu1 %v5441_v25  ;;  %1260 = vmatpush1.msra.mxu0 %v5810_v47  ;;  %v5826_v25 = vld [vmem:[#allocation7 + $0x230] sm:$0xff] }
 0x28c   :  { %1087 = vmatpush2.msra.mxu1 %v5445_v13  ;;  %1261 = vmatprep.subr.mxu0 %v5814_v5  ;;  %v5830_v13 = vld [vmem:[#allocation7 + $0x200] sm:$0xff] }
 0x28d   :  { %1088 = vmatprep.subr.mxu1 %v5449_v6  ;;  %1262 = vmatpush1.msra.mxu0 %v5818_v45  ;;  %v5834_v6 = vld [vmem:[#allocation7 + $0x1f8] sm:$0xff] }
 0x28e   :  { %1089 = vmatpush2.msra.mxu1 %v5453_v8  ;;  %1263 = vmatprep.subr.mxu0 %v5822_v9  ;;  %v5838_v8 = vld [vmem:[#allocation7 + $0x1c8] sm:$0xff] }
 0x28f   :  { %1090 = vmatprep.subr.mxu1 %v5457_v10  ;;  %1264 = vmatpush1.msra.mxu0 %v5826_v25  ;;  %v5842_v10 = vld [vmem:[#allocation7 + $0x1c0] sm:$0xff] }
 0x290   :  { %1091 = vmatpush2.msra.mxu1 %v5461_v12  ;;  %1265 = vmatprep.subr.mxu0 %v5830_v13  ;;  %v5846_v12 = vld [vmem:[#allocation7 + $0x190] sm:$0xff] }
 0x291   :  { %1092 = vmatprep.subr.mxu1 %v5465_v14  ;;  %1266 = vmatpush1.msra.mxu0 %v5834_v6  ;;  %v5850_v14 = vld [vmem:[#allocation7 + $0x188] sm:$0xff] }
 0x292   :  { %1093 = vmatpush2.msra.mxu1 %v5469_v16  ;;  %1267 = vmatprep.subr.mxu0 %v5838_v8  ;;  %v5854_v16 = vld [vmem:[#allocation7 + $0x158] sm:$0xff] }
 0x293   :  { %1094 = vmatprep.subr.mxu1 %v5473_v18  ;;  %1268 = vmatpush1.msra.mxu0 %v5842_v10  ;;  %v5858_v18 = vld [vmem:[#allocation7 + $0x150] sm:$0xff] }
 0x294   :  { %1095 = vmatpush2.msra.mxu1 %v5477_v20  ;;  %1269 = vmatprep.subr.mxu0 %v5846_v12  ;;  %v5862_v20 = vld [vmem:[#allocation7 + $0x120] sm:$0xff] }
 0x295   :  { %1096 = vmatprep.subr.mxu1 %v5481_v22  ;;  %1270 = vmatpush1.msra.mxu0 %v5850_v14  ;;  %v5866_v22 = vld [vmem:[#allocation7 + $0x118] sm:$0xff] }
 0x296   :  { %1097 = vmatpush2.msra.mxu1 %v5485_v24  ;;  %1271 = vmatprep.subr.mxu0 %v5854_v16  ;;  %v5870_v24 = vld [vmem:[#allocation7 + $0xe8] sm:$0xff] }
 0x297   :  { %1098 = vmatprep.subr.mxu1 %v5489_v26  ;;  %1272 = vmatpush1.msra.mxu0 %v5858_v18  ;;  %v5874_v26 = vld [vmem:[#allocation7 + $0xe0] sm:$0xff] }
 0x298   :  { %1099 = vmatpush2.msra.mxu1 %v5493_v28  ;;  %1273 = vmatprep.subr.mxu0 %v5862_v20  ;;  %v5878_v28 = vld [vmem:[#allocation7 + $0xb0] sm:$0xff] }
 0x299   :  { %1100 = vmatprep.subr.mxu1 %v5497_v30  ;;  %1274 = vmatpush1.msra.mxu0 %v5866_v22  ;;  %v5882_v30 = vld [vmem:[#allocation7 + $0xa8] sm:$0xff] }
 0x29a   :  { %1101 = vmatpush2.msra.mxu1 %v5501_v32  ;;  %1275 = vmatprep.subr.mxu0 %v5870_v24  ;;  %v5886_v32 = vld [vmem:[#allocation7 + $0x78] sm:$0xff] }
 0x29b   :  { %1102 = vmatprep.subr.mxu1 %v5505_v34  ;;  %1276 = vmatpush1.msra.mxu0 %v5874_v26  ;;  %v5890_v34 = vld [vmem:[#allocation7 + $0x70] sm:$0xff] }
 0x29c   :  { %1103 = vmatpush2.msra.mxu1 %v5509_v36  ;;  %1277 = vmatprep.subr.mxu0 %v5878_v28  ;;  %v5894_v36 = vld [vmem:[#allocation7 + $0x40] sm:$0xff] }
 0x29d   :  { %1104 = vmatprep.subr.mxu1 %v5513_v38  ;;  %1278 = vmatpush1.msra.mxu0 %v5882_v30  ;;  %v5898_v38 = vld [vmem:[#allocation7 + $0x38] sm:$0xff] }
 0x29e   :  { %1105 = vmatpush2.msra.mxu1 %v5517_v40  ;;  %1279 = vmatprep.subr.mxu0 %v5886_v32  ;;  %v5902_v40 = vld [vmem:[#allocation7 + $0x8] sm:$0xff] }
 0x29f   :  { %1106 = vmatprep.subr.mxu1 %v5521_v42  ;;  %1280 = vmatpush1.msra.mxu0 %v5890_v34  ;;  %v9442_v42 = vld [vmem:[#allocation140_spill] sm:$0xff] }
 0x2a0   :  { %1107 = vmatpush2.msra.mxu1 %v5525_v44  ;;  %1281 = vmatprep.subr.mxu0 %v5894_v36  ;;  %v5908_v44 = vld [vmem:[#allocation7] sm:$0xff] }
 0x2a1   :  { %1108 = vmatprep.subr.mxu1 %v5529_v46  ;;  %1282 = vmatpush1.msra.mxu0 %v5898_v38  ;;  %v9443_v46 = vld [vmem:[#allocation141_spill] sm:$0xff] }
 0x2a2   :  { %1109 = vmatpush2.msra.mxu1 %v5533_v48  ;;  %1283 = vmatprep.subr.mxu0 %v5902_v40  ;;  %v9444_v48 = vld [vmem:[#allocation142_spill] sm:$0xff] }
 0x2a3   :  { %1111 = vmatmul.mubr.f32.vlgmr.msra.gmra.mxu1 %v5713_v54  ;;  %1324 = vmatprep.subr.mxu1 %v5543_v50  ;;  %v9445_v54 = vld [vmem:[#allocation143_spill] sm:$0xff]  ;;  %v5920_v50 = vld [vmem:[#allocation7 + $0x698] sm:$0xff] }
 0x2a4   :  { %1325 = vmatpush1.msra.mxu1 %v9442_v42  ;;  %1284 = vmatpush1.msra.mxu0 %v5908_v44  ;;  %v5968_v42 = vld [vmem:[#allocation7 + $0x548] sm:$0xff] }
 0x2a5   :  { %1326 = vmatprep.subr.mxu1 %v9443_v46  ;;  %1285 = vmatprep.subr.mxu0 %v5912_v52  ;;  %9460 = vst [vmem:[#allocation19_spill] sm:$0xff] %v5968_v42  ;;  %v9461_v46 = vld [vmem:[#allocation43_spill] sm:$0xff] }
 0x2a6   :  { %1327 = vmatpush1.msra.mxu1 %v9444_v48  ;;  %1286 = vmatpush2.msra.mxu0 %v5916_v21  ;;  %v5972_v48 = vld [vmem:[#allocation7 + $0x540] sm:$0xff] }
 0x2a7   :  { %1328 = vmatprep.subr.mxu1 %v9445_v54  ;;  %1287 = vmatprep.subr.mxu0 %v5920_v50  ;;  %9462 = vst [vmem:[#allocation55_spill] sm:$0xff] %v5972_v48  ;;  %v9463_v54 = vld [vmem:[#allocation45_spill] sm:$0xff] }
 0x2a8   :  { %1329 = vmatpush1.msra.mxu1 %v9446_v41  ;;  %1288 = vmatpush2.msra.mxu0 %v5924_v49  ;;  %v5976_v41 = vld [vmem:[#allocation7 + $0x510] sm:$0xff] }
 0x2a9   :  { %1330 = vmatprep.subr.mxu1 %v9447_v53  ;;  %1289 = vmatprep.subr.mxu0 %v5928_v31  ;;  %9464 = vst [vmem:[#allocation20_spill] sm:$0xff] %v5976_v41  ;;  %v5979_v53 = vld [vmem:[#allocation7 + $0x160] sm:$0xff] }
 0x2aa   :  { %1331 = vmatpush1.msra.mxu1 %v9448_v37  ;;  %1290 = vmatpush2.msra.mxu0 %v5932_v33  ;;  %9465 = vst [vmem:[#allocation57_spill] sm:$0xff] %v5979_v53  ;;  %v5982_v37 = vld [vmem:[#allocation7 + $0x508] sm:$0xff] }
 0x2ab   :  { %1332 = vmatprep.subr.mxu1 %v9449_v29  ;;  %1291 = vmatprep.subr.mxu0 %v5936_v60  ;;  %9466 = vst [vmem:[#allocation21_spill] sm:$0xff] %v5982_v37  ;;  %v5985_v29 = vld [vmem:[#allocation7 + $0x130] sm:$0xff] }
 0x2ac   :  { %1333 = vmatpush1.msra.mxu1 %v9450_v39  ;;  %1292 = vmatpush2.msra.mxu0 %v5940_v0  ;;  %9467 = vst [vmem:[#allocation59_spill] sm:$0xff] %v5985_v29  ;;  %v5988_v39 = vld [vmem:[#allocation7 + $0x4d8] sm:$0xff] }
 0x2ad   :  { %1334 = vmatprep.subr.mxu1 %v9451_v4  ;;  %1293 = vmatprep.subr.mxu0 %v5944_v27  ;;  %9468 = vst [vmem:[#allocation22_spill] sm:$0xff] %v5988_v39  ;;  %v5991_v4 = vld [vmem:[#allocation7 + $0x128] sm:$0xff] }
 0x2ae   :  { %1335 = vmatpush1.msra.mxu1 %v9452_v61  ;;  %1294 = vmatpush2.msra.mxu0 %v5948_v23  ;;  %9469 = vst [vmem:[#allocation61_spill] sm:$0xff] %v5991_v4  ;;  %v5994_v61 = vld [vmem:[#allocation7 + $0x4d0] sm:$0xff] }
 0x2af   :  { %1336 = vmatprep.subr.mxu1 %v9453_v35  ;;  %1295 = vmatprep.subr.mxu0 %v5952_v62  ;;  %9470 = vst [vmem:[#allocation23_spill] sm:$0xff] %v5994_v61  ;;  %v5997_v35 = vld [vmem:[#allocation7 + $0xf8] sm:$0xff] }
 0x2b0   :  { %1337 = vmatpush1.msra.mxu1 %v9454_v15  ;;  %1296 = vmatpush2.msra.mxu0 %v5956_v11  ;;  %9471 = vst [vmem:[#allocation63_spill] sm:$0xff] %v5997_v35  ;;  %v6000_v15 = vld [vmem:[#allocation7 + $0x4a0] sm:$0xff] }
 0x2b1   :  { %1338 = vmatprep.subr.mxu1 %v9455_v7  ;;  %1297 = vmatprep.subr.mxu0 %v5960_v19  ;;  %9472 = vst [vmem:[#allocation24_spill] sm:$0xff] %v6000_v15  ;;  %v6003_v7 = vld [vmem:[#allocation7 + $0xf0] sm:$0xff] }
 0x2b2   :  { %1339 = vmatpush1.msra.mxu1 %v9457_v43  ;;  %1298 = vmatpush2.msra.mxu0 %v5964_v63  ;;  %9473 = vst [vmem:[#allocation65_spill] sm:$0xff] %v6003_v7  ;;  %v6006_v43 = vld [vmem:[#allocation7 + $0x498] sm:$0xff] }
 0x2b3   :  { %1340 = vmatprep.subr.mxu1 %v9459_v2  ;;  %1299 = vmatprep.subr.mxu0 %v5968_v42  ;;  %9474 = vst [vmem:[#allocation25_spill] sm:$0xff] %v6006_v43  ;;  %v6009_v2 = vld [vmem:[#allocation7 + $0xc0] sm:$0xff]  ;;  %v9529_v63 = vld [vmem:[#allocation17_spill] sm:$0xff] }
 0x2b4   :  { %1341 = vmatpush1.msra.mxu1 %v9461_v46  ;;  %1300 = vmatpush2.msra.mxu0 %v5972_v48  ;;  %9475 = vst [vmem:[#allocation67_spill] sm:$0xff] %v6009_v2  ;;  %v6012_v46 = vld [vmem:[#allocation7 + $0x468] sm:$0xff] }
 0x2b5   :  { %1342 = vmatprep.subr.mxu1 %v9463_v54  ;;  %1301 = vmatprep.subr.mxu0 %v5976_v41  ;;  %9476 = vst [vmem:[#allocation26_spill] sm:$0xff] %v6012_v46  ;;  %v6015_v54 = vld [vmem:[#allocation7 + $0xb8] sm:$0xff] }
 0x2b6   :  { %1343 = vmatpush1.msra.mxu1 %v5979_v53  ;;  %1302 = vmatpush2.msra.mxu0 %v5982_v37  ;;  %9477 = vst [vmem:[#allocation69_spill] sm:$0xff] %v6015_v54 }
 0x2b7   :  { %1344 = vmatprep.subr.mxu1 %v5985_v29  ;;  %1303 = vmatprep.subr.mxu0 %v5988_v39  ;;  %v9528_v39 = vld [vmem:[#allocation16_spill] sm:$0xff] }
 0x2b8   :  { %1345 = vmatpush1.msra.mxu1 %v5991_v4  ;;  %1304 = vmatpush2.msra.mxu0 %v5994_v61 }
 0x2b9   :  { %1346 = vmatprep.subr.mxu1 %v5997_v35  ;;  %1305 = vmatprep.subr.mxu0 %v6000_v15  ;;  %v6018_v15 = vld [vmem:[#allocation7 + $0x460] sm:$0xff]  ;;  %v9527_v35 = vld [vmem:[#allocation47_spill] sm:$0xff] }
 0x2ba   :  { %1347 = vmatpush1.msra.mxu1 %v6003_v7  ;;  %1306 = vmatpush2.msra.mxu0 %v6006_v43  ;;  %9478 = vst [vmem:[#allocation27_spill] sm:$0xff] %v6018_v15  ;;  %v6021_v7 = vld [vmem:[#allocation7 + $0x88] sm:$0xff]  ;;  %v6024_v43 = vld [vmem:[#allocation7 + $0x430] sm:$0xff] }
 0x2bb   :  { %1348 = vmatprep.subr.mxu1 %v6009_v2  ;;  %1307 = vmatprep.subr.mxu0 %v6012_v46  ;;  %9479 = vst [vmem:[#allocation71_spill] sm:$0xff] %v6021_v7  ;;  %9480 = vst [vmem:[#allocation28_spill] sm:$0xff] %v6024_v43  ;;  %v6027_v2 = vld [vmem:[#allocation7 + $0x80] sm:$0xff]  ;;  %v6030_v46 = vld [vmem:[#allocation7 + $0x428] sm:$0xff] }
 0x2bc   :  { %1349 = vmatpush1.msra.mxu1 %v6015_v54  ;;  %1308 = vmatpush2.msra.mxu0 %v6018_v15  ;;  %9481 = vst [vmem:[#allocation73_spill] sm:$0xff] %v6027_v2  ;;  %9482 = vst [vmem:[#allocation29_spill] sm:$0xff] %v6030_v46  ;;  %v6033_v54 = vld [vmem:[#allocation7 + $0x50] sm:$0xff]  ;;  %v6036_v15 = vld [vmem:[#allocation7 + $0x3f8] sm:$0xff] }
 0x2bd   :  { %1350 = vmatprep.subr.mxu1 %v6021_v7  ;;  %1309 = vmatprep.subr.mxu0 %v6024_v43  ;;  %9483 = vst [vmem:[#allocation75_spill] sm:$0xff] %v6033_v54  ;;  %9484 = vst [vmem:[#allocation30_spill] sm:$0xff] %v6036_v15  ;;  %v6039_v7 = vld [vmem:[#allocation7 + $0x48] sm:$0xff]  ;;  %v6042_v43 = vld [vmem:[#allocation7 + $0x3f0] sm:$0xff] }
 0x2be   :  { %1351 = vmatpush1.msra.mxu1 %v6027_v2  ;;  %1310 = vmatpush2.msra.mxu0 %v6030_v46  ;;  %9485 = vst [vmem:[#allocation77_spill] sm:$0xff] %v6039_v7  ;;  %9486 = vst [vmem:[#allocation31_spill] sm:$0xff] %v6042_v43  ;;  %v6045_v2 = vld [vmem:[#allocation7 + $0x18] sm:$0xff]  ;;  %v6048_v46 = vld [vmem:[#allocation7 + $0x3c0] sm:$0xff] }
 0x2bf   :  { %1352 = vmatprep.subr.mxu1 %v6033_v54  ;;  %1311 = vmatprep.subr.mxu0 %v6036_v15  ;;  %9487 = vst [vmem:[#allocation79_spill] sm:$0xff] %v6045_v2  ;;  %9488 = vst [vmem:[#allocation32_spill] sm:$0xff] %v6048_v46  ;;  %v6051_v54 = vld [vmem:[#allocation7 + $0x10] sm:$0xff]  ;;  %v6054_v15 = vld [vmem:[#allocation7 + $0x3b8] sm:$0xff] }
 0x2c0   :  { %1353 = vmatpush1.msra.mxu1 %v6039_v7  ;;  %1312 = vmatpush2.msra.mxu0 %v6042_v43  ;;  %9489 = vst [vmem:[#allocation81_spill] sm:$0xff] %v6051_v54  ;;  %9490 = vst [vmem:[#allocation33_spill] sm:$0xff] %v6054_v15  ;;  %v6057_v7 = vld [vmem:[#allocation7 + $0x6e0] sm:$0xff]  ;;  %v6060_v43 = vld [vmem:[#allocation7 + $0x388] sm:$0xff] }
 0x2c1   :  { %1354 = vmatprep.subr.mxu1 %v6045_v2  ;;  %1313 = vmatprep.subr.mxu0 %v6048_v46  ;;  %9491 = vst [vmem:[#allocation83_spill] sm:$0xff] %v6057_v7  ;;  %9492 = vst [vmem:[#allocation34_spill] sm:$0xff] %v6060_v43  ;;  %v6063_v2 = vld [vmem:[#allocation7 + $0x6d8] sm:$0xff]  ;;  %v6066_v46 = vld [vmem:[#allocation7 + $0x380] sm:$0xff] }
 0x2c2   :  { %1355 = vmatpush1.msra.mxu1 %v6051_v54  ;;  %1314 = vmatpush2.msra.mxu0 %v6054_v15  ;;  %9493 = vst [vmem:[#allocation35_spill] sm:$0xff] %v6063_v2  ;;  %9494 = vst [vmem:[#allocation36_spill] sm:$0xff] %v6066_v46  ;;  %v6069_v54 = vld [vmem:[#allocation7 + $0x6a8] sm:$0xff]  ;;  %v6072_v15 = vld [vmem:[#allocation7 + $0x370] sm:$0xff] }
 0x2c3   :  { %1356 = vmatprep.subr.mxu1 %v6057_v7  ;;  %1315 = vmatprep.subr.mxu0 %v6060_v43  ;;  %9495 = vst [vmem:[#allocation37_spill] sm:$0xff] %v6069_v54  ;;  %9496 = vst [vmem:[#allocation38_spill] sm:$0xff] %v6072_v15  ;;  %v6075_v7 = vld [vmem:[#allocation7 + $0x6a0] sm:$0xff]  ;;  %v6078_v43 = vld [vmem:[#allocation7 + $0x670] sm:$0xff] }
 0x2c4   :  { %1357 = vmatpush2.msra.mxu1 %v6063_v2  ;;  %1316 = vmatpush2.msra.mxu0 %v6066_v46  ;;  %9497 = vst [vmem:[#allocation40_spill] sm:$0xff] %v6075_v7  ;;  %9498 = vst [vmem:[#allocation42_spill] sm:$0xff] %v6078_v43  ;;  %v6081_v2 = vld [vmem:[#allocation7 + $0x668] sm:$0xff]  ;;  %v6084_v46 = vld [vmem:[#allocation7 + $0x638] sm:$0xff] }
 0x2c5   :  { %1358 = vmatprep.subr.mxu1 %v6069_v54  ;;  %1395 = vmatprep.subr.mxu0 %v6072_v15  ;;  %9499 = vst [vmem:[#allocation44_spill] sm:$0xff] %v6081_v2  ;;  %9500 = vst [vmem:[#allocation46_spill] sm:$0xff] %v6084_v46  ;;  %v6087_v54 = vld [vmem:[#allocation7 + $0x630] sm:$0xff]  ;;  %v6090_v15 = vld [vmem:[#allocation7 + $0x600] sm:$0xff] }
 0x2c6   :  { %1359 = vmatpush2.msra.mxu1 %v6075_v7  ;;  %9501 = vst [vmem:[#allocation48_spill] sm:$0xff] %v6087_v54  ;;  %9502 = vst [vmem:[#allocation50_spill] sm:$0xff] %v6090_v15  ;;  %v6093_v7 = vld [vmem:[#allocation7 + $0x5f8] sm:$0xff] }
 0x2c7   :  { %1360 = vmatprep.subr.mxu1 %v6078_v43  ;;  %9503 = vst [vmem:[#allocation52_spill] sm:$0xff] %v6093_v7  ;;  %v6096_v43 = vld [vmem:[#allocation7 + $0x5c8] sm:$0xff] }
 0x2c8   :  { %1361 = vmatpush2.msra.mxu1 %v6081_v2  ;;  %9504 = vst [vmem:[#allocation54_spill] sm:$0xff] %v6096_v43  ;;  %v6099_v2 = vld [vmem:[#allocation7 + $0x5c0] sm:$0xff] }
 0x2c9   :  { %1362 = vmatprep.subr.mxu1 %v6084_v46  ;;  %9505 = vst [vmem:[#allocation56_spill] sm:$0xff] %v6099_v2  ;;  %v6102_v46 = vld [vmem:[#allocation7 + $0x590] sm:$0xff] }
 0x2ca   :  { %1363 = vmatpush2.msra.mxu1 %v6087_v54  ;;  %9506 = vst [vmem:[#allocation58_spill] sm:$0xff] %v6102_v46  ;;  %v6105_v54 = vld [vmem:[#allocation7 + $0x588] sm:$0xff] }
 0x2cb   :  { %1364 = vmatprep.subr.mxu1 %v6090_v15  ;;  %9507 = vst [vmem:[#allocation60_spill] sm:$0xff] %v6105_v54  ;;  %v6108_v15 = vld [vmem:[#allocation7 + $0x558] sm:$0xff] }
 0x2cc   :  { %1365 = vmatpush2.msra.mxu1 %v6093_v7  ;;  %9508 = vst [vmem:[#allocation62_spill] sm:$0xff] %v6108_v15  ;;  %v6111_v7 = vld [vmem:[#allocation7 + $0x550] sm:$0xff] }
 0x2cd   :  { %1366 = vmatprep.subr.mxu1 %v6096_v43  ;;  %9509 = vst [vmem:[#allocation64_spill] sm:$0xff] %v6111_v7  ;;  %v6114_v43 = vld [vmem:[#allocation7 + $0x520] sm:$0xff] }
 0x2ce   :  { %1367 = vmatpush2.msra.mxu1 %v6099_v2  ;;  %9510 = vst [vmem:[#allocation66_spill] sm:$0xff] %v6114_v43  ;;  %v6117_v2 = vld [vmem:[#allocation7 + $0x518] sm:$0xff] }
 0x2cf   :  { %1368 = vmatprep.subr.mxu1 %v6102_v46  ;;  %9511 = vst [vmem:[#allocation68_spill] sm:$0xff] %v6117_v2  ;;  %v6120_v46 = vld [vmem:[#allocation7 + $0x4e8] sm:$0xff] }
 0x2d0   :  { %1369 = vmatpush2.msra.mxu1 %v6105_v54  ;;  %9512 = vst [vmem:[#allocation70_spill] sm:$0xff] %v6120_v46  ;;  %v6123_v54 = vld [vmem:[#allocation7 + $0x4e0] sm:$0xff] }
 0x2d1   :  { %1370 = vmatprep.subr.mxu1 %v6108_v15  ;;  %9513 = vst [vmem:[#allocation72_spill] sm:$0xff] %v6123_v54  ;;  %v6126_v15 = vld [vmem:[#allocation7 + $0x4b0] sm:$0xff] }
 0x2d2   :  { %1371 = vmatpush2.msra.mxu1 %v6111_v7  ;;  %9514 = vst [vmem:[#allocation74_spill] sm:$0xff] %v6126_v15  ;;  %v6129_v7 = vld [vmem:[#allocation7 + $0x4a8] sm:$0xff] }
 0x2d3   :  { %1372 = vmatprep.subr.mxu1 %v6114_v43  ;;  %9515 = vst [vmem:[#allocation76_spill] sm:$0xff] %v6129_v7  ;;  %v6132_v43 = vld [vmem:[#allocation7 + $0x478] sm:$0xff] }
 0x2d4   :  { %1373 = vmatpush2.msra.mxu1 %v6117_v2  ;;  %9516 = vst [vmem:[#allocation78_spill] sm:$0xff] %v6132_v43  ;;  %v6135_v2 = vld [vmem:[#allocation7 + $0x470] sm:$0xff] }
 0x2d5   :  { %1374 = vmatprep.subr.mxu1 %v6120_v46  ;;  %9517 = vst [vmem:[#allocation80_spill] sm:$0xff] %v6135_v2  ;;  %v6138_v46 = vld [vmem:[#allocation7 + $0x440] sm:$0xff] }
 0x2d6   :  { %1375 = vmatpush2.msra.mxu1 %v6123_v54  ;;  %9518 = vst [vmem:[#allocation82_spill] sm:$0xff] %v6138_v46  ;;  %v6141_v54 = vld [vmem:[#allocation7 + $0x438] sm:$0xff] }
 0x2d7   :  { %1376 = vmatprep.subr.mxu1 %v6126_v15  ;;  %9519 = vst [vmem:[#allocation84_spill] sm:$0xff] %v6141_v54  ;;  %v6144_v15 = vld [vmem:[#allocation7 + $0x408] sm:$0xff] }
 0x2d8   :  { %1377 = vmatpush2.msra.mxu1 %v6129_v7  ;;  %9520 = vst [vmem:[#allocation86_spill] sm:$0xff] %v6144_v15  ;;  %v6147_v7 = vld [vmem:[#allocation7 + $0x400] sm:$0xff] }
 0x2d9   :  { %1378 = vmatprep.subr.mxu1 %v6132_v43  ;;  %9521 = vst [vmem:[#allocation87_spill] sm:$0xff] %v6147_v7  ;;  %v6150_v43 = vld [vmem:[#allocation7 + $0x3d0] sm:$0xff] }
 0x2da   :  { %1379 = vmatpush2.msra.mxu1 %v6135_v2  ;;  %9522 = vst [vmem:[#allocation88_spill] sm:$0xff] %v6150_v43  ;;  %v6153_v2 = vld [vmem:[#allocation7 + $0x3c8] sm:$0xff] }
 0x2db   :  { %1380 = vmatprep.subr.mxu1 %v6138_v46  ;;  %9523 = vst [vmem:[#allocation89_spill] sm:$0xff] %v6153_v2  ;;  %v6156_v46 = vld [vmem:[#allocation7 + $0x398] sm:$0xff] }
 0x2dc   :  { %1381 = vmatpush2.msra.mxu1 %v6141_v54  ;;  %9524 = vst [vmem:[#allocation90_spill] sm:$0xff] %v6156_v46  ;;  %v6159_v54 = vld [vmem:[#allocation7 + $0x390] sm:$0xff] }
 0x2dd   :  { %1382 = vmatprep.subr.mxu1 %v6144_v15  ;;  %9525 = vst [vmem:[#allocation91_spill] sm:$0xff] %v6159_v54  ;;  %v6162_v15 = vld [vmem:[#allocation7 + $0x6f8] sm:$0xff] }
 0x2de   :  { %1383 = vmatpush2.msra.mxu1 %v6147_v7  ;;  %9526 = vst [vmem:[#allocation92_spill] sm:$0xff] %v6162_v15 }
 0x2df   :  { %1384 = vmatprep.subr.mxu1 %v6150_v43 }
 0x2e0   :  { %1385 = vmatpush2.msra.mxu1 %v6153_v2 }
 0x2e1   :  { %1386 = vmatprep.subr.mxu1 %v6156_v46 }
 0x2e2   :  { %1387 = vmatpush2.msra.mxu1 %v6159_v54 }
 0x2e3   :  { %3578 = vmatprep.subr.mxu1 %v6162_v15 }
 0x322   :  { %v970_v7 = vpop.f32.mrf.mxu1  ;;  %v1041_v53 = vpop.f32.mrf.mxu0 }
 0x323   :  { %v1187_v61 = vadd.f32 %v970_v7, %v9527_v35  ;;  %v1189_v19 = vadd.f32 %v1041_v53, %v9529_v63  ;;  %v1210_v53 = vld [vmem:[#allocation5 + $0x28] sm:$0x30] }
 0x324   :  { %v972_v4 = vpop.f32.mrf.mxu1  ;;  %v1043_v54 = vpop.f32.mrf.mxu0 }
 0x325   :  { %v3476_v43 = vmul.f32 -1.442695, %v1187_v61  ;;  %v1188_v2 = vadd.f32 %v972_v4, %v9528_v39  ;;  %v1190_v42 = vadd.f32 %v1043_v54, %v5696_v58  ;;  %v9530_v39 = vld [vmem:[#allocation51_spill] sm:$0xff] }
 0x327   :  { %3886 = vpow2.f32 %v3476_v43  ;;  %v3477_v29 = vmul.f32 -1.442695, %v1188_v2 }
 0x329   :  { %3888 = vpow2.f32 %v3477_v29 }
 0x334   :  { %v3887_v37 = vpop.eup %3886 }
 0x335   :  { %v1194_v46 = vadd.f32 1.0, %v3887_v37 }
 0x336   :  { %v3889_v41 = vpop.eup %3888 }
 0x337   :  { %3890 = vrcp.f32 %v1194_v46  ;;  %v1200_v48 = vadd.f32 1.0, %v3889_v41 }
 0x339   :  { %3892 = vrcp.f32 %v1200_v48 }
 0x344   :  { %v3891_v15 = vpop.eup %3890 }
 0x345   :  { %v1203_v61 = vmul.f32 %v3891_v15, %v1190_v42 }
 0x346   :  { %v3893_v43 = vpop.eup %3892 }
 0x347   :  { %v1204_v7 = vadd.f32 %v1203_v61, %v1189_v19  ;;  %v1206_v4 = vsub.f32 1.0, %v3893_v43  ;;  %v1208_v37 = vmul.f32 %v3893_v43, %v9530_v39  ;;  %v1211_v61 = vld [vmem:[#allocation5 + $0x10] sm:$0x30] }
 0x349   :  { %3894 = vtanh.f32 %v1204_v7 }
 0x356   :  { %v3895_v2 = vpop.eup %3894 }
 0x357   :  { %v1207_v29 = vmul.f32 %v3895_v2, %v1206_v4  ;;  %v3575_v2 = vpop.f32.mrf.mxu0 }
 0x359   :  { %v6170_v46 = vadd.f32 %v1208_v37, %v1207_v29  ;;  %v3576_v37 = vpop.f32.mrf.mxu0 }
 0x35b   :  { %9531 = vst [vmem:[#allocation93_spill] sm:$0xff] %v6170_v46  ;;  %v1247_v35 = vrot.slane %v6170_v46, 4 }
 0x35d   :  { %v1250_v41 = vrot.slane %v1247_v35, 4  ;;  %v3577_v35 = vadd.f32 %v3576_v37, %v3575_v2 }
 0x35f   :  { %1317 = vmatprep.mubr.f32.mxu0 %v1250_v41  ;;  %1388 = vmatprep.mubr.f32.mxu1 %v1250_v41 }
 0x363   :  { %v1112_v54 = vpop.f32.mrf.mxu1 }
 0x364   :  { %v1214_v58 = vrot.slane %v1112_v54, 4  ;;  %v6176_v54 = vld [vmem:[%s8599_s3] ss:$0 sm:$0xff] }
 0x365   :  { %v1114_v48 = vpop.f32.mrf.mxu1 }
 0x366   :  { %v1216_v42 = vadd.f32 %v1214_v58, %v1210_v53  ;;  %v1224_v15 = vrot.slane %v1114_v48, 4  ;;  %v1233_v58 = vadd.f32 %v6176_v54, %v3577_v35  ;;  %v6190_v35 = vld [vmem:[#allocation7 + $0x378] sm:$0xff] }
 0x368   :  { %v3478_v19 = vmul.f32 -1.442695, %v1216_v42  ;;  %v1226_v7 = vadd.f32 %v1224_v15, %v1211_v61  ;;  %v1235_v48 = vrot.slane %v1233_v58, 4  ;;  %v1212_v15 = vld [vmem:[#allocation5 + $0x8] sm:$0x30]  ;;  %v6196_v58 = vld [vmem:[#allocation7 + $0x6c0] sm:$0xff] }
 0x36a   :  { %3896 = vpow2.f32 %v3478_v19  ;;  %v3479_v4 = vmul.f32 -1.442695, %v1226_v7 }
 0x36c   :  { %3898 = vpow2.f32 %v3479_v4  ;;  %v1242_v4 = vrot.slane %v5710_v1, 6  ;;  %v6193_v1 = vld [vmem:[#allocation7 + $0x338] sm:$0xff] }
 0x377   :  { %v3897_v43 = vpop.eup %3896 }
 0x378   :  { %v1220_v29 = vadd.f32 1.0, %v3897_v43 }
 0x379   :  { %v3899_v39 = vpop.eup %3898 }
 0x37a   :  { %3900 = vrcp.f32 %v1220_v29  ;;  %v1230_v53 = vadd.f32 1.0, %v3899_v39  ;;  %v6187_v39 = vld [vmem:[#allocation7 + $0x368] sm:$0xff] }
 0x37c   :  { %3902 = vrcp.f32 %v1230_v53  ;;  %v6199_v53 = vld [vmem:[#allocation7 + $0x330] sm:$0xff] }
 0x387   :  { %v3901_v42 = vpop.eup %3900 }
 0x388   :  { %v1237_v19 = vmul.f32 %v3901_v42, %v1235_v48  ;;  %v6202_v48 = vld [vmem:[#allocation7 + $0x340] sm:$0xff] }
 0x389   :  { %v3903_v7 = vpop.eup %3902  ;;  %v6205_v42 = vld [vmem:[#allocation7 + $0x300] sm:$0xff] }
 0x38a   :  { %v1238_v61 = vadd.f32 %v1237_v19, %v1212_v15  ;;  %v1240_v43 = vsub.f32 1.0, %v3903_v7  ;;  %v1244_v37 = vmul.f32 %v3903_v7, %v1242_v4  ;;  %v6208_v19 = vld [vmem:[#allocation7 + $0x688] sm:$0xff]  ;;  %v6211_v15 = vld [vmem:[#allocation7 + $0x2f8] sm:$0xff]  ;;  %v6220_v7 = vld [vmem:[#allocation7 + $0x650] sm:$0xff] }
 0x38b   :  { %9532 = vst [vmem:[#allocation94_spill] sm:$0xff] %v6220_v7  ;;  %v6223_v4 = vld [vmem:[#allocation7 + $0x2c0] sm:$0xff] }
 0x38c   :  { %3904 = vtanh.f32 %v1238_v61  ;;  %v6217_v61 = vld [vmem:[#allocation7 + $0x2c8] sm:$0xff]  ;;  %9533 = vst [vmem:[#allocation95_spill] sm:$0xff] %v6223_v4 }
 0x399   :  { %v3905_v2 = vpop.eup %3904 }
 0x39a   :  { %v1241_v29 = vmul.f32 %v3905_v2, %v1240_v43  ;;  %v6226_v43 = vld [vmem:[#allocation7 + $0x2d0] sm:$0xff] }
 0x39b   :  { %9534 = vst [vmem:[#allocation96_spill] sm:$0xff] %v6226_v43  ;;  %v6229_v2 = vld [vmem:[#allocation7 + $0x290] sm:$0xff] }
 0x39c   :  { %v6180_v46 = vadd.f32 %v1244_v37, %v1241_v29  ;;  %9535 = vst [vmem:[#allocation97_spill] sm:$0xff] %v6229_v2  ;;  %v6232_v29 = vld [vmem:[#allocation7 + $0x618] sm:$0xff]  ;;  %v6235_v37 = vld [vmem:[#allocation7 + $0x288] sm:$0xff] }
 0x39d   :  { %9536 = vst [vmem:[#allocation98_spill] sm:$0xff] %v6232_v29  ;;  %9537 = vst [vmem:[#allocation99_spill] sm:$0xff] %v6235_v37 }
 0x39e   :  { %v6183_v63 = vrot.slane %v6180_v46, 4 }
 0x3a0   :  { %1318 = vmatmul.mubr.f32.vlgmr.msra.gmra.mxu0 %v6183_v63  ;;  %1389 = vmatmul.mubr.f32.vlgmr.msra.gmra.mxu1 %v6183_v63 }
 0x3a1   :  { %1396 = vmatpush1.msra.mxu0 %v6187_v39  ;;  %3579 = vmatpush3.msra.mxu1 %v6190_v35 }
 0x3a2   :  { %1397 = vmatprep.subr.mxu0 %v6193_v1  ;;  %1459 = vmatprep.mubr.f32.mxu0 %v1250_v41 }
 0x3a3   :  { %3580 = vmatprep.subr.mxu1 %v6196_v58  ;;  %1530 = vmatprep.mubr.f32.mxu1 %v1250_v41  ;;  %v6214_v41 = vld [vmem:[#allocation7 + $0x308] sm:$0xff] }
 0x3a4   :  { %1398 = vmatpush1.msra.mxu0 %v6199_v53  ;;  %3581 = vmatpush3.msra.mxu1 %v6202_v48 }
 0x3a5   :  { %1399 = vmatprep.subr.mxu0 %v6205_v42  ;;  %3582 = vmatprep.subr.mxu1 %v6208_v19 }
 0x3a6   :  { %1400 = vmatpush1.msra.mxu0 %v6211_v15  ;;  %3583 = vmatpush3.msra.mxu1 %v6214_v41 }
 0x3a7   :  { %1401 = vmatprep.subr.mxu0 %v6217_v61  ;;  %3584 = vmatprep.subr.mxu1 %v6220_v7  ;;  %v6238_v7 = vld [vmem:[#allocation7 + $0x298] sm:$0xff] }
 0x3a8   :  { %1402 = vmatpush1.msra.mxu0 %v6223_v4  ;;  %3585 = vmatpush3.msra.mxu1 %v6226_v43  ;;  %9538 = vst [vmem:[#allocation100_spill] sm:$0xff] %v6238_v7  ;;  %v6241_v4 = vld [vmem:[#allocation7 + $0x258] sm:$0xff]  ;;  %v6244_v43 = vld [vmem:[#allocation7 + $0x5e0] sm:$0xff] }
 0x3a9   :  { %1403 = vmatprep.subr.mxu0 %v6229_v2  ;;  %3586 = vmatprep.subr.mxu1 %v6232_v29  ;;  %9539 = vst [vmem:[#allocation101_spill] sm:$0xff] %v6241_v4  ;;  %9540 = vst [vmem:[#allocation102_spill] sm:$0xff] %v6244_v43  ;;  %v6247_v2 = vld [vmem:[#allocation7 + $0x250] sm:$0xff]  ;;  %v6250_v29 = vld [vmem:[#allocation7 + $0x260] sm:$0xff] }
 0x3aa   :  { %1404 = vmatpush1.msra.mxu0 %v6235_v37  ;;  %3587 = vmatpush3.msra.mxu1 %v6238_v7  ;;  %9541 = vst [vmem:[#allocation103_spill] sm:$0xff] %v6247_v2  ;;  %9542 = vst [vmem:[#allocation104_spill] sm:$0xff] %v6250_v29  ;;  %v6253_v37 = vld [vmem:[#allocation7 + $0x220] sm:$0xff]  ;;  %v6256_v7 = vld [vmem:[#allocation7 + $0x5a8] sm:$0xff] }
 0x3ab   :  { %1405 = vmatprep.subr.mxu0 %v6241_v4  ;;  %3588 = vmatprep.subr.mxu1 %v6244_v43  ;;  %9543 = vst [vmem:[#allocation105_spill] sm:$0xff] %v6253_v37  ;;  %9544 = vst [vmem:[#allocation106_spill] sm:$0xff] %v6256_v7  ;;  %v6259_v4 = vld [vmem:[#allocation7 + $0x218] sm:$0xff]  ;;  %v6262_v43 = vld [vmem:[#allocation7 + $0x228] sm:$0xff] }
 0x3ac   :  { %1406 = vmatpush1.msra.mxu0 %v6247_v2  ;;  %3589 = vmatpush3.msra.mxu1 %v6250_v29  ;;  %9545 = vst [vmem:[#allocation107_spill] sm:$0xff] %v6259_v4  ;;  %9546 = vst [vmem:[#allocation108_spill] sm:$0xff] %v6262_v43  ;;  %v6265_v2 = vld [vmem:[#allocation7 + $0x1e8] sm:$0xff]  ;;  %v6268_v29 = vld [vmem:[#allocation7 + $0x570] sm:$0xff] }
 0x3ad   :  { %1407 = vmatprep.subr.mxu0 %v6253_v37  ;;  %3590 = vmatprep.subr.mxu1 %v6256_v7  ;;  %9547 = vst [vmem:[#allocation109_spill] sm:$0xff] %v6265_v2  ;;  %9548 = vst [vmem:[#allocation110_spill] sm:$0xff] %v6268_v29  ;;  %v6271_v37 = vld [vmem:[#allocation7 + $0x1e0] sm:$0xff]  ;;  %v6274_v7 = vld [vmem:[#allocation7 + $0x1f0] sm:$0xff] }
 0x3ae   :  { %1408 = vmatpush1.msra.mxu0 %v6259_v4  ;;  %3591 = vmatpush3.msra.mxu1 %v6262_v43  ;;  %9549 = vst [vmem:[#allocation111_spill] sm:$0xff] %v6271_v37  ;;  %9550 = vst [vmem:[#allocation112_spill] sm:$0xff] %v6274_v7  ;;  %v6277_v4 = vld [vmem:[#allocation7 + $0x1b0] sm:$0xff]  ;;  %v6280_v43 = vld [vmem:[#allocation7 + $0x538] sm:$0xff] }
 0x3af   :  { %1409 = vmatprep.subr.mxu0 %v6265_v2  ;;  %3592 = vmatprep.subr.mxu1 %v6268_v29  ;;  %9551 = vst [vmem:[#allocation113_spill] sm:$0xff] %v6277_v4  ;;  %9552 = vst [vmem:[#allocation114_spill] sm:$0xff] %v6280_v43  ;;  %v6283_v2 = vld [vmem:[#allocation7 + $0x1a8] sm:$0xff]  ;;  %v6286_v29 = vld [vmem:[#allocation7 + $0x1b8] sm:$0xff] }
 0x3b0   :  { %1410 = vmatpush1.msra.mxu0 %v6271_v37  ;;  %3593 = vmatpush3.msra.mxu1 %v6274_v7  ;;  %9553 = vst [vmem:[#allocation115_spill] sm:$0xff] %v6283_v2  ;;  %9554 = vst [vmem:[#allocation116_spill] sm:$0xff] %v6286_v29  ;;  %v6289_v37 = vld [vmem:[#allocation7 + $0x178] sm:$0xff]  ;;  %v6292_v7 = vld [vmem:[#allocation7 + $0x500] sm:$0xff] }
 0x3b1   :  { %1411 = vmatprep.subr.mxu0 %v6277_v4  ;;  %3594 = vmatprep.subr.mxu1 %v6280_v43  ;;  %9555 = vst [vmem:[#allocation117_spill] sm:$0xff] %v6289_v37  ;;  %9556 = vst [vmem:[#allocation118_spill] sm:$0xff] %v6292_v7  ;;  %v6295_v4 = vld [vmem:[#allocation7 + $0x170] sm:$0xff]  ;;  %v6298_v43 = vld [vmem:[#allocation7 + $0x180] sm:$0xff] }
 0x3b2   :  { %1412 = vmatpush1.msra.mxu0 %v6283_v2  ;;  %3595 = vmatpush3.msra.mxu1 %v6286_v29  ;;  %9557 = vst [vmem:[#allocation119_spill] sm:$0xff] %v6295_v4  ;;  %9558 = vst [vmem:[#allocation120_spill] sm:$0xff] %v6298_v43  ;;  %v6301_v2 = vld [vmem:[#allocation7 + $0x140] sm:$0xff]  ;;  %v6304_v29 = vld [vmem:[#allocation7 + $0x4c8] sm:$0xff] }
 0x3b3   :  { %1413 = vmatprep.subr.mxu0 %v6289_v37  ;;  %3596 = vmatprep.subr.mxu1 %v6292_v7  ;;  %9559 = vst [vmem:[#allocation121_spill] sm:$0xff] %v6301_v2  ;;  %9560 = vst [vmem:[#allocation122_spill] sm:$0xff] %v6304_v29  ;;  %v6307_v37 = vld [vmem:[#allocation7 + $0x138] sm:$0xff]  ;;  %v6310_v7 = vld [vmem:[#allocation7 + $0x148] sm:$0xff] }
 0x3b4   :  { %1414 = vmatpush1.msra.mxu0 %v6295_v4  ;;  %3597 = vmatpush3.msra.mxu1 %v6298_v43  ;;  %9561 = vst [vmem:[#allocation123_spill] sm:$0xff] %v6307_v37  ;;  %9562 = vst [vmem:[#allocation124_spill] sm:$0xff] %v6310_v7  ;;  %v6313_v4 = vld [vmem:[#allocation7 + $0x108] sm:$0xff]  ;;  %v6316_v43 = vld [vmem:[#allocation7 + $0x490] sm:$0xff] }
 0x3b5   :  { %1415 = vmatprep.subr.mxu0 %v6301_v2  ;;  %3598 = vmatprep.subr.mxu1 %v6304_v29  ;;  %9563 = vst [vmem:[#allocation125_spill] sm:$0xff] %v6313_v4  ;;  %9564 = vst [vmem:[#allocation126_spill] sm:$0xff] %v6316_v43  ;;  %v6319_v2 = vld [vmem:[#allocation7 + $0x100] sm:$0xff]  ;;  %v6322_v29 = vld [vmem:[#allocation7 + $0x110] sm:$0xff] }
 0x3b6   :  { %1416 = vmatpush1.msra.mxu0 %v6307_v37  ;;  %3599 = vmatpush3.msra.mxu1 %v6310_v7  ;;  %9565 = vst [vmem:[#allocation127_spill] sm:$0xff] %v6319_v2  ;;  %9566 = vst [vmem:[#allocation128_spill] sm:$0xff] %v6322_v29  ;;  %v6325_v37 = vld [vmem:[#allocation7 + $0xd0] sm:$0xff]  ;;  %v6328_v7 = vld [vmem:[#allocation7 + $0x458] sm:$0xff] }
 0x3b7   :  { %1417 = vmatprep.subr.mxu0 %v6313_v4  ;;  %3600 = vmatprep.subr.mxu1 %v6316_v43  ;;  %9567 = vst [vmem:[#allocation129_spill] sm:$0xff] %v6325_v37  ;;  %9568 = vst [vmem:[#allocation130_spill] sm:$0xff] %v6328_v7  ;;  %v6331_v4 = vld [vmem:[#allocation7 + $0xc8] sm:$0xff]  ;;  %v6334_v43 = vld [vmem:[#allocation7 + $0xd8] sm:$0xff] }
 0x3b8   :  { %1418 = vmatpush1.msra.mxu0 %v6319_v2  ;;  %3601 = vmatpush3.msra.mxu1 %v6322_v29  ;;  %9569 = vst [vmem:[#allocation131_spill] sm:$0xff] %v6331_v4  ;;  %9570 = vst [vmem:[#allocation132_spill] sm:$0xff] %v6334_v43  ;;  %v6337_v2 = vld [vmem:[#allocation7 + $0x98] sm:$0xff]  ;;  %v6340_v29 = vld [vmem:[#allocation7 + $0x420] sm:$0xff] }
 0x3b9   :  { %1419 = vmatprep.subr.mxu0 %v6325_v37  ;;  %3602 = vmatprep.subr.mxu1 %v6328_v7  ;;  %9571 = vst [vmem:[#allocation133_spill] sm:$0xff] %v6337_v2  ;;  %9572 = vst [vmem:[#allocation134_spill] sm:$0xff] %v6340_v29  ;;  %v6343_v37 = vld [vmem:[#allocation7 + $0x90] sm:$0xff]  ;;  %v6346_v7 = vld [vmem:[#allocation7 + $0xa0] sm:$0xff] }
 0x3ba   :  { %1420 = vmatpush1.msra.mxu0 %v6331_v4  ;;  %3603 = vmatpush3.msra.mxu1 %v6334_v43  ;;  %9573 = vst [vmem:[#allocation135_spill] sm:$0xff] %v6343_v37  ;;  %9574 = vst [vmem:[#allocation136_spill] sm:$0xff] %v6346_v7  ;;  %v6349_v4 = vld [vmem:[#allocation7 + $0x60] sm:$0xff]  ;;  %v6352_v43 = vld [vmem:[#allocation7 + $0x3e8] sm:$0xff] }
 0x3bb   :  { %1421 = vmatprep.subr.mxu0 %v6337_v2  ;;  %3604 = vmatprep.subr.mxu1 %v6340_v29  ;;  %9575 = vst [vmem:[#allocation137_spill] sm:$0xff] %v6349_v4  ;;  %9576 = vst [vmem:[#allocation138_spill] sm:$0xff] %v6352_v43  ;;  %v6355_v2 = vld [vmem:[#allocation7 + $0x58] sm:$0xff]  ;;  %v6358_v29 = vld [vmem:[#allocation7 + $0x68] sm:$0xff] }
 0x3bc   :  { %1422 = vmatpush1.msra.mxu0 %v6343_v37  ;;  %3605 = vmatpush3.msra.mxu1 %v6346_v7  ;;  %9577 = vst [vmem:[#allocation139_spill] sm:$0xff] %v6355_v2  ;;  %9578 = vst [vmem:[#allocation140_spill] sm:$0xff] %v6358_v29  ;;  %v6361_v37 = vld [vmem:[#allocation7 + $0x28] sm:$0xff]  ;;  %v6364_v7 = vld [vmem:[#allocation7 + $0x3b0] sm:$0xff] }
 0x3bd   :  { %1423 = vmatprep.subr.mxu0 %v6349_v4  ;;  %3606 = vmatprep.subr.mxu1 %v6352_v43  ;;  %9579 = vst [vmem:[#allocation141_spill] sm:$0xff] %v6364_v7  ;;  %v6367_v4 = vld [vmem:[#allocation7 + $0x20] sm:$0xff]  ;;  %v6370_v43 = vld [vmem:[#allocation7 + $0x30] sm:$0xff] }
 0x3be   :  { %1424 = vmatpush1.msra.mxu0 %v6355_v2  ;;  %3607 = vmatpush3.msra.mxu1 %v6358_v29  ;;  %9580 = vst [vmem:[#allocation142_spill] sm:$0xff] %v6367_v4  ;;  %v6373_v2 = vld [vmem:[#allocation7 + $0x6f0] sm:$0xff]  ;;  %v6377_v29 = vld [vmem:[#allocation7 + $0x6e8] sm:$0xff] }
 0x3bf   :  { %1425 = vmatprep.subr.mxu0 %v6361_v37  ;;  %3608 = vmatprep.subr.mxu1 %v6364_v7  ;;  %9581 = vst [vmem:[#allocation143_spill] sm:$0xff] %v6373_v2  ;;  %9582 = vst [vmem:[#allocation144_spill] sm:$0xff] %v6377_v29  ;;  %v6381_v7 = vld [vmem:[#allocation7 + $0x6b8] sm:$0xff] }
 0x3c0   :  { %1426 = vmatpush1.msra.mxu0 %v6367_v4  ;;  %3609 = vmatpush3.msra.mxu1 %v6370_v43  ;;  %v6385_v4 = vld [vmem:[#allocation7 + $0x6b0] sm:$0xff] }
 0x3c1   :  { %1427 = vmatprep.subr.mxu0 %v6373_v2  ;;  %1531 = vmatmul.mubr.f32.vlgmr.msra.gmra.mxu1 %v6183_v63  ;;  %v6389_v2 = vld [vmem:[#allocation7 + $0x680] sm:$0xff] }
 0x3c2   :  { %1428 = vmatpush2.msra.mxu0 %v6377_v29  ;;  %1602 = vmatprep.subr.mxu1 %v5782_v51  ;;  %v6393_v29 = vld [vmem:[#allocation7 + $0x678] sm:$0xff]  ;;  %v6397_v51 = vld [vmem:[#allocation7 + $0x648] sm:$0xff] }
 0x3c3   :  { %1429 = vmatprep.subr.mxu0 %v6381_v7  ;;  %1603 = vmatpush1.msra.mxu1 %v5786_v59  ;;  %v6401_v59 = vld [vmem:[#allocation7 + $0x640] sm:$0xff] }
 0x3c4   :  { %1430 = vmatpush2.msra.mxu0 %v6385_v4  ;;  %1604 = vmatprep.subr.mxu1 %v5790_v55  ;;  %v6405_v55 = vld [vmem:[#allocation7 + $0x610] sm:$0xff] }
 0x3c5   :  { %1431 = vmatprep.subr.mxu0 %v6389_v2  ;;  %1605 = vmatpush1.msra.mxu1 %v5794_v56  ;;  %v6409_v56 = vld [vmem:[#allocation7 + $0x608] sm:$0xff] }
 0x3c6   :  { %1432 = vmatpush2.msra.mxu0 %v6393_v29  ;;  %1606 = vmatprep.subr.mxu1 %v5798_v3  ;;  %v6413_v3 = vld [vmem:[#allocation7 + $0x5d8] sm:$0xff] }
 0x3c7   :  { %1433 = vmatprep.subr.mxu0 %v6397_v51  ;;  %1607 = vmatpush1.msra.mxu1 %v5802_v57  ;;  %v6417_v57 = vld [vmem:[#allocation7 + $0x5d0] sm:$0xff] }
 0x3c8   :  { %1434 = vmatpush2.msra.mxu0 %v6401_v59  ;;  %1608 = vmatprep.subr.mxu1 %v5806_v17  ;;  %v6421_v17 = vld [vmem:[#allocation7 + $0x5a0] sm:$0xff] }
 0x3c9   :  { %1435 = vmatprep.subr.mxu0 %v6405_v55  ;;  %1609 = vmatpush1.msra.mxu1 %v5810_v47  ;;  %v6425_v47 = vld [vmem:[#allocation7 + $0x598] sm:$0xff] }
 0x3ca   :  { %1436 = vmatpush2.msra.mxu0 %v6409_v56  ;;  %1610 = vmatprep.subr.mxu1 %v5814_v5  ;;  %v6429_v5 = vld [vmem:[#allocation7 + $0x568] sm:$0xff] }
 0x3cb   :  { %1437 = vmatprep.subr.mxu0 %v6413_v3  ;;  %1611 = vmatpush1.msra.mxu1 %v5818_v45  ;;  %v6433_v45 = vld [vmem:[#allocation7 + $0x560] sm:$0xff] }
 0x3cc   :  { %1438 = vmatpush2.msra.mxu0 %v6417_v57  ;;  %1612 = vmatprep.subr.mxu1 %v5822_v9  ;;  %v6437_v9 = vld [vmem:[#allocation7 + $0x530] sm:$0xff] }
 0x3cd   :  { %1439 = vmatprep.subr.mxu0 %v6421_v17  ;;  %1613 = vmatpush1.msra.mxu1 %v5826_v25  ;;  %v6441_v25 = vld [vmem:[#allocation7 + $0x528] sm:$0xff] }
 0x3ce   :  { %1440 = vmatpush2.msra.mxu0 %v6425_v47  ;;  %1614 = vmatprep.subr.mxu1 %v5830_v13  ;;  %v6445_v13 = vld [vmem:[#allocation7 + $0x4f8] sm:$0xff] }
 0x3cf   :  { %1441 = vmatprep.subr.mxu0 %v6429_v5  ;;  %1615 = vmatpush1.msra.mxu1 %v5834_v6  ;;  %v6449_v6 = vld [vmem:[#allocation7 + $0x4f0] sm:$0xff] }
 0x3d0   :  { %1442 = vmatpush2.msra.mxu0 %v6433_v45  ;;  %1616 = vmatprep.subr.mxu1 %v5838_v8  ;;  %v6453_v8 = vld [vmem:[#allocation7 + $0x4c0] sm:$0xff] }
 0x3d1   :  { %1443 = vmatprep.subr.mxu0 %v6437_v9  ;;  %1617 = vmatpush1.msra.mxu1 %v5842_v10  ;;  %v6457_v10 = vld [vmem:[#allocation7 + $0x4b8] sm:$0xff] }
 0x3d2   :  { %1444 = vmatpush2.msra.mxu0 %v6441_v25  ;;  %1618 = vmatprep.subr.mxu1 %v5846_v12  ;;  %v6461_v12 = vld [vmem:[#allocation7 + $0x488] sm:$0xff] }
 0x3d3   :  { %1445 = vmatprep.subr.mxu0 %v6445_v13  ;;  %1619 = vmatpush1.msra.mxu1 %v5850_v14  ;;  %v6465_v14 = vld [vmem:[#allocation7 + $0x480] sm:$0xff] }
 0x3d4   :  { %1446 = vmatpush2.msra.mxu0 %v6449_v6  ;;  %1620 = vmatprep.subr.mxu1 %v5854_v16  ;;  %v6469_v16 = vld [vmem:[#allocation7 + $0x450] sm:$0xff] }
 0x3d5   :  { %1447 = vmatprep.subr.mxu0 %v6453_v8  ;;  %1621 = vmatpush1.msra.mxu1 %v5858_v18  ;;  %v6473_v18 = vld [vmem:[#allocation7 + $0x448] sm:$0xff] }
 0x3d6   :  { %1448 = vmatpush2.msra.mxu0 %v6457_v10  ;;  %1622 = vmatprep.subr.mxu1 %v5862_v20  ;;  %v6477_v20 = vld [vmem:[#allocation7 + $0x418] sm:$0xff] }
 0x3d7   :  { %1449 = vmatprep.subr.mxu0 %v6461_v12  ;;  %1623 = vmatpush1.msra.mxu1 %v5866_v22  ;;  %v6481_v22 = vld [vmem:[#allocation7 + $0x410] sm:$0xff] }
 0x3d8   :  { %1450 = vmatpush2.msra.mxu0 %v6465_v14  ;;  %1624 = vmatprep.subr.mxu1 %v5870_v24  ;;  %v6485_v24 = vld [vmem:[#allocation7 + $0x3e0] sm:$0xff] }
 0x3d9   :  { %1451 = vmatprep.subr.mxu0 %v6469_v16  ;;  %1625 = vmatpush1.msra.mxu1 %v5874_v26  ;;  %v6489_v26 = vld [vmem:[#allocation7 + $0x3d8] sm:$0xff] }
 0x3da   :  { %1452 = vmatpush2.msra.mxu0 %v6473_v18  ;;  %1626 = vmatprep.subr.mxu1 %v5878_v28  ;;  %v6493_v28 = vld [vmem:[#allocation7 + $0x3a8] sm:$0xff] }
 0x3db   :  { %1453 = vmatprep.subr.mxu0 %v6477_v20  ;;  %1627 = vmatpush1.msra.mxu1 %v5882_v30  ;;  %v6497_v30 = vld [vmem:[#allocation7 + $0x3a0] sm:$0xff] }
 0x3dc   :  { %1454 = vmatpush2.msra.mxu0 %v6481_v22  ;;  %1628 = vmatprep.subr.mxu1 %v5886_v32  ;;  %9583 = vst [vmem:[#allocation145_spill] sm:$0xff] %v6497_v30  ;;  %v6502_v32 = vld [vmem:[#allocation7 + $0x360] sm:$0xff] }
 0x3dd   :  { %1455 = vmatprep.subr.mxu0 %v6485_v24  ;;  %1629 = vmatpush1.msra.mxu1 %v5890_v34  ;;  %9584 = vst [vmem:[#allocation146_spill] sm:$0xff] %v6502_v32  ;;  %v6505_v34 = vld [vmem:[#allocation7 + $0x358] sm:$0xff] }
 0x3de   :  { %1456 = vmatpush2.msra.mxu0 %v6489_v26  ;;  %1630 = vmatprep.subr.mxu1 %v5894_v36  ;;  %9585 = vst [vmem:[#allocation147_spill] sm:$0xff] %v6505_v34  ;;  %v6509_v36 = vld [vmem:[#allocation7 + $0x328] sm:$0xff] }
 0x3df   :  { %1457 = vmatprep.subr.mxu0 %v6493_v28  ;;  %1631 = vmatpush1.msra.mxu1 %v5898_v38  ;;  %9586 = vst [vmem:[#allocation148_spill] sm:$0xff] %v6509_v36  ;;  %v6513_v38 = vld [vmem:[#allocation7 + $0x320] sm:$0xff] }
 0x3e0   :  { %1458 = vmatpush2.msra.mxu0 %v6497_v30  ;;  %1632 = vmatprep.subr.mxu1 %v5902_v40  ;;  %9587 = vst [vmem:[#allocation149_spill] sm:$0xff] %v6513_v38  ;;  %v6517_v40 = vld [vmem:[#allocation7 + $0x2f0] sm:$0xff] }
 0x3e1   :  { %1460 = vmatmul.mubr.f32.vlgmr.msra.gmra.mxu0 %v6183_v63  ;;  %1673 = vmatprep.subr.mxu0 %v6502_v32  ;;  %9588 = vst [vmem:[#allocation150_spill] sm:$0xff] %v6517_v40  ;;  %v6521_v63 = vld [vmem:[#allocation7 + $0x2e8] sm:$0xff] }
 0x3e2   :  { %1674 = vmatpush1.msra.mxu0 %v6505_v34  ;;  %1633 = vmatpush1.msra.mxu1 %v5908_v44  ;;  %9589 = vst [vmem:[#allocation151_spill] sm:$0xff] %v6521_v63  ;;  %v6525_v44 = vld [vmem:[#allocation7 + $0x2b8] sm:$0xff] }
 0x3e3   :  { %1675 = vmatprep.subr.mxu0 %v6509_v36  ;;  %1634 = vmatprep.subr.mxu1 %v5912_v52  ;;  %9590 = vst [vmem:[#allocation152_spill] sm:$0xff] %v6525_v44  ;;  %v6529_v52 = vld [vmem:[#allocation7 + $0x2b0] sm:$0xff]  ;;  %v9673_v34 = vld [vmem:[#allocation17_spill] sm:$0xff] }
 0x3e4   :  { %1676 = vmatpush1.msra.mxu0 %v6513_v38  ;;  %1635 = vmatpush2.msra.mxu1 %v5916_v21  ;;  %9591 = vst [vmem:[#allocation153_spill] sm:$0xff] %v6529_v52  ;;  %v6533_v21 = vld [vmem:[#allocation7 + $0x280] sm:$0xff] }
 0x3e5   :  { %1677 = vmatprep.subr.mxu0 %v6517_v40  ;;  %1636 = vmatprep.subr.mxu1 %v5920_v50  ;;  %9592 = vst [vmem:[#allocation39_spill] sm:$0xff] %v6533_v21  ;;  %v6537_v50 = vld [vmem:[#allocation7 + $0x278] sm:$0xff] }
 0x3e6   :  { %1678 = vmatpush1.msra.mxu0 %v6521_v63  ;;  %1637 = vmatpush2.msra.mxu1 %v5924_v49  ;;  %9593 = vst [vmem:[#allocation41_spill] sm:$0xff] %v6537_v50  ;;  %v6541_v49 = vld [vmem:[#allocation7 + $0x248] sm:$0xff] }
 0x3e7   :  { %1679 = vmatprep.subr.mxu0 %v6525_v44  ;;  %1638 = vmatprep.subr.mxu1 %v5928_v31  ;;  %9594 = vst [vmem:[#allocation43_spill] sm:$0xff] %v6541_v49  ;;  %v6545_v31 = vld [vmem:[#allocation7 + $0x240] sm:$0xff] }
 0x3e8   :  { %1680 = vmatpush1.msra.mxu0 %v6529_v52  ;;  %1639 = vmatpush2.msra.mxu1 %v5932_v33  ;;  %9595 = vst [vmem:[#allocation45_spill] sm:$0xff] %v6545_v31  ;;  %v6549_v33 = vld [vmem:[#allocation7 + $0x210] sm:$0xff] }
 0x3e9   :  { %1681 = vmatprep.subr.mxu0 %v6533_v21  ;;  %1640 = vmatprep.subr.mxu1 %v5936_v60  ;;  %9596 = vst [vmem:[#allocation154_spill] sm:$0xff] %v6549_v33  ;;  %v6553_v60 = vld [vmem:[#allocation7 + $0x208] sm:$0xff]  ;;  %v9616_v21 = vld [vmem:[#allocation65_spill] sm:$0xff] }
 0x3ea   :  { %1682 = vmatpush1.msra.mxu0 %v6537_v50  ;;  %1641 = vmatpush2.msra.mxu1 %v5940_v0  ;;  %9597 = vst [vmem:[#allocation155_spill] sm:$0xff] %v6553_v60  ;;  %v6557_v0 = vld [vmem:[#allocation7 + $0x1d8] sm:$0xff]  ;;  %v9613_v50 = vld [vmem:[#allocation23_spill] sm:$0xff] }
 0x3eb   :  { %1683 = vmatprep.subr.mxu0 %v6541_v49  ;;  %1642 = vmatprep.subr.mxu1 %v5944_v27  ;;  %9598 = vst [vmem:[#allocation156_spill] sm:$0xff] %v6557_v0  ;;  %v9599_v27 = vld [vmem:[#allocation18_spill] sm:$0xff]  ;;  %v9610_v49 = vld [vmem:[#allocation59_spill] sm:$0xff] }
 0x3ec   :  { %1684 = vmatpush1.msra.mxu0 %v6545_v31  ;;  %1643 = vmatpush2.msra.mxu1 %v5948_v23  ;;  %v6561_v31 = vld [vmem:[#allocation7 + $0x1d0] sm:$0xff]  ;;  %v9601_v23 = vld [vmem:[#allocation53_spill] sm:$0xff] }
 0x3ed   :  { %1685 = vmatprep.subr.mxu0 %v6549_v33  ;;  %1644 = vmatprep.subr.mxu1 %v5952_v62  ;;  %9600 = vst [vmem:[#allocation18_spill] sm:$0xff] %v6561_v31  ;;  %v6565_v33 = vld [vmem:[#allocation7 + $0x1a0] sm:$0xff]  ;;  %v9603_v62 = vld [vmem:[#allocation19_spill] sm:$0xff] }
 0x3ee   :  { %1686 = vmatpush1.msra.mxu0 %v6553_v60  ;;  %1645 = vmatpush2.msra.mxu1 %v5956_v11  ;;  %9602 = vst [vmem:[#allocation53_spill] sm:$0xff] %v6565_v33  ;;  %v6569_v60 = vld [vmem:[#allocation7 + $0x198] sm:$0xff]  ;;  %v9605_v11 = vld [vmem:[#allocation55_spill] sm:$0xff] }
 0x3ef   :  { %1687 = vmatprep.subr.mxu0 %v6557_v0  ;;  %1646 = vmatprep.subr.mxu1 %v9599_v27  ;;  %9604 = vst [vmem:[#allocation19_spill] sm:$0xff] %v6569_v60  ;;  %v6573_v0 = vld [vmem:[#allocation7 + $0x168] sm:$0xff]  ;;  %v9607_v27 = vld [vmem:[#allocation20_spill] sm:$0xff] }
 0x3f0   :  { %1688 = vmatpush1.msra.mxu0 %v6561_v31  ;;  %1647 = vmatpush2.msra.mxu1 %v9601_v23  ;;  %9606 = vst [vmem:[#allocation55_spill] sm:$0xff] %v6573_v0  ;;  %v9608_v31 = vld [vmem:[#allocation57_spill] sm:$0xff] }
 0x3f1   :  { %1689 = vmatprep.subr.mxu0 %v6565_v33  ;;  %1648 = vmatprep.subr.mxu1 %v9603_v62  ;;  %v9609_v23 = vld [vmem:[#allocation21_spill] sm:$0xff]  ;;  %v9611_v33 = vld [vmem:[#allocation22_spill] sm:$0xff] }
 0x3f2   :  { %1690 = vmatpush1.msra.mxu0 %v6569_v60  ;;  %1649 = vmatpush2.msra.mxu1 %v9605_v11  ;;  %v9612_v62 = vld [vmem:[#allocation61_spill] sm:$0xff]  ;;  %v9614_v60 = vld [vmem:[#allocation63_spill] sm:$0xff]  ;;  %v9615_v11 = vld [vmem:[#allocation24_spill] sm:$0xff] }
 0x3f3   :  { %1691 = vmatprep.subr.mxu0 %v6573_v0  ;;  %1650 = vmatprep.subr.mxu1 %v9607_v27  ;;  %v9617_v0 = vld [vmem:[#allocation25_spill] sm:$0xff]  ;;  %v9618_v27 = vld [vmem:[#allocation67_spill] sm:$0xff] }
 0x3f4   :  { %1692 = vmatpush1.msra.mxu0 %v9608_v31  ;;  %1651 = vmatpush2.msra.mxu1 %v9609_v23  ;;  %v9619_v31 = vld [vmem:[#allocation26_spill] sm:$0xff]  ;;  %v9620_v23 = vld [vmem:[#allocation69_spill] sm:$0xff] }
 0x3f5   :  { %1693 = vmatprep.subr.mxu0 %v9610_v49  ;;  %1652 = vmatprep.subr.mxu1 %v9611_v33  ;;  %v9621_v49 = vld [vmem:[#allocation27_spill] sm:$0xff] }
 0x3f6   :  { %1694 = vmatpush1.msra.mxu0 %v9612_v62  ;;  %1653 = vmatpush2.msra.mxu1 %v9613_v50  ;;  %v9622_v33 = vld [vmem:[#allocation71_spill] sm:$0xff]  ;;  %v9623_v62 = vld [vmem:[#allocation28_spill] sm:$0xff]  ;;  %v9624_v50 = vld [vmem:[#allocation73_spill] sm:$0xff] }
 0x3f7   :  { %1695 = vmatprep.subr.mxu0 %v9614_v60  ;;  %1654 = vmatprep.subr.mxu1 %v9615_v11  ;;  %v9625_v60 = vld [vmem:[#allocation29_spill] sm:$0xff]  ;;  %v9626_v11 = vld [vmem:[#allocation75_spill] sm:$0xff] }
 0x3f8   :  { %1696 = vmatpush1.msra.mxu0 %v9616_v21  ;;  %1655 = vmatpush2.msra.mxu1 %v9617_v0  ;;  %v9627_v21 = vld [vmem:[#allocation30_spill] sm:$0xff]  ;;  %v9628_v0 = vld [vmem:[#allocation77_spill] sm:$0xff] }
 0x3f9   :  { %1697 = vmatprep.subr.mxu0 %v9618_v27  ;;  %1656 = vmatprep.subr.mxu1 %v9619_v31  ;;  %v9629_v27 = vld [vmem:[#allocation31_spill] sm:$0xff] }
 0x3fa   :  { %1698 = vmatpush1.msra.mxu0 %v9620_v23  ;;  %1657 = vmatpush2.msra.mxu1 %v9621_v49  ;;  %v9630_v31 = vld [vmem:[#allocation79_spill] sm:$0xff]  ;;  %v9631_v23 = vld [vmem:[#allocation32_spill] sm:$0xff]  ;;  %v9632_v49 = vld [vmem:[#allocation81_spill] sm:$0xff] }
 0x3fb   :  { %1699 = vmatprep.subr.mxu0 %v9622_v33  ;;  %1658 = vmatprep.subr.mxu1 %v9623_v62  ;;  %v9633_v33 = vld [vmem:[#allocation33_spill] sm:$0xff]  ;;  %v9634_v62 = vld [vmem:[#allocation83_spill] sm:$0xff] }
 0x3fc   :  { %1700 = vmatpush1.msra.mxu0 %v9624_v50  ;;  %1659 = vmatpush2.msra.mxu1 %v9625_v60  ;;  %v9635_v50 = vld [vmem:[#allocation34_spill] sm:$0xff]  ;;  %v9636_v60 = vld [vmem:[#allocation35_spill] sm:$0xff] }
 0x3fd   :  { %1701 = vmatprep.subr.mxu0 %v9626_v11  ;;  %1660 = vmatprep.subr.mxu1 %v9627_v21  ;;  %v9637_v11 = vld [vmem:[#allocation36_spill] sm:$0xff]  ;;  %v9638_v21 = vld [vmem:[#allocation37_spill] sm:$0xff] }
 0x3fe   :  { %1702 = vmatpush1.msra.mxu0 %v9628_v0  ;;  %1661 = vmatpush2.msra.mxu1 %v9629_v27  ;;  %v9639_v0 = vld [vmem:[#allocation38_spill] sm:$0xff]  ;;  %v9640_v27 = vld [vmem:[#allocation40_spill] sm:$0xff] }
 0x3ff   :  { %1703 = vmatprep.subr.mxu0 %v9630_v31  ;;  %1662 = vmatprep.subr.mxu1 %v9631_v23  ;;  %v9641_v31 = vld [vmem:[#allocation42_spill] sm:$0xff]  ;;  %v9642_v23 = vld [vmem:[#allocation44_spill] sm:$0xff] }
 0x400   :  { %1704 = vmatpush1.msra.mxu0 %v9632_v49  ;;  %1663 = vmatpush2.msra.mxu1 %v9633_v33  ;;  %v9643_v49 = vld [vmem:[#allocation46_spill] sm:$0xff]  ;;  %v9644_v33 = vld [vmem:[#allocation48_spill] sm:$0xff] }
 0x401   :  { %1705 = vmatprep.subr.mxu0 %v9634_v62  ;;  %1664 = vmatprep.subr.mxu1 %v9635_v50  ;;  %v9645_v62 = vld [vmem:[#allocation50_spill] sm:$0xff]  ;;  %v9646_v50 = vld [vmem:[#allocation52_spill] sm:$0xff] }
 0x402   :  { %1706 = vmatpush2.msra.mxu0 %v9636_v60  ;;  %1665 = vmatpush2.msra.mxu1 %v9637_v11  ;;  %v9647_v60 = vld [vmem:[#allocation54_spill] sm:$0xff]  ;;  %v9648_v11 = vld [vmem:[#allocation56_spill] sm:$0xff] }
 0x403   :  { %1707 = vmatprep.subr.mxu0 %v9638_v21  ;;  %1744 = vmatprep.subr.mxu1 %v9639_v0  ;;  %v9649_v21 = vld [vmem:[#allocation58_spill] sm:$0xff]  ;;  %v9650_v0 = vld [vmem:[#allocation60_spill] sm:$0xff] }
 0x404   :  { %1708 = vmatpush2.msra.mxu0 %v9640_v27  ;;  %v9651_v27 = vld [vmem:[#allocation62_spill] sm:$0xff] }
 0x405   :  { %1709 = vmatprep.subr.mxu0 %v9641_v31  ;;  %v9652_v31 = vld [vmem:[#allocation64_spill] sm:$0xff] }
 0x406   :  { %1710 = vmatpush2.msra.mxu0 %v9642_v23  ;;  %v9653_v23 = vld [vmem:[#allocation66_spill] sm:$0xff] }
 0x407   :  { %1711 = vmatprep.subr.mxu0 %v9643_v49  ;;  %v9654_v49 = vld [vmem:[#allocation68_spill] sm:$0xff] }
 0x408   :  { %1712 = vmatpush2.msra.mxu0 %v9644_v33  ;;  %v9655_v33 = vld [vmem:[#allocation70_spill] sm:$0xff] }
 0x409   :  { %1713 = vmatprep.subr.mxu0 %v9645_v62  ;;  %v9656_v62 = vld [vmem:[#allocation72_spill] sm:$0xff] }
 0x40a   :  { %1714 = vmatpush2.msra.mxu0 %v9646_v50  ;;  %v9657_v50 = vld [vmem:[#allocation74_spill] sm:$0xff] }
 0x40b   :  { %1715 = vmatprep.subr.mxu0 %v9647_v60  ;;  %v9658_v60 = vld [vmem:[#allocation76_spill] sm:$0xff] }
 0x40c   :  { %1716 = vmatpush2.msra.mxu0 %v9648_v11  ;;  %v9659_v11 = vld [vmem:[#allocation78_spill] sm:$0xff] }
 0x40d   :  { %1717 = vmatprep.subr.mxu0 %v9649_v21  ;;  %v9660_v21 = vld [vmem:[#allocation80_spill] sm:$0xff] }
 0x40e   :  { %1718 = vmatpush2.msra.mxu0 %v9650_v0  ;;  %v9661_v0 = vld [vmem:[#allocation82_spill] sm:$0xff] }
 0x40f   :  { %1719 = vmatprep.subr.mxu0 %v9651_v27  ;;  %v9662_v27 = vld [vmem:[#allocation84_spill] sm:$0xff] }
 0x410   :  { %1720 = vmatpush2.msra.mxu0 %v9652_v31  ;;  %v9663_v31 = vld [vmem:[#allocation86_spill] sm:$0xff] }
 0x411   :  { %1721 = vmatprep.subr.mxu0 %v9653_v23  ;;  %v9664_v23 = vld [vmem:[#allocation87_spill] sm:$0xff] }
 0x412   :  { %1722 = vmatpush2.msra.mxu0 %v9654_v49  ;;  %v9665_v49 = vld [vmem:[#allocation88_spill] sm:$0xff] }
 0x413   :  { %1723 = vmatprep.subr.mxu0 %v9655_v33  ;;  %v9666_v33 = vld [vmem:[#allocation89_spill] sm:$0xff] }
 0x414   :  { %1724 = vmatpush2.msra.mxu0 %v9656_v62  ;;  %v9667_v62 = vld [vmem:[#allocation90_spill] sm:$0xff] }
 0x415   :  { %1725 = vmatprep.subr.mxu0 %v9657_v50  ;;  %v9668_v50 = vld [vmem:[#allocation91_spill] sm:$0xff] }
 0x416   :  { %1726 = vmatpush2.msra.mxu0 %v9658_v60  ;;  %v9669_v60 = vld [vmem:[#allocation92_spill] sm:$0xff] }
 0x417   :  { %1727 = vmatprep.subr.mxu0 %v9659_v11 }
 0x418   :  { %1728 = vmatpush2.msra.mxu0 %v9660_v21  ;;  %v9670_v21 = vld [vmem:[#allocation47_spill] sm:$0xff] }
 0x419   :  { %1729 = vmatprep.subr.mxu0 %v9661_v0 }
 0x41a   :  { %1730 = vmatpush2.msra.mxu0 %v9662_v27  ;;  %v9671_v27 = vld [vmem:[#allocation16_spill] sm:$0xff] }
 0x41b   :  { %1731 = vmatprep.subr.mxu0 %v9663_v31 }
 0x41c   :  { %1732 = vmatpush2.msra.mxu0 %v9664_v23 }
 0x41d   :  { %1733 = vmatprep.subr.mxu0 %v9665_v49 }
 0x41e   :  { %1734 = vmatpush2.msra.mxu0 %v9666_v33 }
 0x41f   :  { %1735 = vmatprep.subr.mxu0 %v9667_v62 }
 0x420   :  { %1736 = vmatpush2.msra.mxu0 %v9668_v50  ;;  %v9672_v50 = vld [vmem:[#allocation49_spill] sm:$0xff] }
 0x421   :  { %3613 = vmatprep.subr.mxu0 %v9669_v60 }
 0x460   :  { %v1319_v11 = vpop.f32.mrf.mxu0  ;;  %v1390_v33 = vpop.f32.mrf.mxu1 }
 0x461   :  { %v1536_v52 = vadd.f32 %v1319_v11, %v9670_v21  ;;  %v1538_v32 = vadd.f32 %v1390_v33, %v9673_v34  ;;  %v1559_v33 = vld [vmem:[#allocation5 + $0x28] sm:$0xc0] }
 0x462   :  { %v1321_v44 = vpop.f32.mrf.mxu0  ;;  %v1392_v62 = vpop.f32.mrf.mxu1 }
 0x463   :  { %v3480_v0 = vmul.f32 -1.442695, %v1536_v52  ;;  %v1537_v31 = vadd.f32 %v1321_v44, %v9671_v27  ;;  %v1539_v36 = vadd.f32 %v1392_v62, %v9672_v50  ;;  %v9674_v27 = vld [vmem:[#allocation93_spill] sm:$0xff] }
 0x465   :  { %3906 = vpow2.f32 %v3480_v0  ;;  %v3481_v63 = vmul.f32 -1.442695, %v1537_v31 }
 0x467   :  { %3908 = vpow2.f32 %v3481_v63 }
 0x472   :  { %v3907_v23 = vpop.eup %3906 }
 0x473   :  { %v1543_v49 = vadd.f32 1.0, %v3907_v23 }
 0x474   :  { %v3909_v40 = vpop.eup %3908 }
 0x475   :  { %3910 = vrcp.f32 %v1543_v49  ;;  %v1549_v38 = vadd.f32 1.0, %v3909_v40 }
 0x477   :  { %3912 = vrcp.f32 %v1549_v38 }
 0x482   :  { %v3911_v60 = vpop.eup %3910 }
 0x483   :  { %v1552_v52 = vmul.f32 %v3911_v60, %v1539_v36 }
 0x484   :  { %v3913_v0 = vpop.eup %3912 }
 0x485   :  { %v1553_v11 = vadd.f32 %v1552_v52, %v1538_v32  ;;  %v1555_v44 = vsub.f32 1.0, %v3913_v0  ;;  %v1557_v23 = vmul.f32 %v3913_v0, %v9674_v27  ;;  %v1560_v52 = vld [vmem:[#allocation5 + $0x10] sm:$0xc0] }
 0x487   :  { %3914 = vtanh.f32 %v1553_v11 }
 0x494   :  { %v3915_v31 = vpop.eup %3914 }
 0x495   :  { %v1556_v63 = vmul.f32 %v3915_v31, %v1555_v44  ;;  %v3610_v31 = vpop.f32.mrf.mxu1 }
 0x497   :  { %v6644_v49 = vadd.f32 %v1557_v23, %v1556_v63  ;;  %v3611_v23 = vpop.f32.mrf.mxu1 }
 0x499   :  { %9675 = vst [vmem:[#allocation20_spill] sm:$0xff] %v6644_v49  ;;  %v1596_v21 = vrot.slane %v6644_v49, 2 }
 0x49b   :  { %v1599_v40 = vrot.slane %v1596_v21, 6  ;;  %v3612_v21 = vadd.f32 %v3611_v23, %v3610_v31  ;;  %v9695_v23 = vld [vmem:[#allocation113_spill] sm:$0xff] }
 0x49d   :  { %1666 = vmatprep.mubr.f32.mxu1 %v1599_v40  ;;  %1737 = vmatprep.mubr.f32.mxu0 %v1599_v40  ;;  %v1582_v49 = vadd.f32 %v6176_v54, %v3612_v21  ;;  %v9677_v54 = vld [vmem:[#allocation95_spill] sm:$0xff]  ;;  %v9696_v21 = vld [vmem:[#allocation114_spill] sm:$0xff] }
 0x49f   :  { %v1584_v34 = vrot.slane %v1582_v49, 2  ;;  %v9692_v49 = vld [vmem:[#allocation110_spill] sm:$0xff] }
 0x4a1   :  { %v1461_v62 = vpop.f32.mrf.mxu0 }
 0x4a2   :  { %v1563_v50 = vrot.slane %v1461_v62, 2 }
 0x4a3   :  { %v1463_v38 = vpop.f32.mrf.mxu0 }
 0x4a4   :  { %v1565_v36 = vadd.f32 %v1563_v50, %v1559_v33  ;;  %v1573_v60 = vrot.slane %v1463_v38, 2  ;;  %v1561_v33 = vld [vmem:[#allocation5 + $0x8] sm:$0xc0] }
 0x4a6   :  { %v3482_v32 = vmul.f32 -1.442695, %v1565_v36  ;;  %v1575_v11 = vadd.f32 %v1573_v60, %v1560_v52 }
 0x4a8   :  { %3916 = vpow2.f32 %v3482_v32  ;;  %v3483_v44 = vmul.f32 -1.442695, %v1575_v11  ;;  %v1591_v32 = vrot.slane %v6180_v46, 6  ;;  %v9676_v46 = vld [vmem:[#allocation94_spill] sm:$0xff] }
 0x4aa   :  { %3918 = vpow2.f32 %v3483_v44 }
 0x4b5   :  { %v3917_v0 = vpop.eup %3916 }
 0x4b6   :  { %v1569_v63 = vadd.f32 1.0, %v3917_v0 }
 0x4b7   :  { %v3919_v27 = vpop.eup %3918 }
 0x4b8   :  { %3920 = vrcp.f32 %v1569_v63  ;;  %v1579_v62 = vadd.f32 1.0, %v3919_v27  ;;  %v9691_v27 = vld [vmem:[#allocation109_spill] sm:$0xff]  ;;  %v9694_v63 = vld [vmem:[#allocation112_spill] sm:$0xff] }
 0x4ba   :  { %3922 = vrcp.f32 %v1579_v62  ;;  %v9697_v62 = vld [vmem:[#allocation115_spill] sm:$0xff] }
 0x4c5   :  { %v3921_v30 = vpop.eup %3920 }
 0x4c6   :  { %v1586_v50 = vmul.f32 %v3921_v30, %v1584_v34  ;;  %v9689_v30 = vld [vmem:[#allocation107_spill] sm:$0xff]  ;;  %v9690_v34 = vld [vmem:[#allocation108_spill] sm:$0xff] }
 0x4c7   :  { %v3923_v36 = vpop.eup %3922 }
 0x4c8   :  { %v1587_v38 = vadd.f32 %v1586_v50, %v1561_v33  ;;  %v1589_v60 = vsub.f32 1.0, %v3923_v36  ;;  %v1593_v44 = vmul.f32 %v3923_v36, %v1591_v32  ;;  %v9698_v50 = vld [vmem:[#allocation116_spill] sm:$0xff]  ;;  %v9699_v33 = vld [vmem:[#allocation117_spill] sm:$0xff]  ;;  %v9701_v36 = vld [vmem:[#allocation119_spill] sm:$0xff] }
 0x4c9   :  { %v9702_v32 = vld [vmem:[#allocation120_spill] sm:$0xff] }
 0x4ca   :  { %3924 = vtanh.f32 %v1587_v38  ;;  %v9700_v38 = vld [vmem:[#allocation118_spill] sm:$0xff] }
 0x4d7   :  { %v3925_v52 = vpop.eup %3924 }
 0x4d8   :  { %v1590_v11 = vmul.f32 %v3925_v52, %v1589_v60  ;;  %v9703_v60 = vld [vmem:[#allocation121_spill] sm:$0xff]  ;;  %v9704_v52 = vld [vmem:[#allocation122_spill] sm:$0xff] }
 0x4da   :  { %v1594_v0 = vadd.f32 %v1593_v44, %v1590_v11  ;;  %v9705_v11 = vld [vmem:[#allocation123_spill] sm:$0xff]  ;;  %v9706_v44 = vld [vmem:[#allocation124_spill] sm:$0xff] }
 0x4dc   :  { %v6649_v31 = vrot.slane %v1594_v0, 6  ;;  %v9707_v0 = vld [vmem:[#allocation125_spill] sm:$0xff] }
 0x4de   :  { %1667 = vmatmul.mubr.f32.vlgmr.msra.gmra.mxu1 %v6649_v31  ;;  %1738 = vmatmul.mubr.f32.vlgmr.msra.gmra.mxu0 %v6649_v31 }
 0x4df   :  { %1745 = vmatpush1.msra.mxu1 %v6187_v39  ;;  %3614 = vmatpush3.msra.mxu0 %v6190_v35  ;;  %v9678_v39 = vld [vmem:[#allocation96_spill] sm:$0xff]  ;;  %v9679_v35 = vld [vmem:[#allocation97_spill] sm:$0xff] }
 0x4e0   :  { %1746 = vmatprep.subr.mxu1 %v6193_v1  ;;  %1808 = vmatprep.mubr.f32.mxu1 %v1599_v40  ;;  %v9680_v1 = vld [vmem:[#allocation98_spill] sm:$0xff] }
 0x4e1   :  { %3615 = vmatprep.subr.mxu0 %v6196_v58  ;;  %1879 = vmatprep.mubr.f32.mxu0 %v1599_v40  ;;  %v9681_v58 = vld [vmem:[#allocation99_spill] sm:$0xff] }
 0x4e2   :  { %1747 = vmatpush1.msra.mxu1 %v6199_v53  ;;  %3616 = vmatpush3.msra.mxu0 %v6202_v48  ;;  %v9682_v53 = vld [vmem:[#allocation100_spill] sm:$0xff]  ;;  %v9683_v48 = vld [vmem:[#allocation101_spill] sm:$0xff]  ;;  %v9693_v40 = vld [vmem:[#allocation111_spill] sm:$0xff] }
 0x4e3   :  { %1748 = vmatprep.subr.mxu1 %v6205_v42  ;;  %3617 = vmatprep.subr.mxu0 %v6208_v19  ;;  %v9684_v42 = vld [vmem:[#allocation102_spill] sm:$0xff]  ;;  %v9685_v19 = vld [vmem:[#allocation103_spill] sm:$0xff] }
 0x4e4   :  { %1749 = vmatpush1.msra.mxu1 %v6211_v15  ;;  %3618 = vmatpush3.msra.mxu0 %v6214_v41  ;;  %v9686_v15 = vld [vmem:[#allocation104_spill] sm:$0xff]  ;;  %v9687_v41 = vld [vmem:[#allocation105_spill] sm:$0xff] }
 0x4e5   :  { %1750 = vmatprep.subr.mxu1 %v6217_v61  ;;  %3619 = vmatprep.subr.mxu0 %v9676_v46  ;;  %v9688_v61 = vld [vmem:[#allocation106_spill] sm:$0xff] }
 0x4e6   :  { %1751 = vmatpush1.msra.mxu1 %v9677_v54  ;;  %3620 = vmatpush3.msra.mxu0 %v9678_v39  ;;  %v9708_v46 = vld [vmem:[#allocation126_spill] sm:$0xff]  ;;  %v9709_v54 = vld [vmem:[#allocation127_spill] sm:$0xff]  ;;  %v9710_v39 = vld [vmem:[#allocation128_spill] sm:$0xff] }
 0x4e7   :  { %1752 = vmatprep.subr.mxu1 %v9679_v35  ;;  %3621 = vmatprep.subr.mxu0 %v9680_v1  ;;  %v9711_v35 = vld [vmem:[#allocation129_spill] sm:$0xff]  ;;  %v9712_v1 = vld [vmem:[#allocation130_spill] sm:$0xff] }
 0x4e8   :  { %1753 = vmatpush1.msra.mxu1 %v9681_v58  ;;  %3622 = vmatpush3.msra.mxu0 %v9682_v53  ;;  %v9713_v58 = vld [vmem:[#allocation131_spill] sm:$0xff]  ;;  %v9714_v53 = vld [vmem:[#allocation132_spill] sm:$0xff] }
 0x4e9   :  { %1754 = vmatprep.subr.mxu1 %v9683_v48  ;;  %3623 = vmatprep.subr.mxu0 %v9684_v42  ;;  %v9715_v48 = vld [vmem:[#allocation133_spill] sm:$0xff]  ;;  %v9716_v42 = vld [vmem:[#allocation134_spill] sm:$0xff] }
 0x4ea   :  { %1755 = vmatpush1.msra.mxu1 %v9685_v19  ;;  %3624 = vmatpush3.msra.mxu0 %v9686_v15  ;;  %v9717_v19 = vld [vmem:[#allocation135_spill] sm:$0xff]  ;;  %v9718_v15 = vld [vmem:[#allocation136_spill] sm:$0xff] }
 0x4eb   :  { %1756 = vmatprep.subr.mxu1 %v9687_v41  ;;  %3625 = vmatprep.subr.mxu0 %v9688_v61  ;;  %v9719_v41 = vld [vmem:[#allocation137_spill] sm:$0xff]  ;;  %v9720_v61 = vld [vmem:[#allocation138_spill] sm:$0xff] }
 0x4ec   :  { %1757 = vmatpush1.msra.mxu1 %v9689_v30  ;;  %3626 = vmatpush3.msra.mxu0 %v9690_v34  ;;  %v9721_v30 = vld [vmem:[#allocation139_spill] sm:$0xff]  ;;  %v9722_v34 = vld [vmem:[#allocation140_spill] sm:$0xff] }
 0x4ed   :  { %1758 = vmatprep.subr.mxu1 %v9691_v27  ;;  %3627 = vmatprep.subr.mxu0 %v9692_v49  ;;  %v9723_v27 = vld [vmem:[#allocation141_spill] sm:$0xff]  ;;  %v9724_v49 = vld [vmem:[#allocation142_spill] sm:$0xff] }
 0x4ee   :  { %1759 = vmatpush1.msra.mxu1 %v9693_v40  ;;  %3628 = vmatpush3.msra.mxu0 %v9694_v63  ;;  %v9725_v40 = vld [vmem:[#allocation143_spill] sm:$0xff]  ;;  %v9726_v63 = vld [vmem:[#allocation144_spill] sm:$0xff] }
 0x4ef   :  { %1760 = vmatprep.subr.mxu1 %v9695_v23  ;;  %3629 = vmatprep.subr.mxu0 %v9696_v21  ;;  %v6718_v23 = vld [vmem:[#allocation7 + $0x350] sm:$0xff]  ;;  %v6722_v21 = vld [vmem:[#allocation7 + $0x348] sm:$0xff] }
 0x4f0   :  { %1761 = vmatpush1.msra.mxu1 %v9697_v62  ;;  %3630 = vmatpush3.msra.mxu0 %v9698_v50  ;;  %v6734_v62 = vld [vmem:[#allocation7 + $0x2e0] sm:$0xff]  ;;  %v6838_v50 = vld [vmem:[#allocation7 + $0x8] sm:$0xff] }
 0x4f1   :  { %1762 = vmatprep.subr.mxu1 %v9699_v33  ;;  %3631 = vmatprep.subr.mxu0 %v9700_v38  ;;  %v6844_v33 = vld [vmem:[#allocation7] sm:$0xff]  ;;  %v6848_v38 = vld [vmem:[#allocation7 + $0x6d0] sm:$0xff] }
 0x4f2   :  { %1763 = vmatpush1.msra.mxu1 %v9701_v36  ;;  %3632 = vmatpush3.msra.mxu0 %v9702_v32  ;;  %v9731_v36 = vld [vmem:[#allocation149_spill] sm:$0xff]  ;;  %v6852_v32 = vld [vmem:[#allocation7 + $0x6c8] sm:$0xff] }
 0x4f3   :  { %1764 = vmatprep.subr.mxu1 %v9703_v60  ;;  %3633 = vmatprep.subr.mxu0 %v9704_v52  ;;  %v9732_v60 = vld [vmem:[#allocation150_spill] sm:$0xff]  ;;  %v6856_v52 = vld [vmem:[#allocation7 + $0x698] sm:$0xff] }
 0x4f4   :  { %1765 = vmatpush1.msra.mxu1 %v9705_v11  ;;  %3634 = vmatpush3.msra.mxu0 %v9706_v44  ;;  %v9733_v11 = vld [vmem:[#allocation151_spill] sm:$0xff]  ;;  %v6860_v44 = vld [vmem:[#allocation7 + $0x690] sm:$0xff] }
 0x4f5   :  { %1766 = vmatprep.subr.mxu1 %v9707_v0  ;;  %3635 = vmatprep.subr.mxu0 %v9708_v46  ;;  %v9734_v0 = vld [vmem:[#allocation152_spill] sm:$0xff]  ;;  %v6864_v46 = vld [vmem:[#allocation7 + $0x660] sm:$0xff] }
 0x4f6   :  { %1767 = vmatpush1.msra.mxu1 %v9709_v54  ;;  %3636 = vmatpush3.msra.mxu0 %v9710_v39  ;;  %v9735_v54 = vld [vmem:[#allocation153_spill] sm:$0xff] }
 0x4f7   :  { %1768 = vmatprep.subr.mxu1 %v9711_v35  ;;  %3637 = vmatprep.subr.mxu0 %v9712_v1  ;;  %v6868_v39 = vld [vmem:[#allocation7 + $0x658] sm:$0xff]  ;;  %v9736_v35 = vld [vmem:[#allocation39_spill] sm:$0xff] }
 0x4f8   :  { %1769 = vmatpush1.msra.mxu1 %v9713_v58  ;;  %3638 = vmatpush3.msra.mxu0 %v9714_v53  ;;  %v6872_v1 = vld [vmem:[#allocation7 + $0x628] sm:$0xff]  ;;  %v9737_v58 = vld [vmem:[#allocation41_spill] sm:$0xff]  ;;  %v6876_v53 = vld [vmem:[#allocation7 + $0x620] sm:$0xff] }
 0x4f9   :  { %1770 = vmatprep.subr.mxu1 %v9715_v48  ;;  %3639 = vmatprep.subr.mxu0 %v9716_v42  ;;  %v9738_v48 = vld [vmem:[#allocation43_spill] sm:$0xff]  ;;  %v6880_v42 = vld [vmem:[#allocation7 + $0x5f0] sm:$0xff] }
 0x4fa   :  { %1771 = vmatpush1.msra.mxu1 %v9717_v19  ;;  %3640 = vmatpush3.msra.mxu0 %v9718_v15  ;;  %v9739_v19 = vld [vmem:[#allocation45_spill] sm:$0xff]  ;;  %v6884_v15 = vld [vmem:[#allocation7 + $0x5e8] sm:$0xff] }
 0x4fb   :  { %1772 = vmatprep.subr.mxu1 %v9719_v41  ;;  %3641 = vmatprep.subr.mxu0 %v9720_v61  ;;  %v9740_v41 = vld [vmem:[#allocation154_spill] sm:$0xff]  ;;  %v6888_v61 = vld [vmem:[#allocation7 + $0x5b8] sm:$0xff] }
 0x4fc   :  { %1773 = vmatpush1.msra.mxu1 %v9721_v30  ;;  %3642 = vmatpush3.msra.mxu0 %v9722_v34  ;;  %v9741_v30 = vld [vmem:[#allocation155_spill] sm:$0xff]  ;;  %v6892_v34 = vld [vmem:[#allocation7 + $0x5b0] sm:$0xff] }
 0x4fd   :  { %1774 = vmatprep.subr.mxu1 %v6361_v37  ;;  %3643 = vmatprep.subr.mxu0 %v9723_v27  ;;  %v6726_v37 = vld [vmem:[#allocation7 + $0x318] sm:$0xff]  ;;  %v9742_v27 = vld [vmem:[#allocation156_spill] sm:$0xff] }
 0x4fe   :  { %1775 = vmatpush1.msra.mxu1 %v9724_v49  ;;  %3644 = vmatpush3.msra.mxu0 %v6370_v43  ;;  %v6730_v43 = vld [vmem:[#allocation7 + $0x310] sm:$0xff]  ;;  %v6896_v49 = vld [vmem:[#allocation7 + $0x580] sm:$0xff] }
 0x4ff   :  { %1776 = vmatprep.subr.mxu1 %v9725_v40  ;;  %1880 = vmatmul.mubr.f32.vlgmr.msra.gmra.mxu0 %v6649_v31  ;;  %9743 = vst [vmem:[#allocation57_spill] sm:$0xff] %v6896_v49  ;;  %v9744_v40 = vld [vmem:[#allocation18_spill] sm:$0xff] }
 0x500   :  { %1777 = vmatpush2.msra.mxu1 %v9726_v63  ;;  %1933 = vmatprep.subr.mxu0 %v6718_v23  ;;  %v6900_v63 = vld [vmem:[#allocation7 + $0x578] sm:$0xff] }
 0x501   :  { %1778 = vmatprep.subr.mxu1 %v6381_v7  ;;  %1934 = vmatpush1.msra.mxu0 %v6722_v21  ;;  %v6738_v7 = vld [vmem:[#allocation7 + $0x2d8] sm:$0xff]  ;;  %9745 = vst [vmem:[#allocation21_spill] sm:$0xff] %v6900_v63 }
 0x502   :  { %1779 = vmatpush2.msra.mxu1 %v6385_v4  ;;  %1935 = vmatprep.subr.mxu0 %v6726_v37  ;;  %v6742_v4 = vld [vmem:[#allocation7 + $0x2a8] sm:$0xff] }
 0x503   :  { %1780 = vmatprep.subr.mxu1 %v6389_v2  ;;  %1936 = vmatpush1.msra.mxu0 %v6730_v43  ;;  %v6746_v2 = vld [vmem:[#allocation7 + $0x2a0] sm:$0xff] }
 0x504   :  { %1781 = vmatpush2.msra.mxu1 %v6393_v29  ;;  %1937 = vmatprep.subr.mxu0 %v6734_v62  ;;  %v6750_v29 = vld [vmem:[#allocation7 + $0x270] sm:$0xff] }
 0x505   :  { %1782 = vmatprep.subr.mxu1 %v6397_v51  ;;  %1938 = vmatpush1.msra.mxu0 %v6738_v7  ;;  %v6754_v51 = vld [vmem:[#allocation7 + $0x268] sm:$0xff] }
 0x506   :  { %1783 = vmatpush2.msra.mxu1 %v6401_v59  ;;  %1939 = vmatprep.subr.mxu0 %v6742_v4  ;;  %v6758_v59 = vld [vmem:[#allocation7 + $0x238] sm:$0xff] }
 0x507   :  { %1784 = vmatprep.subr.mxu1 %v6405_v55  ;;  %1940 = vmatpush1.msra.mxu0 %v6746_v2  ;;  %v6762_v55 = vld [vmem:[#allocation7 + $0x230] sm:$0xff] }
 0x508   :  { %1785 = vmatpush2.msra.mxu1 %v6409_v56  ;;  %1941 = vmatprep.subr.mxu0 %v6750_v29  ;;  %v6766_v56 = vld [vmem:[#allocation7 + $0x200] sm:$0xff] }
 0x509   :  { %1786 = vmatprep.subr.mxu1 %v6413_v3  ;;  %1942 = vmatpush1.msra.mxu0 %v6754_v51  ;;  %v6770_v3 = vld [vmem:[#allocation7 + $0x1f8] sm:$0xff] }
 0x50a   :  { %1787 = vmatpush2.msra.mxu1 %v6417_v57  ;;  %1943 = vmatprep.subr.mxu0 %v6758_v59  ;;  %v6774_v57 = vld [vmem:[#allocation7 + $0x1c8] sm:$0xff] }
 0x50b   :  { %1788 = vmatprep.subr.mxu1 %v6421_v17  ;;  %1944 = vmatpush1.msra.mxu0 %v6762_v55  ;;  %v6778_v17 = vld [vmem:[#allocation7 + $0x1c0] sm:$0xff] }
 0x50c   :  { %1789 = vmatpush2.msra.mxu1 %v6425_v47  ;;  %1945 = vmatprep.subr.mxu0 %v6766_v56  ;;  %v6782_v47 = vld [vmem:[#allocation7 + $0x190] sm:$0xff] }
 0x50d   :  { %1790 = vmatprep.subr.mxu1 %v6429_v5  ;;  %1946 = vmatpush1.msra.mxu0 %v6770_v3  ;;  %v6786_v5 = vld [vmem:[#allocation7 + $0x188] sm:$0xff] }
 0x50e   :  { %1791 = vmatpush2.msra.mxu1 %v6433_v45  ;;  %1947 = vmatprep.subr.mxu0 %v6774_v57  ;;  %v6790_v45 = vld [vmem:[#allocation7 + $0x158] sm:$0xff] }
 0x50f   :  { %1792 = vmatprep.subr.mxu1 %v6437_v9  ;;  %1948 = vmatpush1.msra.mxu0 %v6778_v17  ;;  %v6794_v9 = vld [vmem:[#allocation7 + $0x150] sm:$0xff] }
 0x510   :  { %1793 = vmatpush2.msra.mxu1 %v6441_v25  ;;  %1949 = vmatprep.subr.mxu0 %v6782_v47  ;;  %v6798_v25 = vld [vmem:[#allocation7 + $0x120] sm:$0xff] }
 0x511   :  { %1794 = vmatprep.subr.mxu1 %v6445_v13  ;;  %1950 = vmatpush1.msra.mxu0 %v6786_v5  ;;  %v6802_v13 = vld [vmem:[#allocation7 + $0x118] sm:$0xff] }
 0x512   :  { %1795 = vmatpush2.msra.mxu1 %v6449_v6  ;;  %1951 = vmatprep.subr.mxu0 %v6790_v45  ;;  %v6806_v6 = vld [vmem:[#allocation7 + $0xe8] sm:$0xff] }
 0x513   :  { %1796 = vmatprep.subr.mxu1 %v6453_v8  ;;  %1952 = vmatpush1.msra.mxu0 %v6794_v9  ;;  %v6810_v8 = vld [vmem:[#allocation7 + $0xe0] sm:$0xff] }
 0x514   :  { %1797 = vmatpush2.msra.mxu1 %v6457_v10  ;;  %1953 = vmatprep.subr.mxu0 %v6798_v25  ;;  %v6814_v10 = vld [vmem:[#allocation7 + $0xb0] sm:$0xff] }
 0x515   :  { %1798 = vmatprep.subr.mxu1 %v6461_v12  ;;  %1954 = vmatpush1.msra.mxu0 %v6802_v13  ;;  %v6818_v12 = vld [vmem:[#allocation7 + $0xa8] sm:$0xff] }
 0x516   :  { %1799 = vmatpush2.msra.mxu1 %v6465_v14  ;;  %1955 = vmatprep.subr.mxu0 %v6806_v6  ;;  %v6822_v14 = vld [vmem:[#allocation7 + $0x78] sm:$0xff] }
 0x517   :  { %1800 = vmatprep.subr.mxu1 %v6469_v16  ;;  %1956 = vmatpush1.msra.mxu0 %v6810_v8  ;;  %v6826_v16 = vld [vmem:[#allocation7 + $0x70] sm:$0xff] }
 0x518   :  { %1801 = vmatpush2.msra.mxu1 %v6473_v18  ;;  %1957 = vmatprep.subr.mxu0 %v6814_v10  ;;  %v6830_v18 = vld [vmem:[#allocation7 + $0x40] sm:$0xff] }
 0x519   :  { %1802 = vmatprep.subr.mxu1 %v6477_v20  ;;  %1958 = vmatpush1.msra.mxu0 %v6818_v12  ;;  %v6834_v20 = vld [vmem:[#allocation7 + $0x38] sm:$0xff] }
 0x51a   :  { %1803 = vmatpush2.msra.mxu1 %v6481_v22  ;;  %1959 = vmatprep.subr.mxu0 %v6822_v14  ;;  %v9727_v22 = vld [vmem:[#allocation145_spill] sm:$0xff] }
 0x51b   :  { %1804 = vmatprep.subr.mxu1 %v6485_v24  ;;  %1960 = vmatpush1.msra.mxu0 %v6826_v16  ;;  %v9728_v24 = vld [vmem:[#allocation146_spill] sm:$0xff] }
 0x51c   :  { %1805 = vmatpush2.msra.mxu1 %v6489_v26  ;;  %1961 = vmatprep.subr.mxu0 %v6830_v18  ;;  %v9729_v26 = vld [vmem:[#allocation147_spill] sm:$0xff] }
 0x51d   :  { %1806 = vmatprep.subr.mxu1 %v6493_v28  ;;  %1962 = vmatpush1.msra.mxu0 %v6834_v20  ;;  %v9730_v28 = vld [vmem:[#allocation148_spill] sm:$0xff] }
 0x51e   :  { %1807 = vmatpush2.msra.mxu1 %v9727_v22  ;;  %1963 = vmatprep.subr.mxu0 %v6838_v50  ;;  %v9746_v22 = vld [vmem:[#allocation53_spill] sm:$0xff] }
 0x51f   :  { %1809 = vmatmul.mubr.f32.vlgmr.msra.gmra.mxu1 %v6649_v31  ;;  %2004 = vmatprep.subr.mxu1 %v9728_v24  ;;  %v6904_v24 = vld [vmem:[#allocation7 + $0x548] sm:$0xff] }
 0x520   :  { %2005 = vmatpush1.msra.mxu1 %v9729_v26  ;;  %1964 = vmatpush1.msra.mxu0 %v6844_v33  ;;  %9747 = vst [vmem:[#allocation59_spill] sm:$0xff] %v6904_v24  ;;  %v9748_v26 = vld [vmem:[#allocation19_spill] sm:$0xff] }
 0x521   :  { %2006 = vmatprep.subr.mxu1 %v9730_v28  ;;  %1965 = vmatprep.subr.mxu0 %v6848_v38  ;;  %v6908_v28 = vld [vmem:[#allocation7 + $0x540] sm:$0xff] }
 0x522   :  { %2007 = vmatpush1.msra.mxu1 %v9731_v36  ;;  %1966 = vmatpush2.msra.mxu0 %v6852_v32  ;;  %9749 = vst [vmem:[#allocation22_spill] sm:$0xff] %v6908_v28  ;;  %v9750_v36 = vld [vmem:[#allocation55_spill] sm:$0xff] }
 0x523   :  { %2008 = vmatprep.subr.mxu1 %v9732_v60  ;;  %1967 = vmatprep.subr.mxu0 %v6856_v52  ;;  %v6912_v60 = vld [vmem:[#allocation7 + $0x510] sm:$0xff] }
 0x524   :  { %2009 = vmatpush1.msra.mxu1 %v9733_v11  ;;  %1968 = vmatpush2.msra.mxu0 %v6860_v44  ;;  %9751 = vst [vmem:[#allocation61_spill] sm:$0xff] %v6912_v60  ;;  %v6915_v11 = vld [vmem:[#allocation7 + $0x160] sm:$0xff] }
 0x525   :  { %2010 = vmatprep.subr.mxu1 %v9734_v0  ;;  %1969 = vmatprep.subr.mxu0 %v6864_v46  ;;  %9752 = vst [vmem:[#allocation23_spill] sm:$0xff] %v6915_v11  ;;  %v6918_v0 = vld [vmem:[#allocation7 + $0x508] sm:$0xff] }
 0x526   :  { %2011 = vmatpush1.msra.mxu1 %v9735_v54  ;;  %1970 = vmatpush2.msra.mxu0 %v6868_v39  ;;  %9753 = vst [vmem:[#allocation63_spill] sm:$0xff] %v6918_v0  ;;  %v6921_v54 = vld [vmem:[#allocation7 + $0x130] sm:$0xff] }
 0x527   :  { %2012 = vmatprep.subr.mxu1 %v9736_v35  ;;  %1971 = vmatprep.subr.mxu0 %v6872_v1  ;;  %9754 = vst [vmem:[#allocation24_spill] sm:$0xff] %v6921_v54  ;;  %v6924_v35 = vld [vmem:[#allocation7 + $0x4d8] sm:$0xff] }
 0x528   :  { %2013 = vmatpush1.msra.mxu1 %v9737_v58  ;;  %1972 = vmatpush2.msra.mxu0 %v6876_v53  ;;  %9755 = vst [vmem:[#allocation65_spill] sm:$0xff] %v6924_v35  ;;  %v6927_v58 = vld [vmem:[#allocation7 + $0x128] sm:$0xff] }
 0x529   :  { %2014 = vmatprep.subr.mxu1 %v9738_v48  ;;  %1973 = vmatprep.subr.mxu0 %v6880_v42  ;;  %9756 = vst [vmem:[#allocation25_spill] sm:$0xff] %v6927_v58  ;;  %v6930_v48 = vld [vmem:[#allocation7 + $0x4d0] sm:$0xff] }
 0x52a   :  { %2015 = vmatpush1.msra.mxu1 %v9739_v19  ;;  %1974 = vmatpush2.msra.mxu0 %v6884_v15  ;;  %9757 = vst [vmem:[#allocation67_spill] sm:$0xff] %v6930_v48  ;;  %v6933_v19 = vld [vmem:[#allocation7 + $0xf8] sm:$0xff] }
 0x52b   :  { %2016 = vmatprep.subr.mxu1 %v9740_v41  ;;  %1975 = vmatprep.subr.mxu0 %v6888_v61  ;;  %9758 = vst [vmem:[#allocation26_spill] sm:$0xff] %v6933_v19  ;;  %v6936_v41 = vld [vmem:[#allocation7 + $0x4a0] sm:$0xff] }
 0x52c   :  { %2017 = vmatpush1.msra.mxu1 %v9741_v30  ;;  %1976 = vmatpush2.msra.mxu0 %v6892_v34  ;;  %9759 = vst [vmem:[#allocation69_spill] sm:$0xff] %v6936_v41  ;;  %v6939_v30 = vld [vmem:[#allocation7 + $0xf0] sm:$0xff] }
 0x52d   :  { %2018 = vmatprep.subr.mxu1 %v9742_v27  ;;  %1977 = vmatprep.subr.mxu0 %v6896_v49  ;;  %9760 = vst [vmem:[#allocation27_spill] sm:$0xff] %v6939_v30  ;;  %v6942_v27 = vld [vmem:[#allocation7 + $0x498] sm:$0xff] }
 0x52e   :  { %2019 = vmatpush1.msra.mxu1 %v9744_v40  ;;  %1978 = vmatpush2.msra.mxu0 %v6900_v63  ;;  %9761 = vst [vmem:[#allocation71_spill] sm:$0xff] %v6942_v27  ;;  %v6945_v40 = vld [vmem:[#allocation7 + $0xc0] sm:$0xff]  ;;  %v9817_v63 = vld [vmem:[#allocation17_spill] sm:$0xff] }
 0x52f   :  { %2020 = vmatprep.subr.mxu1 %v9746_v22  ;;  %1979 = vmatprep.subr.mxu0 %v6904_v24  ;;  %9762 = vst [vmem:[#allocation28_spill] sm:$0xff] %v6945_v40  ;;  %v6948_v22 = vld [vmem:[#allocation7 + $0x468] sm:$0xff] }
 0x530   :  { %2021 = vmatpush1.msra.mxu1 %v9748_v26  ;;  %1980 = vmatpush2.msra.mxu0 %v6908_v28  ;;  %9763 = vst [vmem:[#allocation73_spill] sm:$0xff] %v6948_v22  ;;  %v6951_v26 = vld [vmem:[#allocation7 + $0xb8] sm:$0xff] }
 0x531   :  { %2022 = vmatprep.subr.mxu1 %v9750_v36  ;;  %1981 = vmatprep.subr.mxu0 %v6912_v60  ;;  %9764 = vst [vmem:[#allocation29_spill] sm:$0xff] %v6951_v26  ;;  %v6954_v36 = vld [vmem:[#allocation7 + $0x460] sm:$0xff]  ;;  %v9816_v28 = vld [vmem:[#allocation49_spill] sm:$0xff] }
 0x532   :  { %2023 = vmatpush1.msra.mxu1 %v6915_v11  ;;  %1982 = vmatpush2.msra.mxu0 %v6918_v0  ;;  %9765 = vst [vmem:[#allocation75_spill] sm:$0xff] %v6954_v36 }
 0x533   :  { %2024 = vmatprep.subr.mxu1 %v6921_v54  ;;  %1983 = vmatprep.subr.mxu0 %v6924_v35 }
 0x534   :  { %2025 = vmatpush1.msra.mxu1 %v6927_v58  ;;  %1984 = vmatpush2.msra.mxu0 %v6930_v48  ;;  %v9815_v58 = vld [vmem:[#allocation16_spill] sm:$0xff] }
 0x535   :  { %2026 = vmatprep.subr.mxu1 %v6933_v19  ;;  %1985 = vmatprep.subr.mxu0 %v6936_v41  ;;  %v9814_v41 = vld [vmem:[#allocation47_spill] sm:$0xff] }
 0x536   :  { %2027 = vmatpush1.msra.mxu1 %v6939_v30  ;;  %1986 = vmatpush2.msra.mxu0 %v6942_v27  ;;  %v6957_v30 = vld [vmem:[#allocation7 + $0x88] sm:$0xff]  ;;  %v6960_v27 = vld [vmem:[#allocation7 + $0x430] sm:$0xff] }
 0x537   :  { %2028 = vmatprep.subr.mxu1 %v6945_v40  ;;  %1987 = vmatprep.subr.mxu0 %v6948_v22  ;;  %9766 = vst [vmem:[#allocation30_spill] sm:$0xff] %v6957_v30  ;;  %9767 = vst [vmem:[#allocation77_spill] sm:$0xff] %v6960_v27  ;;  %v6963_v40 = vld [vmem:[#allocation7 + $0x80] sm:$0xff]  ;;  %v6966_v22 = vld [vmem:[#allocation7 + $0x428] sm:$0xff] }
 0x538   :  { %2029 = vmatpush1.msra.mxu1 %v6951_v26  ;;  %1988 = vmatpush2.msra.mxu0 %v6954_v36  ;;  %9768 = vst [vmem:[#allocation31_spill] sm:$0xff] %v6963_v40  ;;  %9769 = vst [vmem:[#allocation79_spill] sm:$0xff] %v6966_v22  ;;  %v6969_v26 = vld [vmem:[#allocation7 + $0x50] sm:$0xff]  ;;  %v6972_v36 = vld [vmem:[#allocation7 + $0x3f8] sm:$0xff] }
 0x539   :  { %2030 = vmatprep.subr.mxu1 %v6957_v30  ;;  %1989 = vmatprep.subr.mxu0 %v6960_v27  ;;  %9770 = vst [vmem:[#allocation32_spill] sm:$0xff] %v6969_v26  ;;  %9771 = vst [vmem:[#allocation81_spill] sm:$0xff] %v6972_v36  ;;  %v6975_v30 = vld [vmem:[#allocation7 + $0x48] sm:$0xff]  ;;  %v6978_v27 = vld [vmem:[#allocation7 + $0x3f0] sm:$0xff] }
 0x53a   :  { %2031 = vmatpush1.msra.mxu1 %v6963_v40  ;;  %1990 = vmatpush2.msra.mxu0 %v6966_v22  ;;  %9772 = vst [vmem:[#allocation33_spill] sm:$0xff] %v6975_v30  ;;  %9773 = vst [vmem:[#allocation83_spill] sm:$0xff] %v6978_v27  ;;  %v6981_v40 = vld [vmem:[#allocation7 + $0x18] sm:$0xff]  ;;  %v6984_v22 = vld [vmem:[#allocation7 + $0x3c0] sm:$0xff] }
 0x53b   :  { %2032 = vmatprep.subr.mxu1 %v6969_v26  ;;  %1991 = vmatprep.subr.mxu0 %v6972_v36  ;;  %9774 = vst [vmem:[#allocation34_spill] sm:$0xff] %v6981_v40  ;;  %9775 = vst [vmem:[#allocation35_spill] sm:$0xff] %v6984_v22  ;;  %v6987_v26 = vld [vmem:[#allocation7 + $0x10] sm:$0xff]  ;;  %v6990_v36 = vld [vmem:[#allocation7 + $0x3b8] sm:$0xff] }
 0x53c   :  { %2033 = vmatpush1.msra.mxu1 %v6975_v30  ;;  %1992 = vmatpush2.msra.mxu0 %v6978_v27  ;;  %9776 = vst [vmem:[#allocation36_spill] sm:$0xff] %v6987_v26  ;;  %9777 = vst [vmem:[#allocation37_spill] sm:$0xff] %v6990_v36  ;;  %v6993_v30 = vld [vmem:[#allocation7 + $0x6e0] sm:$0xff]  ;;  %v6996_v27 = vld [vmem:[#allocation7 + $0x388] sm:$0xff] }
 0x53d   :  { %2034 = vmatprep.subr.mxu1 %v6981_v40  ;;  %1993 = vmatprep.subr.mxu0 %v6984_v22  ;;  %9778 = vst [vmem:[#allocation38_spill] sm:$0xff] %v6993_v30  ;;  %9779 = vst [vmem:[#allocation40_spill] sm:$0xff] %v6996_v27  ;;  %v6999_v40 = vld [vmem:[#allocation7 + $0x6d8] sm:$0xff]  ;;  %v7002_v22 = vld [vmem:[#allocation7 + $0x380] sm:$0xff] }
 0x53e   :  { %2035 = vmatpush1.msra.mxu1 %v6987_v26  ;;  %1994 = vmatpush2.msra.mxu0 %v6990_v36  ;;  %9780 = vst [vmem:[#allocation42_spill] sm:$0xff] %v6999_v40  ;;  %9781 = vst [vmem:[#allocation44_spill] sm:$0xff] %v7002_v22  ;;  %v7005_v26 = vld [vmem:[#allocation7 + $0x6a8] sm:$0xff]  ;;  %v7008_v36 = vld [vmem:[#allocation7 + $0x370] sm:$0xff] }
 0x53f   :  { %2036 = vmatprep.subr.mxu1 %v6993_v30  ;;  %1995 = vmatprep.subr.mxu0 %v6996_v27  ;;  %9782 = vst [vmem:[#allocation46_spill] sm:$0xff] %v7005_v26  ;;  %9783 = vst [vmem:[#allocation48_spill] sm:$0xff] %v7008_v36  ;;  %v7011_v30 = vld [vmem:[#allocation7 + $0x6a0] sm:$0xff]  ;;  %v7014_v27 = vld [vmem:[#allocation7 + $0x670] sm:$0xff] }
 0x540   :  { %2037 = vmatpush2.msra.mxu1 %v6999_v40  ;;  %1996 = vmatpush2.msra.mxu0 %v7002_v22  ;;  %9784 = vst [vmem:[#allocation50_spill] sm:$0xff] %v7011_v30  ;;  %9785 = vst [vmem:[#allocation52_spill] sm:$0xff] %v7014_v27  ;;  %v7017_v40 = vld [vmem:[#allocation7 + $0x668] sm:$0xff]  ;;  %v7020_v22 = vld [vmem:[#allocation7 + $0x638] sm:$0xff] }
 0x541   :  { %2038 = vmatprep.subr.mxu1 %v7005_v26  ;;  %2075 = vmatprep.subr.mxu0 %v7008_v36  ;;  %9786 = vst [vmem:[#allocation54_spill] sm:$0xff] %v7017_v40  ;;  %9787 = vst [vmem:[#allocation56_spill] sm:$0xff] %v7020_v22  ;;  %v7023_v26 = vld [vmem:[#allocation7 + $0x630] sm:$0xff]  ;;  %v7026_v36 = vld [vmem:[#allocation7 + $0x600] sm:$0xff] }
 0x542   :  { %2039 = vmatpush2.msra.mxu1 %v7011_v30  ;;  %9788 = vst [vmem:[#allocation58_spill] sm:$0xff] %v7023_v26  ;;  %9789 = vst [vmem:[#allocation60_spill] sm:$0xff] %v7026_v36  ;;  %v7029_v30 = vld [vmem:[#allocation7 + $0x5f8] sm:$0xff] }
 0x543   :  { %2040 = vmatprep.subr.mxu1 %v7014_v27  ;;  %9790 = vst [vmem:[#allocation62_spill] sm:$0xff] %v7029_v30  ;;  %v7032_v27 = vld [vmem:[#allocation7 + $0x5c8] sm:$0xff] }
 0x544   :  { %2041 = vmatpush2.msra.mxu1 %v7017_v40  ;;  %9791 = vst [vmem:[#allocation64_spill] sm:$0xff] %v7032_v27  ;;  %v7035_v40 = vld [vmem:[#allocation7 + $0x5c0] sm:$0xff] }
 0x545   :  { %2042 = vmatprep.subr.mxu1 %v7020_v22  ;;  %9792 = vst [vmem:[#allocation66_spill] sm:$0xff] %v7035_v40  ;;  %v7038_v22 = vld [vmem:[#allocation7 + $0x590] sm:$0xff] }
 0x546   :  { %2043 = vmatpush2.msra.mxu1 %v7023_v26  ;;  %9793 = vst [vmem:[#allocation68_spill] sm:$0xff] %v7038_v22  ;;  %v7041_v26 = vld [vmem:[#allocation7 + $0x588] sm:$0xff] }
 0x547   :  { %2044 = vmatprep.subr.mxu1 %v7026_v36  ;;  %9794 = vst [vmem:[#allocation70_spill] sm:$0xff] %v7041_v26  ;;  %v7044_v36 = vld [vmem:[#allocation7 + $0x558] sm:$0xff] }
 0x548   :  { %2045 = vmatpush2.msra.mxu1 %v7029_v30  ;;  %9795 = vst [vmem:[#allocation72_spill] sm:$0xff] %v7044_v36  ;;  %v7047_v30 = vld [vmem:[#allocation7 + $0x550] sm:$0xff] }
 0x549   :  { %2046 = vmatprep.subr.mxu1 %v7032_v27  ;;  %9796 = vst [vmem:[#allocation74_spill] sm:$0xff] %v7047_v30  ;;  %v7050_v27 = vld [vmem:[#allocation7 + $0x520] sm:$0xff] }
 0x54a   :  { %2047 = vmatpush2.msra.mxu1 %v7035_v40  ;;  %9797 = vst [vmem:[#allocation76_spill] sm:$0xff] %v7050_v27  ;;  %v7053_v40 = vld [vmem:[#allocation7 + $0x518] sm:$0xff] }
 0x54b   :  { %2048 = vmatprep.subr.mxu1 %v7038_v22  ;;  %9798 = vst [vmem:[#allocation78_spill] sm:$0xff] %v7053_v40  ;;  %v7056_v22 = vld [vmem:[#allocation7 + $0x4e8] sm:$0xff] }
 0x54c   :  { %2049 = vmatpush2.msra.mxu1 %v7041_v26  ;;  %9799 = vst [vmem:[#allocation80_spill] sm:$0xff] %v7056_v22  ;;  %v7059_v26 = vld [vmem:[#allocation7 + $0x4e0] sm:$0xff] }
 0x54d   :  { %2050 = vmatprep.subr.mxu1 %v7044_v36  ;;  %9800 = vst [vmem:[#allocation82_spill] sm:$0xff] %v7059_v26  ;;  %v7062_v36 = vld [vmem:[#allocation7 + $0x4b0] sm:$0xff] }
 0x54e   :  { %2051 = vmatpush2.msra.mxu1 %v7047_v30  ;;  %9801 = vst [vmem:[#allocation84_spill] sm:$0xff] %v7062_v36  ;;  %v7065_v30 = vld [vmem:[#allocation7 + $0x4a8] sm:$0xff] }
 0x54f   :  { %2052 = vmatprep.subr.mxu1 %v7050_v27  ;;  %9802 = vst [vmem:[#allocation86_spill] sm:$0xff] %v7065_v30  ;;  %v7068_v27 = vld [vmem:[#allocation7 + $0x478] sm:$0xff] }
 0x550   :  { %2053 = vmatpush2.msra.mxu1 %v7053_v40  ;;  %9803 = vst [vmem:[#allocation87_spill] sm:$0xff] %v7068_v27  ;;  %v7071_v40 = vld [vmem:[#allocation7 + $0x470] sm:$0xff] }
 0x551   :  { %2054 = vmatprep.subr.mxu1 %v7056_v22  ;;  %9804 = vst [vmem:[#allocation88_spill] sm:$0xff] %v7071_v40  ;;  %v7074_v22 = vld [vmem:[#allocation7 + $0x440] sm:$0xff] }
 0x552   :  { %2055 = vmatpush2.msra.mxu1 %v7059_v26  ;;  %9805 = vst [vmem:[#allocation89_spill] sm:$0xff] %v7074_v22  ;;  %v7077_v26 = vld [vmem:[#allocation7 + $0x438] sm:$0xff] }
 0x553   :  { %2056 = vmatprep.subr.mxu1 %v7062_v36  ;;  %9806 = vst [vmem:[#allocation90_spill] sm:$0xff] %v7077_v26  ;;  %v7080_v36 = vld [vmem:[#allocation7 + $0x408] sm:$0xff] }
 0x554   :  { %2057 = vmatpush2.msra.mxu1 %v7065_v30  ;;  %9807 = vst [vmem:[#allocation91_spill] sm:$0xff] %v7080_v36  ;;  %v7083_v30 = vld [vmem:[#allocation7 + $0x400] sm:$0xff] }
 0x555   :  { %2058 = vmatprep.subr.mxu1 %v7068_v27  ;;  %9808 = vst [vmem:[#allocation92_spill] sm:$0xff] %v7083_v30  ;;  %v7086_v27 = vld [vmem:[#allocation7 + $0x3d0] sm:$0xff] }
 0x556   :  { %2059 = vmatpush2.msra.mxu1 %v7071_v40  ;;  %9809 = vst [vmem:[#allocation94_spill] sm:$0xff] %v7086_v27  ;;  %v7089_v40 = vld [vmem:[#allocation7 + $0x3c8] sm:$0xff] }
 0x557   :  { %2060 = vmatprep.subr.mxu1 %v7074_v22  ;;  %9810 = vst [vmem:[#allocation95_spill] sm:$0xff] %v7089_v40  ;;  %v7092_v22 = vld [vmem:[#allocation7 + $0x398] sm:$0xff] }
 0x558   :  { %2061 = vmatpush2.msra.mxu1 %v7077_v26  ;;  %9811 = vst [vmem:[#allocation96_spill] sm:$0xff] %v7092_v22  ;;  %v7095_v26 = vld [vmem:[#allocation7 + $0x390] sm:$0xff] }
 0x559   :  { %2062 = vmatprep.subr.mxu1 %v7080_v36  ;;  %9812 = vst [vmem:[#allocation97_spill] sm:$0xff] %v7095_v26  ;;  %v7098_v36 = vld [vmem:[#allocation7 + $0x6f8] sm:$0xff] }
 0x55a   :  { %2063 = vmatpush2.msra.mxu1 %v7083_v30  ;;  %9813 = vst [vmem:[#allocation98_spill] sm:$0xff] %v7098_v36 }
 0x55b   :  { %2064 = vmatprep.subr.mxu1 %v7086_v27 }
 0x55c   :  { %2065 = vmatpush2.msra.mxu1 %v7089_v40 }
 0x55d   :  { %2066 = vmatprep.subr.mxu1 %v7092_v22 }
 0x55e   :  { %2067 = vmatpush2.msra.mxu1 %v7095_v26 }
 0x55f   :  { %3648 = vmatprep.subr.mxu1 %v7098_v36 }
 0x59e   :  { %v1668_v30 = vpop.f32.mrf.mxu1  ;;  %v1739_v0 = vpop.f32.mrf.mxu0 }
 0x59f   :  { %v1885_v19 = vadd.f32 %v1668_v30, %v9814_v41  ;;  %v1887_v49 = vadd.f32 %v1739_v0, %v9817_v63 }
 0x5a0   :  { %v1670_v48 = vpop.f32.mrf.mxu1  ;;  %v1741_v26 = vpop.f32.mrf.mxu0 }
 0x5a1   :  { %v3484_v27 = vmul.f32 -1.442695, %v1885_v19  ;;  %v1886_v40 = vadd.f32 %v1670_v48, %v9815_v58  ;;  %v1888_v24 = vadd.f32 %v1741_v26, %v9816_v28  ;;  %v9818_v58 = vld [vmem:[#allocation20_spill] sm:$0xff] }
 0x5a2   :  { %v1908_v26 = vld [vmem:[#allocation5] sm:$0x3] }
 0x5a3   :  { %3926 = vpow2.f32 %v3484_v27  ;;  %v3485_v35 = vmul.f32 -1.442695, %v1886_v40 }
 0x5a5   :  { %3928 = vpow2.f32 %v3485_v35 }
 0x5b0   :  { %v3927_v54 = vpop.eup %3926 }
 0x5b1   :  { %v1892_v22 = vadd.f32 1.0, %v3927_v54 }
 0x5b2   :  { %v3929_v11 = vpop.eup %3928 }
 0x5b3   :  { %3930 = vrcp.f32 %v1892_v22  ;;  %v1898_v60 = vadd.f32 1.0, %v3929_v11 }
 0x5b5   :  { %3932 = vrcp.f32 %v1898_v60 }
 0x5c0   :  { %v3931_v36 = vpop.eup %3930 }
 0x5c1   :  { %v1901_v19 = vmul.f32 %v3931_v36, %v1888_v24 }
 0x5c2   :  { %v3933_v27 = vpop.eup %3932 }
 0x5c3   :  { %v1902_v30 = vadd.f32 %v1901_v19, %v1887_v49  ;;  %v1904_v48 = vsub.f32 1.0, %v3933_v27  ;;  %v1906_v54 = vmul.f32 %v3933_v27, %v9818_v58  ;;  %v1909_v49 = vld [vmem:[#allocation5 + $0x18] sm:$0x3]  ;;  %v3645_v27 = vpop.f32.mrf.mxu0  ;;  %v7113_v58 = vld [vmem:[%s8599_s3] ss:$0 sm:$0xff] }
 0x5c5   :  { %3934 = vtanh.f32 %v1902_v30 }
 0x5d2   :  { %v3935_v40 = vpop.eup %3934 }
 0x5d3   :  { %v1905_v35 = vmul.f32 %v3935_v40, %v1904_v48  ;;  %v3646_v48 = vpop.f32.mrf.mxu0 }
 0x5d5   :  { %v7106_v22 = vadd.f32 %v1906_v54, %v1905_v35  ;;  %v3647_v35 = vadd.f32 %v3646_v48, %v3645_v27  ;;  %v7121_v48 = vld [vmem:[#allocation7 + $0x368] sm:$0xff] }
 0x5d7   :  { %9819 = vst [vmem:[#allocation99_spill] sm:$0xff] %v7106_v22  ;;  %1997 = vmatprep.mubr.f32.mxu0 %v7106_v22  ;;  %2068 = vmatprep.mubr.f32.mxu1 %v7106_v22 }
 0x5df   :  { %v1810_v11 = vpop.f32.mrf.mxu1 }
 0x5e0   :  { %v1911_v28 = vadd.f32 %v1908_v26, %v1810_v11 }
 0x5e1   :  { %v1812_v60 = vpop.f32.mrf.mxu1 }
 0x5e2   :  { %v3486_v0 = vmul.f32 -1.442695, %v1911_v28  ;;  %v1918_v24 = vadd.f32 %v1909_v49, %v1812_v60  ;;  %v1925_v28 = vadd.f32 %v7113_v58, %v3647_v35  ;;  %v7127_v35 = vld [vmem:[#allocation7 + $0x338] sm:$0xff] }
 0x5e4   :  { %3936 = vpow2.f32 %v3486_v0  ;;  %v3487_v36 = vmul.f32 -1.442695, %v1918_v24  ;;  %v1910_v0 = vld [vmem:[#allocation5 + $0x20] sm:$0x3] }
 0x5e6   :  { %3938 = vpow2.f32 %v3487_v36 }
 0x5f1   :  { %v3937_v19 = vpop.eup %3936 }
 0x5f2   :  { %v1915_v30 = vadd.f32 1.0, %v3937_v19 }
 0x5f3   :  { %v3939_v40 = vpop.eup %3938 }
 0x5f4   :  { %3940 = vrcp.f32 %v1915_v30  ;;  %v1922_v54 = vadd.f32 1.0, %v3939_v40  ;;  %v7124_v40 = vld [vmem:[#allocation7 + $0x378] sm:$0xff] }
 0x5f6   :  { %3942 = vrcp.f32 %v1922_v54  ;;  %v7135_v54 = vld [vmem:[#allocation7 + $0x330] sm:$0xff] }
 0x601   :  { %v3941_v11 = vpop.eup %3940 }
 0x602   :  { %v1926_v26 = vmul.f32 %v3941_v11, %v1925_v28  ;;  %v7138_v28 = vld [vmem:[#allocation7 + $0x340] sm:$0xff] }
 0x603   :  { %v3943_v49 = vpop.eup %3942  ;;  %v7141_v11 = vld [vmem:[#allocation7 + $0x300] sm:$0xff] }
 0x604   :  { %v1927_v60 = vadd.f32 %v1926_v26, %v1910_v0  ;;  %v1929_v24 = vsub.f32 1.0, %v3943_v49  ;;  %v1931_v30 = vmul.f32 %v3943_v49, %v6649_v31  ;;  %v7131_v31 = vld [vmem:[#allocation7 + $0x6c0] sm:$0xff]  ;;  %v7144_v26 = vld [vmem:[#allocation7 + $0x688] sm:$0xff]  ;;  %v7147_v0 = vld [vmem:[#allocation7 + $0x2f8] sm:$0xff] }
 0x605   :  { %v7153_v49 = vld [vmem:[#allocation7 + $0x2c8] sm:$0xff] }
 0x606   :  { %3944 = vtanh.f32 %v1927_v60  ;;  %v7150_v60 = vld [vmem:[#allocation7 + $0x308] sm:$0xff]  ;;  %9821 = vst [vmem:[#allocation101_spill] sm:$0xff] %v7153_v49 }
 0x607   :  { %9820 = vst [vmem:[#allocation100_spill] sm:$0xff] %v7150_v60 }
 0x613   :  { %v3945_v36 = vpop.eup %3944 }
 0x614   :  { %v1930_v19 = vmul.f32 %v3945_v36, %v1929_v24  ;;  %v7156_v24 = vld [vmem:[#allocation7 + $0x650] sm:$0xff]  ;;  %v7159_v36 = vld [vmem:[#allocation7 + $0x2c0] sm:$0xff] }
 0x615   :  { %9822 = vst [vmem:[#allocation102_spill] sm:$0xff] %v7156_v24  ;;  %9823 = vst [vmem:[#allocation103_spill] sm:$0xff] %v7159_v36 }
 0x616   :  { %v7117_v27 = vadd.f32 %v1931_v30, %v1930_v19  ;;  %v7162_v19 = vld [vmem:[#allocation7 + $0x2d0] sm:$0xff] }
 0x617   :  { %9824 = vst [vmem:[#allocation104_spill] sm:$0xff] %v7162_v19  ;;  %v7165_v30 = vld [vmem:[#allocation7 + $0x290] sm:$0xff] }
 0x618   :  { %1998 = vmatmul.mubr.f32.vlgmr.msra.gmra.mxu0 %v7117_v27  ;;  %2069 = vmatmul.mubr.f32.vlgmr.msra.gmra.mxu1 %v7117_v27  ;;  %9825 = vst [vmem:[#allocation105_spill] sm:$0xff] %v7165_v30 }
 0x619   :  { %2076 = vmatpush1.msra.mxu0 %v7121_v48  ;;  %3649 = vmatpush3.msra.mxu1 %v7124_v40 }
 0x61a   :  { %2077 = vmatprep.subr.mxu0 %v7127_v35  ;;  %2139 = vmatprep.mubr.f32.mxu0 %v7106_v22 }
 0x61b   :  { %3650 = vmatprep.subr.mxu1 %v7131_v31  ;;  %2210 = vmatprep.mubr.f32.mxu1 %v7106_v22 }
 0x61c   :  { %2078 = vmatpush1.msra.mxu0 %v7135_v54  ;;  %3651 = vmatpush3.msra.mxu1 %v7138_v28 }
 0x61d   :  { %2079 = vmatprep.subr.mxu0 %v7141_v11  ;;  %3652 = vmatprep.subr.mxu1 %v7144_v26 }
 0x61e   :  { %2080 = vmatpush1.msra.mxu0 %v7147_v0  ;;  %3653 = vmatpush3.msra.mxu1 %v7150_v60  ;;  %v7168_v60 = vld [vmem:[#allocation7 + $0x618] sm:$0xff] }
 0x61f   :  { %2081 = vmatprep.subr.mxu0 %v7153_v49  ;;  %3654 = vmatprep.subr.mxu1 %v7156_v24  ;;  %9826 = vst [vmem:[#allocation106_spill] sm:$0xff] %v7168_v60  ;;  %v7171_v49 = vld [vmem:[#allocation7 + $0x288] sm:$0xff]  ;;  %v7174_v24 = vld [vmem:[#allocation7 + $0x298] sm:$0xff] }
 0x620   :  { %2082 = vmatpush1.msra.mxu0 %v7159_v36  ;;  %3655 = vmatpush3.msra.mxu1 %v7162_v19  ;;  %9827 = vst [vmem:[#allocation107_spill] sm:$0xff] %v7171_v49  ;;  %9828 = vst [vmem:[#allocation108_spill] sm:$0xff] %v7174_v24  ;;  %v7177_v36 = vld [vmem:[#allocation7 + $0x258] sm:$0xff]  ;;  %v7180_v19 = vld [vmem:[#allocation7 + $0x5e0] sm:$0xff] }
 0x621   :  { %2083 = vmatprep.subr.mxu0 %v7165_v30  ;;  %3656 = vmatprep.subr.mxu1 %v7168_v60  ;;  %9829 = vst [vmem:[#allocation109_spill] sm:$0xff] %v7177_v36  ;;  %9830 = vst [vmem:[#allocation110_spill] sm:$0xff] %v7180_v19  ;;  %v7183_v30 = vld [vmem:[#allocation7 + $0x250] sm:$0xff]  ;;  %v7186_v60 = vld [vmem:[#allocation7 + $0x260] sm:$0xff] }
 0x622   :  { %2084 = vmatpush1.msra.mxu0 %v7171_v49  ;;  %3657 = vmatpush3.msra.mxu1 %v7174_v24  ;;  %9831 = vst [vmem:[#allocation111_spill] sm:$0xff] %v7183_v30  ;;  %9832 = vst [vmem:[#allocation112_spill] sm:$0xff] %v7186_v60  ;;  %v7189_v49 = vld [vmem:[#allocation7 + $0x220] sm:$0xff]  ;;  %v7192_v24 = vld [vmem:[#allocation7 + $0x5a8] sm:$0xff] }
 0x623   :  { %2085 = vmatprep.subr.mxu0 %v7177_v36  ;;  %3658 = vmatprep.subr.mxu1 %v7180_v19  ;;  %9833 = vst [vmem:[#allocation113_spill] sm:$0xff] %v7189_v49  ;;  %9834 = vst [vmem:[#allocation114_spill] sm:$0xff] %v7192_v24  ;;  %v7195_v36 = vld [vmem:[#allocation7 + $0x218] sm:$0xff]  ;;  %v7198_v19 = vld [vmem:[#allocation7 + $0x228] sm:$0xff] }
 0x624   :  { %2086 = vmatpush1.msra.mxu0 %v7183_v30  ;;  %3659 = vmatpush3.msra.mxu1 %v7186_v60  ;;  %9835 = vst [vmem:[#allocation115_spill] sm:$0xff] %v7195_v36  ;;  %9836 = vst [vmem:[#allocation116_spill] sm:$0xff] %v7198_v19  ;;  %v7201_v30 = vld [vmem:[#allocation7 + $0x1e8] sm:$0xff]  ;;  %v7204_v60 = vld [vmem:[#allocation7 + $0x570] sm:$0xff] }
 0x625   :  { %2087 = vmatprep.subr.mxu0 %v7189_v49  ;;  %3660 = vmatprep.subr.mxu1 %v7192_v24  ;;  %9837 = vst [vmem:[#allocation117_spill] sm:$0xff] %v7201_v30  ;;  %9838 = vst [vmem:[#allocation118_spill] sm:$0xff] %v7204_v60  ;;  %v7207_v49 = vld [vmem:[#allocation7 + $0x1e0] sm:$0xff]  ;;  %v7210_v24 = vld [vmem:[#allocation7 + $0x1f0] sm:$0xff] }
 0x626   :  { %2088 = vmatpush1.msra.mxu0 %v7195_v36  ;;  %3661 = vmatpush3.msra.mxu1 %v7198_v19  ;;  %9839 = vst [vmem:[#allocation119_spill] sm:$0xff] %v7207_v49  ;;  %9840 = vst [vmem:[#allocation120_spill] sm:$0xff] %v7210_v24  ;;  %v7213_v36 = vld [vmem:[#allocation7 + $0x1b0] sm:$0xff]  ;;  %v7216_v19 = vld [vmem:[#allocation7 + $0x538] sm:$0xff] }
 0x627   :  { %2089 = vmatprep.subr.mxu0 %v7201_v30  ;;  %3662 = vmatprep.subr.mxu1 %v7204_v60  ;;  %9841 = vst [vmem:[#allocation121_spill] sm:$0xff] %v7213_v36  ;;  %9842 = vst [vmem:[#allocation122_spill] sm:$0xff] %v7216_v19  ;;  %v7219_v30 = vld [vmem:[#allocation7 + $0x1a8] sm:$0xff]  ;;  %v7222_v60 = vld [vmem:[#allocation7 + $0x1b8] sm:$0xff] }
 0x628   :  { %2090 = vmatpush1.msra.mxu0 %v7207_v49  ;;  %3663 = vmatpush3.msra.mxu1 %v7210_v24  ;;  %9843 = vst [vmem:[#allocation123_spill] sm:$0xff] %v7219_v30  ;;  %9844 = vst [vmem:[#allocation124_spill] sm:$0xff] %v7222_v60  ;;  %v7225_v49 = vld [vmem:[#allocation7 + $0x178] sm:$0xff]  ;;  %v7228_v24 = vld [vmem:[#allocation7 + $0x500] sm:$0xff] }
 0x629   :  { %2091 = vmatprep.subr.mxu0 %v7213_v36  ;;  %3664 = vmatprep.subr.mxu1 %v7216_v19  ;;  %9845 = vst [vmem:[#allocation125_spill] sm:$0xff] %v7225_v49  ;;  %9846 = vst [vmem:[#allocation126_spill] sm:$0xff] %v7228_v24  ;;  %v7231_v36 = vld [vmem:[#allocation7 + $0x170] sm:$0xff]  ;;  %v7234_v19 = vld [vmem:[#allocation7 + $0x180] sm:$0xff] }
 0x62a   :  { %2092 = vmatpush1.msra.mxu0 %v7219_v30  ;;  %3665 = vmatpush3.msra.mxu1 %v7222_v60  ;;  %9847 = vst [vmem:[#allocation127_spill] sm:$0xff] %v7231_v36  ;;  %9848 = vst [vmem:[#allocation128_spill] sm:$0xff] %v7234_v19  ;;  %v7237_v30 = vld [vmem:[#allocation7 + $0x140] sm:$0xff]  ;;  %v7240_v60 = vld [vmem:[#allocation7 + $0x4c8] sm:$0xff] }
 0x62b   :  { %2093 = vmatprep.subr.mxu0 %v7225_v49  ;;  %3666 = vmatprep.subr.mxu1 %v7228_v24  ;;  %9849 = vst [vmem:[#allocation129_spill] sm:$0xff] %v7237_v30  ;;  %9850 = vst [vmem:[#allocation130_spill] sm:$0xff] %v7240_v60  ;;  %v7243_v49 = vld [vmem:[#allocation7 + $0x138] sm:$0xff]  ;;  %v7246_v24 = vld [vmem:[#allocation7 + $0x148] sm:$0xff] }
 0x62c   :  { %2094 = vmatpush1.msra.mxu0 %v7231_v36  ;;  %3667 = vmatpush3.msra.mxu1 %v7234_v19  ;;  %9851 = vst [vmem:[#allocation131_spill] sm:$0xff] %v7243_v49  ;;  %9852 = vst [vmem:[#allocation132_spill] sm:$0xff] %v7246_v24  ;;  %v7249_v36 = vld [vmem:[#allocation7 + $0x108] sm:$0xff]  ;;  %v7252_v19 = vld [vmem:[#allocation7 + $0x490] sm:$0xff] }
 0x62d   :  { %2095 = vmatprep.subr.mxu0 %v7237_v30  ;;  %3668 = vmatprep.subr.mxu1 %v7240_v60  ;;  %9853 = vst [vmem:[#allocation133_spill] sm:$0xff] %v7249_v36  ;;  %9854 = vst [vmem:[#allocation134_spill] sm:$0xff] %v7252_v19  ;;  %v7255_v30 = vld [vmem:[#allocation7 + $0x100] sm:$0xff]  ;;  %v7258_v60 = vld [vmem:[#allocation7 + $0x110] sm:$0xff] }
 0x62e   :  { %2096 = vmatpush1.msra.mxu0 %v7243_v49  ;;  %3669 = vmatpush3.msra.mxu1 %v7246_v24  ;;  %9855 = vst [vmem:[#allocation135_spill] sm:$0xff] %v7255_v30  ;;  %9856 = vst [vmem:[#allocation136_spill] sm:$0xff] %v7258_v60  ;;  %v7261_v49 = vld [vmem:[#allocation7 + $0xd0] sm:$0xff]  ;;  %v7264_v24 = vld [vmem:[#allocation7 + $0x458] sm:$0xff] }
 0x62f   :  { %2097 = vmatprep.subr.mxu0 %v7249_v36  ;;  %3670 = vmatprep.subr.mxu1 %v7252_v19  ;;  %9857 = vst [vmem:[#allocation137_spill] sm:$0xff] %v7261_v49  ;;  %9858 = vst [vmem:[#allocation138_spill] sm:$0xff] %v7264_v24  ;;  %v7267_v36 = vld [vmem:[#allocation7 + $0xc8] sm:$0xff]  ;;  %v7270_v19 = vld [vmem:[#allocation7 + $0xd8] sm:$0xff] }
 0x630   :  { %2098 = vmatpush1.msra.mxu0 %v7255_v30  ;;  %3671 = vmatpush3.msra.mxu1 %v7258_v60  ;;  %9859 = vst [vmem:[#allocation139_spill] sm:$0xff] %v7267_v36  ;;  %9860 = vst [vmem:[#allocation140_spill] sm:$0xff] %v7270_v19  ;;  %v7273_v30 = vld [vmem:[#allocation7 + $0x98] sm:$0xff]  ;;  %v7276_v60 = vld [vmem:[#allocation7 + $0x420] sm:$0xff] }
 0x631   :  { %2099 = vmatprep.subr.mxu0 %v7261_v49  ;;  %3672 = vmatprep.subr.mxu1 %v7264_v24  ;;  %9861 = vst [vmem:[#allocation141_spill] sm:$0xff] %v7273_v30  ;;  %9862 = vst [vmem:[#allocation142_spill] sm:$0xff] %v7276_v60  ;;  %v7279_v49 = vld [vmem:[#allocation7 + $0x90] sm:$0xff]  ;;  %v7282_v24 = vld [vmem:[#allocation7 + $0xa0] sm:$0xff] }
 0x632   :  { %2100 = vmatpush1.msra.mxu0 %v7267_v36  ;;  %3673 = vmatpush3.msra.mxu1 %v7270_v19  ;;  %9863 = vst [vmem:[#allocation143_spill] sm:$0xff] %v7279_v49  ;;  %9864 = vst [vmem:[#allocation144_spill] sm:$0xff] %v7282_v24  ;;  %v7285_v36 = vld [vmem:[#allocation7 + $0x60] sm:$0xff]  ;;  %v7288_v19 = vld [vmem:[#allocation7 + $0x3e8] sm:$0xff] }
 0x633   :  { %2101 = vmatprep.subr.mxu0 %v7273_v30  ;;  %3674 = vmatprep.subr.mxu1 %v7276_v60  ;;  %9865 = vst [vmem:[#allocation145_spill] sm:$0xff] %v7285_v36  ;;  %9866 = vst [vmem:[#allocation146_spill] sm:$0xff] %v7288_v19  ;;  %v7291_v30 = vld [vmem:[#allocation7 + $0x58] sm:$0xff]  ;;  %v7294_v60 = vld [vmem:[#allocation7 + $0x68] sm:$0xff] }
 0x634   :  { %2102 = vmatpush1.msra.mxu0 %v7279_v49  ;;  %3675 = vmatpush3.msra.mxu1 %v7282_v24  ;;  %9867 = vst [vmem:[#allocation147_spill] sm:$0xff] %v7291_v30  ;;  %9868 = vst [vmem:[#allocation148_spill] sm:$0xff] %v7294_v60  ;;  %v7297_v49 = vld [vmem:[#allocation7 + $0x28] sm:$0xff]  ;;  %v7300_v24 = vld [vmem:[#allocation7 + $0x3b0] sm:$0xff] }
 0x635   :  { %2103 = vmatprep.subr.mxu0 %v7285_v36  ;;  %3676 = vmatprep.subr.mxu1 %v7288_v19  ;;  %9869 = vst [vmem:[#allocation149_spill] sm:$0xff] %v7300_v24  ;;  %v7303_v36 = vld [vmem:[#allocation7 + $0x20] sm:$0xff]  ;;  %v7306_v19 = vld [vmem:[#allocation7 + $0x30] sm:$0xff] }
 0x636   :  { %2104 = vmatpush1.msra.mxu0 %v7291_v30  ;;  %3677 = vmatpush3.msra.mxu1 %v7294_v60  ;;  %9870 = vst [vmem:[#allocation150_spill] sm:$0xff] %v7303_v36  ;;  %v7309_v30 = vld [vmem:[#allocation7 + $0x6f0] sm:$0xff]  ;;  %v7313_v60 = vld [vmem:[#allocation7 + $0x6e8] sm:$0xff] }
 0x637   :  { %2105 = vmatprep.subr.mxu0 %v7297_v49  ;;  %3678 = vmatprep.subr.mxu1 %v7300_v24  ;;  %9871 = vst [vmem:[#allocation151_spill] sm:$0xff] %v7309_v30  ;;  %9872 = vst [vmem:[#allocation152_spill] sm:$0xff] %v7313_v60  ;;  %v7317_v24 = vld [vmem:[#allocation7 + $0x6b8] sm:$0xff] }
 0x638   :  { %2106 = vmatpush1.msra.mxu0 %v7303_v36  ;;  %3679 = vmatpush3.msra.mxu1 %v7306_v19  ;;  %v7321_v36 = vld [vmem:[#allocation7 + $0x6b0] sm:$0xff] }
 0x639   :  { %2107 = vmatprep.subr.mxu0 %v7309_v30  ;;  %2211 = vmatmul.mubr.f32.vlgmr.msra.gmra.mxu1 %v7117_v27  ;;  %v7325_v30 = vld [vmem:[#allocation7 + $0x680] sm:$0xff] }
 0x63a   :  { %2108 = vmatpush2.msra.mxu0 %v7313_v60  ;;  %2283 = vmatprep.subr.mxu1 %v6718_v23  ;;  %v7329_v60 = vld [vmem:[#allocation7 + $0x678] sm:$0xff]  ;;  %v7333_v23 = vld [vmem:[#allocation7 + $0x648] sm:$0xff] }
 0x63b   :  { %2109 = vmatprep.subr.mxu0 %v7317_v24  ;;  %2284 = vmatpush1.msra.mxu1 %v6722_v21  ;;  %v7337_v21 = vld [vmem:[#allocation7 + $0x640] sm:$0xff] }
 0x63c   :  { %2110 = vmatpush2.msra.mxu0 %v7321_v36  ;;  %2285 = vmatprep.subr.mxu1 %v6726_v37  ;;  %v7341_v37 = vld [vmem:[#allocation7 + $0x610] sm:$0xff] }
 0x63d   :  { %2111 = vmatprep.subr.mxu0 %v7325_v30  ;;  %2286 = vmatpush1.msra.mxu1 %v6730_v43  ;;  %v7345_v43 = vld [vmem:[#allocation7 + $0x608] sm:$0xff] }
 0x63e   :  { %2112 = vmatpush2.msra.mxu0 %v7329_v60  ;;  %2287 = vmatprep.subr.mxu1 %v6734_v62  ;;  %v7349_v62 = vld [vmem:[#allocation7 + $0x5d8] sm:$0xff] }
 0x63f   :  { %2113 = vmatprep.subr.mxu0 %v7333_v23  ;;  %2288 = vmatpush1.msra.mxu1 %v6738_v7  ;;  %v7353_v7 = vld [vmem:[#allocation7 + $0x5d0] sm:$0xff] }
 0x640   :  { %2114 = vmatpush2.msra.mxu0 %v7337_v21  ;;  %2289 = vmatprep.subr.mxu1 %v6742_v4  ;;  %v7357_v4 = vld [vmem:[#allocation7 + $0x5a0] sm:$0xff] }
 0x641   :  { %2115 = vmatprep.subr.mxu0 %v7341_v37  ;;  %2290 = vmatpush1.msra.mxu1 %v6746_v2  ;;  %v7361_v2 = vld [vmem:[#allocation7 + $0x598] sm:$0xff] }
 0x642   :  { %2116 = vmatpush2.msra.mxu0 %v7345_v43  ;;  %2291 = vmatprep.subr.mxu1 %v6750_v29  ;;  %v7365_v29 = vld [vmem:[#allocation7 + $0x568] sm:$0xff] }
 0x643   :  { %2117 = vmatprep.subr.mxu0 %v7349_v62  ;;  %2292 = vmatpush1.msra.mxu1 %v6754_v51  ;;  %v7369_v51 = vld [vmem:[#allocation7 + $0x560] sm:$0xff] }
 0x644   :  { %2118 = vmatpush2.msra.mxu0 %v7353_v7  ;;  %2293 = vmatprep.subr.mxu1 %v6758_v59  ;;  %v7373_v59 = vld [vmem:[#allocation7 + $0x530] sm:$0xff] }
 0x645   :  { %2119 = vmatprep.subr.mxu0 %v7357_v4  ;;  %2294 = vmatpush1.msra.mxu1 %v6762_v55  ;;  %v7377_v55 = vld [vmem:[#allocation7 + $0x528] sm:$0xff] }
 0x646   :  { %2120 = vmatpush2.msra.mxu0 %v7361_v2  ;;  %2295 = vmatprep.subr.mxu1 %v6766_v56  ;;  %v7381_v56 = vld [vmem:[#allocation7 + $0x4f8] sm:$0xff] }
 0x647   :  { %2121 = vmatprep.subr.mxu0 %v7365_v29  ;;  %2296 = vmatpush1.msra.mxu1 %v6770_v3  ;;  %v7385_v3 = vld [vmem:[#allocation7 + $0x4f0] sm:$0xff] }
 0x648   :  { %2122 = vmatpush2.msra.mxu0 %v7369_v51  ;;  %2297 = vmatprep.subr.mxu1 %v6774_v57  ;;  %v7389_v57 = vld [vmem:[#allocation7 + $0x4c0] sm:$0xff] }
 0x649   :  { %2123 = vmatprep.subr.mxu0 %v7373_v59  ;;  %2298 = vmatpush1.msra.mxu1 %v6778_v17  ;;  %v7393_v17 = vld [vmem:[#allocation7 + $0x4b8] sm:$0xff] }
 0x64a   :  { %2124 = vmatpush2.msra.mxu0 %v7377_v55  ;;  %2299 = vmatprep.subr.mxu1 %v6782_v47  ;;  %v7397_v47 = vld [vmem:[#allocation7 + $0x488] sm:$0xff] }
 0x64b   :  { %2125 = vmatprep.subr.mxu0 %v7381_v56  ;;  %2300 = vmatpush1.msra.mxu1 %v6786_v5  ;;  %v7401_v5 = vld [vmem:[#allocation7 + $0x480] sm:$0xff] }
 0x64c   :  { %2126 = vmatpush2.msra.mxu0 %v7385_v3  ;;  %2301 = vmatprep.subr.mxu1 %v6790_v45  ;;  %v7405_v45 = vld [vmem:[#allocation7 + $0x450] sm:$0xff] }
 0x64d   :  { %2127 = vmatprep.subr.mxu0 %v7389_v57  ;;  %2302 = vmatpush1.msra.mxu1 %v6794_v9  ;;  %v7409_v9 = vld [vmem:[#allocation7 + $0x448] sm:$0xff] }
 0x64e   :  { %2128 = vmatpush2.msra.mxu0 %v7393_v17  ;;  %2303 = vmatprep.subr.mxu1 %v6798_v25  ;;  %v7413_v25 = vld [vmem:[#allocation7 + $0x418] sm:$0xff] }
 0x64f   :  { %2129 = vmatprep.subr.mxu0 %v7397_v47  ;;  %2304 = vmatpush1.msra.mxu1 %v6802_v13  ;;  %v7417_v13 = vld [vmem:[#allocation7 + $0x410] sm:$0xff] }
 0x650   :  { %2130 = vmatpush2.msra.mxu0 %v7401_v5  ;;  %2305 = vmatprep.subr.mxu1 %v6806_v6  ;;  %v7421_v6 = vld [vmem:[#allocation7 + $0x3e0] sm:$0xff] }
 0x651   :  { %2131 = vmatprep.subr.mxu0 %v7405_v45  ;;  %2306 = vmatpush1.msra.mxu1 %v6810_v8  ;;  %v7425_v8 = vld [vmem:[#allocation7 + $0x3d8] sm:$0xff] }
 0x652   :  { %2132 = vmatpush2.msra.mxu0 %v7409_v9  ;;  %2307 = vmatprep.subr.mxu1 %v6814_v10  ;;  %v7429_v10 = vld [vmem:[#allocation7 + $0x3a8] sm:$0xff] }
 0x653   :  { %2133 = vmatprep.subr.mxu0 %v7413_v25  ;;  %2308 = vmatpush1.msra.mxu1 %v6818_v12  ;;  %v7433_v12 = vld [vmem:[#allocation7 + $0x3a0] sm:$0xff] }
 0x654   :  { %2134 = vmatpush2.msra.mxu0 %v7417_v13  ;;  %2309 = vmatprep.subr.mxu1 %v6822_v14  ;;  %v7438_v14 = vld [vmem:[#allocation7 + $0x360] sm:$0xff] }
 0x655   :  { %2135 = vmatprep.subr.mxu0 %v7421_v6  ;;  %2310 = vmatpush1.msra.mxu1 %v6826_v16  ;;  %v7441_v16 = vld [vmem:[#allocation7 + $0x358] sm:$0xff] }
 0x656   :  { %2136 = vmatpush2.msra.mxu0 %v7425_v8  ;;  %2311 = vmatprep.subr.mxu1 %v6830_v18  ;;  %9873 = vst [vmem:[#allocation153_spill] sm:$0xff] %v7441_v16  ;;  %v7445_v18 = vld [vmem:[#allocation7 + $0x328] sm:$0xff] }
 0x657   :  { %2137 = vmatprep.subr.mxu0 %v7429_v10  ;;  %2312 = vmatpush1.msra.mxu1 %v6834_v20  ;;  %9874 = vst [vmem:[#allocation39_spill] sm:$0xff] %v7445_v18  ;;  %v7449_v20 = vld [vmem:[#allocation7 + $0x320] sm:$0xff] }
 0x658   :  { %2138 = vmatpush2.msra.mxu0 %v7433_v12  ;;  %2313 = vmatprep.subr.mxu1 %v6838_v50  ;;  %9875 = vst [vmem:[#allocation41_spill] sm:$0xff] %v7449_v20  ;;  %v7453_v50 = vld [vmem:[#allocation7 + $0x2f0] sm:$0xff] }
 0x659   :  { %2140 = vmatmul.mubr.f32.vlgmr.msra.gmra.mxu0 %v7117_v27  ;;  %2354 = vmatprep.subr.mxu0 %v7438_v14  ;;  %9876 = vst [vmem:[#allocation43_spill] sm:$0xff] %v7453_v50 }
 0x65a   :  { %2355 = vmatpush1.msra.mxu0 %v7441_v16  ;;  %2314 = vmatpush1.msra.mxu1 %v6844_v33  ;;  %v7457_v16 = vld [vmem:[#allocation7 + $0x2e8] sm:$0xff]  ;;  %v7461_v33 = vld [vmem:[#allocation7 + $0x2b8] sm:$0xff] }
 0x65b   :  { %2356 = vmatprep.subr.mxu0 %v7445_v18  ;;  %2315 = vmatprep.subr.mxu1 %v6848_v38  ;;  %9877 = vst [vmem:[#allocation45_spill] sm:$0xff] %v7457_v16  ;;  %9878 = vst [vmem:[#allocation154_spill] sm:$0xff] %v7461_v33  ;;  %v7465_v38 = vld [vmem:[#allocation7 + $0x2b0] sm:$0xff] }
 0x65c   :  { %2357 = vmatpush1.msra.mxu0 %v7449_v20  ;;  %2316 = vmatpush2.msra.mxu1 %v6852_v32  ;;  %9879 = vst [vmem:[#allocation155_spill] sm:$0xff] %v7465_v38  ;;  %v7469_v32 = vld [vmem:[#allocation7 + $0x280] sm:$0xff] }
 0x65d   :  { %2358 = vmatprep.subr.mxu0 %v7453_v50  ;;  %2317 = vmatprep.subr.mxu1 %v6856_v52  ;;  %9880 = vst [vmem:[#allocation156_spill] sm:$0xff] %v7469_v32  ;;  %v7473_v52 = vld [vmem:[#allocation7 + $0x278] sm:$0xff] }
 0x65e   :  { %2359 = vmatpush1.msra.mxu0 %v7457_v16  ;;  %2318 = vmatpush2.msra.mxu1 %v6860_v44  ;;  %9881 = vst [vmem:[#allocation18_spill] sm:$0xff] %v7473_v52  ;;  %v7477_v44 = vld [vmem:[#allocation7 + $0x248] sm:$0xff] }
 0x65f   :  { %2360 = vmatprep.subr.mxu0 %v7461_v33  ;;  %2319 = vmatprep.subr.mxu1 %v6864_v46  ;;  %9882 = vst [vmem:[#allocation53_spill] sm:$0xff] %v7477_v44  ;;  %v7481_v46 = vld [vmem:[#allocation7 + $0x240] sm:$0xff] }
 0x660   :  { %2361 = vmatpush1.msra.mxu0 %v7465_v38  ;;  %2320 = vmatpush2.msra.mxu1 %v6868_v39  ;;  %9883 = vst [vmem:[#allocation19_spill] sm:$0xff] %v7481_v46  ;;  %v7485_v39 = vld [vmem:[#allocation7 + $0x210] sm:$0xff] }
 0x661   :  { %2362 = vmatprep.subr.mxu0 %v7469_v32  ;;  %2321 = vmatprep.subr.mxu1 %v6872_v1  ;;  %9884 = vst [vmem:[#allocation55_spill] sm:$0xff] %v7485_v39  ;;  %v7489_v1 = vld [vmem:[#allocation7 + $0x208] sm:$0xff] }
 0x662   :  { %2363 = vmatpush1.msra.mxu0 %v7473_v52  ;;  %2322 = vmatpush2.msra.mxu1 %v6876_v53  ;;  %9885 = vst [vmem:[#allocation157_spill] sm:$0xff] %v7489_v1  ;;  %v7493_v53 = vld [vmem:[#allocation7 + $0x1d8] sm:$0xff]  ;;  %v9901_v52 = vld [vmem:[#allocation67_spill] sm:$0xff] }
 0x663   :  { %2364 = vmatprep.subr.mxu0 %v7477_v44  ;;  %2323 = vmatprep.subr.mxu1 %v6880_v42  ;;  %9886 = vst [vmem:[#allocation158_spill] sm:$0xff] %v7493_v53  ;;  %v9887_v42 = vld [vmem:[#allocation57_spill] sm:$0xff]  ;;  %v9898_v44 = vld [vmem:[#allocation24_spill] sm:$0xff]  ;;  %v9904_v32 = vld [vmem:[#allocation27_spill] sm:$0xff] }
 0x664   :  { %2365 = vmatpush1.msra.mxu0 %v7481_v46  ;;  %2324 = vmatpush2.msra.mxu1 %v6884_v15  ;;  %v7497_v46 = vld [vmem:[#allocation7 + $0x1d0] sm:$0xff]  ;;  %v9889_v15 = vld [vmem:[#allocation21_spill] sm:$0xff] }
 0x665   :  { %2366 = vmatprep.subr.mxu0 %v7485_v39  ;;  %2325 = vmatprep.subr.mxu1 %v6888_v61  ;;  %9888 = vst [vmem:[#allocation57_spill] sm:$0xff] %v7497_v46  ;;  %v7501_v39 = vld [vmem:[#allocation7 + $0x1a0] sm:$0xff]  ;;  %v9891_v61 = vld [vmem:[#allocation59_spill] sm:$0xff] }
 0x666   :  { %2367 = vmatpush1.msra.mxu0 %v7489_v1  ;;  %2326 = vmatpush2.msra.mxu1 %v6892_v34  ;;  %9890 = vst [vmem:[#allocation21_spill] sm:$0xff] %v7501_v39  ;;  %v7505_v1 = vld [vmem:[#allocation7 + $0x198] sm:$0xff]  ;;  %v9893_v34 = vld [vmem:[#allocation22_spill] sm:$0xff] }
 0x667   :  { %2368 = vmatprep.subr.mxu0 %v7493_v53  ;;  %2327 = vmatprep.subr.mxu1 %v9887_v42  ;;  %9892 = vst [vmem:[#allocation59_spill] sm:$0xff] %v7505_v1  ;;  %v7509_v53 = vld [vmem:[#allocation7 + $0x168] sm:$0xff]  ;;  %v9895_v42 = vld [vmem:[#allocation61_spill] sm:$0xff] }
 0x668   :  { %2369 = vmatpush1.msra.mxu0 %v7497_v46  ;;  %2328 = vmatpush2.msra.mxu1 %v9889_v15  ;;  %9894 = vst [vmem:[#allocation22_spill] sm:$0xff] %v7509_v53  ;;  %v9896_v46 = vld [vmem:[#allocation23_spill] sm:$0xff] }
 0x669   :  { %2370 = vmatprep.subr.mxu0 %v7501_v39  ;;  %2329 = vmatprep.subr.mxu1 %v9891_v61  ;;  %v9897_v15 = vld [vmem:[#allocation63_spill] sm:$0xff]  ;;  %v9899_v39 = vld [vmem:[#allocation65_spill] sm:$0xff] }
 0x66a   :  { %2371 = vmatpush1.msra.mxu0 %v7505_v1  ;;  %2330 = vmatpush2.msra.mxu1 %v9893_v34  ;;  %v9900_v61 = vld [vmem:[#allocation25_spill] sm:$0xff]  ;;  %v9902_v1 = vld [vmem:[#allocation26_spill] sm:$0xff] }
 0x66b   :  { %2372 = vmatprep.subr.mxu0 %v7509_v53  ;;  %2331 = vmatprep.subr.mxu1 %v9895_v42  ;;  %v9903_v34 = vld [vmem:[#allocation69_spill] sm:$0xff]  ;;  %v9905_v53 = vld [vmem:[#allocation71_spill] sm:$0xff]  ;;  %v9906_v42 = vld [vmem:[#allocation28_spill] sm:$0xff] }
 0x66c   :  { %2373 = vmatpush1.msra.mxu0 %v9896_v46  ;;  %2332 = vmatpush2.msra.mxu1 %v9897_v15  ;;  %v9907_v46 = vld [vmem:[#allocation73_spill] sm:$0xff] }
 0x66d   :  { %2374 = vmatprep.subr.mxu0 %v9898_v44  ;;  %2333 = vmatprep.subr.mxu1 %v9899_v39  ;;  %v9908_v15 = vld [vmem:[#allocation29_spill] sm:$0xff]  ;;  %v9909_v44 = vld [vmem:[#allocation75_spill] sm:$0xff]  ;;  %v9910_v39 = vld [vmem:[#allocation30_spill] sm:$0xff] }
 0x66e   :  { %2375 = vmatpush1.msra.mxu0 %v9900_v61  ;;  %2334 = vmatpush2.msra.mxu1 %v9901_v52  ;;  %v9911_v61 = vld [vmem:[#allocation77_spill] sm:$0xff]  ;;  %v9912_v52 = vld [vmem:[#allocation31_spill] sm:$0xff] }
 0x66f   :  { %2376 = vmatprep.subr.mxu0 %v9902_v1  ;;  %2335 = vmatprep.subr.mxu1 %v9903_v34  ;;  %v9913_v1 = vld [vmem:[#allocation79_spill] sm:$0xff]  ;;  %v9914_v34 = vld [vmem:[#allocation32_spill] sm:$0xff] }
 0x670   :  { %2377 = vmatpush1.msra.mxu0 %v9904_v32  ;;  %2336 = vmatpush2.msra.mxu1 %v9905_v53  ;;  %v9915_v32 = vld [vmem:[#allocation81_spill] sm:$0xff] }
 0x671   :  { %2378 = vmatprep.subr.mxu0 %v9906_v42  ;;  %2337 = vmatprep.subr.mxu1 %v9907_v46  ;;  %v9916_v53 = vld [vmem:[#allocation33_spill] sm:$0xff]  ;;  %v9917_v42 = vld [vmem:[#allocation83_spill] sm:$0xff]  ;;  %v9918_v46 = vld [vmem:[#allocation34_spill] sm:$0xff] }
 0x672   :  { %2379 = vmatpush1.msra.mxu0 %v9908_v15  ;;  %2338 = vmatpush2.msra.mxu1 %v9909_v44  ;;  %v9919_v15 = vld [vmem:[#allocation35_spill] sm:$0xff]  ;;  %v9920_v44 = vld [vmem:[#allocation36_spill] sm:$0xff] }
 0x673   :  { %2380 = vmatprep.subr.mxu0 %v9910_v39  ;;  %2339 = vmatprep.subr.mxu1 %v9911_v61  ;;  %v9921_v39 = vld [vmem:[#allocation37_spill] sm:$0xff]  ;;  %v9922_v61 = vld [vmem:[#allocation38_spill] sm:$0xff] }
 0x674   :  { %2381 = vmatpush1.msra.mxu0 %v9912_v52  ;;  %2340 = vmatpush2.msra.mxu1 %v9913_v1  ;;  %v9923_v52 = vld [vmem:[#allocation40_spill] sm:$0xff]  ;;  %v9924_v1 = vld [vmem:[#allocation42_spill] sm:$0xff] }
 0x675   :  { %2382 = vmatprep.subr.mxu0 %v9914_v34  ;;  %2341 = vmatprep.subr.mxu1 %v9915_v32  ;;  %v9925_v34 = vld [vmem:[#allocation44_spill] sm:$0xff]  ;;  %v9926_v32 = vld [vmem:[#allocation46_spill] sm:$0xff] }
 0x676   :  { %2383 = vmatpush1.msra.mxu0 %v9916_v53  ;;  %2342 = vmatpush2.msra.mxu1 %v9917_v42  ;;  %v9927_v53 = vld [vmem:[#allocation48_spill] sm:$0xff]  ;;  %v9928_v42 = vld [vmem:[#allocation50_spill] sm:$0xff] }
 0x677   :  { %2384 = vmatprep.subr.mxu0 %v9918_v46  ;;  %2343 = vmatprep.subr.mxu1 %v9919_v15  ;;  %v9929_v46 = vld [vmem:[#allocation52_spill] sm:$0xff]  ;;  %v9930_v15 = vld [vmem:[#allocation54_spill] sm:$0xff] }
 0x678   :  { %2385 = vmatpush1.msra.mxu0 %v9920_v44  ;;  %2344 = vmatpush2.msra.mxu1 %v9921_v39  ;;  %v9931_v44 = vld [vmem:[#allocation56_spill] sm:$0xff]  ;;  %v9932_v39 = vld [vmem:[#allocation58_spill] sm:$0xff] }
 0x679   :  { %2386 = vmatprep.subr.mxu0 %v9922_v61  ;;  %2345 = vmatprep.subr.mxu1 %v9923_v52  ;;  %v9933_v61 = vld [vmem:[#allocation60_spill] sm:$0xff]  ;;  %v9934_v52 = vld [vmem:[#allocation62_spill] sm:$0xff] }
 0x67a   :  { %2387 = vmatpush2.msra.mxu0 %v9924_v1  ;;  %2346 = vmatpush2.msra.mxu1 %v9925_v34  ;;  %v9935_v1 = vld [vmem:[#allocation64_spill] sm:$0xff]  ;;  %v9936_v34 = vld [vmem:[#allocation66_spill] sm:$0xff] }
 0x67b   :  { %2388 = vmatprep.subr.mxu0 %v9926_v32  ;;  %2425 = vmatprep.subr.mxu1 %v9927_v53  ;;  %v9937_v32 = vld [vmem:[#allocation68_spill] sm:$0xff]  ;;  %v9938_v53 = vld [vmem:[#allocation70_spill] sm:$0xff] }
 0x67c   :  { %2389 = vmatpush2.msra.mxu0 %v9928_v42  ;;  %v9939_v42 = vld [vmem:[#allocation72_spill] sm:$0xff] }
 0x67d   :  { %2390 = vmatprep.subr.mxu0 %v9929_v46  ;;  %v9940_v46 = vld [vmem:[#allocation74_spill] sm:$0xff] }
 0x67e   :  { %2391 = vmatpush2.msra.mxu0 %v9930_v15  ;;  %v9941_v15 = vld [vmem:[#allocation76_spill] sm:$0xff] }
 0x67f   :  { %2392 = vmatprep.subr.mxu0 %v9931_v44  ;;  %v9942_v44 = vld [vmem:[#allocation78_spill] sm:$0xff] }
 0x680   :  { %2393 = vmatpush2.msra.mxu0 %v9932_v39  ;;  %v9943_v39 = vld [vmem:[#allocation80_spill] sm:$0xff] }
 0x681   :  { %2394 = vmatprep.subr.mxu0 %v9933_v61  ;;  %v9944_v61 = vld [vmem:[#allocation82_spill] sm:$0xff] }
 0x682   :  { %2395 = vmatpush2.msra.mxu0 %v9934_v52  ;;  %v9945_v52 = vld [vmem:[#allocation84_spill] sm:$0xff] }
 0x683   :  { %2396 = vmatprep.subr.mxu0 %v9935_v1  ;;  %v9946_v1 = vld [vmem:[#allocation86_spill] sm:$0xff] }
 0x684   :  { %2397 = vmatpush2.msra.mxu0 %v9936_v34  ;;  %v9947_v34 = vld [vmem:[#allocation87_spill] sm:$0xff] }
 0x685   :  { %2398 = vmatprep.subr.mxu0 %v9937_v32  ;;  %v9948_v32 = vld [vmem:[#allocation88_spill] sm:$0xff] }
 0x686   :  { %2399 = vmatpush2.msra.mxu0 %v9938_v53  ;;  %v9949_v53 = vld [vmem:[#allocation89_spill] sm:$0xff] }
 0x687   :  { %2400 = vmatprep.subr.mxu0 %v9939_v42  ;;  %v9950_v42 = vld [vmem:[#allocation90_spill] sm:$0xff] }
 0x688   :  { %2401 = vmatpush2.msra.mxu0 %v9940_v46  ;;  %v9951_v46 = vld [vmem:[#allocation91_spill] sm:$0xff] }
 0x689   :  { %2402 = vmatprep.subr.mxu0 %v9941_v15  ;;  %v9952_v15 = vld [vmem:[#allocation92_spill] sm:$0xff] }
 0x68a   :  { %2403 = vmatpush2.msra.mxu0 %v9942_v44  ;;  %v9953_v44 = vld [vmem:[#allocation94_spill] sm:$0xff] }
 0x68b   :  { %2404 = vmatprep.subr.mxu0 %v9943_v39  ;;  %v9954_v39 = vld [vmem:[#allocation95_spill] sm:$0xff] }
 0x68c   :  { %2405 = vmatpush2.msra.mxu0 %v9944_v61  ;;  %v9955_v61 = vld [vmem:[#allocation96_spill] sm:$0xff] }
 0x68d   :  { %2406 = vmatprep.subr.mxu0 %v9945_v52  ;;  %v9956_v52 = vld [vmem:[#allocation97_spill] sm:$0xff] }
 0x68e   :  { %2407 = vmatpush2.msra.mxu0 %v9946_v1  ;;  %v9957_v1 = vld [vmem:[#allocation98_spill] sm:$0xff] }
 0x68f   :  { %2408 = vmatprep.subr.mxu0 %v9947_v34 }
 0x690   :  { %2409 = vmatpush2.msra.mxu0 %v9948_v32 }
 0x691   :  { %2410 = vmatprep.subr.mxu0 %v9949_v53 }
 0x692   :  { %2411 = vmatpush2.msra.mxu0 %v9950_v42  ;;  %v9958_v42 = vld [vmem:[#allocation16_spill] sm:$0xff] }
 0x693   :  { %2412 = vmatprep.subr.mxu0 %v9951_v46 }
 0x694   :  { %2413 = vmatpush2.msra.mxu0 %v9952_v15 }
 0x695   :  { %2414 = vmatprep.subr.mxu0 %v9953_v44 }
 0x696   :  { %2415 = vmatpush2.msra.mxu0 %v9954_v39 }
 0x697   :  { %2416 = vmatprep.subr.mxu0 %v9955_v61 }
 0x698   :  { %2417 = vmatpush2.msra.mxu0 %v9956_v52  ;;  %v9959_v52 = vld [vmem:[#allocation49_spill] sm:$0xff] }
 0x699   :  { %3683 = vmatprep.subr.mxu0 %v9957_v1 }
 0x6d8   :  { %v1999_v34 = vpop.f32.mrf.mxu0  ;;  %v2070_v39 = vpop.f32.mrf.mxu1 }
 0x6d9   :  { %v2216_v32 = vadd.f32 %v1999_v34, %v9814_v41  ;;  %v2218_v18 = vadd.f32 %v2070_v39, %v9817_v63  ;;  %v2239_v39 = vld [vmem:[#allocation5] sm:$0xc] }
 0x6da   :  { %v2001_v38 = vpop.f32.mrf.mxu0  ;;  %v2072_v61 = vpop.f32.mrf.mxu1 }
 0x6db   :  { %v3488_v53 = vmul.f32 -1.442695, %v2216_v32  ;;  %v2217_v46 = vadd.f32 %v2001_v38, %v9958_v42  ;;  %v2219_v20 = vadd.f32 %v2072_v61, %v9959_v52 }
 0x6dd   :  { %3946 = vpow2.f32 %v3488_v53  ;;  %v3489_v33 = vmul.f32 -1.442695, %v2217_v46 }
 0x6df   :  { %3948 = vpow2.f32 %v3489_v33 }
 0x6ea   :  { %v3947_v15 = vpop.eup %3946 }
 0x6eb   :  { %v2223_v44 = vadd.f32 1.0, %v3947_v15 }
 0x6ec   :  { %v3949_v16 = vpop.eup %3948 }
 0x6ed   :  { %3950 = vrcp.f32 %v2223_v44  ;;  %v2229_v50 = vadd.f32 1.0, %v3949_v16 }
 0x6ef   :  { %3952 = vrcp.f32 %v2229_v50 }
 0x6fa   :  { %v3951_v1 = vpop.eup %3950 }
 0x6fb   :  { %v2232_v34 = vmul.f32 %v3951_v1, %v2219_v20 }
 0x6fc   :  { %v3953_v53 = vpop.eup %3952 }
 0x6fd   :  { %v2233_v32 = vadd.f32 %v2232_v34, %v2218_v18  ;;  %v2235_v38 = vsub.f32 1.0, %v3953_v53  ;;  %v2237_v15 = vmul.f32 %v3953_v53, %v7106_v22  ;;  %v2240_v34 = vld [vmem:[#allocation5 + $0x18] sm:$0xc] }
 0x6ff   :  { %3954 = vtanh.f32 %v2233_v32 }
 0x70c   :  { %v3955_v46 = vpop.eup %3954 }
 0x70d   :  { %v2236_v33 = vmul.f32 %v3955_v46, %v2235_v38  ;;  %v3680_v46 = vpop.f32.mrf.mxu1 }
 0x70f   :  { %v7580_v44 = vadd.f32 %v2237_v15, %v2236_v33  ;;  %v3681_v15 = vpop.f32.mrf.mxu1 }
 0x711   :  { %9960 = vst [vmem:[#allocation61_spill] sm:$0xff] %v7580_v44  ;;  %v2277_v42 = vrot.slane %v7580_v44, 6 }
 0x713   :  { %v2280_v16 = vrot.slane %v2277_v42, 2  ;;  %v3682_v42 = vadd.f32 %v3681_v15, %v3680_v46  ;;  %v9978_v15 = vld [vmem:[#allocation117_spill] sm:$0xff] }
 0x715   :  { %2347 = vmatprep.mubr.f32.mxu1 %v2280_v16  ;;  %2418 = vmatprep.mubr.f32.mxu0 %v2280_v16  ;;  %v2262_v44 = vadd.f32 %v7113_v58, %v3682_v42  ;;  %v9962_v58 = vld [vmem:[#allocation101_spill] sm:$0xff]  ;;  %v9979_v42 = vld [vmem:[#allocation118_spill] sm:$0xff] }
 0x717   :  { %v2264_v63 = vrot.slane %v2262_v44, 6  ;;  %v9975_v44 = vld [vmem:[#allocation114_spill] sm:$0xff] }
 0x719   :  { %v2141_v61 = vpop.f32.mrf.mxu0 }
 0x71a   :  { %v2243_v52 = vrot.slane %v2141_v61, 6 }
 0x71b   :  { %v2143_v50 = vpop.f32.mrf.mxu0 }
 0x71c   :  { %v2245_v20 = vadd.f32 %v2243_v52, %v2239_v39  ;;  %v2253_v1 = vrot.slane %v2143_v50, 6  ;;  %v2241_v39 = vld [vmem:[#allocation5 + $0x20] sm:$0xc] }
 0x71e   :  { %v3490_v18 = vmul.f32 -1.442695, %v2245_v20  ;;  %v2255_v32 = vadd.f32 %v2253_v1, %v2240_v34  ;;  %v2272_v1 = vrot.slane %v7117_v27, 6  ;;  %v9965_v27 = vld [vmem:[#allocation104_spill] sm:$0xff] }
 0x720   :  { %3956 = vpow2.f32 %v3490_v18  ;;  %v3491_v38 = vmul.f32 -1.442695, %v2255_v32 }
 0x722   :  { %3958 = vpow2.f32 %v3491_v38 }
 0x72d   :  { %v3957_v53 = vpop.eup %3956 }
 0x72e   :  { %v2249_v33 = vadd.f32 1.0, %v3957_v53 }
 0x72f   :  { %v3959_v22 = vpop.eup %3958 }
 0x730   :  { %3960 = vrcp.f32 %v2249_v33  ;;  %v2259_v61 = vadd.f32 1.0, %v3959_v22  ;;  %v9964_v22 = vld [vmem:[#allocation103_spill] sm:$0xff]  ;;  %v9977_v33 = vld [vmem:[#allocation116_spill] sm:$0xff] }
 0x732   :  { %3962 = vrcp.f32 %v2259_v61  ;;  %v9980_v61 = vld [vmem:[#allocation119_spill] sm:$0xff] }
 0x73d   :  { %v3961_v41 = vpop.eup %3960 }
 0x73e   :  { %v2266_v52 = vmul.f32 %v3961_v41, %v2264_v63  ;;  %v9961_v63 = vld [vmem:[#allocation100_spill] sm:$0xff]  ;;  %v9963_v41 = vld [vmem:[#allocation102_spill] sm:$0xff] }
 0x73f   :  { %v3963_v20 = vpop.eup %3962 }
 0x740   :  { %v2267_v50 = vadd.f32 %v2266_v52, %v2241_v39  ;;  %v2269_v18 = vsub.f32 1.0, %v3963_v20  ;;  %v2274_v38 = vmul.f32 %v3963_v20, %v2272_v1  ;;  %v9981_v52 = vld [vmem:[#allocation120_spill] sm:$0xff]  ;;  %v9982_v39 = vld [vmem:[#allocation121_spill] sm:$0xff]  ;;  %v9984_v20 = vld [vmem:[#allocation123_spill] sm:$0xff] }
 0x741   :  { %v9986_v1 = vld [vmem:[#allocation125_spill] sm:$0xff] }
 0x742   :  { %3964 = vtanh.f32 %v2267_v50  ;;  %v9983_v50 = vld [vmem:[#allocation122_spill] sm:$0xff] }
 0x74f   :  { %v3965_v34 = vpop.eup %3964 }
 0x750   :  { %v2270_v32 = vmul.f32 %v3965_v34, %v2269_v18  ;;  %v9985_v18 = vld [vmem:[#allocation124_spill] sm:$0xff]  ;;  %v9987_v34 = vld [vmem:[#allocation126_spill] sm:$0xff] }
 0x752   :  { %v7585_v53 = vadd.f32 %v2274_v38, %v2270_v32  ;;  %v9988_v32 = vld [vmem:[#allocation127_spill] sm:$0xff]  ;;  %v9989_v38 = vld [vmem:[#allocation128_spill] sm:$0xff] }
 0x754   :  { %v7588_v46 = vrot.slane %v7585_v53, 2 }
 0x756   :  { %2348 = vmatmul.mubr.f32.vlgmr.msra.gmra.mxu1 %v7588_v46  ;;  %2419 = vmatmul.mubr.f32.vlgmr.msra.gmra.mxu0 %v7588_v46 }
 0x757   :  { %2426 = vmatpush1.msra.mxu1 %v7121_v48  ;;  %3684 = vmatpush3.msra.mxu0 %v7124_v40  ;;  %v9966_v48 = vld [vmem:[#allocation105_spill] sm:$0xff]  ;;  %v9967_v40 = vld [vmem:[#allocation106_spill] sm:$0xff] }
 0x758   :  { %2427 = vmatprep.subr.mxu1 %v7127_v35  ;;  %2489 = vmatprep.mubr.f32.mxu1 %v2280_v16  ;;  %v9968_v35 = vld [vmem:[#allocation107_spill] sm:$0xff] }
 0x759   :  { %3685 = vmatprep.subr.mxu0 %v7131_v31  ;;  %2560 = vmatprep.mubr.f32.mxu0 %v2280_v16  ;;  %v9969_v31 = vld [vmem:[#allocation108_spill] sm:$0xff]  ;;  %v9976_v16 = vld [vmem:[#allocation115_spill] sm:$0xff] }
 0x75a   :  { %2428 = vmatpush1.msra.mxu1 %v7135_v54  ;;  %3686 = vmatpush3.msra.mxu0 %v7138_v28  ;;  %v9970_v54 = vld [vmem:[#allocation109_spill] sm:$0xff]  ;;  %v9971_v28 = vld [vmem:[#allocation110_spill] sm:$0xff] }
 0x75b   :  { %2429 = vmatprep.subr.mxu1 %v7141_v11  ;;  %3687 = vmatprep.subr.mxu0 %v7144_v26  ;;  %v9972_v11 = vld [vmem:[#allocation111_spill] sm:$0xff]  ;;  %v9973_v26 = vld [vmem:[#allocation112_spill] sm:$0xff] }
 0x75c   :  { %2430 = vmatpush1.msra.mxu1 %v7147_v0  ;;  %3688 = vmatpush3.msra.mxu0 %v9961_v63  ;;  %v9974_v0 = vld [vmem:[#allocation113_spill] sm:$0xff] }
 0x75d   :  { %2431 = vmatprep.subr.mxu1 %v9962_v58  ;;  %3689 = vmatprep.subr.mxu0 %v9963_v41  ;;  %v9990_v63 = vld [vmem:[#allocation129_spill] sm:$0xff]  ;;  %v9991_v58 = vld [vmem:[#allocation130_spill] sm:$0xff]  ;;  %v9992_v41 = vld [vmem:[#allocation131_spill] sm:$0xff] }
 0x75e   :  { %2432 = vmatpush1.msra.mxu1 %v9964_v22  ;;  %3690 = vmatpush3.msra.mxu0 %v9965_v27  ;;  %v9993_v22 = vld [vmem:[#allocation132_spill] sm:$0xff]  ;;  %v9994_v27 = vld [vmem:[#allocation133_spill] sm:$0xff] }
 0x75f   :  { %2433 = vmatprep.subr.mxu1 %v9966_v48  ;;  %3691 = vmatprep.subr.mxu0 %v9967_v40  ;;  %v9995_v48 = vld [vmem:[#allocation134_spill] sm:$0xff]  ;;  %v9996_v40 = vld [vmem:[#allocation135_spill] sm:$0xff] }
 0x760   :  { %2434 = vmatpush1.msra.mxu1 %v9968_v35  ;;  %3692 = vmatpush3.msra.mxu0 %v9969_v31  ;;  %v9997_v35 = vld [vmem:[#allocation136_spill] sm:$0xff]  ;;  %v9998_v31 = vld [vmem:[#allocation137_spill] sm:$0xff] }
 0x761   :  { %2435 = vmatprep.subr.mxu1 %v9970_v54  ;;  %3693 = vmatprep.subr.mxu0 %v9971_v28  ;;  %v9999_v54 = vld [vmem:[#allocation138_spill] sm:$0xff]  ;;  %v10000_v28 = vld [vmem:[#allocation139_spill] sm:$0xff] }
 0x762   :  { %2436 = vmatpush1.msra.mxu1 %v9972_v11  ;;  %3694 = vmatpush3.msra.mxu0 %v9973_v26  ;;  %v10001_v11 = vld [vmem:[#allocation140_spill] sm:$0xff]  ;;  %v10002_v26 = vld [vmem:[#allocation141_spill] sm:$0xff] }
 0x763   :  { %2437 = vmatprep.subr.mxu1 %v9974_v0  ;;  %3695 = vmatprep.subr.mxu0 %v9975_v44  ;;  %v10003_v0 = vld [vmem:[#allocation142_spill] sm:$0xff]  ;;  %v10004_v44 = vld [vmem:[#allocation143_spill] sm:$0xff] }
 0x764   :  { %2438 = vmatpush1.msra.mxu1 %v9976_v16  ;;  %3696 = vmatpush3.msra.mxu0 %v9977_v33  ;;  %v10005_v16 = vld [vmem:[#allocation144_spill] sm:$0xff]  ;;  %v10006_v33 = vld [vmem:[#allocation145_spill] sm:$0xff] }
 0x765   :  { %2439 = vmatprep.subr.mxu1 %v9978_v15  ;;  %3697 = vmatprep.subr.mxu0 %v9979_v42  ;;  %v10007_v15 = vld [vmem:[#allocation146_spill] sm:$0xff]  ;;  %v10008_v42 = vld [vmem:[#allocation147_spill] sm:$0xff] }
 0x766   :  { %2440 = vmatpush1.msra.mxu1 %v9980_v61  ;;  %3698 = vmatpush3.msra.mxu0 %v9981_v52  ;;  %v10009_v61 = vld [vmem:[#allocation148_spill] sm:$0xff]  ;;  %v10010_v52 = vld [vmem:[#allocation149_spill] sm:$0xff] }
 0x767   :  { %2441 = vmatprep.subr.mxu1 %v9982_v39  ;;  %3699 = vmatprep.subr.mxu0 %v9983_v50  ;;  %v10011_v39 = vld [vmem:[#allocation150_spill] sm:$0xff]  ;;  %v10012_v50 = vld [vmem:[#allocation151_spill] sm:$0xff] }
 0x768   :  { %2442 = vmatpush1.msra.mxu1 %v9984_v20  ;;  %3700 = vmatpush3.msra.mxu0 %v9985_v18  ;;  %v10013_v20 = vld [vmem:[#allocation152_spill] sm:$0xff] }
 0x769   :  { %2443 = vmatprep.subr.mxu1 %v9986_v1  ;;  %3701 = vmatprep.subr.mxu0 %v9987_v34  ;;  %v7657_v18 = vld [vmem:[#allocation7 + $0x350] sm:$0xff]  ;;  %v7661_v1 = vld [vmem:[#allocation7 + $0x348] sm:$0xff]  ;;  %v7673_v34 = vld [vmem:[#allocation7 + $0x2e0] sm:$0xff] }
 0x76a   :  { %2444 = vmatpush1.msra.mxu1 %v9988_v32  ;;  %3702 = vmatpush3.msra.mxu0 %v9989_v38  ;;  %v7787_v32 = vld [vmem:[#allocation7 + $0x6d0] sm:$0xff]  ;;  %v7791_v38 = vld [vmem:[#allocation7 + $0x6c8] sm:$0xff] }
 0x76b   :  { %2445 = vmatprep.subr.mxu1 %v9990_v63  ;;  %3703 = vmatprep.subr.mxu0 %v9991_v58  ;;  %v10018_v63 = vld [vmem:[#allocation45_spill] sm:$0xff]  ;;  %v7799_v58 = vld [vmem:[#allocation7 + $0x690] sm:$0xff] }
 0x76c   :  { %2446 = vmatpush1.msra.mxu1 %v9992_v41  ;;  %3704 = vmatpush3.msra.mxu0 %v9993_v22  ;;  %v10019_v41 = vld [vmem:[#allocation154_spill] sm:$0xff] }
 0x76d   :  { %2447 = vmatprep.subr.mxu1 %v9994_v27  ;;  %3705 = vmatprep.subr.mxu0 %v9995_v48  ;;  %v7803_v22 = vld [vmem:[#allocation7 + $0x660] sm:$0xff]  ;;  %v10020_v27 = vld [vmem:[#allocation155_spill] sm:$0xff]  ;;  %v7807_v48 = vld [vmem:[#allocation7 + $0x658] sm:$0xff] }
 0x76e   :  { %2448 = vmatpush1.msra.mxu1 %v9996_v40  ;;  %3706 = vmatpush3.msra.mxu0 %v9997_v35  ;;  %v10021_v40 = vld [vmem:[#allocation156_spill] sm:$0xff]  ;;  %v7811_v35 = vld [vmem:[#allocation7 + $0x628] sm:$0xff] }
 0x76f   :  { %2449 = vmatprep.subr.mxu1 %v9998_v31  ;;  %3707 = vmatprep.subr.mxu0 %v9999_v54  ;;  %v10022_v31 = vld [vmem:[#allocation18_spill] sm:$0xff] }
 0x770   :  { %2450 = vmatpush1.msra.mxu1 %v10000_v28  ;;  %3708 = vmatpush3.msra.mxu0 %v10001_v11  ;;  %v7815_v54 = vld [vmem:[#allocation7 + $0x620] sm:$0xff]  ;;  %v10023_v28 = vld [vmem:[#allocation53_spill] sm:$0xff]  ;;  %v7819_v11 = vld [vmem:[#allocation7 + $0x5f0] sm:$0xff] }
 0x771   :  { %2451 = vmatprep.subr.mxu1 %v10002_v26  ;;  %3709 = vmatprep.subr.mxu0 %v10003_v0  ;;  %v10024_v26 = vld [vmem:[#allocation19_spill] sm:$0xff] }
 0x772   :  { %2452 = vmatpush1.msra.mxu1 %v10004_v44  ;;  %3710 = vmatpush3.msra.mxu0 %v10005_v16  ;;  %v7823_v0 = vld [vmem:[#allocation7 + $0x5e8] sm:$0xff]  ;;  %v7827_v16 = vld [vmem:[#allocation7 + $0x5b8] sm:$0xff] }
 0x773   :  { %2453 = vmatprep.subr.mxu1 %v10006_v33  ;;  %3711 = vmatprep.subr.mxu0 %v10007_v15  ;;  %v10025_v44 = vld [vmem:[#allocation55_spill] sm:$0xff]  ;;  %v10026_v33 = vld [vmem:[#allocation157_spill] sm:$0xff]  ;;  %v7831_v15 = vld [vmem:[#allocation7 + $0x5b0] sm:$0xff] }
 0x774   :  { %2454 = vmatpush1.msra.mxu1 %v10008_v42  ;;  %3712 = vmatpush3.msra.mxu0 %v10009_v61  ;;  %v10027_v42 = vld [vmem:[#allocation158_spill] sm:$0xff] }
 0x775   :  { %2455 = vmatprep.subr.mxu1 %v7297_v49  ;;  %3713 = vmatprep.subr.mxu0 %v10010_v52  ;;  %v7665_v49 = vld [vmem:[#allocation7 + $0x318] sm:$0xff]  ;;  %v7835_v61 = vld [vmem:[#allocation7 + $0x580] sm:$0xff] }
 0x776   :  { %2456 = vmatpush1.msra.mxu1 %v10011_v39  ;;  %3714 = vmatpush3.msra.mxu0 %v7306_v19  ;;  %v7669_v19 = vld [vmem:[#allocation7 + $0x310] sm:$0xff]  ;;  %10028 = vst [vmem:[#allocation23_spill] sm:$0xff] %v7835_v61  ;;  %v10029_v52 = vld [vmem:[#allocation57_spill] sm:$0xff] }
 0x777   :  { %2457 = vmatprep.subr.mxu1 %v10012_v50  ;;  %2561 = vmatmul.mubr.f32.vlgmr.msra.gmra.mxu0 %v7588_v46  ;;  %v7839_v39 = vld [vmem:[#allocation7 + $0x578] sm:$0xff] }
 0x778   :  { %2458 = vmatpush2.msra.mxu1 %v10013_v20  ;;  %2632 = vmatprep.subr.mxu0 %v7657_v18  ;;  %10030 = vst [vmem:[#allocation63_spill] sm:$0xff] %v7839_v39  ;;  %v10031_v50 = vld [vmem:[#allocation21_spill] sm:$0xff]  ;;  %v7843_v20 = vld [vmem:[#allocation7 + $0x548] sm:$0xff] }
 0x779   :  { %2459 = vmatprep.subr.mxu1 %v7317_v24  ;;  %2633 = vmatpush1.msra.mxu0 %v7661_v1  ;;  %v7677_v24 = vld [vmem:[#allocation7 + $0x2d8] sm:$0xff]  ;;  %10032 = vst [vmem:[#allocation24_spill] sm:$0xff] %v7843_v20 }
 0x77a   :  { %2460 = vmatpush2.msra.mxu1 %v7321_v36  ;;  %2634 = vmatprep.subr.mxu0 %v7665_v49  ;;  %v7681_v36 = vld [vmem:[#allocation7 + $0x2a8] sm:$0xff] }
 0x77b   :  { %2461 = vmatprep.subr.mxu1 %v7325_v30  ;;  %2635 = vmatpush1.msra.mxu0 %v7669_v19  ;;  %v7685_v30 = vld [vmem:[#allocation7 + $0x2a0] sm:$0xff] }
 0x77c   :  { %2462 = vmatpush2.msra.mxu1 %v7329_v60  ;;  %2636 = vmatprep.subr.mxu0 %v7673_v34  ;;  %v7689_v60 = vld [vmem:[#allocation7 + $0x270] sm:$0xff] }
 0x77d   :  { %2463 = vmatprep.subr.mxu1 %v7333_v23  ;;  %2637 = vmatpush1.msra.mxu0 %v7677_v24  ;;  %v7693_v23 = vld [vmem:[#allocation7 + $0x268] sm:$0xff] }
 0x77e   :  { %2464 = vmatpush2.msra.mxu1 %v7337_v21  ;;  %2638 = vmatprep.subr.mxu0 %v7681_v36  ;;  %v7697_v21 = vld [vmem:[#allocation7 + $0x238] sm:$0xff] }
 0x77f   :  { %2465 = vmatprep.subr.mxu1 %v7341_v37  ;;  %2639 = vmatpush1.msra.mxu0 %v7685_v30  ;;  %v7701_v37 = vld [vmem:[#allocation7 + $0x230] sm:$0xff] }
 0x780   :  { %2466 = vmatpush2.msra.mxu1 %v7345_v43  ;;  %2640 = vmatprep.subr.mxu0 %v7689_v60  ;;  %v7705_v43 = vld [vmem:[#allocation7 + $0x200] sm:$0xff] }
 0x781   :  { %2467 = vmatprep.subr.mxu1 %v7349_v62  ;;  %2641 = vmatpush1.msra.mxu0 %v7693_v23  ;;  %v7709_v62 = vld [vmem:[#allocation7 + $0x1f8] sm:$0xff] }
 0x782   :  { %2468 = vmatpush2.msra.mxu1 %v7353_v7  ;;  %2642 = vmatprep.subr.mxu0 %v7697_v21  ;;  %v7713_v7 = vld [vmem:[#allocation7 + $0x1c8] sm:$0xff] }
 0x783   :  { %2469 = vmatprep.subr.mxu1 %v7357_v4  ;;  %2643 = vmatpush1.msra.mxu0 %v7701_v37  ;;  %v7717_v4 = vld [vmem:[#allocation7 + $0x1c0] sm:$0xff] }
 0x784   :  { %2470 = vmatpush2.msra.mxu1 %v7361_v2  ;;  %2644 = vmatprep.subr.mxu0 %v7705_v43  ;;  %v7721_v2 = vld [vmem:[#allocation7 + $0x190] sm:$0xff] }
 0x785   :  { %2471 = vmatprep.subr.mxu1 %v7365_v29  ;;  %2645 = vmatpush1.msra.mxu0 %v7709_v62  ;;  %v7725_v29 = vld [vmem:[#allocation7 + $0x188] sm:$0xff] }
 0x786   :  { %2472 = vmatpush2.msra.mxu1 %v7369_v51  ;;  %2646 = vmatprep.subr.mxu0 %v7713_v7  ;;  %v7729_v51 = vld [vmem:[#allocation7 + $0x158] sm:$0xff] }
 0x787   :  { %2473 = vmatprep.subr.mxu1 %v7373_v59  ;;  %2647 = vmatpush1.msra.mxu0 %v7717_v4  ;;  %v7733_v59 = vld [vmem:[#allocation7 + $0x150] sm:$0xff] }
 0x788   :  { %2474 = vmatpush2.msra.mxu1 %v7377_v55  ;;  %2648 = vmatprep.subr.mxu0 %v7721_v2  ;;  %v7737_v55 = vld [vmem:[#allocation7 + $0x120] sm:$0xff] }
 0x789   :  { %2475 = vmatprep.subr.mxu1 %v7381_v56  ;;  %2649 = vmatpush1.msra.mxu0 %v7725_v29  ;;  %v7741_v56 = vld [vmem:[#allocation7 + $0x118] sm:$0xff] }
 0x78a   :  { %2476 = vmatpush2.msra.mxu1 %v7385_v3  ;;  %2650 = vmatprep.subr.mxu0 %v7729_v51  ;;  %v7745_v3 = vld [vmem:[#allocation7 + $0xe8] sm:$0xff] }
 0x78b   :  { %2477 = vmatprep.subr.mxu1 %v7389_v57  ;;  %2651 = vmatpush1.msra.mxu0 %v7733_v59  ;;  %v7749_v57 = vld [vmem:[#allocation7 + $0xe0] sm:$0xff] }
 0x78c   :  { %2478 = vmatpush2.msra.mxu1 %v7393_v17  ;;  %2652 = vmatprep.subr.mxu0 %v7737_v55  ;;  %v7753_v17 = vld [vmem:[#allocation7 + $0xb0] sm:$0xff] }
 0x78d   :  { %2479 = vmatprep.subr.mxu1 %v7397_v47  ;;  %2653 = vmatpush1.msra.mxu0 %v7741_v56  ;;  %v7757_v47 = vld [vmem:[#allocation7 + $0xa8] sm:$0xff] }
 0x78e   :  { %2480 = vmatpush2.msra.mxu1 %v7401_v5  ;;  %2654 = vmatprep.subr.mxu0 %v7745_v3  ;;  %v7761_v5 = vld [vmem:[#allocation7 + $0x78] sm:$0xff] }
 0x78f   :  { %2481 = vmatprep.subr.mxu1 %v7405_v45  ;;  %2655 = vmatpush1.msra.mxu0 %v7749_v57  ;;  %v7765_v45 = vld [vmem:[#allocation7 + $0x70] sm:$0xff] }
 0x790   :  { %2482 = vmatpush2.msra.mxu1 %v7409_v9  ;;  %2656 = vmatprep.subr.mxu0 %v7753_v17  ;;  %v7769_v9 = vld [vmem:[#allocation7 + $0x40] sm:$0xff] }
 0x791   :  { %2483 = vmatprep.subr.mxu1 %v7413_v25  ;;  %2657 = vmatpush1.msra.mxu0 %v7757_v47  ;;  %v7773_v25 = vld [vmem:[#allocation7 + $0x38] sm:$0xff] }
 0x792   :  { %2484 = vmatpush2.msra.mxu1 %v7417_v13  ;;  %2658 = vmatprep.subr.mxu0 %v7761_v5  ;;  %v7777_v13 = vld [vmem:[#allocation7 + $0x8] sm:$0xff] }
 0x793   :  { %2485 = vmatprep.subr.mxu1 %v7421_v6  ;;  %2659 = vmatpush1.msra.mxu0 %v7765_v45  ;;  %v10014_v6 = vld [vmem:[#allocation153_spill] sm:$0xff] }
 0x794   :  { %2486 = vmatpush2.msra.mxu1 %v7425_v8  ;;  %2660 = vmatprep.subr.mxu0 %v7769_v9  ;;  %v7783_v8 = vld [vmem:[#allocation7] sm:$0xff] }
 0x795   :  { %2487 = vmatprep.subr.mxu1 %v7429_v10  ;;  %2661 = vmatpush1.msra.mxu0 %v7773_v25  ;;  %v10015_v10 = vld [vmem:[#allocation39_spill] sm:$0xff] }
 0x796   :  { %2488 = vmatpush2.msra.mxu1 %v7433_v12  ;;  %2662 = vmatprep.subr.mxu0 %v7777_v13  ;;  %v10016_v12 = vld [vmem:[#allocation41_spill] sm:$0xff] }
 0x797   :  { %2490 = vmatmul.mubr.f32.vlgmr.msra.gmra.mxu1 %v7588_v46  ;;  %2703 = vmatprep.subr.mxu1 %v7438_v14  ;;  %v10017_v46 = vld [vmem:[#allocation43_spill] sm:$0xff]  ;;  %v7795_v14 = vld [vmem:[#allocation7 + $0x698] sm:$0xff] }
 0x798   :  { %2704 = vmatpush1.msra.mxu1 %v10014_v6  ;;  %2663 = vmatpush1.msra.mxu0 %v7783_v8  ;;  %v10033_v6 = vld [vmem:[#allocation59_spill] sm:$0xff] }
 0x799   :  { %2705 = vmatprep.subr.mxu1 %v10015_v10  ;;  %2664 = vmatprep.subr.mxu0 %v7787_v32  ;;  %v7847_v10 = vld [vmem:[#allocation7 + $0x540] sm:$0xff] }
 0x79a   :  { %2706 = vmatpush1.msra.mxu1 %v10016_v12  ;;  %2665 = vmatpush2.msra.mxu0 %v7791_v38  ;;  %10034 = vst [vmem:[#allocation65_spill] sm:$0xff] %v7847_v10  ;;  %v10035_v12 = vld [vmem:[#allocation22_spill] sm:$0xff] }
 0x79b   :  { %2707 = vmatprep.subr.mxu1 %v10017_v46  ;;  %2666 = vmatprep.subr.mxu0 %v7795_v14  ;;  %v7851_v46 = vld [vmem:[#allocation7 + $0x510] sm:$0xff] }
 0x79c   :  { %2708 = vmatpush1.msra.mxu1 %v10018_v63  ;;  %2667 = vmatpush2.msra.mxu0 %v7799_v58  ;;  %10036 = vst [vmem:[#allocation25_spill] sm:$0xff] %v7851_v46  ;;  %v7854_v63 = vld [vmem:[#allocation7 + $0x160] sm:$0xff] }
 0x79d   :  { %2709 = vmatprep.subr.mxu1 %v10019_v41  ;;  %2668 = vmatprep.subr.mxu0 %v7803_v22  ;;  %10037 = vst [vmem:[#allocation67_spill] sm:$0xff] %v7854_v63  ;;  %v7857_v41 = vld [vmem:[#allocation7 + $0x508] sm:$0xff] }
 0x79e   :  { %2710 = vmatpush1.msra.mxu1 %v10020_v27  ;;  %2669 = vmatpush2.msra.mxu0 %v7807_v48  ;;  %10038 = vst [vmem:[#allocation26_spill] sm:$0xff] %v7857_v41  ;;  %v7860_v27 = vld [vmem:[#allocation7 + $0x130] sm:$0xff] }
 0x79f   :  { %2711 = vmatprep.subr.mxu1 %v10021_v40  ;;  %2670 = vmatprep.subr.mxu0 %v7811_v35  ;;  %10039 = vst [vmem:[#allocation69_spill] sm:$0xff] %v7860_v27  ;;  %v7863_v40 = vld [vmem:[#allocation7 + $0x4d8] sm:$0xff] }
 0x7a0   :  { %2712 = vmatpush1.msra.mxu1 %v10022_v31  ;;  %2671 = vmatpush2.msra.mxu0 %v7815_v54  ;;  %10040 = vst [vmem:[#allocation27_spill] sm:$0xff] %v7863_v40  ;;  %v7866_v31 = vld [vmem:[#allocation7 + $0x128] sm:$0xff] }
 0x7a1   :  { %2713 = vmatprep.subr.mxu1 %v10023_v28  ;;  %2672 = vmatprep.subr.mxu0 %v7819_v11  ;;  %10041 = vst [vmem:[#allocation71_spill] sm:$0xff] %v7866_v31  ;;  %v7869_v28 = vld [vmem:[#allocation7 + $0x4d0] sm:$0xff] }
 0x7a2   :  { %2714 = vmatpush1.msra.mxu1 %v10024_v26  ;;  %2673 = vmatpush2.msra.mxu0 %v7823_v0  ;;  %10042 = vst [vmem:[#allocation28_spill] sm:$0xff] %v7869_v28  ;;  %v7872_v26 = vld [vmem:[#allocation7 + $0xf8] sm:$0xff] }
 0x7a3   :  { %2715 = vmatprep.subr.mxu1 %v10025_v44  ;;  %2674 = vmatprep.subr.mxu0 %v7827_v16  ;;  %10043 = vst [vmem:[#allocation73_spill] sm:$0xff] %v7872_v26  ;;  %v7875_v44 = vld [vmem:[#allocation7 + $0x4a0] sm:$0xff] }
 0x7a4   :  { %2716 = vmatpush1.msra.mxu1 %v10026_v33  ;;  %2675 = vmatpush2.msra.mxu0 %v7831_v15  ;;  %10044 = vst [vmem:[#allocation29_spill] sm:$0xff] %v7875_v44  ;;  %v7878_v33 = vld [vmem:[#allocation7 + $0xf0] sm:$0xff] }
 0x7a5   :  { %2717 = vmatprep.subr.mxu1 %v10027_v42  ;;  %2676 = vmatprep.subr.mxu0 %v7835_v61  ;;  %10045 = vst [vmem:[#allocation75_spill] sm:$0xff] %v7878_v33  ;;  %v7881_v42 = vld [vmem:[#allocation7 + $0x498] sm:$0xff] }
 0x7a6   :  { %2718 = vmatpush1.msra.mxu1 %v10029_v52  ;;  %2677 = vmatpush2.msra.mxu0 %v7839_v39  ;;  %10046 = vst [vmem:[#allocation30_spill] sm:$0xff] %v7881_v42  ;;  %v7884_v52 = vld [vmem:[#allocation7 + $0xc0] sm:$0xff]  ;;  %v10102_v39 = vld [vmem:[#allocation17_spill] sm:$0xff] }
 0x7a7   :  { %2719 = vmatprep.subr.mxu1 %v10031_v50  ;;  %2678 = vmatprep.subr.mxu0 %v7843_v20  ;;  %10047 = vst [vmem:[#allocation77_spill] sm:$0xff] %v7884_v52  ;;  %v7887_v50 = vld [vmem:[#allocation7 + $0x468] sm:$0xff] }
 0x7a8   :  { %2720 = vmatpush1.msra.mxu1 %v10033_v6  ;;  %2679 = vmatpush2.msra.mxu0 %v7847_v10  ;;  %10048 = vst [vmem:[#allocation31_spill] sm:$0xff] %v7887_v50  ;;  %v7890_v6 = vld [vmem:[#allocation7 + $0xb8] sm:$0xff] }
 0x7a9   :  { %2721 = vmatprep.subr.mxu1 %v10035_v12  ;;  %2680 = vmatprep.subr.mxu0 %v7851_v46  ;;  %10049 = vst [vmem:[#allocation79_spill] sm:$0xff] %v7890_v6  ;;  %v7893_v12 = vld [vmem:[#allocation7 + $0x460] sm:$0xff]  ;;  %v10101_v10 = vld [vmem:[#allocation49_spill] sm:$0xff] }
 0x7aa   :  { %2722 = vmatpush1.msra.mxu1 %v7854_v63  ;;  %2681 = vmatpush2.msra.mxu0 %v7857_v41  ;;  %10050 = vst [vmem:[#allocation32_spill] sm:$0xff] %v7893_v12 }
 0x7ab   :  { %2723 = vmatprep.subr.mxu1 %v7860_v27  ;;  %2682 = vmatprep.subr.mxu0 %v7863_v40 }
 0x7ac   :  { %2724 = vmatpush1.msra.mxu1 %v7866_v31  ;;  %2683 = vmatpush2.msra.mxu0 %v7869_v28  ;;  %v10100_v31 = vld [vmem:[#allocation16_spill] sm:$0xff] }
 0x7ad   :  { %2725 = vmatprep.subr.mxu1 %v7872_v26  ;;  %2684 = vmatprep.subr.mxu0 %v7875_v44  ;;  %v10099_v44 = vld [vmem:[#allocation47_spill] sm:$0xff] }
 0x7ae   :  { %2726 = vmatpush1.msra.mxu1 %v7878_v33  ;;  %2685 = vmatpush2.msra.mxu0 %v7881_v42  ;;  %v7896_v33 = vld [vmem:[#allocation7 + $0x88] sm:$0xff]  ;;  %v7899_v42 = vld [vmem:[#allocation7 + $0x430] sm:$0xff] }
 0x7af   :  { %2727 = vmatprep.subr.mxu1 %v7884_v52  ;;  %2686 = vmatprep.subr.mxu0 %v7887_v50  ;;  %10051 = vst [vmem:[#allocation81_spill] sm:$0xff] %v7896_v33  ;;  %10052 = vst [vmem:[#allocation33_spill] sm:$0xff] %v7899_v42  ;;  %v7902_v52 = vld [vmem:[#allocation7 + $0x80] sm:$0xff]  ;;  %v7905_v50 = vld [vmem:[#allocation7 + $0x428] sm:$0xff] }
 0x7b0   :  { %2728 = vmatpush1.msra.mxu1 %v7890_v6  ;;  %2687 = vmatpush2.msra.mxu0 %v7893_v12  ;;  %10053 = vst [vmem:[#allocation83_spill] sm:$0xff] %v7902_v52  ;;  %10054 = vst [vmem:[#allocation34_spill] sm:$0xff] %v7905_v50  ;;  %v7908_v6 = vld [vmem:[#allocation7 + $0x50] sm:$0xff]  ;;  %v7911_v12 = vld [vmem:[#allocation7 + $0x3f8] sm:$0xff] }
 0x7b1   :  { %2729 = vmatprep.subr.mxu1 %v7896_v33  ;;  %2688 = vmatprep.subr.mxu0 %v7899_v42  ;;  %10055 = vst [vmem:[#allocation35_spill] sm:$0xff] %v7908_v6  ;;  %10056 = vst [vmem:[#allocation36_spill] sm:$0xff] %v7911_v12  ;;  %v7914_v33 = vld [vmem:[#allocation7 + $0x48] sm:$0xff]  ;;  %v7917_v42 = vld [vmem:[#allocation7 + $0x3f0] sm:$0xff] }
 0x7b2   :  { %2730 = vmatpush1.msra.mxu1 %v7902_v52  ;;  %2689 = vmatpush2.msra.mxu0 %v7905_v50  ;;  %10057 = vst [vmem:[#allocation37_spill] sm:$0xff] %v7914_v33  ;;  %10058 = vst [vmem:[#allocation38_spill] sm:$0xff] %v7917_v42  ;;  %v7920_v52 = vld [vmem:[#allocation7 + $0x18] sm:$0xff]  ;;  %v7923_v50 = vld [vmem:[#allocation7 + $0x3c0] sm:$0xff] }
 0x7b3   :  { %2731 = vmatprep.subr.mxu1 %v7908_v6  ;;  %2690 = vmatprep.subr.mxu0 %v7911_v12  ;;  %10059 = vst [vmem:[#allocation40_spill] sm:$0xff] %v7920_v52  ;;  %10060 = vst [vmem:[#allocation42_spill] sm:$0xff] %v7923_v50  ;;  %v7926_v6 = vld [vmem:[#allocation7 + $0x10] sm:$0xff]  ;;  %v7929_v12 = vld [vmem:[#allocation7 + $0x3b8] sm:$0xff] }
 0x7b4   :  { %2732 = vmatpush1.msra.mxu1 %v7914_v33  ;;  %2691 = vmatpush2.msra.mxu0 %v7917_v42  ;;  %10061 = vst [vmem:[#allocation44_spill] sm:$0xff] %v7926_v6  ;;  %10062 = vst [vmem:[#allocation46_spill] sm:$0xff] %v7929_v12  ;;  %v7932_v33 = vld [vmem:[#allocation7 + $0x6e0] sm:$0xff]  ;;  %v7935_v42 = vld [vmem:[#allocation7 + $0x388] sm:$0xff] }
 0x7b5   :  { %2733 = vmatprep.subr.mxu1 %v7920_v52  ;;  %2692 = vmatprep.subr.mxu0 %v7923_v50  ;;  %10063 = vst [vmem:[#allocation48_spill] sm:$0xff] %v7932_v33  ;;  %10064 = vst [vmem:[#allocation50_spill] sm:$0xff] %v7935_v42  ;;  %v7938_v52 = vld [vmem:[#allocation7 + $0x6d8] sm:$0xff]  ;;  %v7941_v50 = vld [vmem:[#allocation7 + $0x380] sm:$0xff] }
 0x7b6   :  { %2734 = vmatpush1.msra.mxu1 %v7926_v6  ;;  %2693 = vmatpush2.msra.mxu0 %v7929_v12  ;;  %10065 = vst [vmem:[#allocation52_spill] sm:$0xff] %v7938_v52  ;;  %10066 = vst [vmem:[#allocation54_spill] sm:$0xff] %v7941_v50  ;;  %v7944_v6 = vld [vmem:[#allocation7 + $0x6a8] sm:$0xff]  ;;  %v7947_v12 = vld [vmem:[#allocation7 + $0x370] sm:$0xff] }
 0x7b7   :  { %2735 = vmatprep.subr.mxu1 %v7932_v33  ;;  %2694 = vmatprep.subr.mxu0 %v7935_v42  ;;  %10067 = vst [vmem:[#allocation56_spill] sm:$0xff] %v7944_v6  ;;  %10068 = vst [vmem:[#allocation58_spill] sm:$0xff] %v7947_v12  ;;  %v7950_v33 = vld [vmem:[#allocation7 + $0x6a0] sm:$0xff]  ;;  %v7953_v42 = vld [vmem:[#allocation7 + $0x670] sm:$0xff] }
 0x7b8   :  { %2736 = vmatpush2.msra.mxu1 %v7938_v52  ;;  %2695 = vmatpush2.msra.mxu0 %v7941_v50  ;;  %10069 = vst [vmem:[#allocation60_spill] sm:$0xff] %v7950_v33  ;;  %10070 = vst [vmem:[#allocation62_spill] sm:$0xff] %v7953_v42  ;;  %v7956_v52 = vld [vmem:[#allocation7 + $0x668] sm:$0xff]  ;;  %v7959_v50 = vld [vmem:[#allocation7 + $0x638] sm:$0xff] }
 0x7b9   :  { %2737 = vmatprep.subr.mxu1 %v7944_v6  ;;  %2774 = vmatprep.subr.mxu0 %v7947_v12  ;;  %10071 = vst [vmem:[#allocation64_spill] sm:$0xff] %v7956_v52  ;;  %10072 = vst [vmem:[#allocation66_spill] sm:$0xff] %v7959_v50  ;;  %v7962_v6 = vld [vmem:[#allocation7 + $0x630] sm:$0xff]  ;;  %v7965_v12 = vld [vmem:[#allocation7 + $0x600] sm:$0xff] }
 0x7ba   :  { %2738 = vmatpush2.msra.mxu1 %v7950_v33  ;;  %10073 = vst [vmem:[#allocation68_spill] sm:$0xff] %v7962_v6  ;;  %10074 = vst [vmem:[#allocation70_spill] sm:$0xff] %v7965_v12  ;;  %v7968_v33 = vld [vmem:[#allocation7 + $0x5f8] sm:$0xff] }
 0x7bb   :  { %2739 = vmatprep.subr.mxu1 %v7953_v42  ;;  %10075 = vst [vmem:[#allocation72_spill] sm:$0xff] %v7968_v33  ;;  %v7971_v42 = vld [vmem:[#allocation7 + $0x5c8] sm:$0xff] }
 0x7bc   :  { %2740 = vmatpush2.msra.mxu1 %v7956_v52  ;;  %10076 = vst [vmem:[#allocation74_spill] sm:$0xff] %v7971_v42  ;;  %v7974_v52 = vld [vmem:[#allocation7 + $0x5c0] sm:$0xff] }
 0x7bd   :  { %2741 = vmatprep.subr.mxu1 %v7959_v50  ;;  %10077 = vst [vmem:[#allocation76_spill] sm:$0xff] %v7974_v52  ;;  %v7977_v50 = vld [vmem:[#allocation7 + $0x590] sm:$0xff] }
 0x7be   :  { %2742 = vmatpush2.msra.mxu1 %v7962_v6  ;;  %10078 = vst [vmem:[#allocation78_spill] sm:$0xff] %v7977_v50  ;;  %v7980_v6 = vld [vmem:[#allocation7 + $0x588] sm:$0xff] }
 0x7bf   :  { %2743 = vmatprep.subr.mxu1 %v7965_v12  ;;  %10079 = vst [vmem:[#allocation80_spill] sm:$0xff] %v7980_v6  ;;  %v7983_v12 = vld [vmem:[#allocation7 + $0x558] sm:$0xff] }
 0x7c0   :  { %2744 = vmatpush2.msra.mxu1 %v7968_v33  ;;  %10080 = vst [vmem:[#allocation82_spill] sm:$0xff] %v7983_v12  ;;  %v7986_v33 = vld [vmem:[#allocation7 + $0x550] sm:$0xff] }
 0x7c1   :  { %2745 = vmatprep.subr.mxu1 %v7971_v42  ;;  %10081 = vst [vmem:[#allocation84_spill] sm:$0xff] %v7986_v33  ;;  %v7989_v42 = vld [vmem:[#allocation7 + $0x520] sm:$0xff] }
 0x7c2   :  { %2746 = vmatpush2.msra.mxu1 %v7974_v52  ;;  %10082 = vst [vmem:[#allocation86_spill] sm:$0xff] %v7989_v42  ;;  %v7992_v52 = vld [vmem:[#allocation7 + $0x518] sm:$0xff] }
 0x7c3   :  { %2747 = vmatprep.subr.mxu1 %v7977_v50  ;;  %10083 = vst [vmem:[#allocation87_spill] sm:$0xff] %v7992_v52  ;;  %v7995_v50 = vld [vmem:[#allocation7 + $0x4e8] sm:$0xff] }
 0x7c4   :  { %2748 = vmatpush2.msra.mxu1 %v7980_v6  ;;  %10084 = vst [vmem:[#allocation88_spill] sm:$0xff] %v7995_v50  ;;  %v7998_v6 = vld [vmem:[#allocation7 + $0x4e0] sm:$0xff] }
 0x7c5   :  { %2749 = vmatprep.subr.mxu1 %v7983_v12  ;;  %10085 = vst [vmem:[#allocation89_spill] sm:$0xff] %v7998_v6  ;;  %v8001_v12 = vld [vmem:[#allocation7 + $0x4b0] sm:$0xff] }
 0x7c6   :  { %2750 = vmatpush2.msra.mxu1 %v7986_v33  ;;  %10086 = vst [vmem:[#allocation90_spill] sm:$0xff] %v8001_v12  ;;  %v8004_v33 = vld [vmem:[#allocation7 + $0x4a8] sm:$0xff] }
 0x7c7   :  { %2751 = vmatprep.subr.mxu1 %v7989_v42  ;;  %10087 = vst [vmem:[#allocation91_spill] sm:$0xff] %v8004_v33  ;;  %v8007_v42 = vld [vmem:[#allocation7 + $0x478] sm:$0xff] }
 0x7c8   :  { %2752 = vmatpush2.msra.mxu1 %v7992_v52  ;;  %10088 = vst [vmem:[#allocation92_spill] sm:$0xff] %v8007_v42  ;;  %v8010_v52 = vld [vmem:[#allocation7 + $0x470] sm:$0xff] }
 0x7c9   :  { %2753 = vmatprep.subr.mxu1 %v7995_v50  ;;  %10089 = vst [vmem:[#allocation94_spill] sm:$0xff] %v8010_v52  ;;  %v8013_v50 = vld [vmem:[#allocation7 + $0x440] sm:$0xff] }
 0x7ca   :  { %2754 = vmatpush2.msra.mxu1 %v7998_v6  ;;  %10090 = vst [vmem:[#allocation95_spill] sm:$0xff] %v8013_v50  ;;  %v8016_v6 = vld [vmem:[#allocation7 + $0x438] sm:$0xff] }
 0x7cb   :  { %2755 = vmatprep.subr.mxu1 %v8001_v12  ;;  %10091 = vst [vmem:[#allocation96_spill] sm:$0xff] %v8016_v6  ;;  %v8019_v12 = vld [vmem:[#allocation7 + $0x408] sm:$0xff] }
 0x7cc   :  { %2756 = vmatpush2.msra.mxu1 %v8004_v33  ;;  %10092 = vst [vmem:[#allocation97_spill] sm:$0xff] %v8019_v12  ;;  %v8022_v33 = vld [vmem:[#allocation7 + $0x400] sm:$0xff] }
 0x7cd   :  { %2757 = vmatprep.subr.mxu1 %v8007_v42  ;;  %10093 = vst [vmem:[#allocation98_spill] sm:$0xff] %v8022_v33  ;;  %v8025_v42 = vld [vmem:[#allocation7 + $0x3d0] sm:$0xff] }
 0x7ce   :  { %2758 = vmatpush2.msra.mxu1 %v8010_v52  ;;  %10094 = vst [vmem:[#allocation100_spill] sm:$0xff] %v8025_v42  ;;  %v8028_v52 = vld [vmem:[#allocation7 + $0x3c8] sm:$0xff] }
 0x7cf   :  { %2759 = vmatprep.subr.mxu1 %v8013_v50  ;;  %10095 = vst [vmem:[#allocation101_spill] sm:$0xff] %v8028_v52  ;;  %v8031_v50 = vld [vmem:[#allocation7 + $0x398] sm:$0xff] }
 0x7d0   :  { %2760 = vmatpush2.msra.mxu1 %v8016_v6  ;;  %10096 = vst [vmem:[#allocation102_spill] sm:$0xff] %v8031_v50  ;;  %v8034_v6 = vld [vmem:[#allocation7 + $0x390] sm:$0xff] }
 0x7d1   :  { %2761 = vmatprep.subr.mxu1 %v8019_v12  ;;  %10097 = vst [vmem:[#allocation103_spill] sm:$0xff] %v8034_v6  ;;  %v8037_v12 = vld [vmem:[#allocation7 + $0x6f8] sm:$0xff] }
 0x7d2   :  { %2762 = vmatpush2.msra.mxu1 %v8022_v33  ;;  %10098 = vst [vmem:[#allocation104_spill] sm:$0xff] %v8037_v12 }
 0x7d3   :  { %2763 = vmatprep.subr.mxu1 %v8025_v42 }
 0x7d4   :  { %2764 = vmatpush2.msra.mxu1 %v8028_v52 }
 0x7d5   :  { %2765 = vmatprep.subr.mxu1 %v8031_v50 }
 0x7d6   :  { %2766 = vmatpush2.msra.mxu1 %v8034_v6 }
 0x7d7   :  { %3718 = vmatprep.subr.mxu1 %v8037_v12 }
 0x816   :  { %v2349_v33 = vpop.f32.mrf.mxu1  ;;  %v2420_v41 = vpop.f32.mrf.mxu0 }
 0x817   :  { %v2566_v26 = vadd.f32 %v2349_v33, %v10099_v44  ;;  %v2568_v61 = vadd.f32 %v2420_v41, %v10102_v39  ;;  %v2589_v41 = vld [vmem:[#allocation5] sm:$0x30] }
 0x818   :  { %v2351_v28 = vpop.f32.mrf.mxu1  ;;  %v2422_v6 = vpop.f32.mrf.mxu0 }
 0x819   :  { %v3492_v42 = vmul.f32 -1.442695, %v2566_v26  ;;  %v2567_v52 = vadd.f32 %v2351_v28, %v10100_v31  ;;  %v2569_v20 = vadd.f32 %v2422_v6, %v10101_v10  ;;  %v10103_v31 = vld [vmem:[#allocation61_spill] sm:$0xff] }
 0x81b   :  { %3966 = vpow2.f32 %v3492_v42  ;;  %v3493_v40 = vmul.f32 -1.442695, %v2567_v52 }
 0x81d   :  { %3968 = vpow2.f32 %v3493_v40 }
 0x828   :  { %v3967_v27 = vpop.eup %3966 }
 0x829   :  { %v2573_v50 = vadd.f32 1.0, %v3967_v27 }
 0x82a   :  { %v3969_v63 = vpop.eup %3968 }
 0x82b   :  { %3970 = vrcp.f32 %v2573_v50  ;;  %v2579_v46 = vadd.f32 1.0, %v3969_v63 }
 0x82d   :  { %3972 = vrcp.f32 %v2579_v46 }
 0x838   :  { %v3971_v12 = vpop.eup %3970 }
 0x839   :  { %v2582_v26 = vmul.f32 %v3971_v12, %v2569_v20 }
 0x83a   :  { %v3973_v42 = vpop.eup %3972 }
 0x83b   :  { %v2583_v33 = vadd.f32 %v2582_v26, %v2568_v61  ;;  %v2585_v28 = vsub.f32 1.0, %v3973_v42  ;;  %v2587_v27 = vmul.f32 %v3973_v42, %v10103_v31  ;;  %v2590_v26 = vld [vmem:[#allocation5 + $0x18] sm:$0x30] }
 0x83d   :  { %3974 = vtanh.f32 %v2583_v33 }
 0x84a   :  { %v3975_v52 = vpop.eup %3974 }
 0x84b   :  { %v2586_v40 = vmul.f32 %v3975_v52, %v2585_v28  ;;  %v3715_v52 = vpop.f32.mrf.mxu0 }
 0x84d   :  { %v8045_v50 = vadd.f32 %v2587_v27, %v2586_v40  ;;  %v3716_v27 = vpop.f32.mrf.mxu0 }
 0x84f   :  { %10104 = vst [vmem:[#allocation105_spill] sm:$0xff] %v8045_v50  ;;  %v2626_v44 = vrot.slane %v8045_v50, 4 }
 0x851   :  { %v2629_v63 = vrot.slane %v2626_v44, 4  ;;  %v3717_v44 = vadd.f32 %v3716_v27, %v3715_v52 }
 0x853   :  { %2696 = vmatprep.mubr.f32.mxu0 %v2629_v63  ;;  %2767 = vmatprep.mubr.f32.mxu1 %v2629_v63 }
 0x857   :  { %v2491_v6 = vpop.f32.mrf.mxu1 }
 0x858   :  { %v2593_v10 = vrot.slane %v2491_v6, 4  ;;  %v8051_v6 = vld [vmem:[%s8599_s3] ss:$0 sm:$0xff] }
 0x859   :  { %v2493_v46 = vpop.f32.mrf.mxu1 }
 0x85a   :  { %v2595_v20 = vadd.f32 %v2593_v10, %v2589_v41  ;;  %v2603_v12 = vrot.slane %v2493_v46, 4  ;;  %v2612_v10 = vadd.f32 %v8051_v6, %v3717_v44  ;;  %v8065_v44 = vld [vmem:[#allocation7 + $0x378] sm:$0xff] }
 0x85c   :  { %v3494_v61 = vmul.f32 -1.442695, %v2595_v20  ;;  %v2605_v33 = vadd.f32 %v2603_v12, %v2590_v26  ;;  %v2614_v46 = vrot.slane %v2612_v10, 4  ;;  %v2591_v12 = vld [vmem:[#allocation5 + $0x20] sm:$0x30]  ;;  %v8071_v10 = vld [vmem:[#allocation7 + $0x6c0] sm:$0xff] }
 0x85e   :  { %3976 = vpow2.f32 %v3494_v61  ;;  %v3495_v28 = vmul.f32 -1.442695, %v2605_v33 }
 0x860   :  { %3978 = vpow2.f32 %v3495_v28  ;;  %v2621_v28 = vrot.slane %v7585_v53, 6  ;;  %v8068_v53 = vld [vmem:[#allocation7 + $0x338] sm:$0xff] }
 0x86b   :  { %v3977_v42 = vpop.eup %3976 }
 0x86c   :  { %v2599_v40 = vadd.f32 1.0, %v3977_v42 }
 0x86d   :  { %v3979_v31 = vpop.eup %3978 }
 0x86e   :  { %3980 = vrcp.f32 %v2599_v40  ;;  %v2609_v41 = vadd.f32 1.0, %v3979_v31  ;;  %v8062_v31 = vld [vmem:[#allocation7 + $0x368] sm:$0xff] }
 0x870   :  { %3982 = vrcp.f32 %v2609_v41  ;;  %v8074_v41 = vld [vmem:[#allocation7 + $0x330] sm:$0xff] }
 0x87b   :  { %v3981_v20 = vpop.eup %3980 }
 0x87c   :  { %v2616_v61 = vmul.f32 %v3981_v20, %v2614_v46  ;;  %v8077_v46 = vld [vmem:[#allocation7 + $0x340] sm:$0xff] }
 0x87d   :  { %v3983_v33 = vpop.eup %3982  ;;  %v8080_v20 = vld [vmem:[#allocation7 + $0x300] sm:$0xff] }
 0x87e   :  { %v2617_v26 = vadd.f32 %v2616_v61, %v2591_v12  ;;  %v2619_v42 = vsub.f32 1.0, %v3983_v33  ;;  %v2623_v27 = vmul.f32 %v3983_v33, %v2621_v28  ;;  %v8083_v61 = vld [vmem:[#allocation7 + $0x688] sm:$0xff]  ;;  %v8086_v12 = vld [vmem:[#allocation7 + $0x2f8] sm:$0xff]  ;;  %v8095_v33 = vld [vmem:[#allocation7 + $0x650] sm:$0xff] }
 0x87f   :  { %10105 = vst [vmem:[#allocation106_spill] sm:$0xff] %v8095_v33  ;;  %v8098_v28 = vld [vmem:[#allocation7 + $0x2c0] sm:$0xff] }
 0x880   :  { %3984 = vtanh.f32 %v2617_v26  ;;  %v8092_v26 = vld [vmem:[#allocation7 + $0x2c8] sm:$0xff]  ;;  %10106 = vst [vmem:[#allocation107_spill] sm:$0xff] %v8098_v28 }
 0x88d   :  { %v3985_v52 = vpop.eup %3984 }
 0x88e   :  { %v2620_v40 = vmul.f32 %v3985_v52, %v2619_v42  ;;  %v8101_v42 = vld [vmem:[#allocation7 + $0x2d0] sm:$0xff] }
 0x88f   :  { %10107 = vst [vmem:[#allocation108_spill] sm:$0xff] %v8101_v42  ;;  %v8104_v52 = vld [vmem:[#allocation7 + $0x290] sm:$0xff] }
 0x890   :  { %v8055_v50 = vadd.f32 %v2623_v27, %v2620_v40  ;;  %10108 = vst [vmem:[#allocation109_spill] sm:$0xff] %v8104_v52  ;;  %v8107_v40 = vld [vmem:[#allocation7 + $0x618] sm:$0xff]  ;;  %v8110_v27 = vld [vmem:[#allocation7 + $0x288] sm:$0xff] }
 0x891   :  { %10109 = vst [vmem:[#allocation110_spill] sm:$0xff] %v8107_v40  ;;  %10110 = vst [vmem:[#allocation111_spill] sm:$0xff] %v8110_v27 }
 0x892   :  { %v8058_v39 = vrot.slane %v8055_v50, 4 }
 0x894   :  { %2697 = vmatmul.mubr.f32.vlgmr.msra.gmra.mxu0 %v8058_v39  ;;  %2768 = vmatmul.mubr.f32.vlgmr.msra.gmra.mxu1 %v8058_v39 }
 0x895   :  { %2775 = vmatpush1.msra.mxu0 %v8062_v31  ;;  %3719 = vmatpush3.msra.mxu1 %v8065_v44 }
 0x896   :  { %2776 = vmatprep.subr.mxu0 %v8068_v53  ;;  %2838 = vmatprep.mubr.f32.mxu0 %v2629_v63 }
 0x897   :  { %3720 = vmatprep.subr.mxu1 %v8071_v10  ;;  %2909 = vmatprep.mubr.f32.mxu1 %v2629_v63  ;;  %v8089_v63 = vld [vmem:[#allocation7 + $0x308] sm:$0xff] }
 0x898   :  { %2777 = vmatpush1.msra.mxu0 %v8074_v41  ;;  %3721 = vmatpush3.msra.mxu1 %v8077_v46 }
 0x899   :  { %2778 = vmatprep.subr.mxu0 %v8080_v20  ;;  %3722 = vmatprep.subr.mxu1 %v8083_v61 }
 0x89a   :  { %2779 = vmatpush1.msra.mxu0 %v8086_v12  ;;  %3723 = vmatpush3.msra.mxu1 %v8089_v63 }
 0x89b   :  { %2780 = vmatprep.subr.mxu0 %v8092_v26  ;;  %3724 = vmatprep.subr.mxu1 %v8095_v33  ;;  %v8113_v33 = vld [vmem:[#allocation7 + $0x298] sm:$0xff] }
 0x89c   :  { %2781 = vmatpush1.msra.mxu0 %v8098_v28  ;;  %3725 = vmatpush3.msra.mxu1 %v8101_v42  ;;  %10111 = vst [vmem:[#allocation112_spill] sm:$0xff] %v8113_v33  ;;  %v8116_v28 = vld [vmem:[#allocation7 + $0x258] sm:$0xff]  ;;  %v8119_v42 = vld [vmem:[#allocation7 + $0x5e0] sm:$0xff] }
 0x89d   :  { %2782 = vmatprep.subr.mxu0 %v8104_v52  ;;  %3726 = vmatprep.subr.mxu1 %v8107_v40  ;;  %10112 = vst [vmem:[#allocation113_spill] sm:$0xff] %v8116_v28  ;;  %10113 = vst [vmem:[#allocation114_spill] sm:$0xff] %v8119_v42  ;;  %v8122_v52 = vld [vmem:[#allocation7 + $0x250] sm:$0xff]  ;;  %v8125_v40 = vld [vmem:[#allocation7 + $0x260] sm:$0xff] }
 0x89e   :  { %2783 = vmatpush1.msra.mxu0 %v8110_v27  ;;  %3727 = vmatpush3.msra.mxu1 %v8113_v33  ;;  %10114 = vst [vmem:[#allocation115_spill] sm:$0xff] %v8122_v52  ;;  %10115 = vst [vmem:[#allocation116_spill] sm:$0xff] %v8125_v40  ;;  %v8128_v27 = vld [vmem:[#allocation7 + $0x220] sm:$0xff]  ;;  %v8131_v33 = vld [vmem:[#allocation7 + $0x5a8] sm:$0xff] }
 0x89f   :  { %2784 = vmatprep.subr.mxu0 %v8116_v28  ;;  %3728 = vmatprep.subr.mxu1 %v8119_v42  ;;  %10116 = vst [vmem:[#allocation117_spill] sm:$0xff] %v8128_v27  ;;  %10117 = vst [vmem:[#allocation118_spill] sm:$0xff] %v8131_v33  ;;  %v8134_v28 = vld [vmem:[#allocation7 + $0x218] sm:$0xff]  ;;  %v8137_v42 = vld [vmem:[#allocation7 + $0x228] sm:$0xff] }
 0x8a0   :  { %2785 = vmatpush1.msra.mxu0 %v8122_v52  ;;  %3729 = vmatpush3.msra.mxu1 %v8125_v40  ;;  %10118 = vst [vmem:[#allocation119_spill] sm:$0xff] %v8134_v28  ;;  %10119 = vst [vmem:[#allocation120_spill] sm:$0xff] %v8137_v42  ;;  %v8140_v52 = vld [vmem:[#allocation7 + $0x1e8] sm:$0xff]  ;;  %v8143_v40 = vld [vmem:[#allocation7 + $0x570] sm:$0xff] }
 0x8a1   :  { %2786 = vmatprep.subr.mxu0 %v8128_v27  ;;  %3730 = vmatprep.subr.mxu1 %v8131_v33  ;;  %10120 = vst [vmem:[#allocation121_spill] sm:$0xff] %v8140_v52  ;;  %10121 = vst [vmem:[#allocation122_spill] sm:$0xff] %v8143_v40  ;;  %v8146_v27 = vld [vmem:[#allocation7 + $0x1e0] sm:$0xff]  ;;  %v8149_v33 = vld [vmem:[#allocation7 + $0x1f0] sm:$0xff] }
 0x8a2   :  { %2787 = vmatpush1.msra.mxu0 %v8134_v28  ;;  %3731 = vmatpush3.msra.mxu1 %v8137_v42  ;;  %10122 = vst [vmem:[#allocation123_spill] sm:$0xff] %v8146_v27  ;;  %10123 = vst [vmem:[#allocation124_spill] sm:$0xff] %v8149_v33  ;;  %v8152_v28 = vld [vmem:[#allocation7 + $0x1b0] sm:$0xff]  ;;  %v8155_v42 = vld [vmem:[#allocation7 + $0x538] sm:$0xff] }
 0x8a3   :  { %2788 = vmatprep.subr.mxu0 %v8140_v52  ;;  %3732 = vmatprep.subr.mxu1 %v8143_v40  ;;  %10124 = vst [vmem:[#allocation125_spill] sm:$0xff] %v8152_v28  ;;  %10125 = vst [vmem:[#allocation126_spill] sm:$0xff] %v8155_v42  ;;  %v8158_v52 = vld [vmem:[#allocation7 + $0x1a8] sm:$0xff]  ;;  %v8161_v40 = vld [vmem:[#allocation7 + $0x1b8] sm:$0xff] }
 0x8a4   :  { %2789 = vmatpush1.msra.mxu0 %v8146_v27  ;;  %3733 = vmatpush3.msra.mxu1 %v8149_v33  ;;  %10126 = vst [vmem:[#allocation127_spill] sm:$0xff] %v8158_v52  ;;  %10127 = vst [vmem:[#allocation128_spill] sm:$0xff] %v8161_v40  ;;  %v8164_v27 = vld [vmem:[#allocation7 + $0x178] sm:$0xff]  ;;  %v8167_v33 = vld [vmem:[#allocation7 + $0x500] sm:$0xff] }
 0x8a5   :  { %2790 = vmatprep.subr.mxu0 %v8152_v28  ;;  %3734 = vmatprep.subr.mxu1 %v8155_v42  ;;  %10128 = vst [vmem:[#allocation129_spill] sm:$0xff] %v8164_v27  ;;  %10129 = vst [vmem:[#allocation130_spill] sm:$0xff] %v8167_v33  ;;  %v8170_v28 = vld [vmem:[#allocation7 + $0x170] sm:$0xff]  ;;  %v8173_v42 = vld [vmem:[#allocation7 + $0x180] sm:$0xff] }
 0x8a6   :  { %2791 = vmatpush1.msra.mxu0 %v8158_v52  ;;  %3735 = vmatpush3.msra.mxu1 %v8161_v40  ;;  %10130 = vst [vmem:[#allocation131_spill] sm:$0xff] %v8170_v28  ;;  %10131 = vst [vmem:[#allocation132_spill] sm:$0xff] %v8173_v42  ;;  %v8176_v52 = vld [vmem:[#allocation7 + $0x140] sm:$0xff]  ;;  %v8179_v40 = vld [vmem:[#allocation7 + $0x4c8] sm:$0xff] }
 0x8a7   :  { %2792 = vmatprep.subr.mxu0 %v8164_v27  ;;  %3736 = vmatprep.subr.mxu1 %v8167_v33  ;;  %10132 = vst [vmem:[#allocation133_spill] sm:$0xff] %v8176_v52  ;;  %10133 = vst [vmem:[#allocation134_spill] sm:$0xff] %v8179_v40  ;;  %v8182_v27 = vld [vmem:[#allocation7 + $0x138] sm:$0xff]  ;;  %v8185_v33 = vld [vmem:[#allocation7 + $0x148] sm:$0xff] }
 0x8a8   :  { %2793 = vmatpush1.msra.mxu0 %v8170_v28  ;;  %3737 = vmatpush3.msra.mxu1 %v8173_v42  ;;  %10134 = vst [vmem:[#allocation135_spill] sm:$0xff] %v8182_v27  ;;  %10135 = vst [vmem:[#allocation136_spill] sm:$0xff] %v8185_v33  ;;  %v8188_v28 = vld [vmem:[#allocation7 + $0x108] sm:$0xff]  ;;  %v8191_v42 = vld [vmem:[#allocation7 + $0x490] sm:$0xff] }
 0x8a9   :  { %2794 = vmatprep.subr.mxu0 %v8176_v52  ;;  %3738 = vmatprep.subr.mxu1 %v8179_v40  ;;  %10136 = vst [vmem:[#allocation137_spill] sm:$0xff] %v8188_v28  ;;  %10137 = vst [vmem:[#allocation138_spill] sm:$0xff] %v8191_v42  ;;  %v8194_v52 = vld [vmem:[#allocation7 + $0x100] sm:$0xff]  ;;  %v8197_v40 = vld [vmem:[#allocation7 + $0x110] sm:$0xff] }
 0x8aa   :  { %2795 = vmatpush1.msra.mxu0 %v8182_v27  ;;  %3739 = vmatpush3.msra.mxu1 %v8185_v33  ;;  %10138 = vst [vmem:[#allocation139_spill] sm:$0xff] %v8194_v52  ;;  %10139 = vst [vmem:[#allocation140_spill] sm:$0xff] %v8197_v40  ;;  %v8200_v27 = vld [vmem:[#allocation7 + $0xd0] sm:$0xff]  ;;  %v8203_v33 = vld [vmem:[#allocation7 + $0x458] sm:$0xff] }
 0x8ab   :  { %2796 = vmatprep.subr.mxu0 %v8188_v28  ;;  %3740 = vmatprep.subr.mxu1 %v8191_v42  ;;  %10140 = vst [vmem:[#allocation141_spill] sm:$0xff] %v8200_v27  ;;  %10141 = vst [vmem:[#allocation142_spill] sm:$0xff] %v8203_v33  ;;  %v8206_v28 = vld [vmem:[#allocation7 + $0xc8] sm:$0xff]  ;;  %v8209_v42 = vld [vmem:[#allocation7 + $0xd8] sm:$0xff] }
 0x8ac   :  { %2797 = vmatpush1.msra.mxu0 %v8194_v52  ;;  %3741 = vmatpush3.msra.mxu1 %v8197_v40  ;;  %10142 = vst [vmem:[#allocation143_spill] sm:$0xff] %v8206_v28  ;;  %10143 = vst [vmem:[#allocation144_spill] sm:$0xff] %v8209_v42  ;;  %v8212_v52 = vld [vmem:[#allocation7 + $0x98] sm:$0xff]  ;;  %v8215_v40 = vld [vmem:[#allocation7 + $0x420] sm:$0xff] }
 0x8ad   :  { %2798 = vmatprep.subr.mxu0 %v8200_v27  ;;  %3742 = vmatprep.subr.mxu1 %v8203_v33  ;;  %10144 = vst [vmem:[#allocation145_spill] sm:$0xff] %v8212_v52  ;;  %10145 = vst [vmem:[#allocation146_spill] sm:$0xff] %v8215_v40  ;;  %v8218_v27 = vld [vmem:[#allocation7 + $0x90] sm:$0xff]  ;;  %v8221_v33 = vld [vmem:[#allocation7 + $0xa0] sm:$0xff] }
 0x8ae   :  { %2799 = vmatpush1.msra.mxu0 %v8206_v28  ;;  %3743 = vmatpush3.msra.mxu1 %v8209_v42  ;;  %10146 = vst [vmem:[#allocation147_spill] sm:$0xff] %v8218_v27  ;;  %10147 = vst [vmem:[#allocation148_spill] sm:$0xff] %v8221_v33  ;;  %v8224_v28 = vld [vmem:[#allocation7 + $0x60] sm:$0xff]  ;;  %v8227_v42 = vld [vmem:[#allocation7 + $0x3e8] sm:$0xff] }
 0x8af   :  { %2800 = vmatprep.subr.mxu0 %v8212_v52  ;;  %3744 = vmatprep.subr.mxu1 %v8215_v40  ;;  %10148 = vst [vmem:[#allocation149_spill] sm:$0xff] %v8224_v28  ;;  %10149 = vst [vmem:[#allocation150_spill] sm:$0xff] %v8227_v42  ;;  %v8230_v52 = vld [vmem:[#allocation7 + $0x58] sm:$0xff]  ;;  %v8233_v40 = vld [vmem:[#allocation7 + $0x68] sm:$0xff] }
 0x8b0   :  { %2801 = vmatpush1.msra.mxu0 %v8218_v27  ;;  %3745 = vmatpush3.msra.mxu1 %v8221_v33  ;;  %10150 = vst [vmem:[#allocation151_spill] sm:$0xff] %v8230_v52  ;;  %10151 = vst [vmem:[#allocation152_spill] sm:$0xff] %v8233_v40  ;;  %v8236_v27 = vld [vmem:[#allocation7 + $0x28] sm:$0xff]  ;;  %v8239_v33 = vld [vmem:[#allocation7 + $0x3b0] sm:$0xff] }
 0x8b1   :  { %2802 = vmatprep.subr.mxu0 %v8224_v28  ;;  %3746 = vmatprep.subr.mxu1 %v8227_v42  ;;  %10152 = vst [vmem:[#allocation153_spill] sm:$0xff] %v8239_v33  ;;  %v8242_v28 = vld [vmem:[#allocation7 + $0x20] sm:$0xff]  ;;  %v8245_v42 = vld [vmem:[#allocation7 + $0x30] sm:$0xff] }
 0x8b2   :  { %2803 = vmatpush1.msra.mxu0 %v8230_v52  ;;  %3747 = vmatpush3.msra.mxu1 %v8233_v40  ;;  %10153 = vst [vmem:[#allocation39_spill] sm:$0xff] %v8242_v28  ;;  %v8248_v52 = vld [vmem:[#allocation7 + $0x6f0] sm:$0xff]  ;;  %v8252_v40 = vld [vmem:[#allocation7 + $0x6e8] sm:$0xff] }
 0x8b3   :  { %2804 = vmatprep.subr.mxu0 %v8236_v27  ;;  %3748 = vmatprep.subr.mxu1 %v8239_v33  ;;  %10154 = vst [vmem:[#allocation41_spill] sm:$0xff] %v8248_v52  ;;  %10155 = vst [vmem:[#allocation43_spill] sm:$0xff] %v8252_v40  ;;  %v8256_v33 = vld [vmem:[#allocation7 + $0x6b8] sm:$0xff] }
 0x8b4   :  { %2805 = vmatpush1.msra.mxu0 %v8242_v28  ;;  %3749 = vmatpush3.msra.mxu1 %v8245_v42  ;;  %v8260_v28 = vld [vmem:[#allocation7 + $0x6b0] sm:$0xff] }
 0x8b5   :  { %2806 = vmatprep.subr.mxu0 %v8248_v52  ;;  %2910 = vmatmul.mubr.f32.vlgmr.msra.gmra.mxu1 %v8058_v39  ;;  %v8264_v52 = vld [vmem:[#allocation7 + $0x680] sm:$0xff] }
 0x8b6   :  { %2807 = vmatpush2.msra.mxu0 %v8252_v40  ;;  %2981 = vmatprep.subr.mxu1 %v7657_v18  ;;  %v8268_v40 = vld [vmem:[#allocation7 + $0x678] sm:$0xff]  ;;  %v8272_v18 = vld [vmem:[#allocation7 + $0x648] sm:$0xff] }
 0x8b7   :  { %2808 = vmatprep.subr.mxu0 %v8256_v33  ;;  %2982 = vmatpush1.msra.mxu1 %v7661_v1  ;;  %v8276_v1 = vld [vmem:[#allocation7 + $0x640] sm:$0xff] }
 0x8b8   :  { %2809 = vmatpush2.msra.mxu0 %v8260_v28  ;;  %2983 = vmatprep.subr.mxu1 %v7665_v49  ;;  %v8280_v49 = vld [vmem:[#allocation7 + $0x610] sm:$0xff] }
 0x8b9   :  { %2810 = vmatprep.subr.mxu0 %v8264_v52  ;;  %2984 = vmatpush1.msra.mxu1 %v7669_v19  ;;  %v8284_v19 = vld [vmem:[#allocation7 + $0x608] sm:$0xff] }
 0x8ba   :  { %2811 = vmatpush2.msra.mxu0 %v8268_v40  ;;  %2985 = vmatprep.subr.mxu1 %v7673_v34  ;;  %v8288_v34 = vld [vmem:[#allocation7 + $0x5d8] sm:$0xff] }
 0x8bb   :  { %2812 = vmatprep.subr.mxu0 %v8272_v18  ;;  %2986 = vmatpush1.msra.mxu1 %v7677_v24  ;;  %v8292_v24 = vld [vmem:[#allocation7 + $0x5d0] sm:$0xff] }
 0x8bc   :  { %2813 = vmatpush2.msra.mxu0 %v8276_v1  ;;  %2987 = vmatprep.subr.mxu1 %v7681_v36  ;;  %v8296_v36 = vld [vmem:[#allocation7 + $0x5a0] sm:$0xff] }
 0x8bd   :  { %2814 = vmatprep.subr.mxu0 %v8280_v49  ;;  %2988 = vmatpush1.msra.mxu1 %v7685_v30  ;;  %v8300_v30 = vld [vmem:[#allocation7 + $0x598] sm:$0xff] }
 0x8be   :  { %2815 = vmatpush2.msra.mxu0 %v8284_v19  ;;  %2989 = vmatprep.subr.mxu1 %v7689_v60  ;;  %v8304_v60 = vld [vmem:[#allocation7 + $0x568] sm:$0xff] }
 0x8bf   :  { %2816 = vmatprep.subr.mxu0 %v8288_v34  ;;  %2990 = vmatpush1.msra.mxu1 %v7693_v23  ;;  %v8308_v23 = vld [vmem:[#allocation7 + $0x560] sm:$0xff] }
 0x8c0   :  { %2817 = vmatpush2.msra.mxu0 %v8292_v24  ;;  %2991 = vmatprep.subr.mxu1 %v7697_v21  ;;  %v8312_v21 = vld [vmem:[#allocation7 + $0x530] sm:$0xff] }
 0x8c1   :  { %2818 = vmatprep.subr.mxu0 %v8296_v36  ;;  %2992 = vmatpush1.msra.mxu1 %v7701_v37  ;;  %v8316_v37 = vld [vmem:[#allocation7 + $0x528] sm:$0xff] }
 0x8c2   :  { %2819 = vmatpush2.msra.mxu0 %v8300_v30  ;;  %2993 = vmatprep.subr.mxu1 %v7705_v43  ;;  %v8320_v43 = vld [vmem:[#allocation7 + $0x4f8] sm:$0xff] }
 0x8c3   :  { %2820 = vmatprep.subr.mxu0 %v8304_v60  ;;  %2994 = vmatpush1.msra.mxu1 %v7709_v62  ;;  %v8324_v62 = vld [vmem:[#allocation7 + $0x4f0] sm:$0xff] }
 0x8c4   :  { %2821 = vmatpush2.msra.mxu0 %v8308_v23  ;;  %2995 = vmatprep.subr.mxu1 %v7713_v7  ;;  %v8328_v7 = vld [vmem:[#allocation7 + $0x4c0] sm:$0xff] }
 0x8c5   :  { %2822 = vmatprep.subr.mxu0 %v8312_v21  ;;  %2996 = vmatpush1.msra.mxu1 %v7717_v4  ;;  %v8332_v4 = vld [vmem:[#allocation7 + $0x4b8] sm:$0xff] }
 0x8c6   :  { %2823 = vmatpush2.msra.mxu0 %v8316_v37  ;;  %2997 = vmatprep.subr.mxu1 %v7721_v2  ;;  %v8336_v2 = vld [vmem:[#allocation7 + $0x488] sm:$0xff] }
 0x8c7   :  { %2824 = vmatprep.subr.mxu0 %v8320_v43  ;;  %2998 = vmatpush1.msra.mxu1 %v7725_v29  ;;  %v8340_v29 = vld [vmem:[#allocation7 + $0x480] sm:$0xff] }
 0x8c8   :  { %2825 = vmatpush2.msra.mxu0 %v8324_v62  ;;  %2999 = vmatprep.subr.mxu1 %v7729_v51  ;;  %v8344_v51 = vld [vmem:[#allocation7 + $0x450] sm:$0xff] }
 0x8c9   :  { %2826 = vmatprep.subr.mxu0 %v8328_v7  ;;  %3000 = vmatpush1.msra.mxu1 %v7733_v59  ;;  %v8348_v59 = vld [vmem:[#allocation7 + $0x448] sm:$0xff] }
 0x8ca   :  { %2827 = vmatpush2.msra.mxu0 %v8332_v4  ;;  %3001 = vmatprep.subr.mxu1 %v7737_v55  ;;  %v8352_v55 = vld [vmem:[#allocation7 + $0x418] sm:$0xff] }
 0x8cb   :  { %2828 = vmatprep.subr.mxu0 %v8336_v2  ;;  %3002 = vmatpush1.msra.mxu1 %v7741_v56  ;;  %v8356_v56 = vld [vmem:[#allocation7 + $0x410] sm:$0xff] }
 0x8cc   :  { %2829 = vmatpush2.msra.mxu0 %v8340_v29  ;;  %3003 = vmatprep.subr.mxu1 %v7745_v3  ;;  %v8360_v3 = vld [vmem:[#allocation7 + $0x3e0] sm:$0xff] }
 0x8cd   :  { %2830 = vmatprep.subr.mxu0 %v8344_v51  ;;  %3004 = vmatpush1.msra.mxu1 %v7749_v57  ;;  %v8364_v57 = vld [vmem:[#allocation7 + $0x3d8] sm:$0xff] }
 0x8ce   :  { %2831 = vmatpush2.msra.mxu0 %v8348_v59  ;;  %3005 = vmatprep.subr.mxu1 %v7753_v17  ;;  %v8368_v17 = vld [vmem:[#allocation7 + $0x3a8] sm:$0xff] }
 0x8cf   :  { %2832 = vmatprep.subr.mxu0 %v8352_v55  ;;  %3006 = vmatpush1.msra.mxu1 %v7757_v47  ;;  %10156 = vst [vmem:[#allocation45_spill] sm:$0xff] %v8368_v17  ;;  %v8372_v47 = vld [vmem:[#allocation7 + $0x3a0] sm:$0xff] }
 0x8d0   :  { %2833 = vmatpush2.msra.mxu0 %v8356_v56  ;;  %3007 = vmatprep.subr.mxu1 %v7761_v5  ;;  %v4699_v5 = vld [vmem:[#allocation7 + $0x360] sm:$0xff] }
 0x8d1   :  { %2834 = vmatprep.subr.mxu0 %v8360_v3  ;;  %3008 = vmatpush1.msra.mxu1 %v7765_v45  ;;  %v4700_v45 = vld [vmem:[#allocation7 + $0x358] sm:$0xff] }
 0x8d2   :  { %2835 = vmatpush2.msra.mxu0 %v8364_v57  ;;  %3009 = vmatprep.subr.mxu1 %v7769_v9  ;;  %v4701_v9 = vld [vmem:[#allocation7 + $0x328] sm:$0xff] }
 0x8d3   :  { %2836 = vmatprep.subr.mxu0 %v8368_v17  ;;  %3010 = vmatpush1.msra.mxu1 %v7773_v25  ;;  %v4702_v17 = vld [vmem:[#allocation7 + $0x320] sm:$0xff]  ;;  %v4703_v25 = vld [vmem:[#allocation7 + $0x2f0] sm:$0xff] }
 0x8d4   :  { %2837 = vmatpush2.msra.mxu0 %v8372_v47  ;;  %3011 = vmatprep.subr.mxu1 %v7777_v13  ;;  %v4704_v13 = vld [vmem:[#allocation7 + $0x2e8] sm:$0xff] }
 0x8d5   :  { %2839 = vmatmul.mubr.f32.vlgmr.msra.gmra.mxu0 %v8058_v39  ;;  %3052 = vmatprep.subr.mxu0 %v4699_v5  ;;  %v4705_v39 = vld [vmem:[#allocation7 + $0x2b8] sm:$0xff]  ;;  %v10158_v5 = vld [vmem:[#allocation63_spill] sm:$0xff] }
 0x8d6   :  { %3053 = vmatpush1.msra.mxu0 %v4700_v45  ;;  %3012 = vmatpush1.msra.mxu1 %v7783_v8  ;;  %v4706_v8 = vld [vmem:[#allocation7 + $0x2b0] sm:$0xff] }
 0x8d7   :  { %3054 = vmatprep.subr.mxu0 %v4701_v9  ;;  %3013 = vmatprep.subr.mxu1 %v7787_v32  ;;  %v4707_v32 = vld [vmem:[#allocation7 + $0x280] sm:$0xff]  ;;  %v10159_v45 = vld [vmem:[#allocation24_spill] sm:$0xff]  ;;  %v10160_v9 = vld [vmem:[#allocation65_spill] sm:$0xff] }
 0x8d8   :  { %3055 = vmatpush1.msra.mxu0 %v4702_v17  ;;  %3014 = vmatpush2.msra.mxu1 %v7791_v38  ;;  %v4708_v38 = vld [vmem:[#allocation7 + $0x278] sm:$0xff]  ;;  %v10157_v17 = vld [vmem:[#allocation23_spill] sm:$0xff] }
 0x8d9   :  { %3056 = vmatprep.subr.mxu0 %v4703_v25  ;;  %3015 = vmatprep.subr.mxu1 %v7795_v14  ;;  %v4709_v14 = vld [vmem:[#allocation7 + $0x248] sm:$0xff]  ;;  %v10161_v25 = vld [vmem:[#allocation25_spill] sm:$0xff] }
 0x8da   :  { %3057 = vmatpush1.msra.mxu0 %v4704_v13  ;;  %3016 = vmatpush2.msra.mxu1 %v7799_v58  ;;  %v4710_v58 = vld [vmem:[#allocation7 + $0x240] sm:$0xff] }
 0x8db   :  { %3058 = vmatprep.subr.mxu0 %v4705_v39  ;;  %3017 = vmatprep.subr.mxu1 %v7803_v22  ;;  %v4711_v22 = vld [vmem:[#allocation7 + $0x210] sm:$0xff]  ;;  %v10163_v13 = vld [vmem:[#allocation26_spill] sm:$0xff]  ;;  %v10164_v39 = vld [vmem:[#allocation69_spill] sm:$0xff] }
 0x8dc   :  { %3059 = vmatpush1.msra.mxu0 %v4706_v8  ;;  %3018 = vmatpush2.msra.mxu1 %v7807_v48  ;;  %v4712_v48 = vld [vmem:[#allocation7 + $0x208] sm:$0xff] }
 0x8dd   :  { %3060 = vmatprep.subr.mxu0 %v4707_v32  ;;  %3019 = vmatprep.subr.mxu1 %v7811_v35  ;;  %v4713_v35 = vld [vmem:[#allocation7 + $0x1d8] sm:$0xff]  ;;  %v10165_v8 = vld [vmem:[#allocation27_spill] sm:$0xff] }
 0x8de   :  { %3061 = vmatpush1.msra.mxu0 %v4708_v38  ;;  %3020 = vmatpush2.msra.mxu1 %v7815_v54  ;;  %v4714_v54 = vld [vmem:[#allocation7 + $0x1d0] sm:$0xff]  ;;  %v10166_v32 = vld [vmem:[#allocation71_spill] sm:$0xff] }
 0x8df   :  { %3062 = vmatprep.subr.mxu0 %v4709_v14  ;;  %3021 = vmatprep.subr.mxu1 %v7819_v11  ;;  %v4715_v11 = vld [vmem:[#allocation7 + $0x1a0] sm:$0xff]  ;;  %v10167_v38 = vld [vmem:[#allocation28_spill] sm:$0xff]  ;;  %v10168_v14 = vld [vmem:[#allocation73_spill] sm:$0xff] }
 0x8e0   :  { %3063 = vmatpush1.msra.mxu0 %v4710_v58  ;;  %3022 = vmatpush2.msra.mxu1 %v7823_v0  ;;  %v4716_v0 = vld [vmem:[#allocation7 + $0x198] sm:$0xff] }
 0x8e1   :  { %3064 = vmatprep.subr.mxu0 %v4711_v22  ;;  %3023 = vmatprep.subr.mxu1 %v7827_v16  ;;  %v4717_v16 = vld [vmem:[#allocation7 + $0x168] sm:$0xff]  ;;  %v10169_v58 = vld [vmem:[#allocation29_spill] sm:$0xff] }
 0x8e2   :  { %3065 = vmatpush1.msra.mxu0 %v4712_v48  ;;  %3024 = vmatpush2.msra.mxu1 %v7831_v15  ;;  %v10162_v15 = vld [vmem:[#allocation67_spill] sm:$0xff]  ;;  %v10171_v48 = vld [vmem:[#allocation30_spill] sm:$0xff] }
 0x8e3   :  { %3066 = vmatprep.subr.mxu0 %v4713_v35  ;;  %3025 = vmatprep.subr.mxu1 %v10157_v17  ;;  %v10170_v22 = vld [vmem:[#allocation75_spill] sm:$0xff]  ;;  %v10172_v35 = vld [vmem:[#allocation77_spill] sm:$0xff] }
 0x8e4   :  { %3067 = vmatpush1.msra.mxu0 %v4714_v54  ;;  %3026 = vmatpush2.msra.mxu1 %v10158_v5  ;;  %v10173_v17 = vld [vmem:[#allocation31_spill] sm:$0xff]  ;;  %v10175_v5 = vld [vmem:[#allocation32_spill] sm:$0xff] }
 0x8e5   :  { %3068 = vmatprep.subr.mxu0 %v4715_v11  ;;  %3027 = vmatprep.subr.mxu1 %v10159_v45  ;;  %v10174_v54 = vld [vmem:[#allocation79_spill] sm:$0xff]  ;;  %v10176_v11 = vld [vmem:[#allocation81_spill] sm:$0xff] }
 0x8e6   :  { %3069 = vmatpush1.msra.mxu0 %v4716_v0  ;;  %3028 = vmatpush2.msra.mxu1 %v10160_v9  ;;  %v10177_v45 = vld [vmem:[#allocation33_spill] sm:$0xff]  ;;  %v10178_v0 = vld [vmem:[#allocation83_spill] sm:$0xff]  ;;  %v10179_v9 = vld [vmem:[#allocation34_spill] sm:$0xff] }
 0x8e7   :  { %3070 = vmatprep.subr.mxu0 %v4717_v16  ;;  %3029 = vmatprep.subr.mxu1 %v10161_v25  ;;  %v10180_v16 = vld [vmem:[#allocation35_spill] sm:$0xff]  ;;  %v10181_v25 = vld [vmem:[#allocation36_spill] sm:$0xff] }
 0x8e8   :  { %3071 = vmatpush1.msra.mxu0 %v10162_v15  ;;  %3030 = vmatpush2.msra.mxu1 %v10163_v13  ;;  %v10182_v15 = vld [vmem:[#allocation37_spill] sm:$0xff]  ;;  %v10183_v13 = vld [vmem:[#allocation38_spill] sm:$0xff] }
 0x8e9   :  { %3072 = vmatprep.subr.mxu0 %v10164_v39  ;;  %3031 = vmatprep.subr.mxu1 %v10165_v8  ;;  %v10184_v39 = vld [vmem:[#allocation40_spill] sm:$0xff]  ;;  %v10185_v8 = vld [vmem:[#allocation42_spill] sm:$0xff] }
 0x8ea   :  { %3073 = vmatpush1.msra.mxu0 %v10166_v32  ;;  %3032 = vmatpush2.msra.mxu1 %v10167_v38  ;;  %v10186_v32 = vld [vmem:[#allocation44_spill] sm:$0xff]  ;;  %v10187_v38 = vld [vmem:[#allocation46_spill] sm:$0xff] }
 0x8eb   :  { %3074 = vmatprep.subr.mxu0 %v10168_v14  ;;  %3033 = vmatprep.subr.mxu1 %v10169_v58  ;;  %v10188_v14 = vld [vmem:[#allocation48_spill] sm:$0xff]  ;;  %v10189_v58 = vld [vmem:[#allocation50_spill] sm:$0xff] }
 0x8ec   :  { %3075 = vmatpush1.msra.mxu0 %v10170_v22  ;;  %3034 = vmatpush2.msra.mxu1 %v10171_v48  ;;  %v10190_v22 = vld [vmem:[#allocation52_spill] sm:$0xff]  ;;  %v10191_v48 = vld [vmem:[#allocation54_spill] sm:$0xff] }
 0x8ed   :  { %3076 = vmatprep.subr.mxu0 %v10172_v35  ;;  %3035 = vmatprep.subr.mxu1 %v10173_v17  ;;  %v10192_v35 = vld [vmem:[#allocation56_spill] sm:$0xff]  ;;  %v10193_v17 = vld [vmem:[#allocation58_spill] sm:$0xff] }
 0x8ee   :  { %3077 = vmatpush1.msra.mxu0 %v10174_v54  ;;  %3036 = vmatpush2.msra.mxu1 %v10175_v5  ;;  %v10194_v54 = vld [vmem:[#allocation60_spill] sm:$0xff]  ;;  %v10195_v5 = vld [vmem:[#allocation62_spill] sm:$0xff] }
 0x8ef   :  { %3078 = vmatprep.subr.mxu0 %v10176_v11  ;;  %3037 = vmatprep.subr.mxu1 %v10177_v45  ;;  %v10196_v11 = vld [vmem:[#allocation64_spill] sm:$0xff]  ;;  %v10197_v45 = vld [vmem:[#allocation66_spill] sm:$0xff] }
 0x8f0   :  { %3079 = vmatpush1.msra.mxu0 %v10178_v0  ;;  %3038 = vmatpush2.msra.mxu1 %v10179_v9  ;;  %v10198_v0 = vld [vmem:[#allocation68_spill] sm:$0xff]  ;;  %v10199_v9 = vld [vmem:[#allocation70_spill] sm:$0xff] }
 0x8f1   :  { %3080 = vmatprep.subr.mxu0 %v10180_v16  ;;  %3039 = vmatprep.subr.mxu1 %v10181_v25  ;;  %v10200_v16 = vld [vmem:[#allocation72_spill] sm:$0xff]  ;;  %v10201_v25 = vld [vmem:[#allocation74_spill] sm:$0xff] }
 0x8f2   :  { %3081 = vmatpush1.msra.mxu0 %v10182_v15  ;;  %3040 = vmatpush2.msra.mxu1 %v10183_v13  ;;  %v10202_v15 = vld [vmem:[#allocation76_spill] sm:$0xff]  ;;  %v10203_v13 = vld [vmem:[#allocation78_spill] sm:$0xff] }
 0x8f3   :  { %3082 = vmatprep.subr.mxu0 %v10184_v39  ;;  %3041 = vmatprep.subr.mxu1 %v10185_v8  ;;  %v10204_v39 = vld [vmem:[#allocation80_spill] sm:$0xff]  ;;  %v10205_v8 = vld [vmem:[#allocation82_spill] sm:$0xff] }
 0x8f4   :  { %3083 = vmatpush1.msra.mxu0 %v10186_v32  ;;  %3042 = vmatpush2.msra.mxu1 %v10187_v38  ;;  %v10206_v32 = vld [vmem:[#allocation84_spill] sm:$0xff]  ;;  %v10207_v38 = vld [vmem:[#allocation86_spill] sm:$0xff] }
 0x8f5   :  { %3084 = vmatprep.subr.mxu0 %v10188_v14  ;;  %3043 = vmatprep.subr.mxu1 %v10189_v58  ;;  %v10208_v14 = vld [vmem:[#allocation87_spill] sm:$0xff]  ;;  %v10209_v58 = vld [vmem:[#allocation88_spill] sm:$0xff] }
 0x8f6   :  { %3085 = vmatpush2.msra.mxu0 %v10190_v22  ;;  %3044 = vmatpush2.msra.mxu1 %v10191_v48  ;;  %v10210_v22 = vld [vmem:[#allocation89_spill] sm:$0xff]  ;;  %v10211_v48 = vld [vmem:[#allocation90_spill] sm:$0xff] }
 0x8f7   :  { %3086 = vmatprep.subr.mxu0 %v10192_v35  ;;  %3123 = vmatprep.subr.mxu1 %v10193_v17  ;;  %v10212_v35 = vld [vmem:[#allocation91_spill] sm:$0xff]  ;;  %v10213_v17 = vld [vmem:[#allocation92_spill] sm:$0xff] }
 0x8f8   :  { %3087 = vmatpush2.msra.mxu0 %v10194_v54  ;;  %v10214_v54 = vld [vmem:[#allocation94_spill] sm:$0xff] }
 0x8f9   :  { %3088 = vmatprep.subr.mxu0 %v10195_v5  ;;  %v10215_v5 = vld [vmem:[#allocation95_spill] sm:$0xff] }
 0x8fa   :  { %3089 = vmatpush2.msra.mxu0 %v10196_v11  ;;  %v10216_v11 = vld [vmem:[#allocation96_spill] sm:$0xff] }
 0x8fb   :  { %3090 = vmatprep.subr.mxu0 %v10197_v45  ;;  %v10217_v45 = vld [vmem:[#allocation97_spill] sm:$0xff] }
 0x8fc   :  { %3091 = vmatpush2.msra.mxu0 %v10198_v0  ;;  %v10218_v0 = vld [vmem:[#allocation98_spill] sm:$0xff] }
 0x8fd   :  { %3092 = vmatprep.subr.mxu0 %v10199_v9  ;;  %v10219_v9 = vld [vmem:[#allocation100_spill] sm:$0xff] }
 0x8fe   :  { %3093 = vmatpush2.msra.mxu0 %v10200_v16  ;;  %v10220_v16 = vld [vmem:[#allocation101_spill] sm:$0xff] }
 0x8ff   :  { %3094 = vmatprep.subr.mxu0 %v10201_v25  ;;  %v10221_v25 = vld [vmem:[#allocation102_spill] sm:$0xff] }
 0x900   :  { %3095 = vmatpush2.msra.mxu0 %v10202_v15  ;;  %v10222_v15 = vld [vmem:[#allocation103_spill] sm:$0xff] }
 0x901   :  { %3096 = vmatprep.subr.mxu0 %v10203_v13  ;;  %v10223_v13 = vld [vmem:[#allocation104_spill] sm:$0xff] }
 0x902   :  { %3097 = vmatpush2.msra.mxu0 %v10204_v39 }
 0x903   :  { %3098 = vmatprep.subr.mxu0 %v10205_v8  ;;  %v10224_v8 = vld [vmem:[#allocation47_spill] sm:$0xff] }
 0x904   :  { %3099 = vmatpush2.msra.mxu0 %v10206_v32 }
 0x905   :  { %3100 = vmatprep.subr.mxu0 %v10207_v38 }
 0x906   :  { %3101 = vmatpush2.msra.mxu0 %v10208_v14 }
 0x907   :  { %3102 = vmatprep.subr.mxu0 %v10209_v58  ;;  %v10225_v58 = vld [vmem:[#allocation16_spill] sm:$0xff] }
 0x908   :  { %3103 = vmatpush2.msra.mxu0 %v10210_v22 }
 0x909   :  { %3104 = vmatprep.subr.mxu0 %v10211_v48 }
 0x90a   :  { %3105 = vmatpush2.msra.mxu0 %v10212_v35 }
 0x90b   :  { %3106 = vmatprep.subr.mxu0 %v10213_v17 }
 0x90c   :  { %3107 = vmatpush2.msra.mxu0 %v10214_v54 }
 0x90d   :  { %3108 = vmatprep.subr.mxu0 %v10215_v5 }
 0x90e   :  { %3109 = vmatpush2.msra.mxu0 %v10216_v11 }
 0x90f   :  { %3110 = vmatprep.subr.mxu0 %v10217_v45 }
 0x910   :  { %3111 = vmatpush2.msra.mxu0 %v10218_v0  ;;  %v10226_v0 = vld [vmem:[#allocation49_spill] sm:$0xff] }
 0x911   :  { %3112 = vmatprep.subr.mxu0 %v10219_v9 }
 0x912   :  { %3113 = vmatpush2.msra.mxu0 %v10220_v16 }
 0x913   :  { %3114 = vmatprep.subr.mxu0 %v10221_v25  ;;  %v10227_v25 = vld [vmem:[#allocation17_spill] sm:$0xff] }
 0x914   :  { %3115 = vmatpush2.msra.mxu0 %v10222_v15 }
 0x915   :  { %3753 = vmatprep.subr.mxu0 %v10223_v13 }
 0x954   :  { %v2698_v39 = vpop.f32.mrf.mxu0  ;;  %v2769_v54 = vpop.f32.mrf.mxu1 }
 0x955   :  { %v2915_v32 = vadd.f32 %v2698_v39, %v10224_v8  ;;  %v2917_v15 = vadd.f32 %v2769_v54, %v10227_v25  ;;  %v2938_v54 = vld [vmem:[#allocation5] sm:$0xc0] }
 0x956   :  { %v2700_v14 = vpop.f32.mrf.mxu0  ;;  %v2771_v11 = vpop.f32.mrf.mxu1 }
 0x957   :  { %v3496_v38 = vmul.f32 -1.442695, %v2915_v32  ;;  %v2916_v22 = vadd.f32 %v2700_v14, %v10225_v58  ;;  %v2918_v9 = vadd.f32 %v2771_v11, %v10226_v0 }
 0x959   :  { %3986 = vpow2.f32 %v3496_v38  ;;  %v3497_v48 = vmul.f32 -1.442695, %v2916_v22 }
 0x95b   :  { %3988 = vpow2.f32 %v3497_v48  ;;  %v10228_v48 = vld [vmem:[#allocation105_spill] sm:$0xff] }
 0x966   :  { %v3987_v35 = vpop.eup %3986 }
 0x967   :  { %v2922_v17 = vadd.f32 1.0, %v3987_v35 }
 0x968   :  { %v3989_v5 = vpop.eup %3988 }
 0x969   :  { %3990 = vrcp.f32 %v2922_v17  ;;  %v2928_v45 = vadd.f32 1.0, %v3989_v5 }
 0x96b   :  { %3992 = vrcp.f32 %v2928_v45 }
 0x976   :  { %v3991_v16 = vpop.eup %3990 }
 0x977   :  { %v2931_v13 = vmul.f32 %v3991_v16, %v2918_v9 }
 0x978   :  { %v3993_v32 = vpop.eup %3992 }
 0x979   :  { %v2932_v39 = vadd.f32 %v2931_v13, %v2917_v15  ;;  %v2934_v38 = vsub.f32 1.0, %v3993_v32  ;;  %v2936_v35 = vmul.f32 %v3993_v32, %v10228_v48  ;;  %v2939_v13 = vld [vmem:[#allocation5 + $0x18] sm:$0xc0] }
 0x97b   :  { %3994 = vtanh.f32 %v2932_v39 }
 0x988   :  { %v3995_v14 = vpop.eup %3994 }
 0x989   :  { %v2935_v22 = vmul.f32 %v3995_v14, %v2934_v38  ;;  %v3750_v14 = vpop.f32.mrf.mxu1 }
 0x98b   :  { %v8462_v17 = vadd.f32 %v2936_v35, %v2935_v22  ;;  %v3751_v35 = vpop.f32.mrf.mxu1 }
 0x98d   :  { %10229 = vst [vmem:[#allocation154_spill] sm:$0xff] %v8462_v17  ;;  %v2975_v58 = vrot.slane %v8462_v17, 2 }
 0x98f   :  { %v2978_v5 = vrot.slane %v2975_v58, 6  ;;  %v3752_v58 = vadd.f32 %v3751_v35, %v3750_v14  ;;  %v10249_v35 = vld [vmem:[#allocation125_spill] sm:$0xff] }
 0x991   :  { %3045 = vmatprep.mubr.f32.mxu1 %v2978_v5  ;;  %3116 = vmatprep.mubr.f32.mxu0 %v2978_v5  ;;  %v2961_v17 = vadd.f32 %v8051_v6, %v3752_v58  ;;  %v10231_v6 = vld [vmem:[#allocation107_spill] sm:$0xff]  ;;  %v10250_v58 = vld [vmem:[#allocation126_spill] sm:$0xff] }
 0x993   :  { %v2963_v25 = vrot.slane %v2961_v17, 2  ;;  %v10246_v17 = vld [vmem:[#allocation122_spill] sm:$0xff] }
 0x995   :  { %v2840_v11 = vpop.f32.mrf.mxu0 }
 0x996   :  { %v2942_v0 = vrot.slane %v2840_v11, 2 }
 0x997   :  { %v2842_v45 = vpop.f32.mrf.mxu0 }
 0x998   :  { %v2944_v9 = vadd.f32 %v2942_v0, %v2938_v54  ;;  %v2952_v15 = vrot.slane %v2842_v45, 2  ;;  %v2940_v54 = vld [vmem:[#allocation5 + $0x20] sm:$0xc0] }
 0x99a   :  { %v3498_v16 = vmul.f32 -1.442695, %v2944_v9  ;;  %v2954_v39 = vadd.f32 %v2952_v15, %v2939_v13 }
 0x99c   :  { %3996 = vpow2.f32 %v3498_v16  ;;  %v3499_v38 = vmul.f32 -1.442695, %v2954_v39  ;;  %v2970_v16 = vrot.slane %v8055_v50, 6  ;;  %v10230_v50 = vld [vmem:[#allocation106_spill] sm:$0xff] }
 0x99e   :  { %3998 = vpow2.f32 %v3499_v38 }
 0x9a9   :  { %v3997_v32 = vpop.eup %3996 }
 0x9aa   :  { %v2948_v22 = vadd.f32 1.0, %v3997_v32 }
 0x9ab   :  { %v3999_v48 = vpop.eup %3998 }
 0x9ac   :  { %4000 = vrcp.f32 %v2948_v22  ;;  %v2958_v11 = vadd.f32 1.0, %v3999_v48  ;;  %v10245_v48 = vld [vmem:[#allocation121_spill] sm:$0xff]  ;;  %v10248_v22 = vld [vmem:[#allocation124_spill] sm:$0xff] }
 0x9ae   :  { %4002 = vrcp.f32 %v2958_v11  ;;  %v10251_v11 = vld [vmem:[#allocation127_spill] sm:$0xff] }
 0x9b9   :  { %v4001_v8 = vpop.eup %4000 }
 0x9ba   :  { %v2965_v0 = vmul.f32 %v4001_v8, %v2963_v25  ;;  %v10243_v8 = vld [vmem:[#allocation119_spill] sm:$0xff]  ;;  %v10244_v25 = vld [vmem:[#allocation120_spill] sm:$0xff] }
 0x9bb   :  { %v4003_v9 = vpop.eup %4002 }
 0x9bc   :  { %v2966_v45 = vadd.f32 %v2965_v0, %v2940_v54  ;;  %v2968_v15 = vsub.f32 1.0, %v4003_v9  ;;  %v2972_v38 = vmul.f32 %v4003_v9, %v2970_v16  ;;  %v10252_v0 = vld [vmem:[#allocation128_spill] sm:$0xff]  ;;  %v10253_v54 = vld [vmem:[#allocation129_spill] sm:$0xff]  ;;  %v10255_v9 = vld [vmem:[#allocation131_spill] sm:$0xff] }
 0x9bd   :  { %v10256_v16 = vld [vmem:[#allocation132_spill] sm:$0xff] }
 0x9be   :  { %4004 = vtanh.f32 %v2966_v45  ;;  %v10254_v45 = vld [vmem:[#allocation130_spill] sm:$0xff] }
 0x9cb   :  { %v4005_v13 = vpop.eup %4004 }
 0x9cc   :  { %v2969_v39 = vmul.f32 %v4005_v13, %v2968_v15  ;;  %v10257_v15 = vld [vmem:[#allocation133_spill] sm:$0xff]  ;;  %v10258_v13 = vld [vmem:[#allocation134_spill] sm:$0xff] }
 0x9ce   :  { %v2973_v32 = vadd.f32 %v2972_v38, %v2969_v39  ;;  %v10259_v39 = vld [vmem:[#allocation135_spill] sm:$0xff]  ;;  %v10260_v38 = vld [vmem:[#allocation136_spill] sm:$0xff] }
 0x9d0   :  { %v8467_v14 = vrot.slane %v2973_v32, 6  ;;  %3309 = vst [vmem:[#allocation2 - $0x6] sm:$0xc0] %v2973_v32  ;;  %v10261_v32 = vld [vmem:[#allocation137_spill] sm:$0xff] }
 0x9d2   :  { %3046 = vmatmul.mubr.f32.vlgmr.msra.gmra.mxu1 %v8467_v14  ;;  %3117 = vmatmul.mubr.f32.vlgmr.msra.gmra.mxu0 %v8467_v14 }
 0x9d3   :  { %3124 = vmatpush1.msra.mxu1 %v8062_v31  ;;  %3754 = vmatpush3.msra.mxu0 %v8065_v44  ;;  %v10232_v31 = vld [vmem:[#allocation108_spill] sm:$0xff]  ;;  %v10233_v44 = vld [vmem:[#allocation109_spill] sm:$0xff] }
 0x9d4   :  { %3125 = vmatprep.subr.mxu1 %v8068_v53  ;;  %3187 = vmatprep.mubr.f32.mxu1 %v2978_v5  ;;  %v10234_v53 = vld [vmem:[#allocation110_spill] sm:$0xff] }
 0x9d5   :  { %3755 = vmatprep.subr.mxu0 %v8071_v10  ;;  %3258 = vmatprep.mubr.f32.mxu0 %v2978_v5  ;;  %v10235_v10 = vld [vmem:[#allocation111_spill] sm:$0xff] }
 0x9d6   :  { %3126 = vmatpush1.msra.mxu1 %v8074_v41  ;;  %3756 = vmatpush3.msra.mxu0 %v8077_v46  ;;  %v10236_v41 = vld [vmem:[#allocation112_spill] sm:$0xff]  ;;  %v10237_v46 = vld [vmem:[#allocation113_spill] sm:$0xff]  ;;  %v10247_v5 = vld [vmem:[#allocation123_spill] sm:$0xff] }
 0x9d7   :  { %3127 = vmatprep.subr.mxu1 %v8080_v20  ;;  %3757 = vmatprep.subr.mxu0 %v8083_v61  ;;  %v10238_v20 = vld [vmem:[#allocation114_spill] sm:$0xff]  ;;  %v10239_v61 = vld [vmem:[#allocation115_spill] sm:$0xff] }
 0x9d8   :  { %3128 = vmatpush1.msra.mxu1 %v8086_v12  ;;  %3758 = vmatpush3.msra.mxu0 %v8089_v63  ;;  %v10240_v12 = vld [vmem:[#allocation116_spill] sm:$0xff]  ;;  %v10241_v63 = vld [vmem:[#allocation117_spill] sm:$0xff] }
 0x9d9   :  { %3129 = vmatprep.subr.mxu1 %v8092_v26  ;;  %3759 = vmatprep.subr.mxu0 %v10230_v50  ;;  %v10242_v26 = vld [vmem:[#allocation118_spill] sm:$0xff] }
 0x9da   :  { %3130 = vmatpush1.msra.mxu1 %v10231_v6  ;;  %3760 = vmatpush3.msra.mxu0 %v10232_v31  ;;  %v10262_v50 = vld [vmem:[#allocation138_spill] sm:$0xff]  ;;  %v10263_v6 = vld [vmem:[#allocation139_spill] sm:$0xff]  ;;  %v10264_v31 = vld [vmem:[#allocation140_spill] sm:$0xff] }
 0x9db   :  { %3131 = vmatprep.subr.mxu1 %v10233_v44  ;;  %3761 = vmatprep.subr.mxu0 %v10234_v53  ;;  %v10265_v44 = vld [vmem:[#allocation141_spill] sm:$0xff]  ;;  %v10266_v53 = vld [vmem:[#allocation142_spill] sm:$0xff] }
 0x9dc   :  { %3132 = vmatpush1.msra.mxu1 %v10235_v10  ;;  %3762 = vmatpush3.msra.mxu0 %v10236_v41  ;;  %v10267_v10 = vld [vmem:[#allocation143_spill] sm:$0xff]  ;;  %v10268_v41 = vld [vmem:[#allocation144_spill] sm:$0xff] }
 0x9dd   :  { %3133 = vmatprep.subr.mxu1 %v10237_v46  ;;  %3763 = vmatprep.subr.mxu0 %v10238_v20  ;;  %v10269_v46 = vld [vmem:[#allocation145_spill] sm:$0xff]  ;;  %v10270_v20 = vld [vmem:[#allocation146_spill] sm:$0xff] }
 0x9de   :  { %3134 = vmatpush1.msra.mxu1 %v10239_v61  ;;  %3764 = vmatpush3.msra.mxu0 %v10240_v12  ;;  %v10271_v61 = vld [vmem:[#allocation93_spill] sm:$0xff] }
 0x9df   :  { %3135 = vmatprep.subr.mxu1 %v10241_v63  ;;  %3765 = vmatprep.subr.mxu0 %v10242_v26  ;;  %v3287_v12 = vrot.slane %v10271_v61, 6  ;;  %v10272_v63 = vld [vmem:[#allocation147_spill] sm:$0xff]  ;;  %v10273_v26 = vld [vmem:[#allocation148_spill] sm:$0xff]  ;;  %v10291_v61 = vld [vmem:[#allocation105_spill] sm:$0xff] }
 0x9e0   :  { %3136 = vmatpush1.msra.mxu1 %v10243_v8  ;;  %3766 = vmatpush3.msra.mxu0 %v10244_v25  ;;  %v10274_v8 = vld [vmem:[#allocation20_spill] sm:$0xff] }
 0x9e1   :  { %3137 = vmatprep.subr.mxu1 %v10245_v48  ;;  %3767 = vmatprep.subr.mxu0 %v10246_v17  ;;  %v3289_v25 = vrot.slane %v10274_v8, 4  ;;  %v10275_v48 = vld [vmem:[#allocation149_spill] sm:$0xff]  ;;  %v10276_v17 = vld [vmem:[#allocation150_spill] sm:$0xff] }
 0x9e2   :  { %3138 = vmatpush1.msra.mxu1 %v10247_v5  ;;  %3768 = vmatpush3.msra.mxu0 %v10248_v22  ;;  %v10277_v5 = vld [vmem:[#allocation99_spill] sm:$0xff] }
 0x9e3   :  { %3139 = vmatprep.subr.mxu1 %v10249_v35  ;;  %3769 = vmatprep.subr.mxu0 %v10250_v58  ;;  %v3292_v22 = vrot.slane %v10277_v5, 2  ;;  %v10278_v35 = vld [vmem:[#allocation151_spill] sm:$0xff]  ;;  %v10279_v58 = vld [vmem:[#allocation152_spill] sm:$0xff] }
 0x9e4   :  { %3140 = vmatpush1.msra.mxu1 %v10251_v11  ;;  %3770 = vmatpush3.msra.mxu0 %v10252_v0  ;;  %v10280_v11 = vld [vmem:[#allocation153_spill] sm:$0xff]  ;;  %v10281_v0 = vld [vmem:[#allocation51_spill] sm:$0xff] }
 0x9e5   :  { %3141 = vmatprep.subr.mxu1 %v10253_v54  ;;  %3771 = vmatprep.subr.mxu0 %v10254_v45  ;;  %v3302_v54 = vsel %vm3301_vm2, %v10281_v0, %v3287_v12  ;;  %v10282_v45 = vld [vmem:[#allocation39_spill] sm:$0xff]  ;;  %v3294_v12 = vrot.slane %v10291_v61, 6 }
 0x9e6   :  { %3142 = vmatpush1.msra.mxu1 %v10255_v9  ;;  %3772 = vmatpush3.msra.mxu0 %v10256_v16  ;;  %v3303_v9 = vsel %vm96_vm0, %v3302_v54, %v3289_v25  ;;  %v10283_v16 = vld [vmem:[#allocation41_spill] sm:$0xff] }
 0x9e7   :  { %3143 = vmatprep.subr.mxu1 %v10257_v15  ;;  %3773 = vmatprep.subr.mxu0 %v10258_v13  ;;  %v3305_v15 = vsel %vm3304_vm3, %v3303_v9, %v3292_v22  ;;  %v10284_v13 = vld [vmem:[#allocation43_spill] sm:$0xff]  ;;  %v10292_v25 = vld [vmem:[#allocation61_spill] sm:$0xff] }
 0x9e8   :  { %3144 = vmatpush1.msra.mxu1 %v10259_v39  ;;  %3774 = vmatpush3.msra.mxu0 %v10260_v38 }
 0x9e9   :  { %3145 = vmatprep.subr.mxu1 %v10261_v32  ;;  %3775 = vmatprep.subr.mxu0 %v10262_v50  ;;  %v10289_v32 = vld [vmem:[#allocation17_spill] sm:$0xff] }
 0x9ea   :  { %3146 = vmatpush1.msra.mxu1 %v10263_v6  ;;  %3776 = vmatpush3.msra.mxu0 %v10264_v31 }
 0x9eb   :  { %3147 = vmatprep.subr.mxu1 %v10265_v44  ;;  %3777 = vmatprep.subr.mxu0 %v10266_v53 }
 0x9ec   :  { %3148 = vmatpush1.msra.mxu1 %v10267_v10  ;;  %3778 = vmatpush3.msra.mxu0 %v10268_v41 }
 0x9ed   :  { %3149 = vmatprep.subr.mxu1 %v10269_v46  ;;  %3779 = vmatprep.subr.mxu0 %v10270_v20  ;;  %v10290_v46 = vld [vmem:[#allocation154_spill] sm:$0xff] }
 0x9ee   :  { %3150 = vmatpush1.msra.mxu1 %v10272_v63  ;;  %3780 = vmatpush3.msra.mxu0 %v10273_v26  ;;  %v3296_v63 = vrot.slane %v10290_v46, 4 }
 0x9ef   :  { %3151 = vmatprep.subr.mxu1 %v10275_v48  ;;  %3781 = vmatprep.subr.mxu0 %v10276_v17  ;;  %v3306_v48 = vsel %vm3301_vm2, %v10292_v25, %v3294_v12 }
 0x9f0   :  { %3152 = vmatpush1.msra.mxu1 %v10278_v35  ;;  %3782 = vmatpush3.msra.mxu0 %v10279_v58  ;;  %v3307_v17 = vsel %vm96_vm0, %v3306_v48, %v3296_v63 }
 0x9f1   :  { %3153 = vmatprep.subr.mxu1 %v8236_v27  ;;  %3783 = vmatprep.subr.mxu0 %v10280_v11  ;;  %v3343_v27 = vld [vmem:[#allocation10 + $0x58] sm:$0xff] }
 0x9f2   :  { %3154 = vmatpush1.msra.mxu1 %v10282_v45  ;;  %3784 = vmatpush3.msra.mxu0 %v8245_v42  ;;  %v3346_v42 = vld [vmem:[#allocation10 + $0x70] sm:$0xff]  ;;  %v10293_v45 = vld [vmem:[#allocation85_spill] sm:$0xff] }
 0x9f3   :  { %3155 = vmatprep.subr.mxu1 %v10283_v16  ;;  %3259 = vmatmul.mubr.f32.vlgmr.msra.gmra.mxu0 %v8467_v14 }
 0x9f4   :  { %3156 = vmatpush2.msra.mxu1 %v10284_v13  ;;  %3843 = vmatprep.mubr.f32.mxu0 %v3305_v15  ;;  %v3502_v13 = vld [vmem:[%s8603_s7] ss:$0 sm:$0xff]  ;;  %s4758_s7 = scalar_lea.vmem %s3450_s13, 256 }
 0x9f5   :  { %3157 = vmatprep.subr.mxu1 %v8256_v33  ;;  %v10285_v33 = vld [vmem:[#allocation45_spill] sm:$0xff]  ;;  %p4759_p10 = scmp.ne.s32.totalorder %s3450_s13, %s4758_s7  ;;  %p4764_p12 = scmp.lt.s32.totalorder %s4758_s7, %s4758_s7 }
 0x9f6   :  { %3158 = vmatpush2.msra.mxu1 %v8260_v28  ;;  %v3347_v28 = vld [vmem:[#allocation10 + $0x78] sm:$0xff] }
 0x9f7   :  { %3159 = vmatprep.subr.mxu1 %v8264_v52  ;;  %3811 = vmatprep.subr.mxu0 %v3347_v28  ;;  %v3345_v52 = vld [vmem:[#allocation10 + $0x68] sm:$0xff]  ;;  %p4765_p13 = por %p4764_p12, %p4763_p11 }
 0x9f8   :  { %3160 = vmatpush2.msra.mxu1 %v8268_v40  ;;  %3812 = vmatpush3.msra.mxu0 %v3347_v28  ;;  %v3344_v40 = vld [vmem:[#allocation10 + $0x60] sm:$0xff] }
 0x9f9   :  { %3161 = vmatprep.subr.mxu1 %v8272_v18  ;;  %3813 = vmatprep.subr.mxu0 %v3346_v42  ;;  %v3342_v18 = vld [vmem:[#allocation10 + $0x50] sm:$0xff]  ;;  %p4766_p0 = pnand %p4765_p13, %p4759_p10 }
 0x9fa   :  { %3162 = vmatpush2.msra.mxu1 %v8276_v1  ;;  %3814 = vmatpush3.msra.mxu0 %v3346_v42  ;;  %v3341_v1 = vld [vmem:[#allocation10 + $0x48] sm:$0xff] }
 0x9fb   :  { %3163 = vmatprep.subr.mxu1 %v8280_v49  ;;  %3815 = vmatprep.subr.mxu0 %v3345_v52  ;;  %v3340_v49 = vld [vmem:[#allocation10 + $0x40] sm:$0xff] }
 0x9fc   :  { %3164 = vmatpush2.msra.mxu1 %v8284_v19  ;;  %3816 = vmatpush3.msra.mxu0 %v3345_v52  ;;  %v3339_v19 = vld [vmem:[#allocation10 + $0x38] sm:$0xff] }
 0x9fd   :  { %3165 = vmatprep.subr.mxu1 %v8288_v34  ;;  %3817 = vmatprep.subr.mxu0 %v3344_v40  ;;  %v3338_v34 = vld [vmem:[#allocation10 + $0x30] sm:$0xff] }
 0x9fe   :  { %3166 = vmatpush2.msra.mxu1 %v8292_v24  ;;  %3818 = vmatpush3.msra.mxu0 %v3344_v40  ;;  %v3337_v24 = vld [vmem:[#allocation10 + $0x28] sm:$0xff] }
 0x9ff   :  { %3167 = vmatprep.subr.mxu1 %v8296_v36  ;;  %3819 = vmatprep.subr.mxu0 %v3343_v27  ;;  %v3336_v36 = vld [vmem:[#allocation10 + $0x20] sm:$0xff] }
 0xa00   :  { %3168 = vmatpush2.msra.mxu1 %v8300_v30  ;;  %3820 = vmatpush3.msra.mxu0 %v3343_v27  ;;  %v3335_v30 = vld [vmem:[#allocation10 + $0x18] sm:$0xff] }
 0xa01   :  { %3169 = vmatprep.subr.mxu1 %v8304_v60  ;;  %3821 = vmatprep.subr.mxu0 %v3342_v18  ;;  %v3334_v60 = vld [vmem:[#allocation10 + $0x10] sm:$0xff] }
 0xa02   :  { %3170 = vmatpush2.msra.mxu1 %v8308_v23  ;;  %3822 = vmatpush3.msra.mxu0 %v3342_v18  ;;  %v3333_v23 = vld [vmem:[#allocation10 + $0x8] sm:$0xff] }
 0xa03   :  { %3171 = vmatprep.subr.mxu1 %v8312_v21  ;;  %3823 = vmatprep.subr.mxu0 %v3341_v1  ;;  %v3332_v21 = vld [vmem:[#allocation10] sm:$0xff] }
 0xa04   :  { %3172 = vmatpush2.msra.mxu1 %v8316_v37  ;;  %3824 = vmatpush3.msra.mxu0 %v3341_v1 }
 0xa05   :  { %3173 = vmatprep.subr.mxu1 %v8320_v43  ;;  %3825 = vmatprep.subr.mxu0 %v3340_v49  ;;  %v10286_v43 = vld [vmem:[#allocation47_spill] sm:$0xff] }
 0xa06   :  { %3174 = vmatpush2.msra.mxu1 %v8324_v62  ;;  %3826 = vmatpush3.msra.mxu0 %v3340_v49 }
 0xa07   :  { %3175 = vmatprep.subr.mxu1 %v8328_v7  ;;  %3827 = vmatprep.subr.mxu0 %v3339_v19 }
 0xa08   :  { %3176 = vmatpush2.msra.mxu1 %v8332_v4  ;;  %3828 = vmatpush3.msra.mxu0 %v3339_v19 }
 0xa09   :  { %3177 = vmatprep.subr.mxu1 %v8336_v2  ;;  %3829 = vmatprep.subr.mxu0 %v3338_v34  ;;  %v10287_v2 = vld [vmem:[#allocation16_spill] sm:$0xff] }
 0xa0a   :  { %3178 = vmatpush2.msra.mxu1 %v8340_v29  ;;  %3830 = vmatpush3.msra.mxu0 %v3338_v34 }
 0xa0b   :  { %3179 = vmatprep.subr.mxu1 %v8344_v51  ;;  %3831 = vmatprep.subr.mxu0 %v3337_v24 }
 0xa0c   :  { %3180 = vmatpush2.msra.mxu1 %v8348_v59  ;;  %3832 = vmatpush3.msra.mxu0 %v3337_v24 }
 0xa0d   :  { %3181 = vmatprep.subr.mxu1 %v8352_v55  ;;  %3833 = vmatprep.subr.mxu0 %v3336_v36 }
 0xa0e   :  { %3182 = vmatpush2.msra.mxu1 %v8356_v56  ;;  %3834 = vmatpush3.msra.mxu0 %v3336_v36 }
 0xa0f   :  { %3183 = vmatprep.subr.mxu1 %v8360_v3  ;;  %3835 = vmatprep.subr.mxu0 %v3335_v30 }
 0xa10   :  { %3184 = vmatpush2.msra.mxu1 %v8364_v57  ;;  %3836 = vmatpush3.msra.mxu0 %v3335_v30 }
 0xa11   :  { %3185 = vmatprep.subr.mxu1 %v10285_v33  ;;  %3837 = vmatprep.subr.mxu0 %v3334_v60 }
 0xa12   :  { %3186 = vmatpush2.msra.mxu1 %v8372_v47  ;;  %3838 = vmatpush3.msra.mxu0 %v3334_v60 }
 0xa13   :  { %3188 = vmatmul.mubr.f32.vlgmr.msra.gmra.mxu1 %v8467_v14  ;;  %3839 = vmatprep.subr.mxu0 %v3333_v23  ;;  %v10288_v14 = vld [vmem:[#allocation49_spill] sm:$0xff] }
 0xa14   :  { %3840 = vmatpush3.msra.mxu0 %v3333_v23 }
 0xa15   :  { %3841 = vmatprep.subr.mxu0 %v3332_v21 }
 0xa16   :  { %3842 = vmatpush3.msra.mxu0 %v3332_v21 }
 0xa92   :  { %v3047_v37 = vpop.f32.mrf.mxu1  ;;  %v3118_v56 = vpop.f32.mrf.mxu0 }
 0xa93   :  { %v3264_v62 = vadd.f32 %v3047_v37, %v10286_v43  ;;  %v3266_v50 = vadd.f32 %v3118_v56, %v10289_v32 }
 0xa94   :  { %v3049_v4 = vpop.f32.mrf.mxu1  ;;  %v3120_v57 = vpop.f32.mrf.mxu0 }
 0xa95   :  { %v3500_v7 = vmul.f32 -1.442695, %v3264_v62  ;;  %v3265_v29 = vadd.f32 %v3049_v4, %v10287_v2  ;;  %v3267_v39 = vadd.f32 %v3120_v57, %v10288_v14 }
 0xa97   :  { %4006 = vpow2.f32 %v3500_v7  ;;  %v3501_v51 = vmul.f32 -1.442695, %v3265_v29 }
 0xa99   :  { %4008 = vpow2.f32 %v3501_v51 }
 0xaa4   :  { %v4007_v59 = vpop.eup %4006 }
 0xaa5   :  { %v3271_v55 = vadd.f32 1.0, %v4007_v59 }
 0xaa6   :  { %v4009_v3 = vpop.eup %4008 }
 0xaa7   :  { %4010 = vrcp.f32 %v3271_v55  ;;  %v3277_v47 = vadd.f32 1.0, %v4009_v3 }
 0xaa9   :  { %4012 = vrcp.f32 %v3277_v47 }
 0xab3   :  { %v3785_v5 = vpop.f32.mrf.mxu0 }
 0xab4   :  { %v4011_v38 = vpop.eup %4010 }
 0xab5   :  { %v3280_v6 = vmul.f32 %v4011_v38, %v3267_v39  ;;  %v3786_v35 = vpop.f32.mrf.mxu0 }
 0xab6   :  { %v4013_v44 = vpop.eup %4012  ;;  %v3787_v11 = vadd.f32 %v3786_v35, %v3785_v5 }
 0xab7   :  { %v3281_v31 = vadd.f32 %v3280_v6, %v3266_v50  ;;  %v3283_v53 = vsub.f32 1.0, %v4013_v44  ;;  %v3285_v20 = vmul.f32 %v4013_v44, %v10290_v46 }
 0xab8   :  { %v3328_v9 = vrot.slane %v3787_v11, %v10293_v45 }
 0xab9   :  { %4014 = vtanh.f32 %v3281_v31 }
 0xac6   :  { %v4015_v10 = vpop.eup %4014 }
 0xac7   :  { %v3284_v41 = vmul.f32 %v4015_v10, %v3283_v53 }
 0xac9   :  { %v3286_v26 = vadd.f32 %v3285_v20, %v3284_v41 }
 0xacb   :  { %v3299_v8 = vrot.slane %v3286_v26, 2  ;;  %3310 = vst [vmem:[#allocation3] sm:$0x3] %v3286_v26 }
 0xacd   :  { %v3308_v22 = vsel %vm3304_vm3, %v3307_v17, %v3299_v8 }
 0xace   :  { %3844 = vmatmul.mubr.f32.vlgmr.msra.gmra.mxu0 %v3308_v22 }
 0xad3   :  { %v3189_v58 = vpop.f32.mrf.mxu1 }
 0xad5   :  { %v3191_v0 = vpop.f32.mrf.mxu1 }
 0xad6   :  { %v3314_v54 = vcombine.low %v3189_v58, %v3191_v0 }
 0xad8   :  { %v3321_v16 = vrot.slane %v3314_v54, %v10293_v45 }
 0xada   :  { %v3329_v15 = vcombine.low %v3321_v16, %v3328_v9 }
 0xadc   :  { %3331 = vst [vmem:[#allocation4] sm:$0x3f] %v3329_v15 }
 0xb8e   :  { %v3845_v33 = vpop.f32.mrf.mxu0 }
 0xb8f   :  { %v3427_v28 = vadd.f32 %v3845_v33, %v3502_v13 }
 0xb90   :  { %v3421_v42 = vpop.f32.mrf.mxu0 }
 0xb91   :  { %v3504_v52 = vmul.f32 -1.442695, %v3427_v28  ;;  %v3422_v40 = vadd.f32 %v3502_v13, %v3421_v42 }
 0xb93   :  { %4016 = vpow2.f32 %v3504_v52  ;;  %v3503_v27 = vmul.f32 -1.442695, %v3422_v40 }
 0xb95   :  { %4018 = vpow2.f32 %v3503_v27 }
 0xba0   :  { %v4017_v18 = vpop.eup %4016 }
 0xba1   :  { %v3437_v1 = vadd.f32 1.0, %v4017_v18 }
 0xba2   :  { %v4019_v49 = vpop.eup %4018 }
 0xba3   :  { %4020 = vrcp.f32 %v3437_v1  ;;  %v3436_v19 = vadd.f32 1.0, %v4019_v49 }
 0xba5   :  { %4022 = vrcp.f32 %v3436_v19 }
 0xbb0   :  { %v4021_v34 = vpop.eup %4020 }
 0xbb1   :  { %3443 = vst [vmem:[#allocation12 + $0x8] sm:$0xff] %v4021_v34 }
 0xbb2   :  { %v4023_v24 = vpop.eup %4022 }
 0xbb3   :  { %3442 = vst [vmem:[#allocation12] sm:$0xff] %v4023_v24 }
 0xbb4   :  { %4769 = shalt.err (!%p4766_p0)
}
 0xbb5   :  { %3455 = dma.vmem_to_hbm [thread:$0]  %s3450_s13, 256, %s8604_s8, [#allocation9], %s4788_s15, %s4788_s15, %s4789_s16  }
 0xbb6   :  { %4782 = dma.done.wait [#allocation9], 256  }
 0xbb7   :  { %4783 = vsyncadd [#allocation9], 4294967040 }
 0xbb8   :  { %3459 = vsyncpa [#allocation8], 1 }
 0xbb9   :  { %3460 = vsyncpa [#allocation11], 1 }
 0xbba   :  { %3461 = vsyncpa [#allocation9], 1 }

</bundles_post_ra>
